<compile_context>
chip_gen: v5e
topology: v5e:2x2
jax: 0.10.0
libtpu: 0.0.40
codegen_flags: <defaults>
</compile_context>

<pallas_src>
import jax
import jax.numpy as jnp
from jax import lax
from jax.experimental import pallas as pl
from jax.experimental.pallas import tpu as pltpu

HIDDEN = 100        # nn.Conv1d(200, 50, 3) forces 2 * hidden_dim == 200
HP = 128            # hidden padded to a full lane group
G = 4 * HP          # 512 gate lanes per direction (i|f|g|o), each lane-dense
CONV_OUT = 50
COP = 128           # conv output channels padded to a full lane group
CONV_K = 3
EPS = 1e-8


def _bilstm_forward_kernel(x_ref, wih_ref, b_ref, whh_ref,
                           convwf_ref, convwb_ref, convb_ref,
                           cos_ref, pooled_ref,
                           xf_sc, xb_sc, h_sc, c_sc, outf_sc, outb_sc):
    T, B2, _ = x_ref.shape          # B2 = 2*B : [q batch | ans batch]
    B = B2 // 2
    Tout = T - CONV_K + 1

    # ---- hoisted input projection: one lane-dense (T*B2, E) @ (E, 2G) matmul
    # covers BOTH directions (columns [0:G] fwd, [G:2G] bwd) and both sentences.
    x16 = x_ref[...].astype(jnp.bfloat16)
    proj = lax.dot_general(x16, wih_ref[...], (((2,), (0,)), ((), ())),
                           preferred_element_type=jnp.float32)
    proj = proj + b_ref[...]                     # (T, B2, 2G) + (1, 2G)
    xf_sc[...] = proj[:, :, 0:G]
    xb_sc[...] = proj[:, :, G:2 * G]

    # ---- recurrence: ONE (B2, 2HP) @ (2HP, 2G) dot per step (block-diag W_hh).
    h_sc[...] = jnp.zeros_like(h_sc)             # [h_fwd | h_bwd], padding lanes 0
    c_sc[...] = jnp.zeros_like(c_sc)
    whh = whh_ref[...]                           # (2HP, 2G) bf16, VMEM-resident

    def gate_update(gates, c_prev):              # PyTorch gate order i, f, g, o
        i = jax.nn.sigmoid(gates[:, 0 * HP:1 * HP])
        f = jax.nn.sigmoid(gates[:, 1 * HP:2 * HP])
        g = jnp.tanh(gates[:, 2 * HP:3 * HP])
        o = jax.nn.sigmoid(gates[:, 3 * HP:4 * HP])
        c = f * c_prev + i * g
        h = o * jnp.tanh(c)
        return h, c

    def step(t, carry):
        rt = T - 1 - t                           # backward direction time index
        h = h_sc[...]                            # (B2, 2HP) f32
        rec = jnp.dot(h.astype(jnp.bfloat16), whh,
                      preferred_element_type=jnp.float32)   # (B2, 2G)
        gates_f = xf_sc[t] + rec[:, 0:G]
        gates_b = xb_sc[rt] + rec[:, G:2 * G]
        c_prev = c_sc[...]
        hf, cf = gate_update(gates_f, c_prev[:, 0:HP])
        hb, cb = gate_update(gates_b, c_prev[:, HP:2 * HP])
        h_sc[...] = jnp.concatenate([hf, hb], axis=1)
        c_sc[...] = jnp.concatenate([cf, cb], axis=1)
        outf_sc[t] = hf                          # fwd hidden at time t
        outb_sc[rt] = hb                         # bwd hidden at time rt
        return carry

    lax.fori_loop(0, T, step, 0, unroll=(T <= 16))

    # ---- Conv1d(200, 50, 3) + tanh + max-over-time, on VMEM-resident states.
    of = outf_sc[...]                            # (T, B2, HP)
    ob = outb_sc[...]
    acc = jnp.zeros((Tout, B2, COP), jnp.float32) + convb_ref[...]
    for k in range(CONV_K):
        acc = acc + lax.dot_general(of[k:k + Tout], convwf_ref[k],
                                    (((2,), (0,)), ((), ())),
                                    preferred_element_type=jnp.float32)
        acc = acc + lax.dot_general(ob[k:k + Tout], convwb_ref[k],
                                    (((2,), (0,)), ((), ())),
                                    preferred_element_type=jnp.float32)
    pooled = jnp.max(jnp.tanh(acc), axis=0)      # (B2, COP); padded lanes == 0
    pooled_ref[...] = pooled

    # ---- CosineSimilarity(dim=1); per-vector eps clamp (matches torch).
    qv = pooled[0:B, :]
    av = pooled[B:B2, :]
    dot = jnp.sum(qv * av, axis=1, keepdims=True)
    nq = jnp.maximum(jnp.sqrt(jnp.sum(qv * qv, axis=1, keepdims=True)), EPS)
    na = jnp.maximum(jnp.sqrt(jnp.sum(av * av, axis=1, keepdims=True)), EPS)
    cos_ref[...] = dot / (nq * na)


def bilstm_forward(sentence1, sentence2, params):
    T, B = sentence1.shape
    assert T >= CONV_K, "Conv1d(kernel=3) needs at least 3 timesteps"
    B2 = 2 * B

    # Embedding lookup (gather) stays in plain JAX glue.
    q = params["emb"][sentence1]                 # (T, B, E)
    a = params["emb"][sentence2]
    x = jnp.concatenate([q, a], axis=1)          # (T, 2B, E): sentences batched

    cos, pooled = pl.pallas_call(
        _bilstm_forward_kernel,
        out_shape=(jax.ShapeDtypeStruct((B, 1), jnp.float32),
                   jax.ShapeDtypeStruct((B2, COP), jnp.float32)),
        in_specs=[pl.BlockSpec(memory_space=pltpu.MemorySpace.VMEM)] * 7,
        out_specs=(pl.BlockSpec(memory_space=pltpu.MemorySpace.VMEM),
                   pl.BlockSpec(memory_space=pltpu.MemorySpace.VMEM)),
        scratch_shapes=[
            pltpu.VMEM((T, B2, G), jnp.float32),      # x @ W_ih (fwd) + bias
            pltpu.VMEM((T, B2, G), jnp.float32),      # x @ W_ih (bwd) + bias
            pltpu.VMEM((B2, 2 * HP), jnp.float32),    # h carry [fwd | bwd]
            pltpu.VMEM((B2, 2 * HP), jnp.float32),    # c carry [fwd | bwd]
            pltpu.VMEM((T, B2, HP), jnp.float32),     # fwd hidden states
            pltpu.VMEM((T, B2, HP), jnp.float32),     # bwd hidden states
        ],
    )(x, params["w_ih"], params["b"], params["w_hh"],
      params["conv_w_f"], params["conv_w_b"], params["conv_b"])

    q_orig = pooled[:B, :CONV_OUT]
    ans_orig = pooled[B:, :CONV_OUT]
    # TODO(synk): stochastic nn.Dropout(0.3) not reproduced; eval-mode identity.
    return cos[:, 0], q_orig, ans_orig


def init_params(key, vocab_size, embedding_dim, hidden_dim=HIDDEN):
    assert hidden_dim == HIDDEN    # conv(200 -> 50) pins 2 * hidden_dim == 200
    H, E = hidden_dim, embedding_dim
    ks = jax.random.split(key, 11)
    bound = float(1.0 / (H ** 0.5))

    def u(k, shape, b):
        return jax.random.uniform(k, shape, jnp.float32, -b, b)

    # Logical (torch-layout) LSTM weights, gate order i | f | g | o.
    wih_f = u(ks[1], (4, E, H), bound)
    whh_f = u(ks[2], (4, H, H), bound)
    bias_f = u(ks[3], (4, H), bound) + u(ks[4], (4, H), bound)   # b_ih + b_hh
    wih_b = u(ks[5], (4, E, H), bound)
    whh_b = u(ks[6], (4, H, H), bound)
    bias_b = u(ks[7], (4, H), bound) + u(ks[8], (4, H), bound)

    # Pack into lane-dense padded layouts (H padded to HP=128; padding = 0 so
    # the padded hidden lanes stay exactly zero through the recurrence).
    wih = jnp.zeros((E, 2 * G), jnp.float32)
    whh = jnp.zeros((2 * HP, 2 * G), jnp.float32)    # block-diag over directions
    b = jnp.zeros((1, 2 * G), jnp.float32)
    for g in range(4):
        wih = wih.at[:, g * HP:g * HP + H].set(wih_f[g])
        wih = wih.at[:, G + g * HP:G + g * HP + H].set(wih_b[g])
        whh = whh.at[0:H, g * HP:g * HP + H].set(whh_f[g])
        whh = whh.at[HP:HP + H, G + g * HP:G + g * HP + H].set(whh_b[g])
        b = b.at[0, g * HP:g * HP + H].set(bias_f[g])
        b = b.at[0, G + g * HP:G + g * HP + H].set(bias_b[g])

    # Conv1d(2H=200 -> 50, k=3): torch in-channels 0:H = fwd hidden, H:2H = bwd.
    cbound = float(1.0 / ((2 * H * CONV_K) ** 0.5))
    conv_w = u(ks[9], (CONV_K, 2 * H, CONV_OUT), cbound)   # (k, C_in, C_out)
    conv_b_log = u(ks[10], (CONV_OUT,), cbound)
    conv_w_f = jnp.zeros((CONV_K, HP, COP), jnp.float32)
    conv_w_b = jnp.zeros((CONV_K, HP, COP), jnp.float32)
    conv_w_f = conv_w_f.at[:, 0:H, 0:CONV_OUT].set(conv_w[:, 0:H, :])
    conv_w_b = conv_w_b.at[:, 0:H, 0:CONV_OUT].set(conv_w[:, H:2 * H, :])
    conv_b = jnp.zeros((1, COP), jnp.float32).at[0, 0:CONV_OUT].set(conv_b_log)

    return dict(
        emb=jax.random.normal(ks[0], (vocab_size, E), jnp.float32),
        w_ih=wih.astype(jnp.bfloat16),       # (E, 2G): [fwd gates | bwd gates]
        w_hh=whh.astype(jnp.bfloat16),       # (2HP, 2G): block-diag directions
        b=b,                                 # (1, 2G) f32
        conv_w_f=conv_w_f,                   # (K, HP, COP) f32
        conv_w_b=conv_w_b,                   # (K, HP, COP) f32
        conv_b=conv_b,                       # (1, COP) f32
    )


if __name__ == "__main__":
    key = jax.random.PRNGKey(0)
    vocab_size, embedding_dim = 64, 32
    batch, seq = 2, 8

    pk, s1k, s2k = jax.random.split(key, 3)
    params = init_params(pk, vocab_size, embedding_dim)
    sentence1 = jax.random.randint(s1k, (seq, batch), 0, vocab_size, jnp.int32)
    sentence2 = jax.random.randint(s2k, (seq, batch), 0, vocab_size, jnp.int32)

    cos, q_orig, ans_orig = jax.jit(bilstm_forward)(sentence1, sentence2, params)
    jax.block_until_ready((cos, q_orig, ans_orig))

    assert cos.shape == (batch,)
    assert q_orig.shape == (batch, CONV_OUT)
    assert ans_orig.shape == (batch, CONV_OUT)
    assert bool(jnp.all(jnp.isfinite(cos)))
    assert bool(jnp.all(jnp.abs(cos) <= 1.0 + 1e-5))
    print("KERNEL_OK")
</pallas_src>

<mosaic_0001>
module attributes {stable_mosaic.version = 11 : i64} {
  func.func @_bilstm_forward_kernel(%arg0: memref<8x4x32xf32, #tpu.memory_space<vmem>>, %arg1: memref<32x1024xbf16, #tpu.memory_space<vmem>>, %arg2: memref<1x1024xf32, #tpu.memory_space<vmem>>, %arg3: memref<256x1024xbf16, #tpu.memory_space<vmem>>, %arg4: memref<3x128x128xf32, #tpu.memory_space<vmem>>, %arg5: memref<3x128x128xf32, #tpu.memory_space<vmem>>, %arg6: memref<1x128xf32, #tpu.memory_space<vmem>>, %arg7: memref<2x1xf32, #tpu.memory_space<vmem>>, %arg8: memref<4x128xf32, #tpu.memory_space<vmem>>, %arg9: memref<8x4x512xf32, #tpu.memory_space<vmem>>, %arg10: memref<8x4x512xf32, #tpu.memory_space<vmem>>, %arg11: memref<4x256xf32, #tpu.memory_space<vmem>>, %arg12: memref<4x256xf32, #tpu.memory_space<vmem>>, %arg13: memref<8x4x128xf32, #tpu.memory_space<vmem>>, %arg14: memref<8x4x128xf32, #tpu.memory_space<vmem>>) attributes {dimension_semantics = [], scalar_prefetch = 0 : i64, scratch_operands = 6 : i64, tpu.core_type = #tpu.core_type<tc>} {
    %c0 = arith.constant 0 : index
    %c0_0 = arith.constant 0 : index
    %c0_1 = arith.constant 0 : index
    %0 = vector.load %arg0[%c0, %c0_0, %c0_1] : memref<8x4x32xf32, #tpu.memory_space<vmem>>, vector<8x4x32xf32>
    %1 = arith.truncf %0 : vector<8x4x32xf32> to vector<8x4x32xbf16>
    %c0_2 = arith.constant 0 : index
    %c0_3 = arith.constant 0 : index
    %2 = vector.load %arg1[%c0_2, %c0_3] : memref<32x1024xbf16, #tpu.memory_space<vmem>>, vector<32x1024xbf16>
    %cst = arith.constant dense<0.000000e+00> : vector<8x4x1024xf32>
    %3 = tpu.matmul %1, %2, %cst {dimension_numbers = #tpu.dot_dimension_numbers<[2], [0], [0, 1], [1], [0, 0, 0, 1, 1, 1], [], []>} : vector<8x4x32xbf16>, vector<32x1024xbf16>, vector<8x4x1024xf32> -> vector<8x4x1024xf32>
    %c0_4 = arith.constant 0 : index
    %c0_5 = arith.constant 0 : index
    %4 = vector.load %arg2[%c0_4, %c0_5] : memref<1x1024xf32, #tpu.memory_space<vmem>>, vector<1x1024xf32>
    %5 = vector.shape_cast %4 : vector<1x1024xf32> to vector<1x1x1024xf32>
    %6 = vector.broadcast %5 : vector<1x1x1024xf32> to vector<8x4x1024xf32>
    %7 = arith.addf %3, %6 : vector<8x4x1024xf32>
    %8 = vector.extract_strided_slice %7 {offsets = [0, 0, 0], sizes = [8, 4, 512], strides = [1, 1, 1]} : vector<8x4x1024xf32> to vector<8x4x512xf32>
    %c0_6 = arith.constant 0 : index
    %c0_7 = arith.constant 0 : index
    %c0_8 = arith.constant 0 : index
    %9 = vector.load %arg9[%c0_6, %c0_7, %c0_8] : memref<8x4x512xf32, #tpu.memory_space<vmem>>, vector<8x4x512xf32>
    tpu.vector_store %arg9[%c0_6, %c0_7, %c0_8], %8 {strides = array<i32>} : memref<8x4x512xf32, #tpu.memory_space<vmem>>, vector<8x4x512xf32>,
    %10 = vector.extract_strided_slice %7 {offsets = [0, 0, 512], sizes = [8, 4, 512], strides = [1, 1, 1]} : vector<8x4x1024xf32> to vector<8x4x512xf32>
    %c0_9 = arith.constant 0 : index
    %c0_10 = arith.constant 0 : index
    %c0_11 = arith.constant 0 : index
    %11 = vector.load %arg10[%c0_9, %c0_10, %c0_11] : memref<8x4x512xf32, #tpu.memory_space<vmem>>, vector<8x4x512xf32>
    tpu.vector_store %arg10[%c0_9, %c0_10, %c0_11], %10 {strides = array<i32>} : memref<8x4x512xf32, #tpu.memory_space<vmem>>, vector<8x4x512xf32>,
    %cst_12 = arith.constant 0.000000e+00 : f32
    %12 = vector.broadcast %cst_12 : f32 to vector<4x256xf32>
    %c0_13 = arith.constant 0 : index
    %c0_14 = arith.constant 0 : index
    %13 = vector.load %arg11[%c0_13, %c0_14] : memref<4x256xf32, #tpu.memory_space<vmem>>, vector<4x256xf32>
    tpu.vector_store %arg11[%c0_13, %c0_14], %12 {strides = array<i32>} : memref<4x256xf32, #tpu.memory_space<vmem>>, vector<4x256xf32>,
    %cst_15 = arith.constant 0.000000e+00 : f32
    %14 = vector.broadcast %cst_15 : f32 to vector<4x256xf32>
    %c0_16 = arith.constant 0 : index
    %c0_17 = arith.constant 0 : index
    %15 = vector.load %arg12[%c0_16, %c0_17] : memref<4x256xf32, #tpu.memory_space<vmem>>, vector<4x256xf32>
    tpu.vector_store %arg12[%c0_16, %c0_17], %14 {strides = array<i32>} : memref<4x256xf32, #tpu.memory_space<vmem>>, vector<4x256xf32>,
    %c0_18 = arith.constant 0 : index
    %c0_19 = arith.constant 0 : index
    %16 = vector.load %arg3[%c0_18, %c0_19] : memref<256x1024xbf16, #tpu.memory_space<vmem>>, vector<256x1024xbf16>
    %c0_i32 = arith.constant 0 : i32
    %c7_i32 = arith.constant 7 : i32
    %17 = arith.subi %c7_i32, %c0_i32 : i32
    %c0_20 = arith.constant 0 : index
    %c0_21 = arith.constant 0 : index
    %18 = vector.load %arg11[%c0_20, %c0_21] : memref<4x256xf32, #tpu.memory_space<vmem>>, vector<4x256xf32>
    %19 = arith.truncf %18 : vector<4x256xf32> to vector<4x256xbf16>
    %cst_22 = arith.constant dense<0.000000e+00> : vector<4x1024xf32>
    %20 = tpu.matmul %19, %16, %cst_22 {dimension_numbers = #tpu.dot_dimension_numbers<[1], [0], [0], [1], [0, 0, 1, 1], [], []>} : vector<4x256xbf16>, vector<256x1024xbf16>, vector<4x1024xf32> -> vector<4x1024xf32>
    %21 = arith.index_cast %c0_i32 : i32 to index
    %c0_23 = arith.constant 0 : index
    %c0_24 = arith.constant 0 : index
    %22 = vector.load %arg9[%21, %c0_23, %c0_24] : memref<8x4x512xf32, #tpu.memory_space<vmem>>, vector<1x4x512xf32>
    %23 = vector.shape_cast %22 : vector<1x4x512xf32> to vector<4x512xf32>
    %24 = vector.extract_strided_slice %20 {offsets = [0, 0], sizes = [4, 512], strides = [1, 1]} : vector<4x1024xf32> to vector<4x512xf32>
    %25 = arith.addf %23, %24 : vector<4x512xf32>
    %26 = arith.index_cast %17 : i32 to index
    %c0_25 = arith.constant 0 : index
    %c0_26 = arith.constant 0 : index
    %27 = vector.load %arg10[%26, %c0_25, %c0_26] : memref<8x4x512xf32, #tpu.memory_space<vmem>>, vector<1x4x512xf32>
    %28 = vector.shape_cast %27 : vector<1x4x512xf32> to vector<4x512xf32>
    %29 = vector.extract_strided_slice %20 {offsets = [0, 512], sizes = [4, 512], strides = [1, 1]} : vector<4x1024xf32> to vector<4x512xf32>
    %30 = arith.addf %28, %29 : vector<4x512xf32>
    %c0_27 = arith.constant 0 : index
    %c0_28 = arith.constant 0 : index
    %31 = vector.load %arg12[%c0_27, %c0_28] : memref<4x256xf32, #tpu.memory_space<vmem>>, vector<4x256xf32>
    %32 = vector.extract_strided_slice %31 {offsets = [0, 0], sizes = [4, 128], strides = [1, 1]} : vector<4x256xf32> to vector<4x128xf32>
    %33 = vector.extract_strided_slice %25 {offsets = [0, 0], sizes = [4, 128], strides = [1, 1]} : vector<4x512xf32> to vector<4x128xf32>
    %34 = arith.negf %33 : vector<4x128xf32>
    %35 = math.exp %34 : vector<4x128xf32>
    %cst_29 = arith.constant 1.000000e+00 : f32
    %36 = vector.broadcast %cst_29 : f32 to vector<4x128xf32>
    %37 = arith.addf %36, %35 : vector<4x128xf32>
    %38 = arith.divf %36, %37 : vector<4x128xf32>
    %39 = vector.extract_strided_slice %25 {offsets = [0, 128], sizes = [4, 128], strides = [1, 1]} : vector<4x512xf32> to vector<4x128xf32>
    %40 = arith.negf %39 : vector<4x128xf32>
    %41 = math.exp %40 : vector<4x128xf32>
    %cst_30 = arith.constant 1.000000e+00 : f32
    %42 = vector.broadcast %cst_30 : f32 to vector<4x128xf32>
    %43 = arith.addf %42, %41 : vector<4x128xf32>
    %44 = arith.divf %42, %43 : vector<4x128xf32>
    %45 = vector.extract_strided_slice %25 {offsets = [0, 256], sizes = [4, 128], strides = [1, 1]} : vector<4x512xf32> to vector<4x128xf32>
    %46 = math.tanh %45 : vector<4x128xf32>
    %47 = vector.extract_strided_slice %25 {offsets = [0, 384], sizes = [4, 128], strides = [1, 1]} : vector<4x512xf32> to vector<4x128xf32>
    %48 = arith.negf %47 : vector<4x128xf32>
    %49 = math.exp %48 : vector<4x128xf32>
    %cst_31 = arith.constant 1.000000e+00 : f32
    %50 = vector.broadcast %cst_31 : f32 to vector<4x128xf32>
    %51 = arith.addf %50, %49 : vector<4x128xf32>
    %52 = arith.divf %50, %51 : vector<4x128xf32>
    %53 = arith.mulf %44, %32 : vector<4x128xf32>
    %54 = arith.mulf %38, %46 : vector<4x128xf32>
    %55 = arith.addf %53, %54 : vector<4x128xf32>
    %56 = math.tanh %55 : vector<4x128xf32>
    %57 = arith.mulf %52, %56 : vector<4x128xf32>
    %58 = vector.extract_strided_slice %31 {offsets = [0, 128], sizes = [4, 128], strides = [1, 1]} : vector<4x256xf32> to vector<4x128xf32>
    %59 = vector.extract_strided_slice %30 {offsets = [0, 0], sizes = [4, 128], strides = [1, 1]} : vector<4x512xf32> to vector<4x128xf32>
    %60 = arith.negf %59 : vector<4x128xf32>
    %61 = math.exp %60 : vector<4x128xf32>
    %cst_32 = arith.constant 1.000000e+00 : f32
    %62 = vector.broadcast %cst_32 : f32 to vector<4x128xf32>
    %63 = arith.addf %62, %61 : vector<4x128xf32>
    %64 = arith.divf %62, %63 : vector<4x128xf32>
    %65 = vector.extract_strided_slice %30 {offsets = [0, 128], sizes = [4, 128], strides = [1, 1]} : vector<4x512xf32> to vector<4x128xf32>
    %66 = arith.negf %65 : vector<4x128xf32>
    %67 = math.exp %66 : vector<4x128xf32>
    %cst_33 = arith.constant 1.000000e+00 : f32
    %68 = vector.broadcast %cst_33 : f32 to vector<4x128xf32>
    %69 = arith.addf %68, %67 : vector<4x128xf32>
    %70 = arith.divf %68, %69 : vector<4x128xf32>
    %71 = vector.extract_strided_slice %30 {offsets = [0, 256], sizes = [4, 128], strides = [1, 1]} : vector<4x512xf32> to vector<4x128xf32>
    %72 = math.tanh %71 : vector<4x128xf32>
    %73 = vector.extract_strided_slice %30 {offsets = [0, 384], sizes = [4, 128], strides = [1, 1]} : vector<4x512xf32> to vector<4x128xf32>
    %74 = arith.negf %73 : vector<4x128xf32>
    %75 = math.exp %74 : vector<4x128xf32>
    %cst_34 = arith.constant 1.000000e+00 : f32
    %76 = vector.broadcast %cst_34 : f32 to vector<4x128xf32>
    %77 = arith.addf %76, %75 : vector<4x128xf32>
    %78 = arith.divf %76, %77 : vector<4x128xf32>
    %79 = arith.mulf %70, %58 : vector<4x128xf32>
    %80 = arith.mulf %64, %72 : vector<4x128xf32>
    %81 = arith.addf %79, %80 : vector<4x128xf32>
    %82 = math.tanh %81 : vector<4x128xf32>
    %83 = arith.mulf %78, %82 : vector<4x128xf32>
    %84 = tpu.concatenate %57, %83 in 1 : vector<4x128xf32>, vector<4x128xf32> -> vector<4x256xf32>
    %c0_35 = arith.constant 0 : index
    %c0_36 = arith.constant 0 : index
    %85 = vector.load %arg11[%c0_35, %c0_36] : memref<4x256xf32, #tpu.memory_space<vmem>>, vector<4x256xf32>
    tpu.vector_store %arg11[%c0_35, %c0_36], %84 {strides = array<i32>} : memref<4x256xf32, #tpu.memory_space<vmem>>, vector<4x256xf32>,
    %86 = tpu.concatenate %55, %81 in 1 : vector<4x128xf32>, vector<4x128xf32> -> vector<4x256xf32>
    %c0_37 = arith.constant 0 : index
    %c0_38 = arith.constant 0 : index
    %87 = vector.load %arg12[%c0_37, %c0_38] : memref<4x256xf32, #tpu.memory_space<vmem>>, vector<4x256xf32>
    tpu.vector_store %arg12[%c0_37, %c0_38], %86 {strides = array<i32>} : memref<4x256xf32, #tpu.memory_space<vmem>>, vector<4x256xf32>,
    %88 = arith.index_cast %c0_i32 : i32 to index
    %c0_39 = arith.constant 0 : index
    %c0_40 = arith.constant 0 : index
    %89 = vector.load %arg13[%88, %c0_39, %c0_40] : memref<8x4x128xf32, #tpu.memory_space<vmem>>, vector<1x4x128xf32>
    %90 = vector.shape_cast %89 : vector<1x4x128xf32> to vector<4x128xf32>
    %91 = vector.shape_cast %57 : vector<4x128xf32> to vector<1x4x128xf32>
    tpu.vector_store %arg13[%88, %c0_39, %c0_40], %91 {strides = array<i32>} : memref<8x4x128xf32, #tpu.memory_space<vmem>>, vector<1x4x128xf32>,
    %92 = arith.index_cast %17 : i32 to index
    %c0_41 = arith.constant 0 : index
    %c0_42 = arith.constant 0 : index
    %93 = vector.load %arg14[%92, %c0_41, %c0_42] : memref<8x4x128xf32, #tpu.memory_space<vmem>>, vector<1x4x128xf32>
    %94 = vector.shape_cast %93 : vector<1x4x128xf32> to vector<4x128xf32>
    %95 = vector.shape_cast %83 : vector<4x128xf32> to vector<1x4x128xf32>
    tpu.vector_store %arg14[%92, %c0_41, %c0_42], %95 {strides = array<i32>} : memref<8x4x128xf32, #tpu.memory_space<vmem>>, vector<1x4x128xf32>,
    %c1_i32 = arith.constant 1 : i32
    %c7_i32_43 = arith.constant 7 : i32
    %96 = arith.subi %c7_i32_43, %c1_i32 : i32
    %c0_44 = arith.constant 0 : index
    %c0_45 = arith.constant 0 : index
    %97 = vector.load %arg11[%c0_44, %c0_45] : memref<4x256xf32, #tpu.memory_space<vmem>>, vector<4x256xf32>
    %98 = arith.truncf %97 : vector<4x256xf32> to vector<4x256xbf16>
    %cst_46 = arith.constant dense<0.000000e+00> : vector<4x1024xf32>
    %99 = tpu.matmul %98, %16, %cst_46 {dimension_numbers = #tpu.dot_dimension_numbers<[1], [0], [0], [1], [0, 0, 1, 1], [], []>} : vector<4x256xbf16>, vector<256x1024xbf16>, vector<4x1024xf32> -> vector<4x1024xf32>
    %100 = arith.index_cast %c1_i32 : i32 to index
    %c0_47 = arith.constant 0 : index
    %c0_48 = arith.constant 0 : index
    %101 = vector.load %arg9[%100, %c0_47, %c0_48] : memref<8x4x512xf32, #tpu.memory_space<vmem>>, vector<1x4x512xf32>
    %102 = vector.shape_cast %101 : vector<1x4x512xf32> to vector<4x512xf32>
    %103 = vector.extract_strided_slice %99 {offsets = [0, 0], sizes = [4, 512], strides = [1, 1]} : vector<4x1024xf32> to vector<4x512xf32>
    %104 = arith.addf %102, %103 : vector<4x512xf32>
    %105 = arith.index_cast %96 : i32 to index
    %c0_49 = arith.constant 0 : index
    %c0_50 = arith.constant 0 : index
    %106 = vector.load %arg10[%105, %c0_49, %c0_50] : memref<8x4x512xf32, #tpu.memory_space<vmem>>, vector<1x4x512xf32>
    %107 = vector.shape_cast %106 : vector<1x4x512xf32> to vector<4x512xf32>
    %108 = vector.extract_strided_slice %99 {offsets = [0, 512], sizes = [4, 512], strides = [1, 1]} : vector<4x1024xf32> to vector<4x512xf32>
    %109 = arith.addf %107, %108 : vector<4x512xf32>
    %c0_51 = arith.constant 0 : index
    %c0_52 = arith.constant 0 : index
    %110 = vector.load %arg12[%c0_51, %c0_52] : memref<4x256xf32, #tpu.memory_space<vmem>>, vector<4x256xf32>
    %111 = vector.extract_strided_slice %110 {offsets = [0, 0], sizes = [4, 128], strides = [1, 1]} : vector<4x256xf32> to vector<4x128xf32>
    %112 = vector.extract_strided_slice %104 {offsets = [0, 0], sizes = [4, 128], strides = [1, 1]} : vector<4x512xf32> to vector<4x128xf32>
    %113 = arith.negf %112 : vector<4x128xf32>
    %114 = math.exp %113 : vector<4x128xf32>
    %cst_53 = arith.constant 1.000000e+00 : f32
    %115 = vector.broadcast %cst_53 : f32 to vector<4x128xf32>
    %116 = arith.addf %115, %114 : vector<4x128xf32>
    %117 = arith.divf %115, %116 : vector<4x128xf32>
    %118 = vector.extract_strided_slice %104 {offsets = [0, 128], sizes = [4, 128], strides = [1, 1]} : vector<4x512xf32> to vector<4x128xf32>
    %119 = arith.negf %118 : vector<4x128xf32>
    %120 = math.exp %119 : vector<4x128xf32>
    %cst_54 = arith.constant 1.000000e+00 : f32
    %121 = vector.broadcast %cst_54 : f32 to vector<4x128xf32>
    %122 = arith.addf %121, %120 : vector<4x128xf32>
    %123 = arith.divf %121, %122 : vector<4x128xf32>
    %124 = vector.extract_strided_slice %104 {offsets = [0, 256], sizes = [4, 128], strides = [1, 1]} : vector<4x512xf32> to vector<4x128xf32>
    %125 = math.tanh %124 : vector<4x128xf32>
    %126 = vector.extract_strided_slice %104 {offsets = [0, 384], sizes = [4, 128], strides = [1, 1]} : vector<4x512xf32> to vector<4x128xf32>
    %127 = arith.negf %126 : vector<4x128xf32>
    %128 = math.exp %127 : vector<4x128xf32>
    %cst_55 = arith.constant 1.000000e+00 : f32
    %129 = vector.broadcast %cst_55 : f32 to vector<4x128xf32>
    %130 = arith.addf %129, %128 : vector<4x128xf32>
    %131 = arith.divf %129, %130 : vector<4x128xf32>
    %132 = arith.mulf %123, %111 : vector<4x128xf32>
    %133 = arith.mulf %117, %125 : vector<4x128xf32>
    %134 = arith.addf %132, %133 : vector<4x128xf32>
    %135 = math.tanh %134 : vector<4x128xf32>
    %136 = arith.mulf %131, %135 : vector<4x128xf32>
    %137 = vector.extract_strided_slice %110 {offsets = [0, 128], sizes = [4, 128], strides = [1, 1]} : vector<4x256xf32> to vector<4x128xf32>
    %138 = vector.extract_strided_slice %109 {offsets = [0, 0], sizes = [4, 128], strides = [1, 1]} : vector<4x512xf32> to vector<4x128xf32>
    %139 = arith.negf %138 : vector<4x128xf32>
    %140 = math.exp %139 : vector<4x128xf32>
    %cst_56 = arith.constant 1.000000e+00 : f32
    %141 = vector.broadcast %cst_56 : f32 to vector<4x128xf32>
    %142 = arith.addf %141, %140 : vector<4x128xf32>
    %143 = arith.divf %141, %142 : vector<4x128xf32>
    %144 = vector.extract_strided_slice %109 {offsets = [0, 128], sizes = [4, 128], strides = [1, 1]} : vector<4x512xf32> to vector<4x128xf32>
    %145 = arith.negf %144 : vector<4x128xf32>
    %146 = math.exp %145 : vector<4x128xf32>
    %cst_57 = arith.constant 1.000000e+00 : f32
    %147 = vector.broadcast %cst_57 : f32 to vector<4x128xf32>
    %148 = arith.addf %147, %146 : vector<4x128xf32>
    %149 = arith.divf %147, %148 : vector<4x128xf32>
    %150 = vector.extract_strided_slice %109 {offsets = [0, 256], sizes = [4, 128], strides = [1, 1]} : vector<4x512xf32> to vector<4x128xf32>
    %151 = math.tanh %150 : vector<4x128xf32>
    %152 = vector.extract_strided_slice %109 {offsets = [0, 384], sizes = [4, 128], strides = [1, 1]} : vector<4x512xf32> to vector<4x128xf32>
    %153 = arith.negf %152 : vector<4x128xf32>
    %154 = math.exp %153 : vector<4x128xf32>
    %cst_58 = arith.constant 1.000000e+00 : f32
    %155 = vector.broadcast %cst_58 : f32 to vector<4x128xf32>
    %156 = arith.addf %155, %154 : vector<4x128xf32>
    %157 = arith.divf %155, %156 : vector<4x128xf32>
    %158 = arith.mulf %149, %137 : vector<4x128xf32>
    %159 = arith.mulf %143, %151 : vector<4x128xf32>
    %160 = arith.addf %158, %159 : vector<4x128xf32>
    %161 = math.tanh %160 : vector<4x128xf32>
    %162 = arith.mulf %157, %161 : vector<4x128xf32>
    %163 = tpu.concatenate %136, %162 in 1 : vector<4x128xf32>, vector<4x128xf32> -> vector<4x256xf32>
    %c0_59 = arith.constant 0 : index
    %c0_60 = arith.constant 0 : index
    %164 = vector.load %arg11[%c0_59, %c0_60] : memref<4x256xf32, #tpu.memory_space<vmem>>, vector<4x256xf32>
    tpu.vector_store %arg11[%c0_59, %c0_60], %163 {strides = array<i32>} : memref<4x256xf32, #tpu.memory_space<vmem>>, vector<4x256xf32>,
    %165 = tpu.concatenate %134, %160 in 1 : vector<4x128xf32>, vector<4x128xf32> -> vector<4x256xf32>
    %c0_61 = arith.constant 0 : index
    %c0_62 = arith.constant 0 : index
    %166 = vector.load %arg12[%c0_61, %c0_62] : memref<4x256xf32, #tpu.memory_space<vmem>>, vector<4x256xf32>
    tpu.vector_store %arg12[%c0_61, %c0_62], %165 {strides = array<i32>} : memref<4x256xf32, #tpu.memory_space<vmem>>, vector<4x256xf32>,
    %167 = arith.index_cast %c1_i32 : i32 to index
    %c0_63 = arith.constant 0 : index
    %c0_64 = arith.constant 0 : index
    %168 = vector.load %arg13[%167, %c0_63, %c0_64] : memref<8x4x128xf32, #tpu.memory_space<vmem>>, vector<1x4x128xf32>
    %169 = vector.shape_cast %168 : vector<1x4x128xf32> to vector<4x128xf32>
    %170 = vector.shape_cast %136 : vector<4x128xf32> to vector<1x4x128xf32>
    tpu.vector_store %arg13[%167, %c0_63, %c0_64], %170 {strides = array<i32>} : memref<8x4x128xf32, #tpu.memory_space<vmem>>, vector<1x4x128xf32>,
    %171 = arith.index_cast %96 : i32 to index
    %c0_65 = arith.constant 0 : index
    %c0_66 = arith.constant 0 : index
    %172 = vector.load %arg14[%171, %c0_65, %c0_66] : memref<8x4x128xf32, #tpu.memory_space<vmem>>, vector<1x4x128xf32>
    %173 = vector.shape_cast %172 : vector<1x4x128xf32> to vector<4x128xf32>
    %174 = vector.shape_cast %162 : vector<4x128xf32> to vector<1x4x128xf32>
    tpu.vector_store %arg14[%171, %c0_65, %c0_66], %174 {strides = array<i32>} : memref<8x4x128xf32, #tpu.memory_space<vmem>>, vector<1x4x128xf32>,
    %c2_i32 = arith.constant 2 : i32
    %c7_i32_67 = arith.constant 7 : i32
    %175 = arith.subi %c7_i32_67, %c2_i32 : i32
    %c0_68 = arith.constant 0 : index
    %c0_69 = arith.constant 0 : index
    %176 = vector.load %arg11[%c0_68, %c0_69] : memref<4x256xf32, #tpu.memory_space<vmem>>, vector<4x256xf32>
    %177 = arith.truncf %176 : vector<4x256xf32> to vector<4x256xbf16>
    %cst_70 = arith.constant dense<0.000000e+00> : vector<4x1024xf32>
    %178 = tpu.matmul %177, %16, %cst_70 {dimension_numbers = #tpu.dot_dimension_numbers<[1], [0], [0], [1], [0, 0, 1, 1], [], []>} : vector<4x256xbf16>, vector<256x1024xbf16>, vector<4x1024xf32> -> vector<4x1024xf32>
    %179 = arith.index_cast %c2_i32 : i32 to index
    %c0_71 = arith.constant 0 : index
    %c0_72 = arith.constant 0 : index
    %180 = vector.load %arg9[%179, %c0_71, %c0_72] : memref<8x4x512xf32, #tpu.memory_space<vmem>>, vector<1x4x512xf32>
    %181 = vector.shape_cast %180 : vector<1x4x512xf32> to vector<4x512xf32>
    %182 = vector.extract_strided_slice %178 {offsets = [0, 0], sizes = [4, 512], strides = [1, 1]} : vector<4x1024xf32> to vector<4x512xf32>
    %183 = arith.addf %181, %182 : vector<4x512xf32>
    %184 = arith.index_cast %175 : i32 to index
    %c0_73 = arith.constant 0 : index
    %c0_74 = arith.constant 0 : index
    %185 = vector.load %arg10[%184, %c0_73, %c0_74] : memref<8x4x512xf32, #tpu.memory_space<vmem>>, vector<1x4x512xf32>
    %186 = vector.shape_cast %185 : vector<1x4x512xf32> to vector<4x512xf32>
    %187 = vector.extract_strided_slice %178 {offsets = [0, 512], sizes = [4, 512], strides = [1, 1]} : vector<4x1024xf32> to vector<4x512xf32>
    %188 = arith.addf %186, %187 : vector<4x512xf32>
    %c0_75 = arith.constant 0 : index
    %c0_76 = arith.constant 0 : index
    %189 = vector.load %arg12[%c0_75, %c0_76] : memref<4x256xf32, #tpu.memory_space<vmem>>, vector<4x256xf32>
    %190 = vector.extract_strided_slice %189 {offsets = [0, 0], sizes = [4, 128], strides = [1, 1]} : vector<4x256xf32> to vector<4x128xf32>
    %191 = vector.extract_strided_slice %183 {offsets = [0, 0], sizes = [4, 128], strides = [1, 1]} : vector<4x512xf32> to vector<4x128xf32>
    %192 = arith.negf %191 : vector<4x128xf32>
    %193 = math.exp %192 : vector<4x128xf32>
    %cst_77 = arith.constant 1.000000e+00 : f32
    %194 = vector.broadcast %cst_77 : f32 to vector<4x128xf32>
    %195 = arith.addf %194, %193 : vector<4x128xf32>
    %196 = arith.divf %194, %195 : vector<4x128xf32>
    %197 = vector.extract_strided_slice %183 {offsets = [0, 128], sizes = [4, 128], strides = [1, 1]} : vector<4x512xf32> to vector<4x128xf32>
    %198 = arith.negf %197 : vector<4x128xf32>
    %199 = math.exp %198 : vector<4x128xf32>
    %cst_78 = arith.constant 1.000000e+00 : f32
    %200 = vector.broadcast %cst_78 : f32 to vector<4x128xf32>
    %201 = arith.addf %200, %199 : vector<4x128xf32>
    %202 = arith.divf %200, %201 : vector<4x128xf32>
    %203 = vector.extract_strided_slice %183 {offsets = [0, 256], sizes = [4, 128], strides = [1, 1]} : vector<4x512xf32> to vector<4x128xf32>
    %204 = math.tanh %203 : vector<4x128xf32>
    %205 = vector.extract_strided_slice %183 {offsets = [0, 384], sizes = [4, 128], strides = [1, 1]} : vector<4x512xf32> to vector<4x128xf32>
    %206 = arith.negf %205 : vector<4x128xf32>
    %207 = math.exp %206 : vector<4x128xf32>
    %cst_79 = arith.constant 1.000000e+00 : f32
    %208 = vector.broadcast %cst_79 : f32 to vector<4x128xf32>
    %209 = arith.addf %208, %207 : vector<4x128xf32>
    %210 = arith.divf %208, %209 : vector<4x128xf32>
    %211 = arith.mulf %202, %190 : vector<4x128xf32>
    %212 = arith.mulf %196, %204 : vector<4x128xf32>
    %213 = arith.addf %211, %212 : vector<4x128xf32>
    %214 = math.tanh %213 : vector<4x128xf32>
    %215 = arith.mulf %210, %214 : vector<4x128xf32>
    %216 = vector.extract_strided_slice %189 {offsets = [0, 128], sizes = [4, 128], strides = [1, 1]} : vector<4x256xf32> to vector<4x128xf32>
    %217 = vector.extract_strided_slice %188 {offsets = [0, 0], sizes = [4, 128], strides = [1, 1]} : vector<4x512xf32> to vector<4x128xf32>
    %218 = arith.negf %217 : vector<4x128xf32>
    %219 = math.exp %218 : vector<4x128xf32>
    %cst_80 = arith.constant 1.000000e+00 : f32
    %220 = vector.broadcast %cst_80 : f32 to vector<4x128xf32>
    %221 = arith.addf %220, %219 : vector<4x128xf32>
    %222 = arith.divf %220, %221 : vector<4x128xf32>
    %223 = vector.extract_strided_slice %188 {offsets = [0, 128], sizes = [4, 128], strides = [1, 1]} : vector<4x512xf32> to vector<4x128xf32>
    %224 = arith.negf %223 : vector<4x128xf32>
    %225 = math.exp %224 : vector<4x128xf32>
    %cst_81 = arith.constant 1.000000e+00 : f32
    %226 = vector.broadcast %cst_81 : f32 to vector<4x128xf32>
    %227 = arith.addf %226, %225 : vector<4x128xf32>
    %228 = arith.divf %226, %227 : vector<4x128xf32>
    %229 = vector.extract_strided_slice %188 {offsets = [0, 256], sizes = [4, 128], strides = [1, 1]} : vector<4x512xf32> to vector<4x128xf32>
    %230 = math.tanh %229 : vector<4x128xf32>
    %231 = vector.extract_strided_slice %188 {offsets = [0, 384], sizes = [4, 128], strides = [1, 1]} : vector<4x512xf32> to vector<4x128xf32>
    %232 = arith.negf %231 : vector<4x128xf32>
    %233 = math.exp %232 : vector<4x128xf32>
    %cst_82 = arith.constant 1.000000e+00 : f32
    %234 = vector.broadcast %cst_82 : f32 to vector<4x128xf32>
    %235 = arith.addf %234, %233 : vector<4x128xf32>
    %236 = arith.divf %234, %235 : vector<4x128xf32>
    %237 = arith.mulf %228, %216 : vector<4x128xf32>
    %238 = arith.mulf %222, %230 : vector<4x128xf32>
    %239 = arith.addf %237, %238 : vector<4x128xf32>
    %240 = math.tanh %239 : vector<4x128xf32>
    %241 = arith.mulf %236, %240 : vector<4x128xf32>
    %242 = tpu.concatenate %215, %241 in 1 : vector<4x128xf32>, vector<4x128xf32> -> vector<4x256xf32>
    %c0_83 = arith.constant 0 : index
    %c0_84 = arith.constant 0 : index
    %243 = vector.load %arg11[%c0_83, %c0_84] : memref<4x256xf32, #tpu.memory_space<vmem>>, vector<4x256xf32>
    tpu.vector_store %arg11[%c0_83, %c0_84], %242 {strides = array<i32>} : memref<4x256xf32, #tpu.memory_space<vmem>>, vector<4x256xf32>,
    %244 = tpu.concatenate %213, %239 in 1 : vector<4x128xf32>, vector<4x128xf32> -> vector<4x256xf32>
    %c0_85 = arith.constant 0 : index
    %c0_86 = arith.constant 0 : index
    %245 = vector.load %arg12[%c0_85, %c0_86] : memref<4x256xf32, #tpu.memory_space<vmem>>, vector<4x256xf32>
    tpu.vector_store %arg12[%c0_85, %c0_86], %244 {strides = array<i32>} : memref<4x256xf32, #tpu.memory_space<vmem>>, vector<4x256xf32>,
    %246 = arith.index_cast %c2_i32 : i32 to index
    %c0_87 = arith.constant 0 : index
    %c0_88 = arith.constant 0 : index
    %247 = vector.load %arg13[%246, %c0_87, %c0_88] : memref<8x4x128xf32, #tpu.memory_space<vmem>>, vector<1x4x128xf32>
    %248 = vector.shape_cast %247 : vector<1x4x128xf32> to vector<4x128xf32>
    %249 = vector.shape_cast %215 : vector<4x128xf32> to vector<1x4x128xf32>
    tpu.vector_store %arg13[%246, %c0_87, %c0_88], %249 {strides = array<i32>} : memref<8x4x128xf32, #tpu.memory_space<vmem>>, vector<1x4x128xf32>,
    %250 = arith.index_cast %175 : i32 to index
    %c0_89 = arith.constant 0 : index
    %c0_90 = arith.constant 0 : index
    %251 = vector.load %arg14[%250, %c0_89, %c0_90] : memref<8x4x128xf32, #tpu.memory_space<vmem>>, vector<1x4x128xf32>
    %252 = vector.shape_cast %251 : vector<1x4x128xf32> to vector<4x128xf32>
    %253 = vector.shape_cast %241 : vector<4x128xf32> to vector<1x4x128xf32>
    tpu.vector_store %arg14[%250, %c0_89, %c0_90], %253 {strides = array<i32>} : memref<8x4x128xf32, #tpu.memory_space<vmem>>, vector<1x4x128xf32>,
    %c3_i32 = arith.constant 3 : i32
    %c7_i32_91 = arith.constant 7 : i32
    %254 = arith.subi %c7_i32_91, %c3_i32 : i32
    %c0_92 = arith.constant 0 : index
    %c0_93 = arith.constant 0 : index
    %255 = vector.load %arg11[%c0_92, %c0_93] : memref<4x256xf32, #tpu.memory_space<vmem>>, vector<4x256xf32>
    %256 = arith.truncf %255 : vector<4x256xf32> to vector<4x256xbf16>
    %cst_94 = arith.constant dense<0.000000e+00> : vector<4x1024xf32>
    %257 = tpu.matmul %256, %16, %cst_94 {dimension_numbers = #tpu.dot_dimension_numbers<[1], [0], [0], [1], [0, 0, 1, 1], [], []>} : vector<4x256xbf16>, vector<256x1024xbf16>, vector<4x1024xf32> -> vector<4x1024xf32>
    %258 = arith.index_cast %c3_i32 : i32 to index
    %c0_95 = arith.constant 0 : index
    %c0_96 = arith.constant 0 : index
    %259 = vector.load %arg9[%258, %c0_95, %c0_96] : memref<8x4x512xf32, #tpu.memory_space<vmem>>, vector<1x4x512xf32>
    %260 = vector.shape_cast %259 : vector<1x4x512xf32> to vector<4x512xf32>
    %261 = vector.extract_strided_slice %257 {offsets = [0, 0], sizes = [4, 512], strides = [1, 1]} : vector<4x1024xf32> to vector<4x512xf32>
    %262 = arith.addf %260, %261 : vector<4x512xf32>
    %263 = arith.index_cast %254 : i32 to index
    %c0_97 = arith.constant 0 : index
    %c0_98 = arith.constant 0 : index
    %264 = vector.load %arg10[%263, %c0_97, %c0_98] : memref<8x4x512xf32, #tpu.memory_space<vmem>>, vector<1x4x512xf32>
    %265 = vector.shape_cast %264 : vector<1x4x512xf32> to vector<4x512xf32>
    %266 = vector.extract_strided_slice %257 {offsets = [0, 512], sizes = [4, 512], strides = [1, 1]} : vector<4x1024xf32> to vector<4x512xf32>
    %267 = arith.addf %265, %266 : vector<4x512xf32>
    %c0_99 = arith.constant 0 : index
    %c0_100 = arith.constant 0 : index
    %268 = vector.load %arg12[%c0_99, %c0_100] : memref<4x256xf32, #tpu.memory_space<vmem>>, vector<4x256xf32>
    %269 = vector.extract_strided_slice %268 {offsets = [0, 0], sizes = [4, 128], strides = [1, 1]} : vector<4x256xf32> to vector<4x128xf32>
    %270 = vector.extract_strided_slice %262 {offsets = [0, 0], sizes = [4, 128], strides = [1, 1]} : vector<4x512xf32> to vector<4x128xf32>
    %271 = arith.negf %270 : vector<4x128xf32>
    %272 = math.exp %271 : vector<4x128xf32>
    %cst_101 = arith.constant 1.000000e+00 : f32
    %273 = vector.broadcast %cst_101 : f32 to vector<4x128xf32>
    %274 = arith.addf %273, %272 : vector<4x128xf32>
    %275 = arith.divf %273, %274 : vector<4x128xf32>
    %276 = vector.extract_strided_slice %262 {offsets = [0, 128], sizes = [4, 128], strides = [1, 1]} : vector<4x512xf32> to vector<4x128xf32>
    %277 = arith.negf %276 : vector<4x128xf32>
    %278 = math.exp %277 : vector<4x128xf32>
    %cst_102 = arith.constant 1.000000e+00 : f32
    %279 = vector.broadcast %cst_102 : f32 to vector<4x128xf32>
    %280 = arith.addf %279, %278 : vector<4x128xf32>
    %281 = arith.divf %279, %280 : vector<4x128xf32>
    %282 = vector.extract_strided_slice %262 {offsets = [0, 256], sizes = [4, 128], strides = [1, 1]} : vector<4x512xf32> to vector<4x128xf32>
    %283 = math.tanh %282 : vector<4x128xf32>
    %284 = vector.extract_strided_slice %262 {offsets = [0, 384], sizes = [4, 128], strides = [1, 1]} : vector<4x512xf32> to vector<4x128xf32>
    %285 = arith.negf %284 : vector<4x128xf32>
    %286 = math.exp %285 : vector<4x128xf32>
    %cst_103 = arith.constant 1.000000e+00 : f32
    %287 = vector.broadcast %cst_103 : f32 to vector<4x128xf32>
    %288 = arith.addf %287, %286 : vector<4x128xf32>
    %289 = arith.divf %287, %288 : vector<4x128xf32>
    %290 = arith.mulf %281, %269 : vector<4x128xf32>
    %291 = arith.mulf %275, %283 : vector<4x128xf32>
    %292 = arith.addf %290, %291 : vector<4x128xf32>
    %293 = math.tanh %292 : vector<4x128xf32>
    %294 = arith.mulf %289, %293 : vector<4x128xf32>
    %295 = vector.extract_strided_slice %268 {offsets = [0, 128], sizes = [4, 128], strides = [1, 1]} : vector<4x256xf32> to vector<4x128xf32>
    %296 = vector.extract_strided_slice %267 {offsets = [0, 0], sizes = [4, 128], strides = [1, 1]} : vector<4x512xf32> to vector<4x128xf32>
    %297 = arith.negf %296 : vector<4x128xf32>
    %298 = math.exp %297 : vector<4x128xf32>
    %cst_104 = arith.constant 1.000000e+00 : f32
    %299 = vector.broadcast %cst_104 : f32 to vector<4x128xf32>
    %300 = arith.addf %299, %298 : vector<4x128xf32>
    %301 = arith.divf %299, %300 : vector<4x128xf32>
    %302 = vector.extract_strided_slice %267 {offsets = [0, 128], sizes = [4, 128], strides = [1, 1]} : vector<4x512xf32> to vector<4x128xf32>
    %303 = arith.negf %302 : vector<4x128xf32>
    %304 = math.exp %303 : vector<4x128xf32>
    %cst_105 = arith.constant 1.000000e+00 : f32
    %305 = vector.broadcast %cst_105 : f32 to vector<4x128xf32>
    %306 = arith.addf %305, %304 : vector<4x128xf32>
    %307 = arith.divf %305, %306 : vector<4x128xf32>
    %308 = vector.extract_strided_slice %267 {offsets = [0, 256], sizes = [4, 128], strides = [1, 1]} : vector<4x512xf32> to vector<4x128xf32>
    %309 = math.tanh %308 : vector<4x128xf32>
    %310 = vector.extract_strided_slice %267 {offsets = [0, 384], sizes = [4, 128], strides = [1, 1]} : vector<4x512xf32> to vector<4x128xf32>
    %311 = arith.negf %310 : vector<4x128xf32>
    %312 = math.exp %311 : vector<4x128xf32>
    %cst_106 = arith.constant 1.000000e+00 : f32
    %313 = vector.broadcast %cst_106 : f32 to vector<4x128xf32>
    %314 = arith.addf %313, %312 : vector<4x128xf32>
    %315 = arith.divf %313, %314 : vector<4x128xf32>
    %316 = arith.mulf %307, %295 : vector<4x128xf32>
    %317 = arith.mulf %301, %309 : vector<4x128xf32>
    %318 = arith.addf %316, %317 : vector<4x128xf32>
    %319 = math.tanh %318 : vector<4x128xf32>
    %320 = arith.mulf %315, %319 : vector<4x128xf32>
    %321 = tpu.concatenate %294, %320 in 1 : vector<4x128xf32>, vector<4x128xf32> -> vector<4x256xf32>
    %c0_107 = arith.constant 0 : index
    %c0_108 = arith.constant 0 : index
    %322 = vector.load %arg11[%c0_107, %c0_108] : memref<4x256xf32, #tpu.memory_space<vmem>>, vector<4x256xf32>
    tpu.vector_store %arg11[%c0_107, %c0_108], %321 {strides = array<i32>} : memref<4x256xf32, #tpu.memory_space<vmem>>, vector<4x256xf32>,
    %323 = tpu.concatenate %292, %318 in 1 : vector<4x128xf32>, vector<4x128xf32> -> vector<4x256xf32>
    %c0_109 = arith.constant 0 : index
    %c0_110 = arith.constant 0 : index
    %324 = vector.load %arg12[%c0_109, %c0_110] : memref<4x256xf32, #tpu.memory_space<vmem>>, vector<4x256xf32>
    tpu.vector_store %arg12[%c0_109, %c0_110], %323 {strides = array<i32>} : memref<4x256xf32, #tpu.memory_space<vmem>>, vector<4x256xf32>,
    %325 = arith.index_cast %c3_i32 : i32 to index
    %c0_111 = arith.constant 0 : index
    %c0_112 = arith.constant 0 : index
    %326 = vector.load %arg13[%325, %c0_111, %c0_112] : memref<8x4x128xf32, #tpu.memory_space<vmem>>, vector<1x4x128xf32>
    %327 = vector.shape_cast %326 : vector<1x4x128xf32> to vector<4x128xf32>
    %328 = vector.shape_cast %294 : vector<4x128xf32> to vector<1x4x128xf32>
    tpu.vector_store %arg13[%325, %c0_111, %c0_112], %328 {strides = array<i32>} : memref<8x4x128xf32, #tpu.memory_space<vmem>>, vector<1x4x128xf32>,
    %329 = arith.index_cast %254 : i32 to index
    %c0_113 = arith.constant 0 : index
    %c0_114 = arith.constant 0 : index
    %330 = vector.load %arg14[%329, %c0_113, %c0_114] : memref<8x4x128xf32, #tpu.memory_space<vmem>>, vector<1x4x128xf32>
    %331 = vector.shape_cast %330 : vector<1x4x128xf32> to vector<4x128xf32>
    %332 = vector.shape_cast %320 : vector<4x128xf32> to vector<1x4x128xf32>
    tpu.vector_store %arg14[%329, %c0_113, %c0_114], %332 {strides = array<i32>} : memref<8x4x128xf32, #tpu.memory_space<vmem>>, vector<1x4x128xf32>,
    %c4_i32 = arith.constant 4 : i32
    %c7_i32_115 = arith.constant 7 : i32
    %333 = arith.subi %c7_i32_115, %c4_i32 : i32
    %c0_116 = arith.constant 0 : index
    %c0_117 = arith.constant 0 : index
    %334 = vector.load %arg11[%c0_116, %c0_117] : memref<4x256xf32, #tpu.memory_space<vmem>>, vector<4x256xf32>
    %335 = arith.truncf %334 : vector<4x256xf32> to vector<4x256xbf16>
    %cst_118 = arith.constant dense<0.000000e+00> : vector<4x1024xf32>
    %336 = tpu.matmul %335, %16, %cst_118 {dimension_numbers = #tpu.dot_dimension_numbers<[1], [0], [0], [1], [0, 0, 1, 1], [], []>} : vector<4x256xbf16>, vector<256x1024xbf16>, vector<4x1024xf32> -> vector<4x1024xf32>
    %337 = arith.index_cast %c4_i32 : i32 to index
    %c0_119 = arith.constant 0 : index
    %c0_120 = arith.constant 0 : index
    %338 = vector.load %arg9[%337, %c0_119, %c0_120] : memref<8x4x512xf32, #tpu.memory_space<vmem>>, vector<1x4x512xf32>
    %339 = vector.shape_cast %338 : vector<1x4x512xf32> to vector<4x512xf32>
    %340 = vector.extract_strided_slice %336 {offsets = [0, 0], sizes = [4, 512], strides = [1, 1]} : vector<4x1024xf32> to vector<4x512xf32>
    %341 = arith.addf %339, %340 : vector<4x512xf32>
    %342 = arith.index_cast %333 : i32 to index
    %c0_121 = arith.constant 0 : index
    %c0_122 = arith.constant 0 : index
    %343 = vector.load %arg10[%342, %c0_121, %c0_122] : memref<8x4x512xf32, #tpu.memory_space<vmem>>, vector<1x4x512xf32>
    %344 = vector.shape_cast %343 : vector<1x4x512xf32> to vector<4x512xf32>
    %345 = vector.extract_strided_slice %336 {offsets = [0, 512], sizes = [4, 512], strides = [1, 1]} : vector<4x1024xf32> to vector<4x512xf32>
    %346 = arith.addf %344, %345 : vector<4x512xf32>
    %c0_123 = arith.constant 0 : index
    %c0_124 = arith.constant 0 : index
    %347 = vector.load %arg12[%c0_123, %c0_124] : memref<4x256xf32, #tpu.memory_space<vmem>>, vector<4x256xf32>
    %348 = vector.extract_strided_slice %347 {offsets = [0, 0], sizes = [4, 128], strides = [1, 1]} : vector<4x256xf32> to vector<4x128xf32>
    %349 = vector.extract_strided_slice %341 {offsets = [0, 0], sizes = [4, 128], strides = [1, 1]} : vector<4x512xf32> to vector<4x128xf32>
    %350 = arith.negf %349 : vector<4x128xf32>
    %351 = math.exp %350 : vector<4x128xf32>
    %cst_125 = arith.constant 1.000000e+00 : f32
    %352 = vector.broadcast %cst_125 : f32 to vector<4x128xf32>
    %353 = arith.addf %352, %351 : vector<4x128xf32>
    %354 = arith.divf %352, %353 : vector<4x128xf32>
    %355 = vector.extract_strided_slice %341 {offsets = [0, 128], sizes = [4, 128], strides = [1, 1]} : vector<4x512xf32> to vector<4x128xf32>
    %356 = arith.negf %355 : vector<4x128xf32>
    %357 = math.exp %356 : vector<4x128xf32>
    %cst_126 = arith.constant 1.000000e+00 : f32
    %358 = vector.broadcast %cst_126 : f32 to vector<4x128xf32>
    %359 = arith.addf %358, %357 : vector<4x128xf32>
    %360 = arith.divf %358, %359 : vector<4x128xf32>
    %361 = vector.extract_strided_slice %341 {offsets = [0, 256], sizes = [4, 128], strides = [1, 1]} : vector<4x512xf32> to vector<4x128xf32>
    %362 = math.tanh %361 : vector<4x128xf32>
    %363 = vector.extract_strided_slice %341 {offsets = [0, 384], sizes = [4, 128], strides = [1, 1]} : vector<4x512xf32> to vector<4x128xf32>
    %364 = arith.negf %363 : vector<4x128xf32>
    %365 = math.exp %364 : vector<4x128xf32>
    %cst_127 = arith.constant 1.000000e+00 : f32
    %366 = vector.broadcast %cst_127 : f32 to vector<4x128xf32>
    %367 = arith.addf %366, %365 : vector<4x128xf32>
    %368 = arith.divf %366, %367 : vector<4x128xf32>
    %369 = arith.mulf %360, %348 : vector<4x128xf32>
    %370 = arith.mulf %354, %362 : vector<4x128xf32>
    %371 = arith.addf %369, %370 : vector<4x128xf32>
    %372 = math.tanh %371 : vector<4x128xf32>
    %373 = arith.mulf %368, %372 : vector<4x128xf32>
    %374 = vector.extract_strided_slice %347 {offsets = [0, 128], sizes = [4, 128], strides = [1, 1]} : vector<4x256xf32> to vector<4x128xf32>
    %375 = vector.extract_strided_slice %346 {offsets = [0, 0], sizes = [4, 128], strides = [1, 1]} : vector<4x512xf32> to vector<4x128xf32>
    %376 = arith.negf %375 : vector<4x128xf32>
    %377 = math.exp %376 : vector<4x128xf32>
    %cst_128 = arith.constant 1.000000e+00 : f32
    %378 = vector.broadcast %cst_128 : f32 to vector<4x128xf32>
    %379 = arith.addf %378, %377 : vector<4x128xf32>
    %380 = arith.divf %378, %379 : vector<4x128xf32>
    %381 = vector.extract_strided_slice %346 {offsets = [0, 128], sizes = [4, 128], strides = [1, 1]} : vector<4x512xf32> to vector<4x128xf32>
    %382 = arith.negf %381 : vector<4x128xf32>
    %383 = math.exp %382 : vector<4x128xf32>
    %cst_129 = arith.constant 1.000000e+00 : f32
    %384 = vector.broadcast %cst_129 : f32 to vector<4x128xf32>
    %385 = arith.addf %384, %383 : vector<4x128xf32>
    %386 = arith.divf %384, %385 : vector<4x128xf32>
    %387 = vector.extract_strided_slice %346 {offsets = [0, 256], sizes = [4, 128], strides = [1, 1]} : vector<4x512xf32> to vector<4x128xf32>
    %388 = math.tanh %387 : vector<4x128xf32>
    %389 = vector.extract_strided_slice %346 {offsets = [0, 384], sizes = [4, 128], strides = [1, 1]} : vector<4x512xf32> to vector<4x128xf32>
    %390 = arith.negf %389 : vector<4x128xf32>
    %391 = math.exp %390 : vector<4x128xf32>
    %cst_130 = arith.constant 1.000000e+00 : f32
    %392 = vector.broadcast %cst_130 : f32 to vector<4x128xf32>
    %393 = arith.addf %392, %391 : vector<4x128xf32>
    %394 = arith.divf %392, %393 : vector<4x128xf32>
    %395 = arith.mulf %386, %374 : vector<4x128xf32>
    %396 = arith.mulf %380, %388 : vector<4x128xf32>
    %397 = arith.addf %395, %396 : vector<4x128xf32>
    %398 = math.tanh %397 : vector<4x128xf32>
    %399 = arith.mulf %394, %398 : vector<4x128xf32>
    %400 = tpu.concatenate %373, %399 in 1 : vector<4x128xf32>, vector<4x128xf32> -> vector<4x256xf32>
    %c0_131 = arith.constant 0 : index
    %c0_132 = arith.constant 0 : index
    %401 = vector.load %arg11[%c0_131, %c0_132] : memref<4x256xf32, #tpu.memory_space<vmem>>, vector<4x256xf32>
    tpu.vector_store %arg11[%c0_131, %c0_132], %400 {strides = array<i32>} : memref<4x256xf32, #tpu.memory_space<vmem>>, vector<4x256xf32>,
    %402 = tpu.concatenate %371, %397 in 1 : vector<4x128xf32>, vector<4x128xf32> -> vector<4x256xf32>
    %c0_133 = arith.constant 0 : index
    %c0_134 = arith.constant 0 : index
    %403 = vector.load %arg12[%c0_133, %c0_134] : memref<4x256xf32, #tpu.memory_space<vmem>>, vector<4x256xf32>
    tpu.vector_store %arg12[%c0_133, %c0_134], %402 {strides = array<i32>} : memref<4x256xf32, #tpu.memory_space<vmem>>, vector<4x256xf32>,
    %404 = arith.index_cast %c4_i32 : i32 to index
    %c0_135 = arith.constant 0 : index
    %c0_136 = arith.constant 0 : index
    %405 = vector.load %arg13[%404, %c0_135, %c0_136] : memref<8x4x128xf32, #tpu.memory_space<vmem>>, vector<1x4x128xf32>
    %406 = vector.shape_cast %405 : vector<1x4x128xf32> to vector<4x128xf32>
    %407 = vector.shape_cast %373 : vector<4x128xf32> to vector<1x4x128xf32>
    tpu.vector_store %arg13[%404, %c0_135, %c0_136], %407 {strides = array<i32>} : memref<8x4x128xf32, #tpu.memory_space<vmem>>, vector<1x4x128xf32>,
    %408 = arith.index_cast %333 : i32 to index
    %c0_137 = arith.constant 0 : index
    %c0_138 = arith.constant 0 : index
    %409 = vector.load %arg14[%408, %c0_137, %c0_138] : memref<8x4x128xf32, #tpu.memory_space<vmem>>, vector<1x4x128xf32>
    %410 = vector.shape_cast %409 : vector<1x4x128xf32> to vector<4x128xf32>
    %411 = vector.shape_cast %399 : vector<4x128xf32> to vector<1x4x128xf32>
    tpu.vector_store %arg14[%408, %c0_137, %c0_138], %411 {strides = array<i32>} : memref<8x4x128xf32, #tpu.memory_space<vmem>>, vector<1x4x128xf32>,
    %c5_i32 = arith.constant 5 : i32
    %c7_i32_139 = arith.constant 7 : i32
    %412 = arith.subi %c7_i32_139, %c5_i32 : i32
    %c0_140 = arith.constant 0 : index
    %c0_141 = arith.constant 0 : index
    %413 = vector.load %arg11[%c0_140, %c0_141] : memref<4x256xf32, #tpu.memory_space<vmem>>, vector<4x256xf32>
    %414 = arith.truncf %413 : vector<4x256xf32> to vector<4x256xbf16>
    %cst_142 = arith.constant dense<0.000000e+00> : vector<4x1024xf32>
    %415 = tpu.matmul %414, %16, %cst_142 {dimension_numbers = #tpu.dot_dimension_numbers<[1], [0], [0], [1], [0, 0, 1, 1], [], []>} : vector<4x256xbf16>, vector<256x1024xbf16>, vector<4x1024xf32> -> vector<4x1024xf32>
    %416 = arith.index_cast %c5_i32 : i32 to index
    %c0_143 = arith.constant 0 : index
    %c0_144 = arith.constant 0 : index
    %417 = vector.load %arg9[%416, %c0_143, %c0_144] : memref<8x4x512xf32, #tpu.memory_space<vmem>>, vector<1x4x512xf32>
    %418 = vector.shape_cast %417 : vector<1x4x512xf32> to vector<4x512xf32>
    %419 = vector.extract_strided_slice %415 {offsets = [0, 0], sizes = [4, 512], strides = [1, 1]} : vector<4x1024xf32> to vector<4x512xf32>
    %420 = arith.addf %418, %419 : vector<4x512xf32>
    %421 = arith.index_cast %412 : i32 to index
    %c0_145 = arith.constant 0 : index
    %c0_146 = arith.constant 0 : index
    %422 = vector.load %arg10[%421, %c0_145, %c0_146] : memref<8x4x512xf32, #tpu.memory_space<vmem>>, vector<1x4x512xf32>
    %423 = vector.shape_cast %422 : vector<1x4x512xf32> to vector<4x512xf32>
    %424 = vector.extract_strided_slice %415 {offsets = [0, 512], sizes = [4, 512], strides = [1, 1]} : vector<4x1024xf32> to vector<4x512xf32>
    %425 = arith.addf %423, %424 : vector<4x512xf32>
    %c0_147 = arith.constant 0 : index
    %c0_148 = arith.constant 0 : index
    %426 = vector.load %arg12[%c0_147, %c0_148] : memref<4x256xf32, #tpu.memory_space<vmem>>, vector<4x256xf32>
    %427 = vector.extract_strided_slice %426 {offsets = [0, 0], sizes = [4, 128], strides = [1, 1]} : vector<4x256xf32> to vector<4x128xf32>
    %428 = vector.extract_strided_slice %420 {offsets = [0, 0], sizes = [4, 128], strides = [1, 1]} : vector<4x512xf32> to vector<4x128xf32>
    %429 = arith.negf %428 : vector<4x128xf32>
    %430 = math.exp %429 : vector<4x128xf32>
    %cst_149 = arith.constant 1.000000e+00 : f32
    %431 = vector.broadcast %cst_149 : f32 to vector<4x128xf32>
    %432 = arith.addf %431, %430 : vector<4x128xf32>
    %433 = arith.divf %431, %432 : vector<4x128xf32>
    %434 = vector.extract_strided_slice %420 {offsets = [0, 128], sizes = [4, 128], strides = [1, 1]} : vector<4x512xf32> to vector<4x128xf32>
    %435 = arith.negf %434 : vector<4x128xf32>
    %436 = math.exp %435 : vector<4x128xf32>
    %cst_150 = arith.constant 1.000000e+00 : f32
    %437 = vector.broadcast %cst_150 : f32 to vector<4x128xf32>
    %438 = arith.addf %437, %436 : vector<4x128xf32>
    %439 = arith.divf %437, %438 : vector<4x128xf32>
    %440 = vector.extract_strided_slice %420 {offsets = [0, 256], sizes = [4, 128], strides = [1, 1]} : vector<4x512xf32> to vector<4x128xf32>
    %441 = math.tanh %440 : vector<4x128xf32>
    %442 = vector.extract_strided_slice %420 {offsets = [0, 384], sizes = [4, 128], strides = [1, 1]} : vector<4x512xf32> to vector<4x128xf32>
    %443 = arith.negf %442 : vector<4x128xf32>
    %444 = math.exp %443 : vector<4x128xf32>
    %cst_151 = arith.constant 1.000000e+00 : f32
    %445 = vector.broadcast %cst_151 : f32 to vector<4x128xf32>
    %446 = arith.addf %445, %444 : vector<4x128xf32>
    %447 = arith.divf %445, %446 : vector<4x128xf32>
    %448 = arith.mulf %439, %427 : vector<4x128xf32>
    %449 = arith.mulf %433, %441 : vector<4x128xf32>
    %450 = arith.addf %448, %449 : vector<4x128xf32>
    %451 = math.tanh %450 : vector<4x128xf32>
    %452 = arith.mulf %447, %451 : vector<4x128xf32>
    %453 = vector.extract_strided_slice %426 {offsets = [0, 128], sizes = [4, 128], strides = [1, 1]} : vector<4x256xf32> to vector<4x128xf32>
    %454 = vector.extract_strided_slice %425 {offsets = [0, 0], sizes = [4, 128], strides = [1, 1]} : vector<4x512xf32> to vector<4x128xf32>
    %455 = arith.negf %454 : vector<4x128xf32>
    %456 = math.exp %455 : vector<4x128xf32>
    %cst_152 = arith.constant 1.000000e+00 : f32
    %457 = vector.broadcast %cst_152 : f32 to vector<4x128xf32>
    %458 = arith.addf %457, %456 : vector<4x128xf32>
    %459 = arith.divf %457, %458 : vector<4x128xf32>
    %460 = vector.extract_strided_slice %425 {offsets = [0, 128], sizes = [4, 128], strides = [1, 1]} : vector<4x512xf32> to vector<4x128xf32>
    %461 = arith.negf %460 : vector<4x128xf32>
    %462 = math.exp %461 : vector<4x128xf32>
    %cst_153 = arith.constant 1.000000e+00 : f32
    %463 = vector.broadcast %cst_153 : f32 to vector<4x128xf32>
    %464 = arith.addf %463, %462 : vector<4x128xf32>
    %465 = arith.divf %463, %464 : vector<4x128xf32>
    %466 = vector.extract_strided_slice %425 {offsets = [0, 256], sizes = [4, 128], strides = [1, 1]} : vector<4x512xf32> to vector<4x128xf32>
    %467 = math.tanh %466 : vector<4x128xf32>
    %468 = vector.extract_strided_slice %425 {offsets = [0, 384], sizes = [4, 128], strides = [1, 1]} : vector<4x512xf32> to vector<4x128xf32>
    %469 = arith.negf %468 : vector<4x128xf32>
    %470 = math.exp %469 : vector<4x128xf32>
    %cst_154 = arith.constant 1.000000e+00 : f32
    %471 = vector.broadcast %cst_154 : f32 to vector<4x128xf32>
    %472 = arith.addf %471, %470 : vector<4x128xf32>
    %473 = arith.divf %471, %472 : vector<4x128xf32>
    %474 = arith.mulf %465, %453 : vector<4x128xf32>
    %475 = arith.mulf %459, %467 : vector<4x128xf32>
    %476 = arith.addf %474, %475 : vector<4x128xf32>
    %477 = math.tanh %476 : vector<4x128xf32>
    %478 = arith.mulf %473, %477 : vector<4x128xf32>
    %479 = tpu.concatenate %452, %478 in 1 : vector<4x128xf32>, vector<4x128xf32> -> vector<4x256xf32>
    %c0_155 = arith.constant 0 : index
    %c0_156 = arith.constant 0 : index
    %480 = vector.load %arg11[%c0_155, %c0_156] : memref<4x256xf32, #tpu.memory_space<vmem>>, vector<4x256xf32>
    tpu.vector_store %arg11[%c0_155, %c0_156], %479 {strides = array<i32>} : memref<4x256xf32, #tpu.memory_space<vmem>>, vector<4x256xf32>,
    %481 = tpu.concatenate %450, %476 in 1 : vector<4x128xf32>, vector<4x128xf32> -> vector<4x256xf32>
    %c0_157 = arith.constant 0 : index
    %c0_158 = arith.constant 0 : index
    %482 = vector.load %arg12[%c0_157, %c0_158] : memref<4x256xf32, #tpu.memory_space<vmem>>, vector<4x256xf32>
    tpu.vector_store %arg12[%c0_157, %c0_158], %481 {strides = array<i32>} : memref<4x256xf32, #tpu.memory_space<vmem>>, vector<4x256xf32>,
    %483 = arith.index_cast %c5_i32 : i32 to index
    %c0_159 = arith.constant 0 : index
    %c0_160 = arith.constant 0 : index
    %484 = vector.load %arg13[%483, %c0_159, %c0_160] : memref<8x4x128xf32, #tpu.memory_space<vmem>>, vector<1x4x128xf32>
    %485 = vector.shape_cast %484 : vector<1x4x128xf32> to vector<4x128xf32>
    %486 = vector.shape_cast %452 : vector<4x128xf32> to vector<1x4x128xf32>
    tpu.vector_store %arg13[%483, %c0_159, %c0_160], %486 {strides = array<i32>} : memref<8x4x128xf32, #tpu.memory_space<vmem>>, vector<1x4x128xf32>,
    %487 = arith.index_cast %412 : i32 to index
    %c0_161 = arith.constant 0 : index
    %c0_162 = arith.constant 0 : index
    %488 = vector.load %arg14[%487, %c0_161, %c0_162] : memref<8x4x128xf32, #tpu.memory_space<vmem>>, vector<1x4x128xf32>
    %489 = vector.shape_cast %488 : vector<1x4x128xf32> to vector<4x128xf32>
    %490 = vector.shape_cast %478 : vector<4x128xf32> to vector<1x4x128xf32>
    tpu.vector_store %arg14[%487, %c0_161, %c0_162], %490 {strides = array<i32>} : memref<8x4x128xf32, #tpu.memory_space<vmem>>, vector<1x4x128xf32>,
    %c6_i32 = arith.constant 6 : i32
    %c7_i32_163 = arith.constant 7 : i32
    %491 = arith.subi %c7_i32_163, %c6_i32 : i32
    %c0_164 = arith.constant 0 : index
    %c0_165 = arith.constant 0 : index
    %492 = vector.load %arg11[%c0_164, %c0_165] : memref<4x256xf32, #tpu.memory_space<vmem>>, vector<4x256xf32>
    %493 = arith.truncf %492 : vector<4x256xf32> to vector<4x256xbf16>
    %cst_166 = arith.constant dense<0.000000e+00> : vector<4x1024xf32>
    %494 = tpu.matmul %493, %16, %cst_166 {dimension_numbers = #tpu.dot_dimension_numbers<[1], [0], [0], [1], [0, 0, 1, 1], [], []>} : vector<4x256xbf16>, vector<256x1024xbf16>, vector<4x1024xf32> -> vector<4x1024xf32>
    %495 = arith.index_cast %c6_i32 : i32 to index
    %c0_167 = arith.constant 0 : index
    %c0_168 = arith.constant 0 : index
    %496 = vector.load %arg9[%495, %c0_167, %c0_168] : memref<8x4x512xf32, #tpu.memory_space<vmem>>, vector<1x4x512xf32>
    %497 = vector.shape_cast %496 : vector<1x4x512xf32> to vector<4x512xf32>
    %498 = vector.extract_strided_slice %494 {offsets = [0, 0], sizes = [4, 512], strides = [1, 1]} : vector<4x1024xf32> to vector<4x512xf32>
    %499 = arith.addf %497, %498 : vector<4x512xf32>
    %500 = arith.index_cast %491 : i32 to index
    %c0_169 = arith.constant 0 : index
    %c0_170 = arith.constant 0 : index
    %501 = vector.load %arg10[%500, %c0_169, %c0_170] : memref<8x4x512xf32, #tpu.memory_space<vmem>>, vector<1x4x512xf32>
    %502 = vector.shape_cast %501 : vector<1x4x512xf32> to vector<4x512xf32>
    %503 = vector.extract_strided_slice %494 {offsets = [0, 512], sizes = [4, 512], strides = [1, 1]} : vector<4x1024xf32> to vector<4x512xf32>
    %504 = arith.addf %502, %503 : vector<4x512xf32>
    %c0_171 = arith.constant 0 : index
    %c0_172 = arith.constant 0 : index
    %505 = vector.load %arg12[%c0_171, %c0_172] : memref<4x256xf32, #tpu.memory_space<vmem>>, vector<4x256xf32>
    %506 = vector.extract_strided_slice %505 {offsets = [0, 0], sizes = [4, 128], strides = [1, 1]} : vector<4x256xf32> to vector<4x128xf32>
    %507 = vector.extract_strided_slice %499 {offsets = [0, 0], sizes = [4, 128], strides = [1, 1]} : vector<4x512xf32> to vector<4x128xf32>
    %508 = arith.negf %507 : vector<4x128xf32>
    %509 = math.exp %508 : vector<4x128xf32>
    %cst_173 = arith.constant 1.000000e+00 : f32
    %510 = vector.broadcast %cst_173 : f32 to vector<4x128xf32>
    %511 = arith.addf %510, %509 : vector<4x128xf32>
    %512 = arith.divf %510, %511 : vector<4x128xf32>
    %513 = vector.extract_strided_slice %499 {offsets = [0, 128], sizes = [4, 128], strides = [1, 1]} : vector<4x512xf32> to vector<4x128xf32>
    %514 = arith.negf %513 : vector<4x128xf32>
    %515 = math.exp %514 : vector<4x128xf32>
    %cst_174 = arith.constant 1.000000e+00 : f32
    %516 = vector.broadcast %cst_174 : f32 to vector<4x128xf32>
    %517 = arith.addf %516, %515 : vector<4x128xf32>
    %518 = arith.divf %516, %517 : vector<4x128xf32>
    %519 = vector.extract_strided_slice %499 {offsets = [0, 256], sizes = [4, 128], strides = [1, 1]} : vector<4x512xf32> to vector<4x128xf32>
    %520 = math.tanh %519 : vector<4x128xf32>
    %521 = vector.extract_strided_slice %499 {offsets = [0, 384], sizes = [4, 128], strides = [1, 1]} : vector<4x512xf32> to vector<4x128xf32>
    %522 = arith.negf %521 : vector<4x128xf32>
    %523 = math.exp %522 : vector<4x128xf32>
    %cst_175 = arith.constant 1.000000e+00 : f32
    %524 = vector.broadcast %cst_175 : f32 to vector<4x128xf32>
    %525 = arith.addf %524, %523 : vector<4x128xf32>
    %526 = arith.divf %524, %525 : vector<4x128xf32>
    %527 = arith.mulf %518, %506 : vector<4x128xf32>
    %528 = arith.mulf %512, %520 : vector<4x128xf32>
    %529 = arith.addf %527, %528 : vector<4x128xf32>
    %530 = math.tanh %529 : vector<4x128xf32>
    %531 = arith.mulf %526, %530 : vector<4x128xf32>
    %532 = vector.extract_strided_slice %505 {offsets = [0, 128], sizes = [4, 128], strides = [1, 1]} : vector<4x256xf32> to vector<4x128xf32>
    %533 = vector.extract_strided_slice %504 {offsets = [0, 0], sizes = [4, 128], strides = [1, 1]} : vector<4x512xf32> to vector<4x128xf32>
    %534 = arith.negf %533 : vector<4x128xf32>
    %535 = math.exp %534 : vector<4x128xf32>
    %cst_176 = arith.constant 1.000000e+00 : f32
    %536 = vector.broadcast %cst_176 : f32 to vector<4x128xf32>
    %537 = arith.addf %536, %535 : vector<4x128xf32>
    %538 = arith.divf %536, %537 : vector<4x128xf32>
    %539 = vector.extract_strided_slice %504 {offsets = [0, 128], sizes = [4, 128], strides = [1, 1]} : vector<4x512xf32> to vector<4x128xf32>
    %540 = arith.negf %539 : vector<4x128xf32>
    %541 = math.exp %540 : vector<4x128xf32>
    %cst_177 = arith.constant 1.000000e+00 : f32
    %542 = vector.broadcast %cst_177 : f32 to vector<4x128xf32>
    %543 = arith.addf %542, %541 : vector<4x128xf32>
    %544 = arith.divf %542, %543 : vector<4x128xf32>
    %545 = vector.extract_strided_slice %504 {offsets = [0, 256], sizes = [4, 128], strides = [1, 1]} : vector<4x512xf32> to vector<4x128xf32>
    %546 = math.tanh %545 : vector<4x128xf32>
    %547 = vector.extract_strided_slice %504 {offsets = [0, 384], sizes = [4, 128], strides = [1, 1]} : vector<4x512xf32> to vector<4x128xf32>
    %548 = arith.negf %547 : vector<4x128xf32>
    %549 = math.exp %548 : vector<4x128xf32>
    %cst_178 = arith.constant 1.000000e+00 : f32
    %550 = vector.broadcast %cst_178 : f32 to vector<4x128xf32>
    %551 = arith.addf %550, %549 : vector<4x128xf32>
    %552 = arith.divf %550, %551 : vector<4x128xf32>
    %553 = arith.mulf %544, %532 : vector<4x128xf32>
    %554 = arith.mulf %538, %546 : vector<4x128xf32>
    %555 = arith.addf %553, %554 : vector<4x128xf32>
    %556 = math.tanh %555 : vector<4x128xf32>
    %557 = arith.mulf %552, %556 : vector<4x128xf32>
    %558 = tpu.concatenate %531, %557 in 1 : vector<4x128xf32>, vector<4x128xf32> -> vector<4x256xf32>
    %c0_179 = arith.constant 0 : index
    %c0_180 = arith.constant 0 : index
    %559 = vector.load %arg11[%c0_179, %c0_180] : memref<4x256xf32, #tpu.memory_space<vmem>>, vector<4x256xf32>
    tpu.vector_store %arg11[%c0_179, %c0_180], %558 {strides = array<i32>} : memref<4x256xf32, #tpu.memory_space<vmem>>, vector<4x256xf32>,
    %560 = tpu.concatenate %529, %555 in 1 : vector<4x128xf32>, vector<4x128xf32> -> vector<4x256xf32>
    %c0_181 = arith.constant 0 : index
    %c0_182 = arith.constant 0 : index
    %561 = vector.load %arg12[%c0_181, %c0_182] : memref<4x256xf32, #tpu.memory_space<vmem>>, vector<4x256xf32>
    tpu.vector_store %arg12[%c0_181, %c0_182], %560 {strides = array<i32>} : memref<4x256xf32, #tpu.memory_space<vmem>>, vector<4x256xf32>,
    %562 = arith.index_cast %c6_i32 : i32 to index
    %c0_183 = arith.constant 0 : index
    %c0_184 = arith.constant 0 : index
    %563 = vector.load %arg13[%562, %c0_183, %c0_184] : memref<8x4x128xf32, #tpu.memory_space<vmem>>, vector<1x4x128xf32>
    %564 = vector.shape_cast %563 : vector<1x4x128xf32> to vector<4x128xf32>
    %565 = vector.shape_cast %531 : vector<4x128xf32> to vector<1x4x128xf32>
    tpu.vector_store %arg13[%562, %c0_183, %c0_184], %565 {strides = array<i32>} : memref<8x4x128xf32, #tpu.memory_space<vmem>>, vector<1x4x128xf32>,
    %566 = arith.index_cast %491 : i32 to index
    %c0_185 = arith.constant 0 : index
    %c0_186 = arith.constant 0 : index
    %567 = vector.load %arg14[%566, %c0_185, %c0_186] : memref<8x4x128xf32, #tpu.memory_space<vmem>>, vector<1x4x128xf32>
    %568 = vector.shape_cast %567 : vector<1x4x128xf32> to vector<4x128xf32>
    %569 = vector.shape_cast %557 : vector<4x128xf32> to vector<1x4x128xf32>
    tpu.vector_store %arg14[%566, %c0_185, %c0_186], %569 {strides = array<i32>} : memref<8x4x128xf32, #tpu.memory_space<vmem>>, vector<1x4x128xf32>,
    %c7_i32_187 = arith.constant 7 : i32
    %c7_i32_188 = arith.constant 7 : i32
    %570 = arith.subi %c7_i32_188, %c7_i32_187 : i32
    %c0_189 = arith.constant 0 : index
    %c0_190 = arith.constant 0 : index
    %571 = vector.load %arg11[%c0_189, %c0_190] : memref<4x256xf32, #tpu.memory_space<vmem>>, vector<4x256xf32>
    %572 = arith.truncf %571 : vector<4x256xf32> to vector<4x256xbf16>
    %cst_191 = arith.constant dense<0.000000e+00> : vector<4x1024xf32>
    %573 = tpu.matmul %572, %16, %cst_191 {dimension_numbers = #tpu.dot_dimension_numbers<[1], [0], [0], [1], [0, 0, 1, 1], [], []>} : vector<4x256xbf16>, vector<256x1024xbf16>, vector<4x1024xf32> -> vector<4x1024xf32>
    %574 = arith.index_cast %c7_i32_187 : i32 to index
    %c0_192 = arith.constant 0 : index
    %c0_193 = arith.constant 0 : index
    %575 = vector.load %arg9[%574, %c0_192, %c0_193] : memref<8x4x512xf32, #tpu.memory_space<vmem>>, vector<1x4x512xf32>
    %576 = vector.shape_cast %575 : vector<1x4x512xf32> to vector<4x512xf32>
    %577 = vector.extract_strided_slice %573 {offsets = [0, 0], sizes = [4, 512], strides = [1, 1]} : vector<4x1024xf32> to vector<4x512xf32>
    %578 = arith.addf %576, %577 : vector<4x512xf32>
    %579 = arith.index_cast %570 : i32 to index
    %c0_194 = arith.constant 0 : index
    %c0_195 = arith.constant 0 : index
    %580 = vector.load %arg10[%579, %c0_194, %c0_195] : memref<8x4x512xf32, #tpu.memory_space<vmem>>, vector<1x4x512xf32>
    %581 = vector.shape_cast %580 : vector<1x4x512xf32> to vector<4x512xf32>
    %582 = vector.extract_strided_slice %573 {offsets = [0, 512], sizes = [4, 512], strides = [1, 1]} : vector<4x1024xf32> to vector<4x512xf32>
    %583 = arith.addf %581, %582 : vector<4x512xf32>
    %c0_196 = arith.constant 0 : index
    %c0_197 = arith.constant 0 : index
    %584 = vector.load %arg12[%c0_196, %c0_197] : memref<4x256xf32, #tpu.memory_space<vmem>>, vector<4x256xf32>
    %585 = vector.extract_strided_slice %584 {offsets = [0, 0], sizes = [4, 128], strides = [1, 1]} : vector<4x256xf32> to vector<4x128xf32>
    %586 = vector.extract_strided_slice %578 {offsets = [0, 0], sizes = [4, 128], strides = [1, 1]} : vector<4x512xf32> to vector<4x128xf32>
    %587 = arith.negf %586 : vector<4x128xf32>
    %588 = math.exp %587 : vector<4x128xf32>
    %cst_198 = arith.constant 1.000000e+00 : f32
    %589 = vector.broadcast %cst_198 : f32 to vector<4x128xf32>
    %590 = arith.addf %589, %588 : vector<4x128xf32>
    %591 = arith.divf %589, %590 : vector<4x128xf32>
    %592 = vector.extract_strided_slice %578 {offsets = [0, 128], sizes = [4, 128], strides = [1, 1]} : vector<4x512xf32> to vector<4x128xf32>
    %593 = arith.negf %592 : vector<4x128xf32>
    %594 = math.exp %593 : vector<4x128xf32>
    %cst_199 = arith.constant 1.000000e+00 : f32
    %595 = vector.broadcast %cst_199 : f32 to vector<4x128xf32>
    %596 = arith.addf %595, %594 : vector<4x128xf32>
    %597 = arith.divf %595, %596 : vector<4x128xf32>
    %598 = vector.extract_strided_slice %578 {offsets = [0, 256], sizes = [4, 128], strides = [1, 1]} : vector<4x512xf32> to vector<4x128xf32>
    %599 = math.tanh %598 : vector<4x128xf32>
    %600 = vector.extract_strided_slice %578 {offsets = [0, 384], sizes = [4, 128], strides = [1, 1]} : vector<4x512xf32> to vector<4x128xf32>
    %601 = arith.negf %600 : vector<4x128xf32>
    %602 = math.exp %601 : vector<4x128xf32>
    %cst_200 = arith.constant 1.000000e+00 : f32
    %603 = vector.broadcast %cst_200 : f32 to vector<4x128xf32>
    %604 = arith.addf %603, %602 : vector<4x128xf32>
    %605 = arith.divf %603, %604 : vector<4x128xf32>
    %606 = arith.mulf %597, %585 : vector<4x128xf32>
    %607 = arith.mulf %591, %599 : vector<4x128xf32>
    %608 = arith.addf %606, %607 : vector<4x128xf32>
    %609 = math.tanh %608 : vector<4x128xf32>
    %610 = arith.mulf %605, %609 : vector<4x128xf32>
    %611 = vector.extract_strided_slice %584 {offsets = [0, 128], sizes = [4, 128], strides = [1, 1]} : vector<4x256xf32> to vector<4x128xf32>
    %612 = vector.extract_strided_slice %583 {offsets = [0, 0], sizes = [4, 128], strides = [1, 1]} : vector<4x512xf32> to vector<4x128xf32>
    %613 = arith.negf %612 : vector<4x128xf32>
    %614 = math.exp %613 : vector<4x128xf32>
    %cst_201 = arith.constant 1.000000e+00 : f32
    %615 = vector.broadcast %cst_201 : f32 to vector<4x128xf32>
    %616 = arith.addf %615, %614 : vector<4x128xf32>
    %617 = arith.divf %615, %616 : vector<4x128xf32>
    %618 = vector.extract_strided_slice %583 {offsets = [0, 128], sizes = [4, 128], strides = [1, 1]} : vector<4x512xf32> to vector<4x128xf32>
    %619 = arith.negf %618 : vector<4x128xf32>
    %620 = math.exp %619 : vector<4x128xf32>
    %cst_202 = arith.constant 1.000000e+00 : f32
    %621 = vector.broadcast %cst_202 : f32 to vector<4x128xf32>
    %622 = arith.addf %621, %620 : vector<4x128xf32>
    %623 = arith.divf %621, %622 : vector<4x128xf32>
    %624 = vector.extract_strided_slice %583 {offsets = [0, 256], sizes = [4, 128], strides = [1, 1]} : vector<4x512xf32> to vector<4x128xf32>
    %625 = math.tanh %624 : vector<4x128xf32>
    %626 = vector.extract_strided_slice %583 {offsets = [0, 384], sizes = [4, 128], strides = [1, 1]} : vector<4x512xf32> to vector<4x128xf32>
    %627 = arith.negf %626 : vector<4x128xf32>
    %628 = math.exp %627 : vector<4x128xf32>
    %cst_203 = arith.constant 1.000000e+00 : f32
    %629 = vector.broadcast %cst_203 : f32 to vector<4x128xf32>
    %630 = arith.addf %629, %628 : vector<4x128xf32>
    %631 = arith.divf %629, %630 : vector<4x128xf32>
    %632 = arith.mulf %623, %611 : vector<4x128xf32>
    %633 = arith.mulf %617, %625 : vector<4x128xf32>
    %634 = arith.addf %632, %633 : vector<4x128xf32>
    %635 = math.tanh %634 : vector<4x128xf32>
    %636 = arith.mulf %631, %635 : vector<4x128xf32>
    %637 = tpu.concatenate %610, %636 in 1 : vector<4x128xf32>, vector<4x128xf32> -> vector<4x256xf32>
    %c0_204 = arith.constant 0 : index
    %c0_205 = arith.constant 0 : index
    %638 = vector.load %arg11[%c0_204, %c0_205] : memref<4x256xf32, #tpu.memory_space<vmem>>, vector<4x256xf32>
    tpu.vector_store %arg11[%c0_204, %c0_205], %637 {strides = array<i32>} : memref<4x256xf32, #tpu.memory_space<vmem>>, vector<4x256xf32>,
    %639 = tpu.concatenate %608, %634 in 1 : vector<4x128xf32>, vector<4x128xf32> -> vector<4x256xf32>
    %c0_206 = arith.constant 0 : index
    %c0_207 = arith.constant 0 : index
    %640 = vector.load %arg12[%c0_206, %c0_207] : memref<4x256xf32, #tpu.memory_space<vmem>>, vector<4x256xf32>
    tpu.vector_store %arg12[%c0_206, %c0_207], %639 {strides = array<i32>} : memref<4x256xf32, #tpu.memory_space<vmem>>, vector<4x256xf32>,
    %641 = arith.index_cast %c7_i32_187 : i32 to index
    %c0_208 = arith.constant 0 : index
    %c0_209 = arith.constant 0 : index
    %642 = vector.load %arg13[%641, %c0_208, %c0_209] : memref<8x4x128xf32, #tpu.memory_space<vmem>>, vector<1x4x128xf32>
    %643 = vector.shape_cast %642 : vector<1x4x128xf32> to vector<4x128xf32>
    %644 = vector.shape_cast %610 : vector<4x128xf32> to vector<1x4x128xf32>
    tpu.vector_store %arg13[%641, %c0_208, %c0_209], %644 {strides = array<i32>} : memref<8x4x128xf32, #tpu.memory_space<vmem>>, vector<1x4x128xf32>,
    %645 = arith.index_cast %570 : i32 to index
    %c0_210 = arith.constant 0 : index
    %c0_211 = arith.constant 0 : index
    %646 = vector.load %arg14[%645, %c0_210, %c0_211] : memref<8x4x128xf32, #tpu.memory_space<vmem>>, vector<1x4x128xf32>
    %647 = vector.shape_cast %646 : vector<1x4x128xf32> to vector<4x128xf32>
    %648 = vector.shape_cast %636 : vector<4x128xf32> to vector<1x4x128xf32>
    tpu.vector_store %arg14[%645, %c0_210, %c0_211], %648 {strides = array<i32>} : memref<8x4x128xf32, #tpu.memory_space<vmem>>, vector<1x4x128xf32>,
    %c8_i32 = arith.constant 8 : i32
    %c0_212 = arith.constant 0 : index
    %c0_213 = arith.constant 0 : index
    %c0_214 = arith.constant 0 : index
    %649 = vector.load %arg13[%c0_212, %c0_213, %c0_214] : memref<8x4x128xf32, #tpu.memory_space<vmem>>, vector<8x4x128xf32>
    %c0_215 = arith.constant 0 : index
    %c0_216 = arith.constant 0 : index
    %c0_217 = arith.constant 0 : index
    %650 = vector.load %arg14[%c0_215, %c0_216, %c0_217] : memref<8x4x128xf32, #tpu.memory_space<vmem>>, vector<8x4x128xf32>
    %cst_218 = arith.constant 0.000000e+00 : f32
    %651 = vector.broadcast %cst_218 : f32 to vector<6x4x128xf32>
    %c0_219 = arith.constant 0 : index
    %c0_220 = arith.constant 0 : index
    %652 = vector.load %arg6[%c0_219, %c0_220] : memref<1x128xf32, #tpu.memory_space<vmem>>, vector<1x128xf32>
    %653 = vector.shape_cast %652 : vector<1x128xf32> to vector<1x1x128xf32>
    %654 = vector.broadcast %653 : vector<1x1x128xf32> to vector<6x4x128xf32>
    %655 = arith.addf %651, %654 : vector<6x4x128xf32>
    %656 = vector.extract_strided_slice %649 {offsets = [0, 0, 0], sizes = [6, 4, 128], strides = [1, 1, 1]} : vector<8x4x128xf32> to vector<6x4x128xf32>
    %c0_221 = arith.constant 0 : index
    %c0_222 = arith.constant 0 : index
    %c0_223 = arith.constant 0 : index
    %657 = vector.load %arg4[%c0_221, %c0_222, %c0_223] : memref<3x128x128xf32, #tpu.memory_space<vmem>>, vector<1x128x128xf32>
    %658 = vector.shape_cast %657 : vector<1x128x128xf32> to vector<128x128xf32>
    %cst_224 = arith.constant dense<0.000000e+00> : vector<6x4x128xf32>
    %659 = tpu.matmul %656, %658, %cst_224 {dimension_numbers = #tpu.dot_dimension_numbers<[2], [0], [0, 1], [1], [0, 0, 0, 1, 1, 1], [], []>} : vector<6x4x128xf32>, vector<128x128xf32>, vector<6x4x128xf32> -> vector<6x4x128xf32>
    %660 = arith.addf %655, %659 : vector<6x4x128xf32>
    %661 = vector.extract_strided_slice %650 {offsets = [0, 0, 0], sizes = [6, 4, 128], strides = [1, 1, 1]} : vector<8x4x128xf32> to vector<6x4x128xf32>
    %c0_225 = arith.constant 0 : index
    %c0_226 = arith.constant 0 : index
    %c0_227 = arith.constant 0 : index
    %662 = vector.load %arg5[%c0_225, %c0_226, %c0_227] : memref<3x128x128xf32, #tpu.memory_space<vmem>>, vector<1x128x128xf32>
    %663 = vector.shape_cast %662 : vector<1x128x128xf32> to vector<128x128xf32>
    %cst_228 = arith.constant dense<0.000000e+00> : vector<6x4x128xf32>
    %664 = tpu.matmul %661, %663, %cst_228 {dimension_numbers = #tpu.dot_dimension_numbers<[2], [0], [0, 1], [1], [0, 0, 0, 1, 1, 1], [], []>} : vector<6x4x128xf32>, vector<128x128xf32>, vector<6x4x128xf32> -> vector<6x4x128xf32>
    %665 = arith.addf %660, %664 : vector<6x4x128xf32>
    %666 = vector.extract_strided_slice %649 {offsets = [1, 0, 0], sizes = [6, 4, 128], strides = [1, 1, 1]} : vector<8x4x128xf32> to vector<6x4x128xf32>
    %c1 = arith.constant 1 : index
    %c0_229 = arith.constant 0 : index
    %c0_230 = arith.constant 0 : index
    %667 = vector.load %arg4[%c1, %c0_229, %c0_230] : memref<3x128x128xf32, #tpu.memory_space<vmem>>, vector<1x128x128xf32>
    %668 = vector.shape_cast %667 : vector<1x128x128xf32> to vector<128x128xf32>
    %cst_231 = arith.constant dense<0.000000e+00> : vector<6x4x128xf32>
    %669 = tpu.matmul %666, %668, %cst_231 {dimension_numbers = #tpu.dot_dimension_numbers<[2], [0], [0, 1], [1], [0, 0, 0, 1, 1, 1], [], []>} : vector<6x4x128xf32>, vector<128x128xf32>, vector<6x4x128xf32> -> vector<6x4x128xf32>
    %670 = arith.addf %665, %669 : vector<6x4x128xf32>
    %671 = vector.extract_strided_slice %650 {offsets = [1, 0, 0], sizes = [6, 4, 128], strides = [1, 1, 1]} : vector<8x4x128xf32> to vector<6x4x128xf32>
    %c1_232 = arith.constant 1 : index
    %c0_233 = arith.constant 0 : index
    %c0_234 = arith.constant 0 : index
    %672 = vector.load %arg5[%c1_232, %c0_233, %c0_234] : memref<3x128x128xf32, #tpu.memory_space<vmem>>, vector<1x128x128xf32>
    %673 = vector.shape_cast %672 : vector<1x128x128xf32> to vector<128x128xf32>
    %cst_235 = arith.constant dense<0.000000e+00> : vector<6x4x128xf32>
    %674 = tpu.matmul %671, %673, %cst_235 {dimension_numbers = #tpu.dot_dimension_numbers<[2], [0], [0, 1], [1], [0, 0, 0, 1, 1, 1], [], []>} : vector<6x4x128xf32>, vector<128x128xf32>, vector<6x4x128xf32> -> vector<6x4x128xf32>
    %675 = arith.addf %670, %674 : vector<6x4x128xf32>
    %676 = vector.extract_strided_slice %649 {offsets = [2, 0, 0], sizes = [6, 4, 128], strides = [1, 1, 1]} : vector<8x4x128xf32> to vector<6x4x128xf32>
    %c2 = arith.constant 2 : index
    %c0_236 = arith.constant 0 : index
    %c0_237 = arith.constant 0 : index
    %677 = vector.load %arg4[%c2, %c0_236, %c0_237] : memref<3x128x128xf32, #tpu.memory_space<vmem>>, vector<1x128x128xf32>
    %678 = vector.shape_cast %677 : vector<1x128x128xf32> to vector<128x128xf32>
    %cst_238 = arith.constant dense<0.000000e+00> : vector<6x4x128xf32>
    %679 = tpu.matmul %676, %678, %cst_238 {dimension_numbers = #tpu.dot_dimension_numbers<[2], [0], [0, 1], [1], [0, 0, 0, 1, 1, 1], [], []>} : vector<6x4x128xf32>, vector<128x128xf32>, vector<6x4x128xf32> -> vector<6x4x128xf32>
    %680 = arith.addf %675, %679 : vector<6x4x128xf32>
    %681 = vector.extract_strided_slice %650 {offsets = [2, 0, 0], sizes = [6, 4, 128], strides = [1, 1, 1]} : vector<8x4x128xf32> to vector<6x4x128xf32>
    %c2_239 = arith.constant 2 : index
    %c0_240 = arith.constant 0 : index
    %c0_241 = arith.constant 0 : index
    %682 = vector.load %arg5[%c2_239, %c0_240, %c0_241] : memref<3x128x128xf32, #tpu.memory_space<vmem>>, vector<1x128x128xf32>
    %683 = vector.shape_cast %682 : vector<1x128x128xf32> to vector<128x128xf32>
    %cst_242 = arith.constant dense<0.000000e+00> : vector<6x4x128xf32>
    %684 = tpu.matmul %681, %683, %cst_242 {dimension_numbers = #tpu.dot_dimension_numbers<[2], [0], [0, 1], [1], [0, 0, 0, 1, 1, 1], [], []>} : vector<6x4x128xf32>, vector<128x128xf32>, vector<6x4x128xf32> -> vector<6x4x128xf32>
    %685 = arith.addf %680, %684 : vector<6x4x128xf32>
    %686 = math.tanh %685 : vector<6x4x128xf32>
    %cst_243 = arith.constant dense<0xFF800000> : vector<4x128xf32>
    %687 = vector.multi_reduction <maximumf>, %686, %cst_243 [0] : vector<6x4x128xf32> to vector<4x128xf32>
    %c0_244 = arith.constant 0 : index
    %c0_245 = arith.constant 0 : index
    %688 = vector.load %arg8[%c0_244, %c0_245] : memref<4x128xf32, #tpu.memory_space<vmem>>, vector<4x128xf32>
    tpu.vector_store %arg8[%c0_244, %c0_245], %687 {strides = array<i32>} : memref<4x128xf32, #tpu.memory_space<vmem>>, vector<4x128xf32>,
    %689 = vector.extract_strided_slice %687 {offsets = [0, 0], sizes = [2, 128], strides = [1, 1]} : vector<4x128xf32> to vector<2x128xf32>
    %690 = vector.extract_strided_slice %687 {offsets = [2, 0], sizes = [2, 128], strides = [1, 1]} : vector<4x128xf32> to vector<2x128xf32>
    %691 = arith.mulf %689, %690 : vector<2x128xf32>
    %cst_246 = arith.constant dense<0.000000e+00> : vector<2xf32>
    %692 = vector.multi_reduction <add>, %691, %cst_246 [1] : vector<2x128xf32> to vector<2xf32>
    %693 = vector.shape_cast %692 : vector<2xf32> to vector<2x1xf32>
    %694 = arith.mulf %689, %689 : vector<2x128xf32>
    %cst_247 = arith.constant dense<0.000000e+00> : vector<2xf32>
    %695 = vector.multi_reduction <add>, %694, %cst_247 [1] : vector<2x128xf32> to vector<2xf32>
    %696 = vector.shape_cast %695 : vector<2xf32> to vector<2x1xf32>
    %697 = math.sqrt %696 : vector<2x1xf32>
    %cst_248 = arith.constant 9.99999993E-9 : f32
    %698 = vector.broadcast %cst_248 : f32 to vector<2x1xf32>
    %699 = arith.maximumf %697, %698 : vector<2x1xf32>
    %700 = arith.mulf %690, %690 : vector<2x128xf32>
    %cst_249 = arith.constant dense<0.000000e+00> : vector<2xf32>
    %701 = vector.multi_reduction <add>, %700, %cst_249 [1] : vector<2x128xf32> to vector<2xf32>
    %702 = vector.shape_cast %701 : vector<2xf32> to vector<2x1xf32>
    %703 = math.sqrt %702 : vector<2x1xf32>
    %cst_250 = arith.constant 9.99999993E-9 : f32
    %704 = vector.broadcast %cst_250 : f32 to vector<2x1xf32>
    %705 = arith.maximumf %703, %704 : vector<2x1xf32>
    %706 = arith.mulf %699, %705 : vector<2x1xf32>
    %707 = arith.divf %693, %706 : vector<2x1xf32>
    %c0_251 = arith.constant 0 : index
    %c0_252 = arith.constant 0 : index
    %708 = vector.load %arg7[%c0_251, %c0_252] : memref<2x1xf32, #tpu.memory_space<vmem>>, vector<2x1xf32>
    tpu.vector_store %arg7[%c0_251, %c0_252], %707 {strides = array<i32>} : memref<2x1xf32, #tpu.memory_space<vmem>>, vector<2x1xf32>,
    return
  }
}

</mosaic_0001>

<bundles_post_ra>
// kernel: bilstm_forward.1
= control target key start
LH: loop header
LB: loop body
LE: loop exit
PB: predicated region body
PF: predicated region fallthrough
CT: control target
= control target key end

     0   :  { %14 = vsyncpa [#allocation9], 0  ;;  %s8716_s0 = inlined_call_operand.vmem [shape: f32[8,4,32], index: 0, kind: input, shape index: {}]   ;;  %s8717_s1 = inlined_call_operand.hbm [shape: bf16[32,1024], index: 1, kind: input, shape index: {}]   ;;  %s8718_s2 = inlined_call_operand.vmem [shape: f32[1,1024], index: 2, kind: input, shape index: {}]   ;;  %s8719_s3 = inlined_call_operand.hbm [shape: bf16[256,1024], index: 3, kind: input, shape index: {}]   ;;  %s8720_s4 = inlined_call_operand.vmem [shape: f32[3,128,128], index: 4, kind: input, shape index: {}]   ;;  %s8721_s5 = inlined_call_operand.hbm [shape: f32[3,128,128], index: 5, kind: input, shape index: {}]   ;;  %s8722_s6 = inlined_call_operand.vmem [shape: f32[1,128], index: 6, kind: input, shape index: {}]   ;;  %s8723_s7 = inlined_call_operand.vmem [shape: f32[2,1], index: 7, kind: output, shape index: {0}]   ;;  %s8724_s8 = inlined_call_operand.vmem [shape: f32[4,128], index: 8, kind: output, shape index: {1}]  }
   0x1   :  { %15 = vsyncpa [#allocation11], 0  ;;  %s37_s29 = sshll.u32 %s8719_s3, 4  ;;  %s6413_s30 = smov [#allocation10]   ;;  %s38_s29 = int_to_ptr.hbm [resolvable:$true] %s37_s29 }
   0x2   :  { %s39_s9 = sshll.u32 %s6413_s30, 4  ;;  %s22_s12 = sshll.u32 %s8717_s1, 4  ;;  %s40_s9 = int_to_ptr.vmem [resolvable:$true] %s39_s9  ;;  %s23_s12 = int_to_ptr.hbm [resolvable:$true] %s22_s12 }
   0x3   :  { %s6414_s13 = smov 512   ;;  %s6415_s14 = smov 32  }
   0x4   :  { %45 = dma.hbm_to_vmem [thread:$0]  %s38_s29, 16384, %s40_s9, [#allocation11], %s6414_s13, %s6414_s13, %s6415_s14  }
   0x5   :  { %s6416_s15 = smov [#allocation8]   ;;  %s52_s19 = sshll.u32 %s8721_s5, 4  ;;  %s53_s19 = int_to_ptr.hbm [resolvable:$true] %s52_s19 }
   0x6   :  { %s24_s16 = sshll.u32 %s6416_s15, 4  ;;  %s6417_s3 = smov [#allocation12]   ;;  %s25_s16 = int_to_ptr.vmem [resolvable:$true] %s24_s16 }
   0x7   :  { %30 = dma.hbm_to_vmem [thread:$0]  %s23_s12, 2048, %s25_s16, [#allocation9], %s6414_s13, %s6414_s13, %s6415_s14  }
   0x8   :  { %s54_s20 = sshll.u32 %s6417_s3, 4  ;;  %s6418_s21 = smov 128   ;;  %s55_s20 = int_to_ptr.vmem [resolvable:$true] %s54_s20 }
   0x9   :  { %s6419_s22 = smov 8  }
   0xa   :  { %60 = dma.hbm_to_vmem [thread:$0]  %s53_s19, 6144, %s55_s20, [#allocation11], %s6418_s21, %s6418_s21, %s6419_s22  }
   0xb   :  { %6409 = dma.done.wait [#allocation9], 2048  }
   0xc   :  { %6410 = vsyncadd [#allocation9], 4294965248 }
   0xd   :  { %6411 = dma.done.wait [#allocation11], 22528  }
   0xe   :  { %6412 = vsyncadd [#allocation11], 4294944768  ;;  %v5268_v0 = vld [vmem:[#allocation8 + $0x40] sm:$0xf]  ;;  %v5914_v2 = vld [vmem:[#allocation8 + $0x44] sm:$0xf] }
   0xf   :  { %v5918_v1 = vld [vmem:[#allocation8 + $0x5c] sm:$0xf0]  ;;  %v5270_v4 = vld [vmem:[#allocation8 + $0x60] sm:$0xf0]  ;;  %v80_v10 = vld [vmem:[%s8716_s0 + $0x10] sm:$0xf] }
  0x10   :  { %v5269_v3 = vor.u32 %v5918_v1, %v5268_v0  ;;  %v5236_v5 = vld [vmem:[#allocation8] sm:$0xf]  ;;  %v5273_v7 = vor.u32 %v5914_v2, %v5270_v4  ;;  %v5906_v8 = vld [vmem:[#allocation8 + $0x4] sm:$0xf]  ;;  %v81_v13 = vld [vmem:[%s8716_s0 + $0x14] sm:$0xf]  ;;  %v88_v16 = vpack.c.bf16 %v80_v10, %v80_v10 }
  0x11   :  { %v5910_v6 = vld [vmem:[#allocation8 + $0x1c] sm:$0xf0]  ;;  %v5238_v9 = vld [vmem:[#allocation8 + $0x20] sm:$0xf0]  ;;  %v82_v14 = vld [vmem:[%s8716_s0 + $0x18] sm:$0xf]  ;;  %v89_v17 = vpack.c.bf16 %v81_v13, %v81_v13 }
  0x12   :  { %6050 = vmatpush.bf16.msra.mxu2 %v5269_v3  ;;  %v5237_v11 = vor.u32 %v5910_v6, %v5236_v5  ;;  %v5241_v12 = vor.u32 %v5906_v8, %v5238_v9  ;;  %v83_v15 = vld [vmem:[%s8716_s0 + $0x1c] sm:$0xf]  ;;  %346 = vmatpush.bf16.msra.mxu0 %v5269_v3  ;;  %v90_v18 = vpack.c.bf16 %v82_v14, %v82_v14  ;;  %v5276_v20 = vld [vmem:[#allocation8 + $0x48] sm:$0xf]  ;;  %v5915_v22 = vld [vmem:[#allocation8 + $0x4c] sm:$0xf] }
  0x13   :  { %6052 = vmatpush.bf16.msra.mxu3 %v5273_v7  ;;  %v91_v19 = vpack.c.bf16 %v83_v15, %v83_v15  ;;  %v5919_v21 = vld [vmem:[#allocation8 + $0x64] sm:$0xf0]  ;;  %365 = vmatpush.bf16.msra.mxu1 %v5273_v7  ;;  %140 = vst [vmem:[#allocation1 + $0x20] ss:$4 sm:$0xff] %v88_v16  ;;  %vm335_vm0 = vcmask 261120   ;;  %vm122_vm1 = vcmask 1043456  }
  0x14   :  { %v5277_v23 = vor.u32 %v5919_v21, %v5276_v20  ;;  %v5278_v24 = vld [vmem:[#allocation8 + $0x68] sm:$0xf0]  ;;  %v5244_v25 = vld [vmem:[#allocation8 + $0x8] sm:$0xf]  ;;  %143 = vst [vmem:[#allocation1 + $0x21] ss:$4 sm:$0xff] %v89_v17 }
  0x15   :  { %v5281_v26 = vor.u32 %v5915_v22, %v5278_v24  ;;  %v5911_v27 = vld [vmem:[#allocation8 + $0x24] sm:$0xf0]  ;;  %v5907_v28 = vld [vmem:[#allocation8 + $0xc] sm:$0xf]  ;;  %146 = vst [vmem:[#allocation1 + $0x22] ss:$4 sm:$0xff] %v90_v18 }
  0x16   :  { %6051 = vmatpush.bf16.msra.mxu2 %v5237_v11  ;;  %v5246_v29 = vld [vmem:[#allocation8 + $0x28] sm:$0xf0]  ;;  %347 = vmatpush.bf16.msra.mxu0 %v5237_v11  ;;  %v76_v30 = vld [vmem:[%s8716_s0] sm:$0xf]  ;;  %149 = vst [vmem:[#allocation1 + $0x23] ss:$4 sm:$0xff] %v91_v19  ;;  %v5245_v31 = vor.u32 %v5911_v27, %v5244_v25 }
  0x17   :  { %6053 = vmatpush.bf16.msra.mxu3 %v5241_v12  ;;  %v77_v32 = vld [vmem:[%s8716_s0 + $0x4] sm:$0xf]  ;;  %v78_v33 = vld [vmem:[%s8716_s0 + $0x8] sm:$0xf]  ;;  %v84_v34 = vpack.c.bf16 %v76_v30, %v76_v30  ;;  %v5249_v35 = vor.u32 %v5907_v28, %v5246_v29  ;;  %366 = vmatpush.bf16.msra.mxu1 %v5241_v12  ;;  %v79_v36 = vld [vmem:[%s8716_s0 + $0xc] sm:$0xf] }
  0x18   :  { %v85_v37 = vpack.c.bf16 %v77_v32, %v77_v32  ;;  %v86_v38 = vpack.c.bf16 %v78_v33, %v78_v33  ;;  %v5284_v39 = vld [vmem:[#allocation8 + $0x50] sm:$0xf]  ;;  %v87_v41 = vpack.c.bf16 %v79_v36, %v79_v36  ;;  %v5916_v43 = vld [vmem:[#allocation8 + $0x54] sm:$0xf]  ;;  %v5292_v46 = vld [vmem:[#allocation8 + $0x58] sm:$0xf] }
  0x19   :  { %v5920_v40 = vld [vmem:[#allocation8 + $0x6c] sm:$0xf0]  ;;  %128 = vst [vmem:[#allocation1] ss:$4 sm:$0xff] %v84_v34  ;;  %v5286_v44 = vld [vmem:[#allocation8 + $0x70] sm:$0xf0] }
  0x1a   :  { %384 = vmatpush.bf16.msrb.mxu2 %v5277_v23  ;;  %v5285_v42 = vor.u32 %v5920_v40, %v5284_v39  ;;  %131 = vst [vmem:[#allocation1 + $0x1] ss:$4 sm:$0xff] %v85_v37  ;;  %v5289_v45 = vor.u32 %v5916_v43, %v5286_v44  ;;  %v5921_v47 = vld [vmem:[#allocation8 + $0x74] sm:$0xf0]  ;;  %v5917_v48 = vld [vmem:[#allocation8 + $0x5c] sm:$0xf] }
  0x1b   :  { %403 = vmatpush.bf16.msrb.mxu3 %v5281_v26  ;;  %134 = vst [vmem:[#allocation1 + $0x2] ss:$4 sm:$0xff] %v86_v38  ;;  %v5294_v49 = vld [vmem:[#allocation8 + $0x78] sm:$0xf0]  ;;  %v5293_v50 = vor.u32 %v5921_v47, %v5292_v46  ;;  %v5252_v52 = vld [vmem:[#allocation8 + $0x10] sm:$0xf] }
  0x1c   :  { %422 = vmatpush.bf16.msrb.mxu0 %v5285_v42  ;;  %137 = vst [vmem:[#allocation1 + $0x3] ss:$4 sm:$0xff] %v87_v41  ;;  %441 = vmatpush.bf16.msrb.mxu1 %v5289_v45  ;;  %v5297_v51 = vor.u32 %v5917_v48, %v5294_v49  ;;  %v5912_v53 = vld [vmem:[#allocation8 + $0x2c] sm:$0xf0]  ;;  %v5908_v55 = vld [vmem:[#allocation8 + $0x14] sm:$0xf] }
  0x1d   :  { %v5253_v54 = vor.u32 %v5912_v53, %v5252_v52  ;;  %v5254_v56 = vld [vmem:[#allocation8 + $0x30] sm:$0xf0]  ;;  %v5260_v57 = vld [vmem:[#allocation8 + $0x18] sm:$0xf]  ;;  %v5909_v61 = vld [vmem:[#allocation8 + $0x1c] sm:$0xf] }
  0x1e   :  { %385 = vmatpush.bf16.msrb.mxu2 %v5245_v31  ;;  %v6499_v58 = vld.sshfl [vmem:[#allocation1 + $0x20] sm:$0xff pattern:$0x73625140]  ;;  %v5257_v59 = vor.u32 %v5908_v55, %v5254_v56  ;;  %v5540_v63 = vld [vmem:[#allocation10 + $0x1c0] sm:$0xf] }
  0x1f   :  { %404 = vmatpush.bf16.msrb.mxu3 %v5249_v35  ;;  %v5913_v60 = vld [vmem:[#allocation8 + $0x34] sm:$0xf0]  ;;  %5299 = vmatmul.msk.bf16.vlgmr.msra.gmra.mxu2 %vm335_vm0, %v6499_v58  ;;  %v5262_v62 = vld [vmem:[#allocation8 + $0x38] sm:$0xf0]  ;;  %v5982_v1 = vld [vmem:[#allocation10 + $0x1dc] sm:$0xf0] }
  0x20   :  { %5301 = vmatmul.msk.bf16.vlgmr.msra.gmra.mxu3 %vm335_vm0, %v6499_v58  ;;  %v5261_v0 = vor.u32 %v5913_v60, %v5260_v57  ;;  %v5796_v2 = vld [vmem:[#allocation10 + $0x3c0] sm:$0xf]  ;;  %423 = vmatpush.bf16.msrb.mxu0 %v5253_v54  ;;  %v5265_v4 = vor.u32 %v5909_v61, %v5262_v62  ;;  %v6505_v5 = vor.u32 %v5982_v1, %v5540_v63  ;;  %v5978_v18 = vld [vmem:[#allocation10 + $0x1c4] sm:$0xf] }
  0x21   :  { %v6046_v3 = vld [vmem:[#allocation10 + $0x3dc] sm:$0xf0]  ;;  %442 = vmatpush.bf16.msrb.mxu1 %v5257_v59  ;;  %v5542_v19 = vld [vmem:[#allocation10 + $0x1e0] sm:$0xf0] }
  0x22   :  { %460 = vmatpush.bf16.msra.mxu2 %v5293_v50  ;;  %9019 = vst [vmem:[#allocation15_spill] sm:$0xff] %v6505_v5  ;;  %v6507_v6 = vor.u32 %v6046_v3, %v5796_v2  ;;  %v5508_v7 = vld [vmem:[#allocation10 + $0x180] sm:$0xf]  ;;  %v6042_v20 = vld [vmem:[#allocation10 + $0x3c4] sm:$0xf]  ;;  %v6527_v28 = vor.u32 %v5978_v18, %v5542_v19 }
  0x23   :  { %479 = vmatpush.bf16.msra.mxu3 %v5297_v51  ;;  %v5974_v8 = vld [vmem:[#allocation10 + $0x19c] sm:$0xf0]  ;;  %v6509_v9 = vld.sshfl [vmem:[#allocation1] sm:$0xff pattern:$0x73625140] }
  0x24   :  { %9020 = vst [vmem:[#allocation16_spill] sm:$0xff] %v6507_v6  ;;  %v5764_v10 = vld [vmem:[#allocation10 + $0x380] sm:$0xf]  ;;  %5300 = vmatmul.msk.bf16.vlgmr.msra.gmra.mxu1 %vm335_vm0, %v6509_v9  ;;  %5298 = vmatmul.msk.bf16.vlgmr.msra.gmra.mxu0 %vm335_vm0, %v6509_v9  ;;  %v6517_v12 = vor.u32 %v5974_v8, %v5508_v7  ;;  %v5798_v21 = vld [vmem:[#allocation10 + $0x3e0] sm:$0xf0] }
  0x25   :  { %v6038_v11 = vld [vmem:[#allocation10 + $0x39c] sm:$0xf0]  ;;  %1431 = vmatpush.bf16.msra.mxu0 %v6505_v5  ;;  %1444 = vmatpush.bf16.msra.mxu1 %v6507_v6  ;;  %9025 = vst [vmem:[#allocation21_spill] sm:$0xff] %v6527_v28  ;;  %v6529_v29 = vor.u32 %v6042_v20, %v5798_v21  ;;  %v5970_v30 = vld [vmem:[#allocation10 + $0x184] sm:$0xf] }
  0x26   :  { %461 = vmatpush.bf16.msra.mxu2 %v5261_v0  ;;  %9021 = vst [vmem:[#allocation17_spill] sm:$0xff] %v6517_v12  ;;  %v6519_v13 = vor.u32 %v6038_v11, %v5764_v10  ;;  %v5476_v14 = vld [vmem:[#allocation10 + $0x140] sm:$0xf]  ;;  %v5510_v31 = vld [vmem:[#allocation10 + $0x1a0] sm:$0xf0] }
  0x27   :  { %480 = vmatpush.bf16.msra.mxu3 %v5265_v4  ;;  %v5966_v15 = vld [vmem:[#allocation10 + $0x15c] sm:$0xf0]  ;;  %9026 = vst [vmem:[#allocation22_spill] sm:$0xff] %v6529_v29  ;;  %v6034_v32 = vld [vmem:[#allocation10 + $0x384] sm:$0xf]  ;;  %v6543_v40 = vor.u32 %v5970_v30, %v5510_v31 }
  0x28   :  { %9022 = vst [vmem:[#allocation18_spill] sm:$0xff] %v6519_v13  ;;  %v5732_v16 = vld [vmem:[#allocation10 + $0x340] sm:$0xf]  ;;  %v6523_v22 = vor.u32 %v5966_v15, %v5476_v14  ;;  %v5766_v33 = vld [vmem:[#allocation10 + $0x3a0] sm:$0xf0] }
  0x29   :  { %v6030_v17 = vld [vmem:[#allocation10 + $0x35c] sm:$0xf0]  ;;  %1432 = vmatpush.bf16.msra.mxu0 %v6517_v12  ;;  %1445 = vmatpush.bf16.msra.mxu1 %v6519_v13  ;;  %9029 = vst [vmem:[#allocation25_spill] sm:$0xff] %v6543_v40  ;;  %v6545_v41 = vor.u32 %v6034_v32, %v5766_v33  ;;  %v5962_v42 = vld [vmem:[#allocation10 + $0x144] sm:$0xf] }
  0x2a   :  { %9023 = vst [vmem:[#allocation19_spill] sm:$0xff] %v6523_v22  ;;  %v6525_v23 = vor.u32 %v6030_v17, %v5732_v16  ;;  %v5444_v24 = vld [vmem:[#allocation10 + $0x100] sm:$0xf]  ;;  %v5478_v43 = vld [vmem:[#allocation10 + $0x160] sm:$0xf0] }
  0x2b   :  { %v5958_v25 = vld [vmem:[#allocation10 + $0x11c] sm:$0xf0]  ;;  %9030 = vst [vmem:[#allocation26_spill] sm:$0xff] %v6545_v41  ;;  %v6026_v44 = vld [vmem:[#allocation10 + $0x344] sm:$0xf]  ;;  %v6555_v52 = vor.u32 %v5962_v42, %v5478_v43 }
  0x2c   :  { %9024 = vst [vmem:[#allocation20_spill] sm:$0xff] %v6525_v23  ;;  %v5700_v26 = vld [vmem:[#allocation10 + $0x300] sm:$0xf]  ;;  %v6533_v34 = vor.u32 %v5958_v25, %v5444_v24  ;;  %v5734_v45 = vld [vmem:[#allocation10 + $0x360] sm:$0xf0] }
  0x2d   :  { %v6022_v27 = vld [vmem:[#allocation10 + $0x31c] sm:$0xf0]  ;;  %1433 = vmatpush.bf16.msra.mxu0 %v6523_v22  ;;  %1446 = vmatpush.bf16.msra.mxu1 %v6525_v23  ;;  %9033 = vst [vmem:[#allocation29_spill] sm:$0xff] %v6555_v52  ;;  %v6557_v53 = vor.u32 %v6026_v44, %v5734_v45  ;;  %v5954_v54 = vld [vmem:[#allocation10 + $0x104] sm:$0xf] }
  0x2e   :  { %9027 = vst [vmem:[#allocation23_spill] sm:$0xff] %v6533_v34  ;;  %v6535_v35 = vor.u32 %v6022_v27, %v5700_v26  ;;  %v5412_v36 = vld [vmem:[#allocation10 + $0xc0] sm:$0xf]  ;;  %v5446_v55 = vld [vmem:[#allocation10 + $0x120] sm:$0xf0] }
  0x2f   :  { %5302 = vmatmul.msk.bf16.vlgmr.msrb.gmra.mxu2 %vm335_vm0, %v6509_v9  ;;  %v5950_v37 = vld [vmem:[#allocation10 + $0xdc] sm:$0xf0]  ;;  %9034 = vst [vmem:[#allocation30_spill] sm:$0xff] %v6557_v53  ;;  %v6018_v56 = vld [vmem:[#allocation10 + $0x304] sm:$0xf]  ;;  %v6571_v1 = vor.u32 %v5954_v54, %v5446_v55 }
  0x30   :  { %9028 = vst [vmem:[#allocation24_spill] sm:$0xff] %v6535_v35  ;;  %5304 = vmatmul.msk.bf16.vlgmr.msrb.gmra.mxu3 %vm335_vm0, %v6509_v9  ;;  %v5668_v38 = vld [vmem:[#allocation10 + $0x2c0] sm:$0xf]  ;;  %1457 = vmatpush.bf16.msrb.mxu2 %v6527_v28  ;;  %v6549_v46 = vor.u32 %v5950_v37, %v5412_v36  ;;  %v5702_v57 = vld [vmem:[#allocation10 + $0x320] sm:$0xf0] }
  0x31   :  { %v6014_v39 = vld [vmem:[#allocation10 + $0x2dc] sm:$0xf0]  ;;  %1470 = vmatpush.bf16.msrb.mxu3 %v6529_v29  ;;  %1434 = vmatpush.bf16.msra.mxu0 %v6533_v34  ;;  %9037 = vst [vmem:[#allocation33_spill] sm:$0xff] %v6571_v1  ;;  %v6573_v2 = vor.u32 %v6018_v56, %v5702_v57  ;;  %v5946_v3 = vld [vmem:[#allocation10 + $0xc4] sm:$0xf] }
  0x32   :  { %1447 = vmatpush.bf16.msra.mxu1 %v6535_v35  ;;  %9031 = vst [vmem:[#allocation27_spill] sm:$0xff] %v6549_v46  ;;  %v6551_v47 = vor.u32 %v6014_v39, %v5668_v38  ;;  %v5380_v48 = vld [vmem:[#allocation10 + $0x80] sm:$0xf]  ;;  %v5414_v4 = vld [vmem:[#allocation10 + $0xe0] sm:$0xf0] }
  0x33   :  { %v5942_v49 = vld [vmem:[#allocation10 + $0x9c] sm:$0xf0]  ;;  %9038 = vst [vmem:[#allocation34_spill] sm:$0xff] %v6573_v2  ;;  %v6010_v7 = vld [vmem:[#allocation10 + $0x2c4] sm:$0xf]  ;;  %v6583_v20 = vor.u32 %v5946_v3, %v5414_v4 }
  0x34   :  { %9032 = vst [vmem:[#allocation28_spill] sm:$0xff] %v6551_v47  ;;  %v5636_v50 = vld [vmem:[#allocation10 + $0x280] sm:$0xf]  ;;  %1458 = vmatpush.bf16.msrb.mxu2 %v6543_v40  ;;  %5308 = vmatmul.msk.bf16.vlgmr.msrb.gmra.mxu1 %vm335_vm0, %v6509_v9  ;;  %v6565_v59 = vor.u32 %v5942_v49, %v5380_v48  ;;  %v5670_v8 = vld [vmem:[#allocation10 + $0x2e0] sm:$0xf0] }
  0x35   :  { %v6006_v51 = vld [vmem:[#allocation10 + $0x29c] sm:$0xf0]  ;;  %1471 = vmatpush.bf16.msrb.mxu3 %v6545_v41  ;;  %5306 = vmatmul.msk.bf16.vlgmr.msrb.gmra.mxu0 %vm335_vm0, %v6509_v9  ;;  %v5938_v16 = vld [vmem:[#allocation10 + $0x84] sm:$0xf]  ;;  %v5548_v19 = vld [vmem:[#allocation10 + $0x1c8] sm:$0xf]  ;;  %v6585_v21 = vor.u32 %v6010_v7, %v5670_v8 }
  0x36   :  { %1435 = vmatpush.bf16.msra.mxu0 %v6549_v46  ;;  %1448 = vmatpush.bf16.msra.mxu1 %v6551_v47  ;;  %9035 = vst [vmem:[#allocation31_spill] sm:$0xff] %v6565_v59  ;;  %v6567_v60 = vor.u32 %v6006_v51, %v5636_v50  ;;  %v5348_v61 = vld [vmem:[#allocation10 + $0x40] sm:$0xf]  ;;  %v5983_v24 = vld [vmem:[#allocation10 + $0x1e4] sm:$0xf0] }
  0x37   :  { %v5934_v62 = vld [vmem:[#allocation10 + $0x5c] sm:$0xf0]  ;;  %9041 = vst [vmem:[#allocation37_spill] sm:$0xff] %v6583_v20  ;;  %v5804_v25 = vld [vmem:[#allocation10 + $0x3c8] sm:$0xf]  ;;  %v6597_v37 = vor.u32 %v5983_v24, %v5548_v19 }
  0x38   :  { %9036 = vst [vmem:[#allocation32_spill] sm:$0xff] %v6567_v60  ;;  %v5604_v63 = vld [vmem:[#allocation10 + $0x240] sm:$0xf]  ;;  %1459 = vmatpush.bf16.msrb.mxu2 %v6555_v52  ;;  %v6577_v10 = vor.u32 %v5934_v62, %v5348_v61  ;;  %v6047_v26 = vld [vmem:[#allocation10 + $0x3e4] sm:$0xf0] }
  0x39   :  { %v5998_v0 = vld [vmem:[#allocation10 + $0x25c] sm:$0xf0]  ;;  %1472 = vmatpush.bf16.msrb.mxu3 %v6557_v53  ;;  %9042 = vst [vmem:[#allocation38_spill] sm:$0xff] %v6585_v21  ;;  %v5382_v27 = vld [vmem:[#allocation10 + $0xa0] sm:$0xf0]  ;;  %v6599_v38 = vor.u32 %v6047_v26, %v5804_v25 }
  0x3a   :  { %1436 = vmatpush.bf16.msra.mxu0 %v6565_v59  ;;  %1449 = vmatpush.bf16.msra.mxu1 %v6567_v60  ;;  %9039 = vst [vmem:[#allocation35_spill] sm:$0xff] %v6577_v10  ;;  %v6579_v11 = vor.u32 %v5998_v0, %v5604_v63  ;;  %v5316_v14 = vld [vmem:[#allocation10] sm:$0xf]  ;;  %v6002_v30 = vld [vmem:[#allocation10 + $0x284] sm:$0xf]  ;;  %v6603_v42 = vor.u32 %v5938_v16, %v5382_v27  ;;  %v6634_v16 = vld [vmem:[%s8718_s2] sm:$0xff] }
  0x3b   :  { %v5926_v15 = vld [vmem:[#allocation10 + $0x1c] sm:$0xf0]  ;;  %v5638_v31 = vld [vmem:[#allocation10 + $0x2a0] sm:$0xf0]  ;;  %9045 = vst [vmem:[#allocation41_spill] sm:$0xff] %v6597_v37 }
  0x3c   :  { %9040 = vst [vmem:[#allocation36_spill] sm:$0xff] %v6579_v11  ;;  %v5572_v17 = vld [vmem:[#allocation10 + $0x200] sm:$0xf]  ;;  %1460 = vmatpush.bf16.msrb.mxu2 %v6571_v1  ;;  %v6589_v32 = vor.u32 %v5926_v15, %v5316_v14  ;;  %v5930_v36 = vld [vmem:[#allocation10 + $0x44] sm:$0xf]  ;;  %v6605_v43 = vor.u32 %v6002_v30, %v5638_v31 }
  0x3d   :  { %v5990_v18 = vld [vmem:[#allocation10 + $0x21c] sm:$0xf0]  ;;  %1473 = vmatpush.bf16.msrb.mxu3 %v6573_v2  ;;  %9046 = vst [vmem:[#allocation42_spill] sm:$0xff] %v6599_v38  ;;  %v5516_v39 = vld [vmem:[#allocation10 + $0x188] sm:$0xf] }
  0x3e   :  { %1437 = vmatpush.bf16.msra.mxu0 %v6577_v10  ;;  %1450 = vmatpush.bf16.msra.mxu1 %v6579_v11  ;;  %9043 = vst [vmem:[#allocation39_spill] sm:$0xff] %v6589_v32  ;;  %v6591_v33 = vor.u32 %v5990_v18, %v5572_v17  ;;  %v5975_v44 = vld [vmem:[#allocation10 + $0x1a4] sm:$0xf0]  ;;  %v5350_v49 = vld [vmem:[#allocation10 + $0x60] sm:$0xf0] }
  0x3f   :  { %5303 = vmatmul.msk.bf16.gmra.mxu2 %vm335_vm0, %v6499_v58  ;;  %9047 = vst [vmem:[#allocation43_spill] sm:$0xff] %v6603_v42  ;;  %v5772_v45 = vld [vmem:[#allocation10 + $0x388] sm:$0xf]  ;;  %v5994_v50 = vld [vmem:[#allocation10 + $0x244] sm:$0xf]  ;;  %v6611_v55 = vor.u32 %v5975_v44, %v5516_v39  ;;  %v6617_v61 = vor.u32 %v5930_v36, %v5350_v49  ;;  %v110_v39 = vperm.slane %v6634_v16, 0 }
  0x40   :  { %9044 = vst [vmem:[#allocation40_spill] sm:$0xff] %v6591_v33  ;;  %5305 = vmatmul.msk.bf16.gmra.mxu3 %vm335_vm0, %v6499_v58  ;;  %1461 = vmatpush.bf16.msrb.mxu2 %v6583_v20  ;;  %v6039_v48 = vld [vmem:[#allocation10 + $0x3a4] sm:$0xf0]  ;;  %v5606_v51 = vld [vmem:[#allocation10 + $0x260] sm:$0xf0]  ;;  %v111_v44 = vperm.slane %v6634_v16, 1 }
  0x41   :  { %1474 = vmatpush.bf16.msrb.mxu3 %v6585_v21  ;;  %9048 = vst [vmem:[#allocation44_spill] sm:$0xff] %v6605_v43  ;;  %v5922_v54 = vld [vmem:[#allocation10 + $0x4] sm:$0xf]  ;;  %v6613_v56 = vor.u32 %v6039_v48, %v5772_v45  ;;  %v5484_v57 = vld [vmem:[#allocation10 + $0x148] sm:$0xf]  ;;  %v6619_v62 = vor.u32 %v5994_v50, %v5606_v51 }
  0x42   :  { %1438 = vmatpush.bf16.msra.mxu0 %v6589_v32  ;;  %1451 = vmatpush.bf16.msra.mxu1 %v6591_v33  ;;  %9049 = vst [vmem:[#allocation45_spill] sm:$0xff] %v6611_v55  ;;  %v5967_v63 = vld [vmem:[#allocation10 + $0x164] sm:$0xf0]  ;;  %v5318_v4 = vld [vmem:[#allocation10 + $0x20] sm:$0xf0]  ;;  %v118_v51 = vrot.slane %v111_v44, 4 }
  0x43   :  { %9050 = vst [vmem:[#allocation46_spill] sm:$0xff] %v6613_v56  ;;  %v5740_v0 = vld [vmem:[#allocation10 + $0x348] sm:$0xf]  ;;  %v5986_v7 = vld [vmem:[#allocation10 + $0x204] sm:$0xf]  ;;  %v6627_v14 = vor.u32 %v5967_v63, %v5484_v57  ;;  %v6638_v17 = vor.u32 %v5922_v54, %v5318_v4 }
  0x44   :  { %1462 = vmatpush.bf16.msrb.mxu2 %v6603_v42  ;;  %9051 = vst [vmem:[#allocation47_spill] sm:$0xff] %v6617_v61  ;;  %v6031_v3 = vld [vmem:[#allocation10 + $0x364] sm:$0xf0]  ;;  %v5574_v8 = vld [vmem:[#allocation10 + $0x220] sm:$0xf0]  ;;  %5309 = vmatmul.msk.bf16.gmra.mxu1 %vm335_vm0, %v6499_v58 }
  0x45   :  { %1475 = vmatpush.bf16.msrb.mxu3 %v6605_v43  ;;  %9052 = vst [vmem:[#allocation48_spill] sm:$0xff] %v6619_v62  ;;  %5307 = vmatmul.msk.bf16.gmra.mxu0 %vm335_vm0, %v6499_v58  ;;  %v6629_v15 = vor.u32 %v6031_v3, %v5740_v0  ;;  %v6640_v18 = vor.u32 %v5986_v7, %v5574_v8  ;;  %v5979_v19 = vld [vmem:[#allocation10 + $0x1cc] sm:$0xf]  ;;  %v5452_v27 = vld [vmem:[#allocation10 + $0x108] sm:$0xf] }
  0x46   :  { %1483 = vmatpush.bf16.msrb.mxu0 %v6597_v37  ;;  %1496 = vmatpush.bf16.msrb.mxu1 %v6599_v38  ;;  %9053 = vst [vmem:[#allocation49_spill] sm:$0xff] %v6627_v14  ;;  %v5550_v24 = vld [vmem:[#allocation10 + $0x1e8] sm:$0xf0]  ;;  %v5959_v30 = vld [vmem:[#allocation10 + $0x124] sm:$0xf0] }
  0x47   :  { %9054 = vst [vmem:[#allocation50_spill] sm:$0xff] %v6629_v15  ;;  %v6043_v25 = vld [vmem:[#allocation10 + $0x3cc] sm:$0xf]  ;;  %v5708_v31 = vld [vmem:[#allocation10 + $0x308] sm:$0xf]  ;;  %v6648_v45 = vor.u32 %v5979_v19, %v5550_v24  ;;  %v6652_v63 = vor.u32 %v5959_v30, %v5452_v27 }
  0x48   :  { %1463 = vmatpush.bf16.msrb.mxu2 %v6617_v61  ;;  %9055 = vst [vmem:[#allocation51_spill] sm:$0xff] %v6638_v17  ;;  %v5806_v26 = vld [vmem:[#allocation10 + $0x3e8] sm:$0xf0]  ;;  %v6023_v36 = vld [vmem:[#allocation10 + $0x324] sm:$0xf0] }
  0x49   :  { %1476 = vmatpush.bf16.msrb.mxu3 %v6619_v62  ;;  %9056 = vst [vmem:[#allocation52_spill] sm:$0xff] %v6640_v18  ;;  %v6650_v48 = vor.u32 %v6043_v25, %v5806_v26  ;;  %v5971_v49 = vld [vmem:[#allocation10 + $0x18c] sm:$0xf]  ;;  %v6654_v0 = vor.u32 %v6023_v36, %v5708_v31  ;;  %v5420_v3 = vld [vmem:[#allocation10 + $0xc8] sm:$0xf] }
  0x4a   :  { %1484 = vmatpush.bf16.msrb.mxu0 %v6611_v55  ;;  %1497 = vmatpush.bf16.msrb.mxu1 %v6613_v56  ;;  %9057 = vst [vmem:[#allocation53_spill] sm:$0xff] %v6648_v45  ;;  %v5518_v50 = vld [vmem:[#allocation10 + $0x1a8] sm:$0xf0]  ;;  %v5951_v4 = vld [vmem:[#allocation10 + $0xe4] sm:$0xf0] }
  0x4b   :  { %9058 = vst [vmem:[#allocation54_spill] sm:$0xff] %v6650_v48  ;;  %v6035_v54 = vld [vmem:[#allocation10 + $0x38c] sm:$0xf]  ;;  %v5676_v7 = vld [vmem:[#allocation10 + $0x2c8] sm:$0xf]  ;;  %v6666_v19 = vor.u32 %v5971_v49, %v5518_v50 }
  0x4c   :  { %1464 = vmatpush.bf16.msrb.mxu2 %v6638_v17  ;;  %v5774_v57 = vld [vmem:[#allocation10 + $0x3a8] sm:$0xf0]  ;;  %9059 = vst [vmem:[#allocation55_spill] sm:$0xff] %v6652_v63  ;;  %v6015_v8 = vld [vmem:[#allocation10 + $0x2e4] sm:$0xf0] }
  0x4d   :  { %1477 = vmatpush.bf16.msrb.mxu3 %v6640_v18  ;;  %9060 = vst [vmem:[#allocation56_spill] sm:$0xff] %v6654_v0  ;;  %v6668_v24 = vor.u32 %v6035_v54, %v5774_v57  ;;  %v5963_v25 = vld [vmem:[#allocation10 + $0x14c] sm:$0xf]  ;;  %v6675_v31 = vor.u32 %v6015_v8, %v5676_v7  ;;  %v5388_v36 = vld [vmem:[#allocation10 + $0x88] sm:$0xf] }
  0x4e   :  { %1485 = vmatpush.bf16.msrb.mxu0 %v6627_v14  ;;  %1498 = vmatpush.bf16.msrb.mxu1 %v6629_v15  ;;  %v6657_v15 = vsel %vm122_vm1, %v110_v39, %v118_v51  ;;  %9061 = vst [vmem:[#allocation57_spill] sm:$0xff] %v6666_v19  ;;  %v5486_v26 = vld [vmem:[#allocation10 + $0x168] sm:$0xf0]  ;;  %v5943_v39 = vld [vmem:[#allocation10 + $0xa4] sm:$0xf0] }
  0x4f   :  { %5310 = vmatmul.msk.bf16.vlgmr.msra.gmra.mxu2 %vm335_vm0, %v6509_v9  ;;  %232 = vst [vmem:[#allocation1] ss:$2 sm:$0xff] %v6657_v15  ;;  %v6027_v27 = vld [vmem:[#allocation10 + $0x34c] sm:$0xf]  ;;  %v5644_v44 = vld [vmem:[#allocation10 + $0x288] sm:$0xf]  ;;  %v6679_v50 = vor.u32 %v5963_v25, %v5486_v26 }
  0x50   :  { %5312 = vmatmul.msk.bf16.vlgmr.msra.gmra.mxu3 %vm335_vm0, %v6509_v9  ;;  %1509 = vmatpush.bf16.msra.mxu2 %v6648_v45  ;;  %9062 = vst [vmem:[#allocation58_spill] sm:$0xff] %v6668_v24  ;;  %v5742_v30 = vld [vmem:[#allocation10 + $0x368] sm:$0xf0]  ;;  %v6673_v9 = vor.u32 %v5951_v4, %v5420_v3  ;;  %v6007_v49 = vld [vmem:[#allocation10 + $0x2a4] sm:$0xf0]  ;;  %v6685_v3 = vor.u32 %v5943_v39, %v5388_v36 }
  0x51   :  { %1522 = vmatpush.bf16.msra.mxu3 %v6650_v48  ;;  %234 = vst [vmem:[#allocation1 + $0x1] ss:$2 sm:$0xff] %v6657_v15  ;;  %v6681_v51 = vor.u32 %v6027_v27, %v5742_v30  ;;  %v5955_v54 = vld [vmem:[#allocation10 + $0x10c] sm:$0xf]  ;;  %v6687_v4 = vor.u32 %v6007_v49, %v5644_v44  ;;  %v5356_v7 = vld [vmem:[#allocation10 + $0x48] sm:$0xf] }
  0x52   :  { %1486 = vmatpush.bf16.msrb.mxu0 %v6652_v63  ;;  %1499 = vmatpush.bf16.msrb.mxu1 %v6654_v0  ;;  %9063 = vst [vmem:[#allocation59_spill] sm:$0xff] %v6673_v9  ;;  %v5454_v57 = vld [vmem:[#allocation10 + $0x128] sm:$0xf0]  ;;  %v5935_v8 = vld [vmem:[#allocation10 + $0x64] sm:$0xf0] }
  0x53   :  { %9064 = vst [vmem:[#allocation60_spill] sm:$0xff] %v6675_v31  ;;  %v6019_v63 = vld [vmem:[#allocation10 + $0x30c] sm:$0xf]  ;;  %v5612_v14 = vld [vmem:[#allocation10 + $0x248] sm:$0xf]  ;;  %v6695_v30 = vor.u32 %v5955_v54, %v5454_v57  ;;  %v6702_v49 = vor.u32 %v5935_v8, %v5356_v7 }
  0x54   :  { %1510 = vmatpush.bf16.msra.mxu2 %v6666_v19  ;;  %9065 = vst [vmem:[#allocation61_spill] sm:$0xff] %v6679_v50  ;;  %v5710_v0 = vld [vmem:[#allocation10 + $0x328] sm:$0xf0]  ;;  %v5927_v54 = vld [vmem:[#allocation10 + $0x24] sm:$0xf0] }
  0x55   :  { %1523 = vmatpush.bf16.msra.mxu3 %v6668_v24  ;;  %9066 = vst [vmem:[#allocation62_spill] sm:$0xff] %v6681_v51  ;;  %v5999_v24 = vld [vmem:[#allocation10 + $0x264] sm:$0xf0]  ;;  %v5947_v25 = vld [vmem:[#allocation10 + $0xcc] sm:$0xf] }
  0x56   :  { %1487 = vmatpush.bf16.msrb.mxu0 %v6673_v9  ;;  %1500 = vmatpush.bf16.msrb.mxu1 %v6675_v31  ;;  %9067 = vst [vmem:[#allocation63_spill] sm:$0xff] %v6685_v3  ;;  %v6697_v31 = vor.u32 %v6019_v63, %v5710_v0  ;;  %v5422_v36 = vld [vmem:[#allocation10 + $0xe8] sm:$0xf0]  ;;  %v6704_v9 = vor.u32 %v5999_v24, %v5612_v14  ;;  %v5580_v57 = vld [vmem:[#allocation10 + $0x208] sm:$0xf] }
  0x57   :  { %9068 = vst [vmem:[#allocation64_spill] sm:$0xff] %v6687_v4  ;;  %v6011_v39 = vld [vmem:[#allocation10 + $0x2cc] sm:$0xf]  ;;  %v5991_v63 = vld [vmem:[#allocation10 + $0x224] sm:$0xf0]  ;;  %v6709_v0 = vor.u32 %v5947_v25, %v5422_v36 }
  0x58   :  { %v6689_v26 = vld.sshfl [vmem:[#allocation1] sm:$0xff pattern:$0x75316420]  ;;  %v6691_v27 = vld.sshfl [vmem:[#allocation1 + $0x8] sm:$0xff pattern:$0x75316420]  ;;  %1511 = vmatpush.bf16.msra.mxu2 %v6679_v50  ;;  %v6717_v24 = vor.u32 %v5991_v63, %v5580_v57 }
  0x59   :  { %1524 = vmatpush.bf16.msra.mxu3 %v6681_v51  ;;  %9069 = vst [vmem:[#allocation65_spill] sm:$0xff] %v6695_v30  ;;  %v5678_v44 = vld [vmem:[#allocation10 + $0x2e8] sm:$0xf0]  ;;  %v5324_v50 = vld [vmem:[#allocation10 + $0x8] sm:$0xf] }
  0x5a   :  { %9070 = vst [vmem:[#allocation66_spill] sm:$0xff] %v6697_v31  ;;  %1488 = vmatpush.bf16.msrb.mxu0 %v6685_v3  ;;  %1501 = vmatpush.bf16.msrb.mxu1 %v6687_v4  ;;  %v6711_v51 = vor.u32 %v6011_v39, %v5678_v44  ;;  %v5939_v3 = vld [vmem:[#allocation10 + $0x8c] sm:$0xf]  ;;  %v6715_v14 = vor.u32 %v5927_v54, %v5324_v50  ;;  %v5780_v55 = vld [vmem:[#allocation10 + $0x390] sm:$0xf] }
  0x5b   :  { %255 = vst [vmem:[#allocation1] ss:$2 sm:$0xff] %v6657_v15  ;;  %v5390_v4 = vld [vmem:[#allocation10 + $0xa8] sm:$0xf0]  ;;  %v6040_v48 = vld [vmem:[#allocation10 + $0x3ac] sm:$0xf0] }
  0x5c   :  { %9071 = vst [vmem:[#allocation67_spill] sm:$0xff] %v6702_v49  ;;  %1512 = vmatpush.bf16.msra.mxu2 %v6695_v30  ;;  %v6003_v7 = vld [vmem:[#allocation10 + $0x28c] sm:$0xf]  ;;  %v6725_v39 = vor.u32 %v5939_v3, %v5390_v4  ;;  %v5524_v30 = vld [vmem:[#allocation10 + $0x190] sm:$0xf] }
  0x5d   :  { %9072 = vst [vmem:[#allocation68_spill] sm:$0xff] %v6704_v9  ;;  %1525 = vmatpush.bf16.msra.mxu3 %v6697_v31  ;;  %v5646_v8 = vld [vmem:[#allocation10 + $0x2a8] sm:$0xf0]  ;;  %v5972_v45 = vld [vmem:[#allocation10 + $0x194] sm:$0xf] }
  0x5e   :  { %256 = vst [vmem:[#allocation1 + $0x1] ss:$2 sm:$0xff] %v6657_v15  ;;  %1489 = vmatpush.bf16.msrb.mxu0 %v6702_v49  ;;  %1502 = vmatpush.bf16.msrb.mxu1 %v6704_v9  ;;  %v5931_v25 = vld [vmem:[#allocation10 + $0x4c] sm:$0xf]  ;;  %v6727_v44 = vor.u32 %v6003_v7, %v5646_v8  ;;  %v5782_v18 = vld [vmem:[#allocation10 + $0x3b0] sm:$0xf0] }
  0x5f   :  { %9073 = vst [vmem:[#allocation69_spill] sm:$0xff] %v6709_v0  ;;  %5311 = vmatmul.msk.bf16.gmra.mxu2 %vm335_vm0, %v6499_v58  ;;  %v5358_v36 = vld [vmem:[#allocation10 + $0x68] sm:$0xf0]  ;;  %v5964_v17 = vld [vmem:[#allocation10 + $0x154] sm:$0xf] }
  0x60   :  { %9074 = vst [vmem:[#allocation70_spill] sm:$0xff] %v6711_v51  ;;  %5313 = vmatmul.msk.bf16.gmra.mxu3 %vm335_vm0, %v6499_v58  ;;  %1513 = vmatpush.bf16.msra.mxu2 %v6709_v0  ;;  %v5995_v57 = vld [vmem:[#allocation10 + $0x24c] sm:$0xf]  ;;  %v6739_v58 = vor.u32 %v5931_v25, %v5358_v36  ;;  %v6028_v38 = vld [vmem:[#allocation10 + $0x354] sm:$0xf] }
  0x61   :  { %9075 = vst [vmem:[#allocation71_spill] sm:$0xff] %v6715_v14  ;;  %1526 = vmatpush.bf16.msra.mxu3 %v6711_v51  ;;  %v5614_v63 = vld [vmem:[#allocation10 + $0x268] sm:$0xf0]  ;;  %v5590_v37 = vld [vmem:[#allocation10 + $0x230] sm:$0xf0] }
  0x62   :  { %9076 = vst [vmem:[#allocation72_spill] sm:$0xff] %v6717_v24  ;;  %1490 = vmatpush.bf16.msrb.mxu0 %v6715_v14  ;;  %1503 = vmatpush.bf16.msrb.mxu1 %v6717_v24  ;;  %v6741_v3 = vor.u32 %v5995_v57, %v5614_v63  ;;  %v5923_v4 = vld [vmem:[#allocation10 + $0xc] sm:$0xf]  ;;  %v8775_v57 = vmov 0.0   ;;  %v5984_v63 = vld [vmem:[#allocation10 + $0x1ec] sm:$0xf0] }
  0x63   :  { %9077 = vst [vmem:[#allocation73_spill] sm:$0xff] %v6725_v39  ;;  %v5326_v7 = vld [vmem:[#allocation10 + $0x28] sm:$0xf0]  ;;  %v5532_v32 = vld [vmem:[#allocation10 + $0x198] sm:$0xf] }
  0x64   :  { %9078 = vst [vmem:[#allocation74_spill] sm:$0xff] %v6727_v44  ;;  %1514 = vmatpush.bf16.msra.mxu2 %v6725_v39  ;;  %v5987_v8 = vld [vmem:[#allocation10 + $0x20c] sm:$0xf]  ;;  %v6745_v24 = vor.u32 %v5923_v4, %v5326_v7  ;;  %v5812_v4 = vld [vmem:[#allocation10 + $0x3d0] sm:$0xf] }
  0x65   :  { %v6729_v50 = vld.sshfl [vmem:[#allocation1] sm:$0xff pattern:$0x75316420]  ;;  %v6731_v54 = vld.sshfl [vmem:[#allocation1 + $0x8] sm:$0xff pattern:$0x75316420]  ;;  %1527 = vmatpush.bf16.msra.mxu3 %v6727_v44 }
  0x66   :  { %271 = vst [vmem:[#allocation1] ss:$2 sm:$0xff] %v6657_v15  ;;  %v5582_v9 = vld [vmem:[#allocation10 + $0x228] sm:$0xf0]  ;;  %v6048_v7 = vld [vmem:[#allocation10 + $0x3ec] sm:$0xf0] }
  0x67   :  { %272 = vst [vmem:[#allocation1 + $0x1] ss:$2 sm:$0xff] %v6657_v15  ;;  %v6747_v14 = vor.u32 %v5987_v8, %v5582_v9  ;;  %v5556_v9 = vld [vmem:[#allocation10 + $0x1d0] sm:$0xf]  ;;  %v5980_v8 = vld [vmem:[#allocation10 + $0x1d4] sm:$0xf]  ;;  %v6768_v31 = vor.u32 %v6048_v7, %v5812_v4 }
  0x68   :  { %9079 = vst [vmem:[#allocation75_spill] sm:$0xff] %v6739_v58  ;;  %1515 = vmatpush.bf16.msra.mxu2 %v6739_v58  ;;  %v6044_v58 = vld [vmem:[#allocation10 + $0x3d4] sm:$0xf]  ;;  %v6766_v0 = vor.u32 %v5984_v63, %v5556_v9  ;;  %v5968_v9 = vld [vmem:[#allocation10 + $0x16c] sm:$0xf0] }
  0x69   :  { %9080 = vst [vmem:[#allocation76_spill] sm:$0xff] %v6741_v3  ;;  %1528 = vmatpush.bf16.msra.mxu3 %v6741_v3  ;;  %v5558_v3 = vld [vmem:[#allocation10 + $0x1f0] sm:$0xf0]  ;;  %v5748_v7 = vld [vmem:[#allocation10 + $0x350] sm:$0xf] }
  0x6a   :  { %9081 = vst [vmem:[#allocation77_spill] sm:$0xff] %v6745_v24  ;;  %v5814_v44 = vld [vmem:[#allocation10 + $0x3f0] sm:$0xf0]  ;;  %v6770_v19 = vor.u32 %v5980_v8, %v5558_v3  ;;  %v5492_v3 = vld [vmem:[#allocation10 + $0x150] sm:$0xf] }
  0x6b   :  { %9082 = vst [vmem:[#allocation78_spill] sm:$0xff] %v6747_v14  ;;  %v6772_v56 = vor.u32 %v6044_v58, %v5814_v44  ;;  %v6782_v58 = vor.u32 %v6040_v48, %v5780_v55  ;;  %v6032_v8 = vld [vmem:[#allocation10 + $0x36c] sm:$0xf0]  ;;  %v6792_v55 = vor.u32 %v5968_v9, %v5492_v3  ;;  %v5977_v62 = vld [vmem:[#allocation10 + $0x1b4] sm:$0xf0] }
  0x6c   :  { %1516 = vmatpush.bf16.msra.mxu2 %v6745_v24  ;;  %9083 = vst [vmem:[#allocation79_spill] sm:$0xff] %v6766_v0  ;;  %v6794_v48 = vor.u32 %v6032_v8, %v5748_v7  ;;  %v5428_v7 = vld [vmem:[#allocation10 + $0xd0] sm:$0xf] }
  0x6d   :  { %1529 = vmatpush.bf16.msra.mxu3 %v6747_v14  ;;  %9084 = vst [vmem:[#allocation80_spill] sm:$0xff] %v6768_v31  ;;  %v5952_v8 = vld [vmem:[#allocation10 + $0xec] sm:$0xf0] }
  0x6e   :  { %v6749_v49 = vld.sshfl [vmem:[#allocation1] sm:$0xff pattern:$0x75316420]  ;;  %v6751_v39 = vld.sshfl [vmem:[#allocation1 + $0x8] sm:$0xff pattern:$0x75316420] }
  0x6f   :  { %287 = vst [vmem:[#allocation1] ss:$2 sm:$0xff] %v6657_v15 }
  0x70   :  { %288 = vst [vmem:[#allocation1 + $0x1] ss:$2 sm:$0xff] %v6657_v15 }
  0x71   :  { %9085 = vst [vmem:[#allocation81_spill] sm:$0xff] %v6770_v19 }
  0x72   :  { %9086 = vst [vmem:[#allocation82_spill] sm:$0xff] %v6772_v56 }
  0x73   :  { %9088 = vst [vmem:[#allocation84_spill] sm:$0xff] %v6782_v58 }
  0x74   :  { %9091 = vst [vmem:[#allocation87_spill] sm:$0xff] %v6792_v55 }
  0x75   :  { %9092 = vst [vmem:[#allocation88_spill] sm:$0xff] %v6794_v48 }
  0x77   :  { %v6757_v25 = vld.sshfl [vmem:[#allocation1] sm:$0xff pattern:$0x75316420]  ;;  %v6759_v36 = vld.sshfl [vmem:[#allocation1 + $0x8] sm:$0xff pattern:$0x75316420] }
  0x78   :  { %784 = vst [vmem:[#allocation1] ss:$2 sm:$0xff] %v8775_v57  ;;  %v5976_v57 = vld [vmem:[#allocation10 + $0x1ac] sm:$0xf0] }
  0x79   :  { %v6780_v44 = vor.u32 %v5976_v57, %v5524_v30  ;;  %v5460_v30 = vld [vmem:[#allocation10 + $0x110] sm:$0xf] }
  0x7a   :  { %v5960_v57 = vld [vmem:[#allocation10 + $0x12c] sm:$0xf0] }
  0x7b   :  { %9087 = vst [vmem:[#allocation83_spill] sm:$0xff] %v6780_v44  ;;  %v6804_v3 = vor.u32 %v5960_v57, %v5460_v30  ;;  %v6816_v30 = vor.u32 %v5952_v8, %v5428_v7 }
  0x7d   :  { %9095 = vst [vmem:[#allocation91_spill] sm:$0xff] %v6804_v3 }
  0x7e   :  { %9099 = vst [vmem:[#allocation95_spill] sm:$0xff] %v6816_v30 }
  0x7f   :  { %v785_v15 = vld.sshfl [vmem:[#allocation1] sm:$0xff pattern:$0x75316420]  ;;  %v786_v51 = vld.sshfl [vmem:[#allocation1 + $0x8] sm:$0xff pattern:$0x75316420] }
  0x80   :  { %v6762_v24 = vpack.c.bf16 %v785_v15, %v785_v15  ;;  %v6764_v14 = vpack.c.bf16 %v786_v51, %v786_v51  ;;  %v5526_v15 = vld [vmem:[#allocation10 + $0x1b0] sm:$0xf0] }
  0x81   :  { %v6036_v51 = vld [vmem:[#allocation10 + $0x394] sm:$0xf]  ;;  %v6786_v63 = vor.u32 %v5972_v45, %v5526_v15  ;;  %v5716_v15 = vld [vmem:[#allocation10 + $0x310] sm:$0xf] }
  0x82   :  { %1439 = vmatmul.bf16.vlgmr.msra.gmra.mxu0 %v6762_v24  ;;  %1452 = vmatmul.bf16.vlgmr.msra.gmra.mxu1 %v6764_v14  ;;  %v6788_v4 = vor.u32 %v6036_v51, %v5782_v18  ;;  %v6024_v51 = vld [vmem:[#allocation10 + $0x32c] sm:$0xf0] }
  0x83   :  { %1465 = vmatmul.bf16.vlgmr.msrb.gmra.mxu2 %v6762_v24  ;;  %1478 = vmatmul.bf16.vlgmr.msrb.gmra.mxu3 %v6764_v14  ;;  %9089 = vst [vmem:[#allocation85_spill] sm:$0xff] %v6786_v63  ;;  %v6806_v9 = vor.u32 %v6024_v51, %v5716_v15  ;;  %v5396_v15 = vld [vmem:[#allocation10 + $0x90] sm:$0xf] }
  0x84   :  { %1535 = vmatpush.bf16.msra.mxu0 %v6766_v0  ;;  %1548 = vmatpush.bf16.msra.mxu1 %v6768_v31  ;;  %9090 = vst [vmem:[#allocation86_spill] sm:$0xff] %v6788_v4  ;;  %v5494_v0 = vld [vmem:[#allocation10 + $0x170] sm:$0xf0]  ;;  %v5944_v51 = vld [vmem:[#allocation10 + $0xac] sm:$0xf0] }
  0x85   :  { %1561 = vmatpush.bf16.msrb.mxu2 %v6770_v19  ;;  %1574 = vmatpush.bf16.msrb.mxu3 %v6772_v56  ;;  %v5750_v31 = vld [vmem:[#allocation10 + $0x370] sm:$0xf0]  ;;  %v6798_v18 = vor.u32 %v5964_v17, %v5494_v0  ;;  %9096 = vst [vmem:[#allocation92_spill] sm:$0xff] %v6806_v9  ;;  %v6016_v0 = vld [vmem:[#allocation10 + $0x2ec] sm:$0xf0] }
  0x86   :  { %v6800_v45 = vor.u32 %v6028_v38, %v5750_v31  ;;  %v5956_v56 = vld [vmem:[#allocation10 + $0x114] sm:$0xf]  ;;  %v5684_v31 = vld [vmem:[#allocation10 + $0x2d0] sm:$0xf] }
  0x87   :  { %9093 = vst [vmem:[#allocation89_spill] sm:$0xff] %v6798_v18  ;;  %v6020_v19 = vld [vmem:[#allocation10 + $0x314] sm:$0xf]  ;;  %v6818_v57 = vor.u32 %v6016_v0, %v5684_v31  ;;  %v5620_v31 = vld [vmem:[#allocation10 + $0x250] sm:$0xf] }
  0x88   :  { %1536 = vmatpush.bf16.msra.mxu0 %v6780_v44  ;;  %1549 = vmatpush.bf16.msra.mxu1 %v6782_v58  ;;  %9094 = vst [vmem:[#allocation90_spill] sm:$0xff] %v6800_v45  ;;  %v5462_v44 = vld [vmem:[#allocation10 + $0x130] sm:$0xf0]  ;;  %v6000_v0 = vld [vmem:[#allocation10 + $0x26c] sm:$0xf0] }
  0x89   :  { %1562 = vmatpush.bf16.msrb.mxu2 %v6786_v63  ;;  %1575 = vmatpush.bf16.msrb.mxu3 %v6788_v4  ;;  %v5718_v58 = vld [vmem:[#allocation10 + $0x330] sm:$0xf0]  ;;  %v6810_v38 = vor.u32 %v5956_v56, %v5462_v44  ;;  %9100 = vst [vmem:[#allocation96_spill] sm:$0xff] %v6818_v57  ;;  %v5652_v44 = vld [vmem:[#allocation10 + $0x290] sm:$0xf] }
  0x8a   :  { %v6812_v17 = vor.u32 %v6020_v19, %v5718_v58  ;;  %v5948_v4 = vld [vmem:[#allocation10 + $0xd4] sm:$0xf]  ;;  %v6008_v58 = vld [vmem:[#allocation10 + $0x2ac] sm:$0xf0] }
  0x8b   :  { %9097 = vst [vmem:[#allocation93_spill] sm:$0xff] %v6810_v38  ;;  %v6012_v63 = vld [vmem:[#allocation10 + $0x2d4] sm:$0xf] }
  0x8c   :  { %1537 = vmatpush.bf16.msra.mxu0 %v6792_v55  ;;  %1550 = vmatpush.bf16.msra.mxu1 %v6794_v48  ;;  %9098 = vst [vmem:[#allocation94_spill] sm:$0xff] %v6812_v17  ;;  %v5430_v55 = vld [vmem:[#allocation10 + $0xf0] sm:$0xf0] }
  0x8d   :  { %1563 = vmatpush.bf16.msrb.mxu2 %v6798_v18  ;;  %1576 = vmatpush.bf16.msrb.mxu3 %v6800_v45  ;;  %v5686_v48 = vld [vmem:[#allocation10 + $0x2f0] sm:$0xf0]  ;;  %v6822_v56 = vor.u32 %v5948_v4, %v5430_v55  ;;  %v6834_v4 = vor.u32 %v6008_v58, %v5652_v44  ;;  %v5364_v55 = vld [vmem:[#allocation10 + $0x50] sm:$0xf]  ;;  %v6846_v44 = vor.u32 %v6000_v0, %v5620_v31  ;;  %v6049_v31 = vld [vmem:[#allocation10 + $0x3f4] sm:$0xf0] }
  0x8e   :  { %v6824_v19 = vor.u32 %v6012_v63, %v5686_v48  ;;  %v5940_v45 = vld [vmem:[#allocation10 + $0x94] sm:$0xf]  ;;  %v6832_v63 = vor.u32 %v5944_v51, %v5396_v15  ;;  %v5936_v48 = vld [vmem:[#allocation10 + $0x6c] sm:$0xf0]  ;;  %v5981_v0 = vld [vmem:[#allocation10 + $0x1dc] sm:$0xf] }
  0x8f   :  { %9101 = vst [vmem:[#allocation97_spill] sm:$0xff] %v6822_v56  ;;  %v6004_v18 = vld [vmem:[#allocation10 + $0x294] sm:$0xf]  ;;  %v5332_v15 = vld [vmem:[#allocation10 + $0x10] sm:$0xf]  ;;  %v6844_v51 = vor.u32 %v5936_v48, %v5364_v55 }
  0x90   :  { %1538 = vmatpush.bf16.msra.mxu0 %v6804_v3  ;;  %1551 = vmatpush.bf16.msra.mxu1 %v6806_v9  ;;  %9102 = vst [vmem:[#allocation98_spill] sm:$0xff] %v6824_v19  ;;  %v5398_v3 = vld [vmem:[#allocation10 + $0xb0] sm:$0xf0]  ;;  %v5928_v58 = vld [vmem:[#allocation10 + $0x2c] sm:$0xf0] }
  0x91   :  { %1564 = vmatpush.bf16.msrb.mxu2 %v6810_v38  ;;  %1577 = vmatpush.bf16.msrb.mxu3 %v6812_v17  ;;  %v5654_v9 = vld [vmem:[#allocation10 + $0x2b0] sm:$0xf0]  ;;  %9103 = vst [vmem:[#allocation99_spill] sm:$0xff] %v6832_v63  ;;  %v6838_v7 = vor.u32 %v5940_v45, %v5398_v3  ;;  %v5588_v45 = vld [vmem:[#allocation10 + $0x210] sm:$0xf] }
  0x92   :  { %1491 = vmatmul.bf16.vlgmr.msrb.gmra.mxu0 %v6762_v24  ;;  %1504 = vmatmul.bf16.vlgmr.msrb.gmra.mxu1 %v6764_v14  ;;  %9104 = vst [vmem:[#allocation100_spill] sm:$0xff] %v6834_v4  ;;  %v6840_v8 = vor.u32 %v6004_v18, %v5654_v9  ;;  %v5932_v17 = vld [vmem:[#allocation10 + $0x54] sm:$0xf]  ;;  %v5992_v3 = vld [vmem:[#allocation10 + $0x22c] sm:$0xf0] }
  0x93   :  { %1517 = vmatmul.bf16.vlgmr.msra.gmra.mxu2 %v6762_v24  ;;  %1530 = vmatmul.bf16.vlgmr.msra.gmra.mxu3 %v6764_v14  ;;  %9105 = vst [vmem:[#allocation101_spill] sm:$0xff] %v6838_v7  ;;  %v5996_v38 = vld [vmem:[#allocation10 + $0x254] sm:$0xf]  ;;  %v5985_v55 = vld [vmem:[#allocation10 + $0x1f4] sm:$0xf0] }
  0x94   :  { %1539 = vmatpush.bf16.msra.mxu0 %v6816_v30  ;;  %1552 = vmatpush.bf16.msra.mxu1 %v6818_v57  ;;  %9106 = vst [vmem:[#allocation102_spill] sm:$0xff] %v6840_v8  ;;  %v5366_v30 = vld [vmem:[#allocation10 + $0x70] sm:$0xf0]  ;;  %v5820_v48 = vld [vmem:[#allocation10 + $0x3d8] sm:$0xf] }
  0x95   :  { %1565 = vmatpush.bf16.msrb.mxu2 %v6822_v56  ;;  %1578 = vmatpush.bf16.msrb.mxu3 %v6824_v19  ;;  %v5622_v57 = vld [vmem:[#allocation10 + $0x270] sm:$0xf0]  ;;  %9107 = vst [vmem:[#allocation103_spill] sm:$0xff] %v6844_v51  ;;  %v6850_v18 = vor.u32 %v5932_v17, %v5366_v30  ;;  %v5566_v17 = vld [vmem:[#allocation10 + $0x1f8] sm:$0xf0] }
  0x96   :  { %9108 = vst [vmem:[#allocation104_spill] sm:$0xff] %v6846_v44  ;;  %v6852_v9 = vor.u32 %v5996_v38, %v5622_v57  ;;  %v5924_v19 = vld [vmem:[#allocation10 + $0x14] sm:$0xf]  ;;  %v6045_v38 = vld [vmem:[#allocation10 + $0x3dc] sm:$0xf] }
  0x97   :  { %9109 = vst [vmem:[#allocation105_spill] sm:$0xff] %v6850_v18  ;;  %v5334_v56 = vld [vmem:[#allocation10 + $0x30] sm:$0xf0]  ;;  %v5822_v30 = vld [vmem:[#allocation10 + $0x3f8] sm:$0xf0] }
  0x98   :  { %1540 = vmatpush.bf16.msra.mxu0 %v6832_v63  ;;  %1553 = vmatpush.bf16.msra.mxu1 %v6834_v4  ;;  %9110 = vst [vmem:[#allocation106_spill] sm:$0xff] %v6852_v9  ;;  %v5988_v63 = vld [vmem:[#allocation10 + $0x214] sm:$0xf]  ;;  %v5564_v4 = vld [vmem:[#allocation10 + $0x1d8] sm:$0xf]  ;;  %v6862_v57 = vor.u32 %v5924_v19, %v5334_v56  ;;  %v6873_v61 = vor.u32 %v6045_v38, %v5822_v30  ;;  %v112_v56 = vperm.slane %v6634_v16, 2 }
  0x99   :  { %1566 = vmatpush.bf16.msrb.mxu2 %v6838_v7  ;;  %1579 = vmatpush.bf16.msrb.mxu3 %v6840_v8  ;;  %v6856_v7 = vor.u32 %v5928_v58, %v5332_v15  ;;  %v6858_v8 = vor.u32 %v5992_v3, %v5588_v45  ;;  %v6864_v33 = vor.u32 %v5988_v63, %v5590_v37  ;;  %v5788_v15 = vld [vmem:[#allocation10 + $0x398] sm:$0xf]  ;;  %v113_v45 = vperm.slane %v6634_v16, 3  ;;  %v6037_v37 = vld [vmem:[#allocation10 + $0x39c] sm:$0xf] }
  0x9a   :  { %9113 = vst [vmem:[#allocation109_spill] sm:$0xff] %v6862_v57  ;;  %v6041_v58 = vld [vmem:[#allocation10 + $0x3b4] sm:$0xf0]  ;;  %v6871_v3 = vor.u32 %v5981_v0, %v5566_v17  ;;  %v5790_v19 = vld [vmem:[#allocation10 + $0x3b8] sm:$0xf0] }
  0x9b   :  { %9111 = vst [vmem:[#allocation107_spill] sm:$0xff] %v6856_v7  ;;  %v119_v63 = vrot.slane %v113_v45, 4  ;;  %v5756_v0 = vld [vmem:[#allocation10 + $0x358] sm:$0xf]  ;;  %v6893_v45 = vor.u32 %v6037_v37, %v5790_v19 }
  0x9c   :  { %1541 = vmatpush.bf16.msra.mxu0 %v6844_v51  ;;  %1554 = vmatpush.bf16.msra.mxu1 %v6846_v44  ;;  %9112 = vst [vmem:[#allocation108_spill] sm:$0xff] %v6858_v8  ;;  %v6866_v51 = vor.u32 %v5985_v55, %v5564_v4  ;;  %v6868_v44 = vor.u32 %v6049_v31, %v5820_v48  ;;  %v5500_v4 = vld [vmem:[#allocation10 + $0x158] sm:$0xf] }
  0x9d   :  { %1567 = vmatpush.bf16.msrb.mxu2 %v6850_v18  ;;  %1580 = vmatpush.bf16.msrb.mxu3 %v6852_v9  ;;  %9114 = vst [vmem:[#allocation110_spill] sm:$0xff] %v6864_v33  ;;  %v5973_v18 = vld [vmem:[#allocation10 + $0x19c] sm:$0xf]  ;;  %v6882_v55 = vor.u32 %v5977_v62, %v5532_v32  ;;  %v6884_v48 = vor.u32 %v6041_v58, %v5788_v15  ;;  %v5969_v31 = vld [vmem:[#allocation10 + $0x174] sm:$0xf0] }
  0x9e   :  { %9115 = vst [vmem:[#allocation111_spill] sm:$0xff] %v6866_v51  ;;  %v5534_v9 = vld [vmem:[#allocation10 + $0x1b8] sm:$0xf0]  ;;  %v6033_v17 = vld [vmem:[#allocation10 + $0x374] sm:$0xf0]  ;;  %v6887_v38 = vsel %vm122_vm1, %v112_v56, %v119_v63 }
  0x9f   :  { %9116 = vst [vmem:[#allocation112_spill] sm:$0xff] %v6868_v44  ;;  %v6891_v30 = vor.u32 %v5973_v18, %v5534_v9  ;;  %v6029_v32 = vld [vmem:[#allocation10 + $0x35c] sm:$0xf]  ;;  %v6903_v18 = vor.u32 %v5969_v31, %v5500_v4  ;;  %v6905_v9 = vor.u32 %v6033_v17, %v5756_v0  ;;  %v5468_v15 = vld [vmem:[#allocation10 + $0x118] sm:$0xf] }
  0xa0   :  { %9117 = vst [vmem:[#allocation113_spill] sm:$0xff] %v6871_v3  ;;  %1542 = vmatpush.bf16.msra.mxu0 %v6856_v7  ;;  %1555 = vmatpush.bf16.msra.mxu1 %v6858_v8  ;;  %v5758_v62 = vld [vmem:[#allocation10 + $0x378] sm:$0xf0]  ;;  %v5961_v58 = vld [vmem:[#allocation10 + $0x134] sm:$0xf0] }
  0xa1   :  { %9118 = vst [vmem:[#allocation114_spill] sm:$0xff] %v6873_v61  ;;  %1568 = vmatpush.bf16.msrb.mxu2 %v6862_v57  ;;  %1581 = vmatpush.bf16.msrb.mxu3 %v6864_v33  ;;  %v368_v56 = vpop.f32.mrf.mxu1  ;;  %v6911_v19 = vor.u32 %v6029_v32, %v5758_v62  ;;  %v5724_v63 = vld [vmem:[#allocation10 + $0x318] sm:$0xf]  ;;  %v5470_v31 = vld [vmem:[#allocation10 + $0x138] sm:$0xf0] }
  0xa2   :  { %9119 = vst [vmem:[#allocation115_spill] sm:$0xff] %v6882_v55  ;;  %v6914_v4 = vadd.f32 %v368_v56, %v6691_v27  ;;  %v6021_v0 = vld [vmem:[#allocation10 + $0x31c] sm:$0xf]  ;;  %v5436_v57 = vld [vmem:[#allocation10 + $0xd8] sm:$0xf]  ;;  %v6923_v27 = vor.u32 %v5961_v58, %v5468_v15 }
  0xa3   :  { %9120 = vst [vmem:[#allocation116_spill] sm:$0xff] %v6884_v48  ;;  %1543 = vmatmul.bf16.vlgmr.msra.gmra.mxu0 %v6762_v24  ;;  %1556 = vmatmul.bf16.vlgmr.msra.gmra.mxu1 %v6764_v14  ;;  %v5726_v17 = vld [vmem:[#allocation10 + $0x338] sm:$0xf0] }
  0xa4   :  { %1587 = vmatpush.bf16.msrb.mxu0 %v6866_v51  ;;  %1600 = vmatpush.bf16.msrb.mxu1 %v6868_v44  ;;  %9121 = vst [vmem:[#allocation117_spill] sm:$0xff] %v6891_v30  ;;  %v5965_v51 = vld [vmem:[#allocation10 + $0x15c] sm:$0xf] }
  0xa5   :  { %1613 = vmatpush.bf16.msra.mxu2 %v6871_v3  ;;  %1626 = vmatpush.bf16.msra.mxu3 %v6873_v61  ;;  %9122 = vst [vmem:[#allocation118_spill] sm:$0xff] %v6893_v45  ;;  %v5502_v44 = vld [vmem:[#allocation10 + $0x178] sm:$0xf0]  ;;  %v6025_v61 = vld [vmem:[#allocation10 + $0x334] sm:$0xf0]  ;;  %v354_v3 = vpop.f32.mrf.mxu2 }
  0xa6   :  { %236 = vst [vmem:[#allocation1 + $0x10] ss:$2 sm:$0xff] %v6887_v38  ;;  %1569 = vmatmul.bf16.vlgmr.msrb.gmra.mxu2 %v6762_v24  ;;  %1582 = vmatmul.bf16.vlgmr.msrb.gmra.mxu3 %v6764_v14  ;;  %v6909_v37 = vor.u32 %v5965_v51, %v5502_v44  ;;  %v5692_v51 = vld [vmem:[#allocation10 + $0x2d8] sm:$0xf]  ;;  %v6925_v56 = vor.u32 %v6025_v61, %v5724_v63  ;;  %v5949_v8 = vld [vmem:[#allocation10 + $0xdc] sm:$0xf] }
  0xa7   :  { %238 = vst [vmem:[#allocation1 + $0x11] ss:$2 sm:$0xff] %v6887_v38  ;;  %v6017_v44 = vld [vmem:[#allocation10 + $0x2f4] sm:$0xf0] }
  0xa8   :  { %1588 = vmatpush.bf16.msrb.mxu0 %v6882_v55  ;;  %1601 = vmatpush.bf16.msrb.mxu1 %v6884_v48  ;;  %9123 = vst [vmem:[#allocation119_spill] sm:$0xff] %v6903_v18  ;;  %v5957_v55 = vld [vmem:[#allocation10 + $0x11c] sm:$0xf]  ;;  %v373_v48 = vpop.f32.mrf.mxu3 }
  0xa9   :  { %9124 = vst [vmem:[#allocation120_spill] sm:$0xff] %v6905_v9  ;;  %1614 = vmatpush.bf16.msra.mxu2 %v6891_v30  ;;  %1627 = vmatpush.bf16.msra.mxu3 %v6893_v45  ;;  %v374_v33 = vadd.f32 %v373_v48, %v6751_v39  ;;  %v349_v30 = vpop.f32.mrf.mxu0  ;;  %v5953_v45 = vld [vmem:[#allocation10 + $0xf4] sm:$0xf0]  ;;  %v5438_v39 = vld [vmem:[#allocation10 + $0xf8] sm:$0xf0]  ;;  %v355_v48 = vadd.f32 %v354_v3, %v6749_v49 }
  0xaa   :  { %9125 = vst [vmem:[#allocation121_spill] sm:$0xff] %v6909_v37  ;;  %v6919_v62 = vadd.f32 %v349_v30, %v6689_v26  ;;  %v6930_v32 = vor.u32 %v5957_v55, %v5470_v31  ;;  %v6932_v26 = vor.u32 %v6021_v0, %v5726_v17  ;;  %v9131_v30 = vrot.slane %v6914_v4, 4  ;;  %v6013_v49 = vld [vmem:[#allocation10 + $0x2dc] sm:$0xf]  ;;  %v5404_v0 = vld [vmem:[#allocation10 + $0x98] sm:$0xf] }
  0xab   :  { %9126 = vst [vmem:[#allocation122_spill] sm:$0xff] %v6911_v19  ;;  %v532_v7 = vrot.slane %v374_v33, 4  ;;  %v5694_v33 = vld [vmem:[#allocation10 + $0x2f8] sm:$0xf0]  ;;  %v6954_v63 = vor.u32 %v5953_v45, %v5436_v57  ;;  %v6956_v31 = vor.u32 %v6017_v44, %v5692_v51  ;;  %v5945_v17 = vld [vmem:[#allocation10 + $0xb4] sm:$0xf0] }
  0xac   :  { %1589 = vmatpush.bf16.msrb.mxu0 %v6903_v18  ;;  %1602 = vmatpush.bf16.msrb.mxu1 %v6905_v9  ;;  %9127 = vst [vmem:[#allocation123_spill] sm:$0xff] %v6923_v27  ;;  %v6938_v15 = vsel %vm122_vm1, %v9131_v30, %v6919_v62  ;;  %v370_v30 = vpop.f32.mrf.mxu1  ;;  %v5406_v45 = vld [vmem:[#allocation10 + $0xb8] sm:$0xf0]  ;;  %v5596_v9 = vld [vmem:[#allocation10 + $0x218] sm:$0xf] }
  0xad   :  { %9128 = vst [vmem:[#allocation124_spill] sm:$0xff] %v6925_v56  ;;  %1615 = vmatpush.bf16.msra.mxu2 %v6909_v37  ;;  %1628 = vmatpush.bf16.msra.mxu3 %v6911_v19  ;;  %v6945_v3 = vsel %vm122_vm1, %v355_v48, %v532_v7  ;;  %v6948_v55 = vsel %vm122_vm1, %v532_v7, %v355_v48  ;;  %v6005_v51 = vld [vmem:[#allocation10 + $0x29c] sm:$0xf]  ;;  %v6001_v37 = vld [vmem:[#allocation10 + $0x274] sm:$0xf0] }
  0xae   :  { %9129 = vst [vmem:[#allocation125_spill] sm:$0xff] %v6930_v32  ;;  %v6940_v61 = vld.sshfl [vmem:[#allocation1 + $0x10] sm:$0xff pattern:$0x75316420]  ;;  %v6960_v7 = vor.u32 %v5949_v8, %v5438_v39  ;;  %v6962_v48 = vor.u32 %v6013_v49, %v5694_v33  ;;  %v6965_v57 = vadd.f32 %v370_v30, %v6731_v54  ;;  %v5662_v44 = vld [vmem:[#allocation10 + $0x2b8] sm:$0xf0]  ;;  %v6976_v54 = vor.u32 %v5945_v17, %v5404_v0 }
  0xaf   :  { %9130 = vst [vmem:[#allocation126_spill] sm:$0xff] %v6932_v26  ;;  %v6942_v58 = vld.sshfl [vmem:[#allocation1 + $0x18] sm:$0xff pattern:$0x75316420]  ;;  %v5937_v8 = vld [vmem:[#allocation10 + $0x74] sm:$0xf0] }
  0xb0   :  { %9132 = vst [vmem:[#allocation127_spill] sm:$0xff] %v6938_v15  ;;  %1590 = vmatpush.bf16.msrb.mxu0 %v6923_v27  ;;  %1603 = vmatpush.bf16.msrb.mxu1 %v6925_v56  ;;  %v5941_v15 = vld [vmem:[#allocation10 + $0x9c] sm:$0xf]  ;;  %v356_v27 = vpop.f32.mrf.mxu2  ;;  %v375_v56 = vpop.f32.mrf.mxu3  ;;  %v5628_v39 = vld [vmem:[#allocation10 + $0x258] sm:$0xf] }
  0xb1   :  { %9133 = vst [vmem:[#allocation128_spill] sm:$0xff] %v6945_v3  ;;  %1616 = vmatpush.bf16.msra.mxu2 %v6930_v32  ;;  %1629 = vmatpush.bf16.msra.mxu3 %v6932_v26  ;;  %v6009_v3 = vld [vmem:[#allocation10 + $0x2b4] sm:$0xf0]  ;;  %v6968_v19 = vadd.f32 %v375_v56, %v6759_v36  ;;  %v351_v32 = vpop.f32.mrf.mxu0  ;;  %v5933_v36 = vld [vmem:[#allocation10 + $0x5c] sm:$0xf]  ;;  %v6981_v56 = vadd.f32 %v356_v27, %v6757_v25 }
  0xb2   :  { %9134 = vst [vmem:[#allocation129_spill] sm:$0xff] %v6948_v55  ;;  %v5660_v55 = vld [vmem:[#allocation10 + $0x298] sm:$0xf]  ;;  %v6972_v33 = vadd.f32 %v351_v32, %v6729_v50  ;;  %v6986_v50 = vor.u32 %v5941_v15, %v5406_v45  ;;  %v6988_v32 = vor.u32 %v6005_v51, %v5662_v44  ;;  %v5374_v49 = vld [vmem:[#allocation10 + $0x78] sm:$0xf0]  ;;  %v114_v44 = vperm.slane %v6634_v16, 4 }
  0xb3   :  { %257 = vst [vmem:[#allocation1 + $0x10] ss:$2 sm:$0xff] %v6887_v38  ;;  %v5372_v26 = vld [vmem:[#allocation10 + $0x58] sm:$0xf]  ;;  %v6978_v30 = vor.u32 %v6009_v3, %v5660_v55  ;;  %v5997_v0 = vld [vmem:[#allocation10 + $0x25c] sm:$0xf] }
  0xb4   :  { %258 = vst [vmem:[#allocation1 + $0x11] ss:$2 sm:$0xff] %v6887_v38  ;;  %1591 = vmatpush.bf16.msrb.mxu0 %v6954_v63  ;;  %1604 = vmatpush.bf16.msrb.mxu1 %v6956_v31  ;;  %v5630_v17 = vld [vmem:[#allocation10 + $0x278] sm:$0xf0]  ;;  %v9147_v3 = vrot.slane %v6965_v57, 4 }
  0xb5   :  { %9135 = vst [vmem:[#allocation130_spill] sm:$0xff] %v6954_v63  ;;  %1617 = vmatpush.bf16.msra.mxu2 %v6960_v7  ;;  %1630 = vmatpush.bf16.msra.mxu3 %v6962_v48  ;;  %v5340_v25 = vld [vmem:[#allocation10 + $0x18] sm:$0xf] }
  0xb6   :  { %9136 = vst [vmem:[#allocation131_spill] sm:$0xff] %v6956_v31  ;;  %v6994_v55 = vsel %vm122_vm1, %v9147_v3, %v6972_v33  ;;  %v5929_v27 = vld [vmem:[#allocation10 + $0x34] sm:$0xf0]  ;;  %v7006_v3 = vor.u32 %v5937_v8, %v5372_v26 }
  0xb7   :  { %9137 = vst [vmem:[#allocation132_spill] sm:$0xff] %v6960_v7  ;;  %v5993_v31 = vld [vmem:[#allocation10 + $0x234] sm:$0xf0]  ;;  %v115_v7 = vperm.slane %v6634_v16, 5 }
  0xb8   :  { %9138 = vst [vmem:[#allocation133_spill] sm:$0xff] %v6962_v48  ;;  %v9149_v48 = vrot.slane %v6968_v19, 4  ;;  %1592 = vmatpush.bf16.msrb.mxu0 %v6976_v54  ;;  %1605 = vmatpush.bf16.msrb.mxu1 %v6978_v30  ;;  %v387_v26 = vpop.f32.mrf.mxu2  ;;  %v406_v8 = vpop.f32.mrf.mxu3 }
  0xb9   :  { %9139 = vst [vmem:[#allocation134_spill] sm:$0xff] %v6965_v57  ;;  %1618 = vmatpush.bf16.msra.mxu2 %v6986_v50  ;;  %1631 = vmatpush.bf16.msra.mxu3 %v6988_v32  ;;  %v5342_v57 = vld [vmem:[#allocation10 + $0x38] sm:$0xf0] }
  0xba   :  { %9140 = vst [vmem:[#allocation135_spill] sm:$0xff] %v6968_v19  ;;  %v7000_v15 = vsel %vm122_vm1, %v9149_v48, %v6981_v56  ;;  %v116_v48 = vperm.slane %v6634_v16, 6  ;;  %v7017_v19 = vor.u32 %v5997_v0, %v5630_v17 }
  0xbb   :  { %9141 = vst [vmem:[#allocation136_spill] sm:$0xff] %v6972_v33  ;;  %v265_v45 = vld.sshfl [vmem:[#allocation1 + $0x10] sm:$0xff pattern:$0x75316420]  ;;  %v5925_v33 = vld [vmem:[#allocation10 + $0x1c] sm:$0xf] }
  0xbc   :  { %9142 = vst [vmem:[#allocation137_spill] sm:$0xff] %v6976_v54  ;;  %v266_v51 = vld.sshfl [vmem:[#allocation1 + $0x18] sm:$0xff pattern:$0x75316420]  ;;  %v407_v54 = vadd.f32 %v406_v8, %v6942_v58  ;;  %1593 = vmatpush.bf16.msrb.mxu0 %v7006_v3 }
  0xbd   :  { %9143 = vst [vmem:[#allocation138_spill] sm:$0xff] %v6978_v30  ;;  %v5598_v30 = vld [vmem:[#allocation10 + $0x238] sm:$0xf0]  ;;  %1632 = vmatpush.bf16.msra.mxu3 %v7017_v19 }
  0xbe   :  { %9144 = vst [vmem:[#allocation139_spill] sm:$0xff] %v6981_v56  ;;  %v7015_v56 = vor.u32 %v5933_v36, %v5374_v49  ;;  %v388_v36 = vadd.f32 %v387_v26, %v6940_v61  ;;  %v525_v0 = vrot.slane %v407_v54, 4  ;;  %v425_v54 = vpop.f32.mrf.mxu0 }
  0xbf   :  { %9145 = vst [vmem:[#allocation140_spill] sm:$0xff] %v6986_v50  ;;  %v7023_v50 = vor.u32 %v5993_v31, %v5596_v9  ;;  %v7037_v9 = vor.u32 %v5925_v33, %v5342_v57  ;;  %v444_v33 = vpop.f32.mrf.mxu1 }
  0xc0   :  { %9146 = vst [vmem:[#allocation141_spill] sm:$0xff] %v6988_v32  ;;  %1619 = vmatpush.bf16.msra.mxu2 %v7015_v56  ;;  %v7043_v31 = vsel %vm122_vm1, %v388_v36, %v525_v0  ;;  %v7046_v61 = vsel %vm122_vm1, %v525_v0, %v388_v36  ;;  %v408_v17 = vpop.f32.mrf.mxu3 }
  0xc1   :  { %9148 = vst [vmem:[#allocation142_spill] sm:$0xff] %v6994_v55  ;;  %v7008_v55 = vor.u32 %v6001_v37, %v5628_v39  ;;  %v120_v37 = vrot.slane %v115_v7, 4  ;;  %v5989_v39 = vld [vmem:[#allocation10 + $0x21c] sm:$0xf] }
  0xc2   :  { %9150 = vst [vmem:[#allocation143_spill] sm:$0xff] %v7000_v15  ;;  %v117_v15 = vperm.slane %v6634_v16, 7  ;;  %v7021_v16 = vor.u32 %v5929_v27, %v5340_v25  ;;  %v7039_v58 = vor.u32 %v5989_v39, %v5598_v30  ;;  %v389_v30 = vpop.f32.mrf.mxu2  ;;  %v7055_v25 = vadd.f32 %v408_v17, %v266_v51 }
  0xc3   :  { %9151 = vst [vmem:[#allocation144_spill] sm:$0xff] %v7006_v3  ;;  %v7026_v49 = vsel %vm122_vm1, %v114_v44, %v120_v37  ;;  %1606 = vmatpush.bf16.msrb.mxu1 %v7008_v55  ;;  %v7064_v27 = vadd.f32 %v389_v30, %v265_v45 }
  0xc4   :  { %9152 = vst [vmem:[#allocation145_spill] sm:$0xff] %v7008_v55  ;;  %v121_v63 = vrot.slane %v117_v15, 4  ;;  %1594 = vmatpush.bf16.msrb.mxu0 %v7021_v16  ;;  %1620 = vmatpush.bf16.msra.mxu2 %v7037_v9  ;;  %v8914_v15 = vrot.slane %v7055_v25, 4 }
  0xc5   :  { %273 = vst [vmem:[#allocation1 + $0x10] ss:$2 sm:$0xff] %v6887_v38  ;;  %1633 = vmatpush.bf16.msra.mxu3 %v7039_v58 }
  0xc6   :  { %9153 = vst [vmem:[#allocation146_spill] sm:$0xff] %v7015_v56  ;;  %v7033_v7 = vsel %vm122_vm1, %v116_v48, %v121_v63 }
  0xc7   :  { %9154 = vst [vmem:[#allocation147_spill] sm:$0xff] %v7017_v19  ;;  %1607 = vmatpush.bf16.msrb.mxu1 %v7023_v50  ;;  %1595 = vmatmul.bf16.vlgmr.msrb.gmra.mxu0 %v6762_v24 }
  0xc8   :  { %274 = vst [vmem:[#allocation1 + $0x11] ss:$2 sm:$0xff] %v6887_v38  ;;  %1834 = vmatpush.bf16.msra.mxu0 %v6505_v5  ;;  %1621 = vmatmul.bf16.vlgmr.msra.gmra.mxu2 %v6762_v24  ;;  %v411_v37 = vpop.f32.mrf.mxu3 }
  0xc9   :  { %9155 = vst [vmem:[#allocation148_spill] sm:$0xff] %v7021_v16  ;;  %1634 = vmatmul.bf16.vlgmr.msra.gmra.mxu3 %v6764_v14  ;;  %1860 = vmatpush.bf16.msrb.mxu2 %v6527_v28 }
  0xca   :  { %9156 = vst [vmem:[#allocation149_spill] sm:$0xff] %v7023_v50  ;;  %1608 = vmatmul.bf16.vlgmr.msrb.gmra.mxu1 %v6764_v14  ;;  %1873 = vmatpush.bf16.msrb.mxu3 %v6529_v29  ;;  %v392_v8 = vpop.f32.mrf.mxu2 }
  0xcb   :  { %240 = vst [vmem:[#allocation1 + $0x20] ss:$2 sm:$0xff] %v7026_v49  ;;  %1847 = vmatpush.bf16.msra.mxu1 %v6507_v6 }
  0xcc   :  { %9157 = vst [vmem:[#allocation150_spill] sm:$0xff] %v7037_v9  ;;  %1835 = vmatpush.bf16.msra.mxu0 %v6517_v12 }
  0xcd   :  { %9158 = vst [vmem:[#allocation151_spill] sm:$0xff] %v7039_v58  ;;  %1861 = vmatpush.bf16.msrb.mxu2 %v6543_v40 }
  0xce   :  { %242 = vst [vmem:[#allocation1 + $0x21] ss:$2 sm:$0xff] %v7026_v49  ;;  %1874 = vmatpush.bf16.msrb.mxu3 %v6545_v41 }
  0xcf   :  { %9159 = vst [vmem:[#allocation152_spill] sm:$0xff] %v7046_v61  ;;  %v281_v63 = vld.sshfl [vmem:[#allocation1 + $0x10] sm:$0xff pattern:$0x75316420]  ;;  %1848 = vmatpush.bf16.msra.mxu1 %v6519_v13 }
  0xd0   :  { %244 = vst [vmem:[#allocation1 + $0x30] ss:$2 sm:$0xff] %v7033_v7  ;;  %v282_v57 = vld.sshfl [vmem:[#allocation1 + $0x18] sm:$0xff pattern:$0x75316420]  ;;  %1836 = vmatpush.bf16.msra.mxu0 %v6523_v22  ;;  %v393_v30 = vadd.f32 %v392_v8, %v281_v63 }
  0xd1   :  { %246 = vst [vmem:[#allocation1 + $0x31] ss:$2 sm:$0xff] %v7033_v7  ;;  %v412_v0 = vadd.f32 %v411_v37, %v282_v57  ;;  %1862 = vmatpush.bf16.msrb.mxu2 %v6555_v52 }
  0xd2   :  { %289 = vst [vmem:[#allocation1 + $0x10] ss:$2 sm:$0xff] %v6887_v38  ;;  %1875 = vmatpush.bf16.msrb.mxu3 %v6557_v53  ;;  %v394_v37 = vpop.f32.mrf.mxu2 }
  0xd3   :  { %9160 = vst [vmem:[#allocation153_spill] sm:$0xff] %v7055_v25  ;;  %1849 = vmatpush.bf16.msra.mxu1 %v6525_v23  ;;  %v533_v17 = vrot.slane %v412_v0, 4  ;;  %v413_v0 = vpop.f32.mrf.mxu3  ;;  %v9187_v25 = vld [vmem:[#allocation45_spill] sm:$0xff] }
  0xd4   :  { %290 = vst [vmem:[#allocation1 + $0x11] ss:$2 sm:$0xff] %v6887_v38  ;;  %v7073_v38 = vsel %vm122_vm1, %v8914_v15, %v7064_v27  ;;  %1837 = vmatpush.bf16.msra.mxu0 %v6533_v34 }
  0xd5   :  { %9161 = vst [vmem:[#allocation154_spill] sm:$0xff] %v7064_v27  ;;  %v252_v51 = vld.sshfl [vmem:[#allocation1 + $0x28] sm:$0xff pattern:$0x75316420]  ;;  %v7097_v57 = vsel %vm122_vm1, %v533_v17, %v393_v30  ;;  %1863 = vmatpush.bf16.msrb.mxu2 %v6571_v1  ;;  %v9186_v27 = vld [vmem:[#allocation54_spill] sm:$0xff] }
  0xd6   :  { %v445_v44 = vadd.f32 %v444_v33, %v252_v51  ;;  %v251_v48 = vld.sshfl [vmem:[#allocation1 + $0x20] sm:$0xff pattern:$0x75316420]  ;;  %9162 = vst [vmem:[#allocation155_spill] sm:$0xff] %v7073_v38  ;;  %v446_v33 = vpop.f32.mrf.mxu1  ;;  %v7094_v51 = vsel %vm122_vm1, %v393_v30, %v533_v17  ;;  %1876 = vmatpush.bf16.msrb.mxu3 %v6573_v2  ;;  %v9183_v38 = vld [vmem:[#allocation51_spill] sm:$0xff] }
  0xd7   :  { %v426_v24 = vadd.f32 %v425_v54, %v251_v48  ;;  %259 = vst [vmem:[#allocation1 + $0x20] ss:$2 sm:$0xff] %v7026_v49  ;;  %v427_v54 = vpop.f32.mrf.mxu0  ;;  %1850 = vmatpush.bf16.msra.mxu1 %v6535_v35 }
  0xd8   :  { %v526_v14 = vrot.slane %v445_v44, 4  ;;  %260 = vst [vmem:[#allocation1 + $0x21] ss:$2 sm:$0xff] %v7026_v49  ;;  %v253_v45 = vld.sshfl [vmem:[#allocation1 + $0x30] sm:$0xff pattern:$0x75316420]  ;;  %1838 = vmatpush.bf16.msra.mxu0 %v6549_v46 }
  0xd9   :  { %v254_v26 = vld.sshfl [vmem:[#allocation1 + $0x38] sm:$0xff pattern:$0x75316420]  ;;  %9165 = vst [vmem:[#allocation158_spill] sm:$0xff] %v7094_v51  ;;  %1864 = vmatpush.bf16.msrb.mxu2 %v6583_v20 }
  0xda   :  { %v7080_v39 = vsel %vm122_vm1, %v426_v24, %v526_v14  ;;  %v7083_v36 = vsel %vm122_vm1, %v526_v14, %v426_v24  ;;  %261 = vst [vmem:[#allocation1 + $0x30] ss:$2 sm:$0xff] %v7033_v7  ;;  %1877 = vmatpush.bf16.msrb.mxu3 %v6585_v21 }
  0xdb   :  { %9163 = vst [vmem:[#allocation156_spill] sm:$0xff] %v7080_v39  ;;  %v298_v24 = vld.sshfl [vmem:[#allocation1 + $0x18] sm:$0xff pattern:$0x75316420]  ;;  %1851 = vmatpush.bf16.msra.mxu1 %v6551_v47 }
  0xdc   :  { %9164 = vst [vmem:[#allocation157_spill] sm:$0xff] %v7083_v36  ;;  %v297_v8 = vld.sshfl [vmem:[#allocation1 + $0x10] sm:$0xff pattern:$0x75316420]  ;;  %v7110_v17 = vadd.f32 %v413_v0, %v298_v24  ;;  %1839 = vmatpush.bf16.msra.mxu0 %v6565_v59  ;;  %v463_v36 = vpop.f32.mrf.mxu2 }
  0xdd   :  { %262 = vst [vmem:[#allocation1 + $0x31] ss:$2 sm:$0xff] %v7033_v7  ;;  %1865 = vmatpush.bf16.msrb.mxu2 %v6603_v42 }
  0xde   :  { %9166 = vst [vmem:[#allocation159_spill] sm:$0xff] %v7097_v57  ;;  %v449_v24 = vpop.f32.mrf.mxu1  ;;  %1878 = vmatpush.bf16.msrb.mxu3 %v6605_v43 }
  0xdf   :  { %v268_v44 = vld.sshfl [vmem:[#allocation1 + $0x28] sm:$0xff pattern:$0x75316420]  ;;  %v267_v48 = vld.sshfl [vmem:[#allocation1 + $0x20] sm:$0xff pattern:$0x75316420]  ;;  %v430_v0 = vpop.f32.mrf.mxu0  ;;  %1852 = vmatpush.bf16.msra.mxu1 %v6567_v60 }
  0xe0   :  { %v7101_v14 = vadd.f32 %v446_v33, %v268_v44  ;;  %v7103_v63 = vadd.f32 %v427_v54, %v267_v48  ;;  %275 = vst [vmem:[#allocation1 + $0x20] ss:$2 sm:$0xff] %v7026_v49  ;;  %v7121_v44 = vadd.f32 %v394_v37, %v297_v8  ;;  %v8918_v48 = vrot.slane %v7110_v17, 4  ;;  %1840 = vmatpush.bf16.msra.mxu0 %v6577_v10 }
  0xe1   :  { %276 = vst [vmem:[#allocation1 + $0x21] ss:$2 sm:$0xff] %v7026_v49 }
  0xe2   :  { %9167 = vst [vmem:[#allocation160_spill] sm:$0xff] %v7101_v14  ;;  %v8915_v30 = vrot.slane %v7101_v14, 4 }
  0xe3   :  { %9168 = vst [vmem:[#allocation161_spill] sm:$0xff] %v7103_v63  ;;  %1853 = vmatpush.bf16.msra.mxu1 %v6579_v11 }
  0xe4   :  { %9169 = vst [vmem:[#allocation162_spill] sm:$0xff] %v7110_v17  ;;  %v269_v15 = vld.sshfl [vmem:[#allocation1 + $0x30] sm:$0xff pattern:$0x75316420]  ;;  %v7118_v54 = vsel %vm122_vm1, %v7103_v63, %v8915_v30  ;;  %v7131_v30 = vsel %vm122_vm1, %v8918_v48, %v7121_v44  ;;  %v464_v17 = vadd.f32 %v463_v36, %v253_v45  ;;  %v9175_v45 = vld [vmem:[#allocation47_spill] sm:$0xff] }
  0xe5   :  { %v270_v33 = vld.sshfl [vmem:[#allocation1 + $0x38] sm:$0xff pattern:$0x75316420]  ;;  %9170 = vst [vmem:[#allocation163_spill] sm:$0xff] %v7118_v54  ;;  %v482_v54 = vpop.f32.mrf.mxu3  ;;  %1866 = vmatpush.bf16.msrb.mxu2 %v9175_v45 }
  0xe6   :  { %277 = vst [vmem:[#allocation1 + $0x30] ss:$2 sm:$0xff] %v7033_v7  ;;  %v483_v14 = vadd.f32 %v482_v54, %v254_v26  ;;  %v9180_v54 = vld [vmem:[#allocation40_spill] sm:$0xff] }
  0xe7   :  { %9171 = vst [vmem:[#allocation164_spill] sm:$0xff] %v7121_v44  ;;  %1854 = vmatpush.bf16.msra.mxu1 %v9180_v54  ;;  %v9182_v44 = vld [vmem:[#allocation42_spill] sm:$0xff] }
  0xe8   :  { %278 = vst [vmem:[#allocation1 + $0x31] ss:$2 sm:$0xff] %v7033_v7  ;;  %v284_v8 = vld.sshfl [vmem:[#allocation1 + $0x28] sm:$0xff pattern:$0x75316420]  ;;  %v9188_v54 = vld [vmem:[#allocation46_spill] sm:$0xff] }
  0xe9   :  { %9172 = vst [vmem:[#allocation165_spill] sm:$0xff] %v7131_v30  ;;  %v450_v37 = vadd.f32 %v449_v24, %v284_v8  ;;  %v283_v39 = vld.sshfl [vmem:[#allocation1 + $0x20] sm:$0xff pattern:$0x75316420]  ;;  %v527_v30 = vrot.slane %v483_v14, 4  ;;  %v9179_v14 = vld [vmem:[#allocation39_spill] sm:$0xff]  ;;  %1867 = vmatpush.bf16.msrb.mxu2 %v9183_v38 }
  0xea   :  { %v431_v57 = vadd.f32 %v430_v0, %v283_v39  ;;  %291 = vst [vmem:[#allocation1 + $0x20] ss:$2 sm:$0xff] %v7026_v49  ;;  %1841 = vmatpush.bf16.msra.mxu0 %v9179_v14 }
  0xeb   :  { %v534_v48 = vrot.slane %v450_v37, 4  ;;  %292 = vst [vmem:[#allocation1 + $0x21] ss:$2 sm:$0xff] %v7026_v49  ;;  %v9176_v49 = vld [vmem:[#allocation48_spill] sm:$0xff]  ;;  %v7152_v26 = vsel %vm122_vm1, %v464_v17, %v527_v30  ;;  %v7155_v36 = vsel %vm122_vm1, %v527_v30, %v464_v17  ;;  %v9181_v37 = vld [vmem:[#allocation41_spill] sm:$0xff]  ;;  %1899 = vmatpush.bf16.msrb.mxu1 %v9182_v44 }
  0xec   :  { %1879 = vmatpush.bf16.msrb.mxu3 %v9176_v49  ;;  %9177 = vst [vmem:[#allocation168_spill] sm:$0xff] %v7152_v26  ;;  %v9184_v26 = vld [vmem:[#allocation52_spill] sm:$0xff] }
  0xed   :  { %v7142_v39 = vsel %vm122_vm1, %v431_v57, %v534_v48  ;;  %v7145_v0 = vsel %vm122_vm1, %v534_v48, %v431_v57  ;;  %9178 = vst [vmem:[#allocation169_spill] sm:$0xff] %v7155_v36  ;;  %v451_v57 = vpop.f32.mrf.mxu1  ;;  %v432_v48 = vpop.f32.mrf.mxu0 }
  0xee   :  { %9173 = vst [vmem:[#allocation166_spill] sm:$0xff] %v7142_v39  ;;  %1886 = vmatpush.bf16.msrb.mxu0 %v9181_v37  ;;  %v484_v63 = vpop.f32.mrf.mxu3 }
  0xef   :  { %v285_v24 = vld.sshfl [vmem:[#allocation1 + $0x30] sm:$0xff pattern:$0x75316420]  ;;  %v286_v8 = vld.sshfl [vmem:[#allocation1 + $0x38] sm:$0xff pattern:$0x75316420]  ;;  %v485_v30 = vadd.f32 %v484_v63, %v270_v33  ;;  %1900 = vmatpush.bf16.msrb.mxu1 %v9188_v54 }
  0xf0   :  { %9174 = vst [vmem:[#allocation167_spill] sm:$0xff] %v7145_v0  ;;  %1880 = vmatpush.bf16.msrb.mxu3 %v9184_v26  ;;  %v9185_v0 = vld [vmem:[#allocation53_spill] sm:$0xff] }
  0xf1   :  { %293 = vst [vmem:[#allocation1 + $0x30] ss:$2 sm:$0xff] %v7033_v7  ;;  %1912 = vmatpush.bf16.msra.mxu2 %v9185_v0  ;;  %v531_v44 = vrot.slane %v485_v30, 4  ;;  %v9192_v33 = vld [vmem:[#allocation57_spill] sm:$0xff] }
  0xf2   :  { %294 = vst [vmem:[#allocation1 + $0x31] ss:$2 sm:$0xff] %v7033_v7  ;;  %v465_v7 = vpop.f32.mrf.mxu2  ;;  %v300_v51 = vld.sshfl [vmem:[#allocation1 + $0x28] sm:$0xff pattern:$0x75316420]  ;;  %1887 = vmatpush.bf16.msrb.mxu0 %v9187_v25 }
  0xf3   :  { %v299_v39 = vld.sshfl [vmem:[#allocation1 + $0x20] sm:$0xff pattern:$0x75316420]  ;;  %v7163_v17 = vadd.f32 %v451_v57, %v300_v51  ;;  %v466_v61 = vadd.f32 %v465_v7, %v269_v15 }
  0xf4   :  { %v7165_v36 = vadd.f32 %v432_v48, %v299_v39  ;;  %1925 = vmatpush.bf16.msra.mxu3 %v9186_v27  ;;  %v9193_v15 = vld [vmem:[#allocation58_spill] sm:$0xff]  ;;  %v9194_v39 = vld [vmem:[#allocation49_spill] sm:$0xff] }
  0xf5   :  { %v8923_v37 = vrot.slane %v7163_v17, 4  ;;  %v7173_v38 = vsel %vm122_vm1, %v466_v61, %v531_v44  ;;  %v7176_v51 = vsel %vm122_vm1, %v531_v44, %v466_v61  ;;  %1913 = vmatpush.bf16.msra.mxu2 %v9192_v33  ;;  %v9195_v57 = vld [vmem:[#allocation50_spill] sm:$0xff]  ;;  %v9196_v61 = vld [vmem:[#allocation61_spill] sm:$0xff] }
  0xf6   :  { %9189 = vst [vmem:[#allocation170_spill] sm:$0xff] %v7173_v38  ;;  %1888 = vmatpush.bf16.msrb.mxu0 %v9194_v39  ;;  %1901 = vmatpush.bf16.msrb.mxu1 %v9195_v57  ;;  %v487_v7 = vpop.f32.mrf.mxu3  ;;  %v9197_v44 = vld [vmem:[#allocation62_spill] sm:$0xff]  ;;  %v9202_v57 = vld [vmem:[#allocation65_spill] sm:$0xff] }
  0xf7   :  { %9190 = vst [vmem:[#allocation171_spill] sm:$0xff] %v7176_v51  ;;  %v7182_v63 = vsel %vm122_vm1, %v7165_v36, %v8923_v37  ;;  %v488_v38 = vadd.f32 %v487_v7, %v286_v8  ;;  %v9198_v51 = vld [vmem:[#allocation55_spill] sm:$0xff] }
  0xf8   :  { %9191 = vst [vmem:[#allocation172_spill] sm:$0xff] %v7182_v63  ;;  %1926 = vmatpush.bf16.msra.mxu3 %v9193_v15  ;;  %v9199_v63 = vld [vmem:[#allocation56_spill] sm:$0xff]  ;;  %v9204_v8 = vld [vmem:[#allocation59_spill] sm:$0xff] }
  0xf9   :  { %1914 = vmatpush.bf16.msra.mxu2 %v9196_v61  ;;  %v535_v37 = vrot.slane %v488_v38, 4  ;;  %v302_v15 = vld.sshfl [vmem:[#allocation1 + $0x38] sm:$0xff pattern:$0x75316420] }
  0xfa   :  { %v468_v48 = vpop.f32.mrf.mxu2  ;;  %1889 = vmatpush.bf16.msrb.mxu0 %v9198_v51  ;;  %1902 = vmatpush.bf16.msrb.mxu1 %v9199_v63  ;;  %v301_v7 = vld.sshfl [vmem:[#allocation1 + $0x30] sm:$0xff pattern:$0x75316420]  ;;  %v9206_v63 = vld [vmem:[#allocation69_spill] sm:$0xff] }
  0xfb   :  { %v469_v30 = vadd.f32 %v468_v48, %v285_v24  ;;  %v9203_v24 = vld [vmem:[#allocation66_spill] sm:$0xff]  ;;  %v9205_v48 = vld [vmem:[#allocation60_spill] sm:$0xff] }
  0xfc   :  { %1927 = vmatpush.bf16.msra.mxu3 %v9197_v44 }
  0xfd   :  { %v7193_v33 = vsel %vm122_vm1, %v469_v30, %v535_v37  ;;  %v7196_v39 = vsel %vm122_vm1, %v535_v37, %v469_v30  ;;  %1915 = vmatpush.bf16.msra.mxu2 %v9202_v57  ;;  %v9208_v37 = vld [vmem:[#allocation63_spill] sm:$0xff] }
  0xfe   :  { %9200 = vst [vmem:[#allocation173_spill] sm:$0xff] %v7193_v33  ;;  %1890 = vmatpush.bf16.msrb.mxu0 %v9204_v8  ;;  %1903 = vmatpush.bf16.msrb.mxu1 %v9205_v48  ;;  %v489_v38 = vpop.f32.mrf.mxu3  ;;  %v9207_v33 = vld [vmem:[#allocation70_spill] sm:$0xff]  ;;  %v9219_v8 = vld [vmem:[#allocation77_spill] sm:$0xff] }
  0xff   :  { %9201 = vst [vmem:[#allocation174_spill] sm:$0xff] %v7196_v39  ;;  %v7202_v44 = vadd.f32 %v489_v38, %v302_v15  ;;  %v9211_v15 = vld [vmem:[#allocation73_spill] sm:$0xff]  ;;  %v9212_v38 = vld [vmem:[#allocation74_spill] sm:$0xff] }
 0x100   :  { %1928 = vmatpush.bf16.msra.mxu3 %v9203_v24  ;;  %v9209_v24 = vld [vmem:[#allocation64_spill] sm:$0xff] }
 0x101   :  { %1916 = vmatpush.bf16.msra.mxu2 %v9206_v63  ;;  %v8924_v39 = vrot.slane %v7202_v44, 4  ;;  %v9213_v63 = vld [vmem:[#allocation67_spill] sm:$0xff] }
 0x102   :  { %v470_v51 = vpop.f32.mrf.mxu2  ;;  %1891 = vmatpush.bf16.msrb.mxu0 %v9208_v37  ;;  %1904 = vmatpush.bf16.msrb.mxu1 %v9209_v24  ;;  %v9217_v37 = vld [vmem:[#allocation71_spill] sm:$0xff]  ;;  %v9218_v24 = vld [vmem:[#allocation72_spill] sm:$0xff] }
 0x103   :  { %v7207_v30 = vadd.f32 %v470_v51, %v301_v7  ;;  %v9215_v51 = vld [vmem:[#allocation75_spill] sm:$0xff]  ;;  %v9216_v7 = vld [vmem:[#allocation76_spill] sm:$0xff] }
 0x104   :  { %1929 = vmatpush.bf16.msra.mxu3 %v9207_v33  ;;  %v9214_v33 = vld [vmem:[#allocation68_spill] sm:$0xff] }
 0x105   :  { %v7215_v48 = vsel %vm122_vm1, %v7207_v30, %v8924_v39  ;;  %1917 = vmatpush.bf16.msra.mxu2 %v9211_v15  ;;  %v9220_v39 = vld [vmem:[#allocation78_spill] sm:$0xff]  ;;  %v1453_v15 = vpop.f32.mrf.mxu1 }
 0x106   :  { %9210 = vst [vmem:[#allocation175_spill] sm:$0xff] %v7215_v48  ;;  %1892 = vmatpush.bf16.msrb.mxu0 %v9213_v63  ;;  %1905 = vmatpush.bf16.msrb.mxu1 %v9214_v33  ;;  %v1440_v48 = vpop.f32.mrf.mxu0 }
 0x107   :  { %v1454_v61 = vadd.f32 %v1453_v15, %v1440_v48 }
 0x108   :  { %1930 = vmatpush.bf16.msra.mxu3 %v9212_v38  ;;  %v1479_v38 = vpop.f32.mrf.mxu3 }
 0x109   :  { %1918 = vmatpush.bf16.msra.mxu2 %v9215_v51  ;;  %v9221_v51 = vrot.slane %v6914_v4, 4 }
 0x10a   :  { %1893 = vmatpush.bf16.msrb.mxu0 %v9217_v37  ;;  %1906 = vmatpush.bf16.msrb.mxu1 %v9218_v24  ;;  %v1466_v57 = vpop.f32.mrf.mxu2 }
 0x10b   :  { %v1480_v63 = vadd.f32 %v1479_v38, %v1466_v57  ;;  %v540_v37 = vsel %vm122_vm1, %v6919_v62, %v9221_v51 }
 0x10c   :  { %1931 = vmatpush.bf16.msra.mxu3 %v9216_v7 }
 0x10d   :  { %1919 = vmatpush.bf16.msra.mxu2 %v9219_v8  ;;  %v1455_v33 = vpop.f32.mrf.mxu1  ;;  %v1645_v25 = vrot.slane %v1480_v63, 4 }
 0x10e   :  { %v1442_v54 = vpop.f32.mrf.mxu0 }
 0x10f   :  { %v1647_v24 = vsel %vm122_vm1, %v1454_v61, %v1645_v25 }
 0x110   :  { %1932 = vmatpush.bf16.msra.mxu3 %v9220_v39  ;;  %v1651_v7 = vadd.f32 %v1647_v24, %v540_v37  ;;  %v1481_v0 = vpop.f32.mrf.mxu3 }
 0x112   :  { %v5826_v8 = vmul.f32 -1.442695, %v1651_v7  ;;  %v1689_v27 = vrot.slane %v1651_v7, 4  ;;  %v1468_v39 = vpop.f32.mrf.mxu2 }
 0x114   :  { %6063 = vpow2.f32 %v5826_v8  ;;  %v5827_v48 = vmul.f32 -1.442695, %v1689_v27 }
 0x115   :  { %v1505_v14 = vpop.f32.mrf.mxu1 }
 0x116   :  { %v1492_v26 = vpop.f32.mrf.mxu0  ;;  %6065 = vpow2.f32 %v5827_v48 }
 0x117   :  { %v1506_v15 = vadd.f32 %v1505_v14, %v1492_v26 }
 0x118   :  { %v1531_v63 = vpop.f32.mrf.mxu3 }
 0x11a   :  { %v6064_v54 = vpop.eup %6063  ;;  %v1518_v33 = vpop.f32.mrf.mxu2 }
 0x11b   :  { %v1672_v57 = vadd.f32 1.0, %v6064_v54  ;;  %v1532_v4 = vadd.f32 %v1531_v63, %v1518_v33 }
 0x11c   :  { %v6066_v51 = vpop.eup %6065 }
 0x11d   :  { %v1507_v62 = vpop.f32.mrf.mxu1  ;;  %6067 = vrcp.f32 %v1672_v57  ;;  %v1694_v25 = vadd.f32 1.0, %v6066_v51  ;;  %v1646_v61 = vrot.slane %v1532_v4, 4  ;;  %v1684_v51 = vand.u32 2147483648, %v1672_v57 }
 0x11e   :  { %v1494_v38 = vpop.f32.mrf.mxu0  ;;  %vm1678_vm5 = vweird.f32 %v1672_v57 }
 0x11f   :  { %6069 = vrcp.f32 %v1694_v25  ;;  %v1648_v0 = vsel %vm122_vm1, %v1506_v15, %v1646_v61  ;;  %v1706_v4 = vand.u32 2147483648, %v1694_v25  ;;  %vm1700_vm4 = vweird.f32 %v1694_v25 }
 0x120   :  { %v1652_v39 = vadd.f32 %v1648_v0, %v7043_v31  ;;  %v1533_v8 = vpop.f32.mrf.mxu3  ;;  %v1704_v31 = vand.u32 2147483647, %v1694_v25  ;;  %v9222_v0 = vrot.slane %v7163_v17, 4 }
 0x122   :  { %v1712_v24 = vrot.slane %v1652_v39, 4  ;;  %v1520_v27 = vpop.f32.mrf.mxu2  ;;  %vm1705_vm8 = vcmp.eq.f32.partialorder %v1704_v31, 8.507059e+37 }
 0x123   :  { %v6068_v37 = vpop.eup %6067  ;;  %v1682_v27 = vand.u32 2147483647, %v1672_v57 }
 0x124   :  { %v1674_v7 = vmul.f32 %v6068_v37, %v1672_v57  ;;  %v5828_v48 = vmul.f32 -1.442695, %v1712_v24  ;;  %vm1679_vm2 = vweird.f32 %v6068_v37  ;;  %v584_v24 = vsel %vm122_vm1, %v9222_v0, %v7165_v36 }
 0x125   :  { %v6070_v54 = vpop.eup %6069  ;;  %v1557_v63 = vpop.f32.mrf.mxu1  ;;  %vm7238_vm6 = vmor %vm1678_vm5, %vm1679_vm2  ;;  %v1707_v36 = vor.u32 1.1754944e-38, %v1706_v4  ;;  %v585_v10 = vrot.slane %v584_v24, 4  ;;  %vm1683_vm9 = vcmp.eq.f32.partialorder %v1682_v27, 8.507059e+37 }
 0x126   :  { %v1675_v33 = vsub.f32 1.0, %v1674_v7  ;;  %v1696_v26 = vmul.f32 %v6070_v54, %v1694_v25  ;;  %6071 = vpow2.f32 %v5828_v48  ;;  %v1544_v14 = vpop.f32.mrf.mxu0  ;;  %vm1701_vm3 = vweird.f32 %v6070_v54 }
 0x127   :  { %6073 = vtanh.f32 %v1652_v39  ;;  %vm1702_vm7 = vmor %vm1700_vm4, %vm1701_vm3  ;;  %v1685_v25 = vor.u32 1.1754944e-38, %v1684_v51 }
 0x128   :  { %v1697_v38 = vsub.f32 1.0, %v1696_v26  ;;  %v1676_v62 = vmul.f32 %v6068_v37, %v1675_v33 }
 0x129   :  { %v1583_v7 = vpop.f32.mrf.mxu3 }
 0x12a   :  { %v1698_v15 = vmul.f32 %v6070_v54, %v1697_v38  ;;  %v1677_v61 = vadd.f32 %v6068_v37, %v1676_v62  ;;  %v1570_v8 = vpop.f32.mrf.mxu2  ;;  %v1558_v62 = vadd.f32 %v1557_v63, %v1544_v14 }
 0x12b   :  { %v1584_v38 = vadd.f32 %v1583_v7, %v1570_v8 }
 0x12c   :  { %v6072_v48 = vpop.eup %6071  ;;  %v1699_v26 = vadd.f32 %v6070_v54, %v1698_v15  ;;  %v1681_v49 = vsel %vm7238_vm6, %v6068_v37, %v1677_v61 }
 0x12d   :  { %v1717_v17 = vadd.f32 1.0, %v6072_v48  ;;  %v1660_v0 = vrot.slane %v1584_v38, 4  ;;  %v1559_v11 = vpop.f32.mrf.mxu1  ;;  %v1686_v39 = vsel %vm1683_vm9, %v1685_v25, %v1681_v49  ;;  %v6074_v37 = vpop.eup %6073 }
 0x12e   :  { %v1703_v57 = vsel %vm1702_vm7, %v6070_v54, %v1699_v26  ;;  %v1546_v45 = vpop.f32.mrf.mxu0  ;;  %v1734_v61 = vmul.f32 %v6074_v37, %v1686_v39 }
 0x12f   :  { %v1708_v43 = vsel %vm1705_vm8, %v1707_v36, %v1703_v57  ;;  %6075 = vrcp.f32 %v1717_v17  ;;  %v1662_v14 = vsel %vm122_vm1, %v1558_v62, %v1660_v0  ;;  %v1729_v27 = vand.u32 2147483648, %v1717_v17 }
 0x130   :  { %v1733_v63 = vmul.f32 0.0, %v1708_v43  ;;  %v1666_v15 = vadd.f32 %v1662_v14, %v585_v10  ;;  %v1727_v10 = vand.u32 2147483647, %v1717_v17  ;;  %vm1723_vm11 = vweird.f32 %v1717_v17 }
 0x131   :  { %v1585_v51 = vpop.f32.mrf.mxu3  ;;  %v1730_v38 = vor.u32 1.1754944e-38, %v1729_v27 }
 0x132   :  { %v5829_v8 = vmul.f32 -1.442695, %v1666_v15  ;;  %v1758_v4 = vrot.slane %v1666_v15, 4  ;;  %v1572_v7 = vpop.f32.mrf.mxu2  ;;  %v7246_v31 = vadd.f32 %v1734_v61, %v1733_v63  ;;  %vm1728_vm13 = vcmp.eq.f32.partialorder %v1727_v10, 8.507059e+37 }
 0x133   :  { %v9225_v51 = vrot.slane %v7202_v44, 4 }
 0x134   :  { %6077 = vpow2.f32 %v5829_v8  ;;  %v5830_v11 = vmul.f32 -1.442695, %v1758_v4 }
 0x135   :  { %v6076_v54 = vpop.eup %6075 }
 0x136   :  { %v1719_v45 = vmul.f32 %v6076_v54, %v1717_v17  ;;  %6079 = vpow2.f32 %v5830_v11  ;;  %vm1724_vm10 = vweird.f32 %v6076_v54 }
 0x137   :  { %6081 = vtanh.f32 %v7246_v31  ;;  %vm1725_vm12 = vmor %vm1723_vm11, %vm1724_vm10 }
 0x138   :  { %v1720_v24 = vsub.f32 1.0, %v1719_v45 }
 0x13a   :  { %v1721_v49 = vmul.f32 %v6076_v54, %v1720_v24  ;;  %v6078_v43 = vpop.eup %6077 }
 0x13b   :  { %v1741_v33 = vadd.f32 1.0, %v6078_v43 }
 0x13c   :  { %v1722_v48 = vadd.f32 %v6076_v54, %v1721_v49  ;;  %v6080_v26 = vpop.eup %6079 }
 0x13d   :  { %6083 = vrcp.f32 %v1741_v33  ;;  %v1763_v36 = vadd.f32 1.0, %v6080_v26  ;;  %v6082_v25 = vpop.eup %6081  ;;  %vm1747_vm3 = vweird.f32 %v1741_v33 }
 0x13e   :  { %v1726_v62 = vsel %vm1725_vm12, %v6076_v54, %v1722_v48  ;;  %v586_v54 = vsel %vm122_vm1, %v9225_v51, %v7207_v30 }
 0x13f   :  { %v1731_v57 = vsel %vm1728_vm13, %v1730_v38, %v1726_v62  ;;  %6085 = vrcp.f32 %v1763_v36  ;;  %v587_v48 = vrot.slane %v586_v54, 4  ;;  %v1775_v62 = vand.u32 2147483648, %v1763_v36 }
 0x140   :  { %v7249_v0 = vmul.f32 %v6082_v25, %v1731_v57  ;;  %vm1769_vm15 = vweird.f32 %v1763_v36  ;;  %v1773_v44 = vand.u32 2147483647, %v1763_v36 }
 0x142   :  { %1822 = vst [vmem:[#allocation6] sm:$0xf] %v7249_v0  ;;  %vm1774_vm5 = vcmp.eq.f32.partialorder %v1773_v44, 8.507059e+37 }
 0x143   :  { %v6084_v63 = vpop.eup %6083 }
 0x144   :  { %v1596_v39 = vpop.f32.mrf.mxu0  ;;  %v1743_v15 = vmul.f32 %v6084_v63, %v1741_v33  ;;  %vm1748_vm0 = vweird.f32 %v6084_v63 }
 0x145   :  { %v6086_v17 = vpop.eup %6085  ;;  %vm1749_vm4 = vmor %vm1747_vm3, %vm1748_vm0 }
 0x146   :  { %v1765_v37 = vmul.f32 %v6086_v17, %v1763_v36  ;;  %v1744_v61 = vsub.f32 1.0, %v1743_v15  ;;  %vm1770_vm14 = vweird.f32 %v6086_v17  ;;  %v9228_v36 = vmov 0.0  }
 0x147   :  { %v1609_v14 = vpop.f32.mrf.mxu1  ;;  %vm7257_vm2 = vmor %vm1769_vm15, %vm1770_vm14  ;;  %v1803_v54 = vrot.slane %v9228_v36, 4 }
 0x148   :  { %v1766_v8 = vsub.f32 1.0, %v1765_v37  ;;  %v1610_v11 = vadd.f32 %v1609_v14, %v1596_v39  ;;  %v1745_v43 = vmul.f32 %v6084_v63, %v1744_v61  ;;  %v1753_v39 = vand.u32 2147483648, %v1741_v33 }
 0x149   :  { %v1751_v61 = vand.u32 2147483647, %v1741_v33 }
 0x14a   :  { %v1767_v49 = vmul.f32 %v6086_v17, %v1766_v8  ;;  %v1746_v57 = vadd.f32 %v6084_v63, %v1745_v43 }
 0x14b   :  { %v1622_v4 = vpop.f32.mrf.mxu2  ;;  %vm1752_vm6 = vcmp.eq.f32.partialorder %v1751_v61, 8.507059e+37 }
 0x14c   :  { %v1635_v7 = vpop.f32.mrf.mxu3  ;;  %v1598_v24 = vpop.f32.mrf.mxu0  ;;  %v1768_v38 = vadd.f32 %v6086_v17, %v1767_v49  ;;  %v1750_v51 = vsel %vm1749_vm4, %v6084_v63, %v1746_v57 }
 0x14d   :  { %v1636_v45 = vadd.f32 %v1635_v7, %v1622_v4  ;;  %v1776_v4 = vor.u32 1.1754944e-38, %v1775_v62 }
 0x14e   :  { %v1772_v8 = vsel %vm7257_vm2, %v6086_v17, %v1768_v38 }
 0x14f   :  { %v1611_v27 = vpop.f32.mrf.mxu1  ;;  %v1661_v10 = vrot.slane %v1636_v45, 4  ;;  %v1777_v45 = vsel %vm1774_vm5, %v1776_v4, %v1772_v8 }
 0x150   :  { %v1805_v49 = vmul.f32 %v1803_v54, %v1777_v45  ;;  %v9229_v54 = vld [vmem:[#allocation79_spill] sm:$0xff]  ;;  %v9232_v45 = vld [vmem:[#allocation82_spill] sm:$0xff] }
 0x151   :  { %v1663_v26 = vsel %vm122_vm1, %v1610_v11, %v1661_v10  ;;  %v1754_v11 = vor.u32 1.1754944e-38, %v1753_v39 }
 0x152   :  { %v1667_v25 = vadd.f32 %v1663_v26, %v587_v48 }
 0x153   :  { %v1624_v15 = vpop.f32.mrf.mxu2  ;;  %v1755_v27 = vsel %vm1752_vm6, %v1754_v11, %v1750_v51  ;;  %v9230_v11 = vld [vmem:[#allocation80_spill] sm:$0xff] }
 0x154   :  { %6087 = vtanh.f32 %v1667_v25  ;;  %v1781_v14 = vrot.slane %v1667_v25, 4  ;;  %v1637_v37 = vpop.f32.mrf.mxu3 }
 0x156   :  { %v5831_v7 = vmul.f32 -1.442695, %v1781_v14 }
 0x158   :  { %6089 = vpow2.f32 %v5831_v7 }
 0x15a   :  { %v6088_v24 = vpop.eup %6087 }
 0x15b   :  { %v1806_v10 = vmul.f32 %v6088_v24, %v1755_v27  ;;  %v9233_v24 = vld [vmem:[#allocation83_spill] sm:$0xff]  ;;  %v9234_v27 = vld [vmem:[#allocation84_spill] sm:$0xff] }
 0x15d   :  { %v1807_v43 = vadd.f32 %v1806_v10, %v1805_v49  ;;  %v9235_v49 = vld [vmem:[#allocation85_spill] sm:$0xff]  ;;  %v9236_v10 = vld [vmem:[#allocation86_spill] sm:$0xff] }
 0x15e   :  { %v6090_v33 = vpop.eup %6089 }
 0x15f   :  { %v1786_v48 = vadd.f32 1.0, %v6090_v33  ;;  %v1818_v26 = vrot.slane %v1807_v43, 4  ;;  %v9238_v33 = vld [vmem:[#allocation88_spill] sm:$0xff] }
 0x161   :  { %6091 = vrcp.f32 %v1786_v48  ;;  %v7266_v17 = vsel %vm122_vm1, %v7246_v31, %v1818_v26  ;;  %v1798_v25 = vand.u32 2147483648, %v1786_v48  ;;  %v1796_v44 = vand.u32 2147483647, %v1786_v48  ;;  %v9240_v26 = vld [vmem:[#allocation90_spill] sm:$0xff] }
 0x162   :  { %6093 = vtanh.f32 %v1807_v43  ;;  %vm1792_vm8 = vweird.f32 %v1786_v48  ;;  %v9237_v43 = vld [vmem:[#allocation87_spill] sm:$0xff] }
 0x163   :  { %v1799_v39 = vor.u32 1.1754944e-38, %v1798_v25  ;;  %vm1797_vm10 = vcmp.eq.f32.partialorder %v1796_v44, 8.507059e+37  ;;  %v9244_v25 = vld [vmem:[#allocation94_spill] sm:$0xff]  ;;  %v9246_v44 = vld [vmem:[#allocation96_spill] sm:$0xff] }
 0x167   :  { %v6092_v63 = vpop.eup %6091 }
 0x168   :  { %v1788_v38 = vmul.f32 %v6092_v63, %v1786_v48  ;;  %vm1793_vm7 = vweird.f32 %v6092_v63  ;;  %v6094_v15 = vpop.eup %6093  ;;  %v9239_v48 = vld [vmem:[#allocation89_spill] sm:$0xff] }
 0x169   :  { %vm1794_vm9 = vmor %vm1792_vm8, %vm1793_vm7 }
 0x16a   :  { %v1789_v62 = vsub.f32 1.0, %v1788_v38  ;;  %v9242_v38 = vld [vmem:[#allocation92_spill] sm:$0xff] }
 0x16c   :  { %v1790_v57 = vmul.f32 %v6092_v63, %v1789_v62  ;;  %v9243_v62 = vld [vmem:[#allocation93_spill] sm:$0xff] }
 0x16e   :  { %v1791_v30 = vadd.f32 %v6092_v63, %v1790_v57  ;;  %v9245_v57 = vld [vmem:[#allocation95_spill] sm:$0xff] }
 0x170   :  { %v1795_v14 = vsel %vm1794_vm9, %v6092_v63, %v1791_v30  ;;  %v9241_v63 = vld [vmem:[#allocation91_spill] sm:$0xff]  ;;  %v9247_v30 = vld [vmem:[#allocation97_spill] sm:$0xff] }
 0x171   :  { %v1800_v37 = vsel %vm1797_vm10, %v1799_v39, %v1795_v14  ;;  %v9248_v39 = vld [vmem:[#allocation98_spill] sm:$0xff]  ;;  %v9249_v14 = vld [vmem:[#allocation99_spill] sm:$0xff] }
 0x172   :  { %v1809_v61 = vmul.f32 %v6094_v15, %v1800_v37  ;;  %v9250_v15 = vld [vmem:[#allocation100_spill] sm:$0xff]  ;;  %v9251_v37 = vld [vmem:[#allocation101_spill] sm:$0xff] }
 0x174   :  { %v1812_v8 = vrot.slane %v1809_v61, 4  ;;  %1824 = vst [vmem:[#allocation7 + $0x1c] sm:$0xf] %v1809_v61  ;;  %v9252_v61 = vld [vmem:[#allocation102_spill] sm:$0xff] }
 0x176   :  { %v1813_v31 = vsel %vm122_vm1, %v7249_v0, %v1812_v8  ;;  %v9231_v0 = vld [vmem:[#allocation81_spill] sm:$0xff]  ;;  %v9253_v8 = vld [vmem:[#allocation103_spill] sm:$0xff] }
 0x177   :  { %1827 = vst [vmem:[#allocation1] ss:$2 sm:$0xff] %v1813_v31  ;;  %v9254_v31 = vld [vmem:[#allocation104_spill] sm:$0xff] }
 0x17e   :  { %v1828_v4 = vld.sshfl [vmem:[#allocation1] sm:$0xff pattern:$0x75316420]  ;;  %v1829_v7 = vld.sshfl [vmem:[#allocation1 + $0x8] sm:$0xff pattern:$0x75316420] }
 0x17f   :  { %v7270_v51 = vpack.c.bf16 %v1828_v4, %v1828_v4  ;;  %v7272_v36 = vpack.c.bf16 %v1829_v7, %v1829_v7  ;;  %v9255_v4 = vld [vmem:[#allocation105_spill] sm:$0xff]  ;;  %v9256_v7 = vld [vmem:[#allocation106_spill] sm:$0xff] }
 0x181   :  { %1842 = vmatmul.bf16.vlgmr.msra.gmra.mxu0 %v7270_v51  ;;  %1855 = vmatmul.bf16.vlgmr.msra.gmra.mxu1 %v7272_v36 }
 0x182   :  { %1868 = vmatmul.bf16.vlgmr.msrb.gmra.mxu2 %v7270_v51  ;;  %1881 = vmatmul.bf16.vlgmr.msrb.gmra.mxu3 %v7272_v36 }
 0x183   :  { %1938 = vmatpush.bf16.msra.mxu0 %v9229_v54  ;;  %1951 = vmatpush.bf16.msra.mxu1 %v9230_v11 }
 0x184   :  { %1964 = vmatpush.bf16.msrb.mxu2 %v9231_v0  ;;  %1977 = vmatpush.bf16.msrb.mxu3 %v9232_v45 }
 0x187   :  { %1939 = vmatpush.bf16.msra.mxu0 %v9233_v24  ;;  %1952 = vmatpush.bf16.msra.mxu1 %v9234_v27 }
 0x188   :  { %1965 = vmatpush.bf16.msrb.mxu2 %v9235_v49  ;;  %1978 = vmatpush.bf16.msrb.mxu3 %v9236_v10 }
 0x18b   :  { %1940 = vmatpush.bf16.msra.mxu0 %v9237_v43  ;;  %1953 = vmatpush.bf16.msra.mxu1 %v9238_v33 }
 0x18c   :  { %1966 = vmatpush.bf16.msrb.mxu2 %v9239_v48  ;;  %1979 = vmatpush.bf16.msrb.mxu3 %v9240_v26 }
 0x18f   :  { %1941 = vmatpush.bf16.msra.mxu0 %v9241_v63  ;;  %1954 = vmatpush.bf16.msra.mxu1 %v9242_v38 }
 0x190   :  { %1967 = vmatpush.bf16.msrb.mxu2 %v9243_v62  ;;  %1980 = vmatpush.bf16.msrb.mxu3 %v9244_v25 }
 0x191   :  { %1894 = vmatmul.bf16.vlgmr.msrb.gmra.mxu0 %v7270_v51  ;;  %1907 = vmatmul.bf16.vlgmr.msrb.gmra.mxu1 %v7272_v36 }
 0x192   :  { %1920 = vmatmul.bf16.vlgmr.msra.gmra.mxu2 %v7270_v51  ;;  %1933 = vmatmul.bf16.vlgmr.msra.gmra.mxu3 %v7272_v36 }
 0x193   :  { %1942 = vmatpush.bf16.msra.mxu0 %v9245_v57  ;;  %1955 = vmatpush.bf16.msra.mxu1 %v9246_v44  ;;  %v9257_v44 = vld [vmem:[#allocation107_spill] sm:$0xff] }
 0x194   :  { %1968 = vmatpush.bf16.msrb.mxu2 %v9247_v30  ;;  %1981 = vmatpush.bf16.msrb.mxu3 %v9248_v39  ;;  %v9258_v30 = vld [vmem:[#allocation108_spill] sm:$0xff]  ;;  %v9259_v39 = vld [vmem:[#allocation109_spill] sm:$0xff] }
 0x197   :  { %1943 = vmatpush.bf16.msra.mxu0 %v9249_v14  ;;  %1956 = vmatpush.bf16.msra.mxu1 %v9250_v15  ;;  %v9260_v14 = vld [vmem:[#allocation110_spill] sm:$0xff]  ;;  %v9261_v15 = vld [vmem:[#allocation111_spill] sm:$0xff] }
 0x198   :  { %1969 = vmatpush.bf16.msrb.mxu2 %v9251_v37  ;;  %1982 = vmatpush.bf16.msrb.mxu3 %v9252_v61  ;;  %v9262_v37 = vld [vmem:[#allocation112_spill] sm:$0xff]  ;;  %v9263_v61 = vld [vmem:[#allocation113_spill] sm:$0xff] }
 0x19b   :  { %1944 = vmatpush.bf16.msra.mxu0 %v9253_v8  ;;  %1957 = vmatpush.bf16.msra.mxu1 %v9254_v31  ;;  %v9264_v8 = vld [vmem:[#allocation114_spill] sm:$0xff] }
 0x19c   :  { %1970 = vmatpush.bf16.msrb.mxu2 %v9255_v4  ;;  %1983 = vmatpush.bf16.msrb.mxu3 %v9256_v7  ;;  %v9273_v7 = vld [vmem:[#allocation124_spill] sm:$0xff]  ;;  %v9274_v4 = vld [vmem:[#allocation125_spill] sm:$0xff] }
 0x19f   :  { %1945 = vmatpush.bf16.msra.mxu0 %v9257_v44  ;;  %1958 = vmatpush.bf16.msra.mxu1 %v9258_v30  ;;  %v9265_v30 = vld [vmem:[#allocation115_spill] sm:$0xff] }
 0x1a0   :  { %1971 = vmatpush.bf16.msrb.mxu2 %v9259_v39  ;;  %1984 = vmatpush.bf16.msrb.mxu3 %v9260_v14  ;;  %v9266_v39 = vld [vmem:[#allocation116_spill] sm:$0xff]  ;;  %v9267_v14 = vld [vmem:[#allocation117_spill] sm:$0xff]  ;;  %v9272_v44 = vld [vmem:[#allocation123_spill] sm:$0xff] }
 0x1a2   :  { %1946 = vmatmul.bf16.vlgmr.msra.gmra.mxu0 %v7270_v51  ;;  %1959 = vmatmul.bf16.vlgmr.msra.gmra.mxu1 %v7272_v36 }
 0x1a3   :  { %1990 = vmatpush.bf16.msrb.mxu0 %v9261_v15  ;;  %2003 = vmatpush.bf16.msrb.mxu1 %v9262_v37  ;;  %v9268_v15 = vld [vmem:[#allocation118_spill] sm:$0xff] }
 0x1a4   :  { %2016 = vmatpush.bf16.msra.mxu2 %v9263_v61  ;;  %2029 = vmatpush.bf16.msra.mxu3 %v9264_v8  ;;  %v9269_v61 = vld [vmem:[#allocation120_spill] sm:$0xff]  ;;  %v9270_v8 = vld [vmem:[#allocation121_spill] sm:$0xff]  ;;  %v9271_v37 = vld [vmem:[#allocation122_spill] sm:$0xff] }
 0x1a5   :  { %1972 = vmatmul.bf16.vlgmr.msrb.gmra.mxu2 %v7270_v51  ;;  %1985 = vmatmul.bf16.vlgmr.msrb.gmra.mxu3 %v7272_v36 }
 0x1a7   :  { %1991 = vmatpush.bf16.msrb.mxu0 %v9265_v30  ;;  %2004 = vmatpush.bf16.msrb.mxu1 %v9266_v39  ;;  %v9275_v30 = vld [vmem:[#allocation126_spill] sm:$0xff] }
 0x1a8   :  { %2017 = vmatpush.bf16.msra.mxu2 %v9267_v14  ;;  %2030 = vmatpush.bf16.msra.mxu3 %v9268_v15  ;;  %v9276_v39 = vld [vmem:[#allocation130_spill] sm:$0xff]  ;;  %v9277_v14 = vld [vmem:[#allocation131_spill] sm:$0xff]  ;;  %v9278_v15 = vld [vmem:[#allocation132_spill] sm:$0xff] }
 0x1ab   :  { %1992 = vmatpush.bf16.msrb.mxu0 %v6903_v18  ;;  %2005 = vmatpush.bf16.msrb.mxu1 %v9269_v61  ;;  %v9279_v18 = vld [vmem:[#allocation133_spill] sm:$0xff] }
 0x1ac   :  { %2018 = vmatpush.bf16.msra.mxu2 %v9270_v8  ;;  %2031 = vmatpush.bf16.msra.mxu3 %v9271_v37  ;;  %v9280_v61 = vld [vmem:[#allocation137_spill] sm:$0xff]  ;;  %v9281_v8 = vld [vmem:[#allocation138_spill] sm:$0xff]  ;;  %v9282_v37 = vld [vmem:[#allocation140_spill] sm:$0xff] }
 0x1af   :  { %1993 = vmatpush.bf16.msrb.mxu0 %v9272_v44  ;;  %2006 = vmatpush.bf16.msrb.mxu1 %v9273_v7 }
 0x1b0   :  { %2019 = vmatpush.bf16.msra.mxu2 %v9274_v4  ;;  %2032 = vmatpush.bf16.msra.mxu3 %v9275_v30 }
 0x1b3   :  { %1994 = vmatpush.bf16.msrb.mxu0 %v9276_v39  ;;  %2007 = vmatpush.bf16.msrb.mxu1 %v9277_v14 }
 0x1b4   :  { %2020 = vmatpush.bf16.msra.mxu2 %v9278_v15  ;;  %2033 = vmatpush.bf16.msra.mxu3 %v9279_v18 }
 0x1b7   :  { %1995 = vmatpush.bf16.msrb.mxu0 %v9280_v61  ;;  %2008 = vmatpush.bf16.msrb.mxu1 %v9281_v8 }
 0x1b8   :  { %2021 = vmatpush.bf16.msra.mxu2 %v9282_v37  ;;  %2034 = vmatpush.bf16.msra.mxu3 %v6988_v32 }
 0x1bb   :  { %1996 = vmatpush.bf16.msrb.mxu0 %v7006_v3  ;;  %2009 = vmatpush.bf16.msrb.mxu1 %v7008_v55 }
 0x1bc   :  { %2022 = vmatpush.bf16.msra.mxu2 %v7015_v56  ;;  %2035 = vmatpush.bf16.msra.mxu3 %v7017_v19 }
 0x1bf   :  { %1997 = vmatpush.bf16.msrb.mxu0 %v7021_v16  ;;  %2010 = vmatpush.bf16.msrb.mxu1 %v7023_v50 }
 0x1c0   :  { %2023 = vmatpush.bf16.msra.mxu2 %v7037_v9  ;;  %2036 = vmatpush.bf16.msra.mxu3 %v7039_v58 }
 0x1c2   :  { %1998 = vmatmul.bf16.vlgmr.msrb.gmra.mxu0 %v7270_v51  ;;  %2011 = vmatmul.bf16.vlgmr.msrb.gmra.mxu1 %v7272_v36 }
 0x1c3   :  { %2239 = vmatpush.bf16.msra.mxu0 %v6505_v5  ;;  %2252 = vmatpush.bf16.msra.mxu1 %v6507_v6 }
 0x1c4   :  { %2024 = vmatmul.bf16.vlgmr.msra.gmra.mxu2 %v7270_v51  ;;  %2037 = vmatmul.bf16.vlgmr.msra.gmra.mxu3 %v7272_v36  ;;  %v9283_v51 = vld [vmem:[#allocation44_spill] sm:$0xff]  ;;  %v9284_v36 = vld [vmem:[#allocation35_spill] sm:$0xff] }
 0x1c5   :  { %2265 = vmatpush.bf16.msrb.mxu2 %v6527_v28  ;;  %2278 = vmatpush.bf16.msrb.mxu3 %v6529_v29 }
 0x1c7   :  { %2240 = vmatpush.bf16.msra.mxu0 %v6517_v12  ;;  %2253 = vmatpush.bf16.msra.mxu1 %v6519_v13 }
 0x1c9   :  { %2266 = vmatpush.bf16.msrb.mxu2 %v6543_v40  ;;  %2279 = vmatpush.bf16.msrb.mxu3 %v6545_v41 }
 0x1cb   :  { %2241 = vmatpush.bf16.msra.mxu0 %v6523_v22  ;;  %2254 = vmatpush.bf16.msra.mxu1 %v6525_v23 }
 0x1cd   :  { %2267 = vmatpush.bf16.msrb.mxu2 %v6555_v52  ;;  %2280 = vmatpush.bf16.msrb.mxu3 %v6557_v53 }
 0x1cf   :  { %2242 = vmatpush.bf16.msra.mxu0 %v6533_v34  ;;  %2255 = vmatpush.bf16.msra.mxu1 %v6535_v35 }
 0x1d1   :  { %2268 = vmatpush.bf16.msrb.mxu2 %v6571_v1  ;;  %2281 = vmatpush.bf16.msrb.mxu3 %v6573_v2  ;;  %v9285_v1 = vld [vmem:[#allocation36_spill] sm:$0xff]  ;;  %v9286_v2 = vld [vmem:[#allocation47_spill] sm:$0xff] }
 0x1d3   :  { %2243 = vmatpush.bf16.msra.mxu0 %v6549_v46  ;;  %2256 = vmatpush.bf16.msra.mxu1 %v6551_v47  ;;  %v9287_v46 = vld [vmem:[#allocation48_spill] sm:$0xff]  ;;  %v9288_v47 = vld [vmem:[#allocation39_spill] sm:$0xff] }
 0x1d5   :  { %2269 = vmatpush.bf16.msrb.mxu2 %v6583_v20  ;;  %2282 = vmatpush.bf16.msrb.mxu3 %v6585_v21  ;;  %v9289_v20 = vld [vmem:[#allocation40_spill] sm:$0xff]  ;;  %v9290_v21 = vld [vmem:[#allocation41_spill] sm:$0xff] }
 0x1d7   :  { %2244 = vmatpush.bf16.msra.mxu0 %v6565_v59  ;;  %2257 = vmatpush.bf16.msra.mxu1 %v6567_v60  ;;  %v9291_v59 = vld [vmem:[#allocation42_spill] sm:$0xff]  ;;  %v9292_v60 = vld [vmem:[#allocation51_spill] sm:$0xff] }
 0x1d9   :  { %2270 = vmatpush.bf16.msrb.mxu2 %v6603_v42  ;;  %2283 = vmatpush.bf16.msrb.mxu3 %v9283_v51  ;;  %v9293_v42 = vld [vmem:[#allocation52_spill] sm:$0xff]  ;;  %v9294_v51 = vld [vmem:[#allocation53_spill] sm:$0xff] }
 0x1db   :  { %2245 = vmatpush.bf16.msra.mxu0 %v9284_v36  ;;  %2258 = vmatpush.bf16.msra.mxu1 %v9285_v1  ;;  %v9295_v36 = vld [vmem:[#allocation54_spill] sm:$0xff]  ;;  %v9296_v1 = vld [vmem:[#allocation45_spill] sm:$0xff] }
 0x1dd   :  { %2271 = vmatpush.bf16.msrb.mxu2 %v9286_v2  ;;  %2284 = vmatpush.bf16.msrb.mxu3 %v9287_v46  ;;  %v9297_v2 = vld [vmem:[#allocation46_spill] sm:$0xff]  ;;  %v9298_v46 = vld [vmem:[#allocation57_spill] sm:$0xff] }
 0x1df   :  { %2246 = vmatpush.bf16.msra.mxu0 %v9288_v47  ;;  %2259 = vmatpush.bf16.msra.mxu1 %v9289_v20  ;;  %v9299_v47 = vld [vmem:[#allocation58_spill] sm:$0xff]  ;;  %v9300_v20 = vld [vmem:[#allocation49_spill] sm:$0xff] }
 0x1e1   :  { %2272 = vmatpush.bf16.msrb.mxu2 %v9292_v60  ;;  %2285 = vmatpush.bf16.msrb.mxu3 %v9293_v42  ;;  %v9303_v60 = vld [vmem:[#allocation62_spill] sm:$0xff]  ;;  %v9304_v42 = vld [vmem:[#allocation55_spill] sm:$0xff] }
 0x1e3   :  { %2291 = vmatpush.bf16.msrb.mxu0 %v9290_v21  ;;  %2304 = vmatpush.bf16.msrb.mxu1 %v9291_v59  ;;  %v9301_v21 = vld [vmem:[#allocation50_spill] sm:$0xff]  ;;  %v9302_v59 = vld [vmem:[#allocation61_spill] sm:$0xff] }
 0x1e5   :  { %2317 = vmatpush.bf16.msra.mxu2 %v9294_v51  ;;  %2330 = vmatpush.bf16.msra.mxu3 %v9295_v36  ;;  %v9305_v51 = vld [vmem:[#allocation56_spill] sm:$0xff]  ;;  %v9306_v36 = vld [vmem:[#allocation65_spill] sm:$0xff] }
 0x1e7   :  { %2292 = vmatpush.bf16.msrb.mxu0 %v9296_v1  ;;  %2305 = vmatpush.bf16.msrb.mxu1 %v9297_v2  ;;  %v9307_v1 = vld [vmem:[#allocation66_spill] sm:$0xff]  ;;  %v9308_v2 = vld [vmem:[#allocation59_spill] sm:$0xff] }
 0x1e9   :  { %2318 = vmatpush.bf16.msra.mxu2 %v9298_v46  ;;  %2331 = vmatpush.bf16.msra.mxu3 %v9299_v47  ;;  %v9309_v46 = vld [vmem:[#allocation60_spill] sm:$0xff]  ;;  %v9310_v47 = vld [vmem:[#allocation69_spill] sm:$0xff] }
 0x1eb   :  { %2293 = vmatpush.bf16.msrb.mxu0 %v9300_v20  ;;  %2306 = vmatpush.bf16.msrb.mxu1 %v9301_v21  ;;  %v9311_v20 = vld [vmem:[#allocation70_spill] sm:$0xff]  ;;  %v9312_v21 = vld [vmem:[#allocation63_spill] sm:$0xff] }
 0x1ed   :  { %2319 = vmatpush.bf16.msra.mxu2 %v9302_v59  ;;  %2332 = vmatpush.bf16.msra.mxu3 %v9303_v60  ;;  %v9313_v59 = vld [vmem:[#allocation64_spill] sm:$0xff]  ;;  %v9314_v60 = vld [vmem:[#allocation73_spill] sm:$0xff] }
 0x1ef   :  { %2294 = vmatpush.bf16.msrb.mxu0 %v9304_v42  ;;  %2307 = vmatpush.bf16.msrb.mxu1 %v9305_v51  ;;  %v9315_v42 = vld [vmem:[#allocation74_spill] sm:$0xff]  ;;  %v9316_v51 = vld [vmem:[#allocation67_spill] sm:$0xff] }
 0x1f1   :  { %2320 = vmatpush.bf16.msra.mxu2 %v9306_v36  ;;  %2333 = vmatpush.bf16.msra.mxu3 %v9307_v1  ;;  %v9317_v36 = vld [vmem:[#allocation68_spill] sm:$0xff]  ;;  %v9318_v1 = vld [vmem:[#allocation75_spill] sm:$0xff] }
 0x1f3   :  { %2295 = vmatpush.bf16.msrb.mxu0 %v9308_v2  ;;  %2308 = vmatpush.bf16.msrb.mxu1 %v9309_v46  ;;  %v9319_v2 = vld [vmem:[#allocation76_spill] sm:$0xff]  ;;  %v9320_v46 = vld [vmem:[#allocation71_spill] sm:$0xff] }
 0x1f5   :  { %2321 = vmatpush.bf16.msra.mxu2 %v9310_v47  ;;  %2334 = vmatpush.bf16.msra.mxu3 %v9311_v20  ;;  %v9321_v47 = vld [vmem:[#allocation72_spill] sm:$0xff]  ;;  %v9322_v20 = vld [vmem:[#allocation77_spill] sm:$0xff] }
 0x1f7   :  { %2296 = vmatpush.bf16.msrb.mxu0 %v9312_v21  ;;  %2309 = vmatpush.bf16.msrb.mxu1 %v9313_v59  ;;  %v9323_v21 = vld [vmem:[#allocation78_spill] sm:$0xff] }
 0x1f9   :  { %2322 = vmatpush.bf16.msra.mxu2 %v9314_v60  ;;  %2335 = vmatpush.bf16.msra.mxu3 %v9315_v42 }
 0x1fb   :  { %2297 = vmatpush.bf16.msrb.mxu0 %v9316_v51  ;;  %2310 = vmatpush.bf16.msrb.mxu1 %v9317_v36 }
 0x1fd   :  { %2323 = vmatpush.bf16.msra.mxu2 %v9318_v1  ;;  %2336 = vmatpush.bf16.msra.mxu3 %v9319_v2  ;;  %v9324_v1 = vld [vmem:[#allocation127_spill] sm:$0xff] }
 0x1fe   :  { %v1843_v59 = vpop.f32.mrf.mxu0  ;;  %v1856_v60 = vpop.f32.mrf.mxu1  ;;  %v545_v23 = vrot.slane %v9324_v1, 4 }
 0x1ff   :  { %2298 = vmatpush.bf16.msrb.mxu0 %v9320_v46  ;;  %2311 = vmatpush.bf16.msrb.mxu1 %v9321_v47  ;;  %v1857_v36 = vadd.f32 %v1856_v60, %v1843_v59 }
 0x201   :  { %2324 = vmatpush.bf16.msra.mxu2 %v9322_v20  ;;  %2337 = vmatpush.bf16.msra.mxu3 %v9323_v21 }
 0x205   :  { %v1869_v35 = vpop.f32.mrf.mxu2  ;;  %v1882_v42 = vpop.f32.mrf.mxu3 }
 0x206   :  { %v1883_v34 = vadd.f32 %v1882_v42, %v1869_v35  ;;  %v1845_v51 = vpop.f32.mrf.mxu0  ;;  %v1858_v53 = vpop.f32.mrf.mxu1 }
 0x208   :  { %v2049_v52 = vrot.slane %v1883_v34, 4 }
 0x20a   :  { %v2051_v2 = vsel %vm122_vm1, %v1857_v36, %v2049_v52 }
 0x20b   :  { %v2055_v46 = vadd.f32 %v2051_v2, %v545_v23 }
 0x20d   :  { %v5832_v22 = vmul.f32 -1.442695, %v2055_v46  ;;  %v2093_v47 = vrot.slane %v2055_v46, 4  ;;  %v1871_v41 = vpop.f32.mrf.mxu2  ;;  %v1884_v20 = vpop.f32.mrf.mxu3  ;;  %v9325_v46 = vld [vmem:[#allocation152_spill] sm:$0xff] }
 0x20e   :  { %v1895_v40 = vpop.f32.mrf.mxu0  ;;  %v1908_v21 = vpop.f32.mrf.mxu1  ;;  %v547_v41 = vrot.slane %v9325_v46, 4 }
 0x20f   :  { %6095 = vpow2.f32 %v5832_v22  ;;  %v5833_v13 = vmul.f32 -1.442695, %v2093_v47  ;;  %v1909_v23 = vadd.f32 %v1908_v21, %v1895_v40 }
 0x211   :  { %6097 = vpow2.f32 %v5833_v13 }
 0x215   :  { %v6096_v12 = vpop.eup %6095  ;;  %v1921_v35 = vpop.f32.mrf.mxu2 }
 0x216   :  { %v1934_v42 = vpop.f32.mrf.mxu3  ;;  %v2076_v53 = vadd.f32 1.0, %v6096_v12  ;;  %v1897_v34 = vpop.f32.mrf.mxu0 }
 0x217   :  { %v1935_v59 = vadd.f32 %v1934_v42, %v1921_v35  ;;  %v1910_v60 = vpop.f32.mrf.mxu1  ;;  %v6098_v1 = vpop.eup %6097 }
 0x218   :  { %6099 = vrcp.f32 %v2076_v53  ;;  %v2098_v52 = vadd.f32 1.0, %v6098_v1  ;;  %v2088_v40 = vand.u32 2147483648, %v2076_v53  ;;  %v2086_v1 = vand.u32 2147483647, %v2076_v53 }
 0x219   :  { %v2050_v2 = vrot.slane %v1935_v59, 4  ;;  %vm2082_vm12 = vweird.f32 %v2076_v53 }
 0x21a   :  { %6101 = vrcp.f32 %v2098_v52  ;;  %vm2104_vm15 = vweird.f32 %v2098_v52  ;;  %vm2087_vm0 = vcmp.eq.f32.partialorder %v2086_v1, 8.507059e+37 }
 0x21b   :  { %v2052_v20 = vsel %vm122_vm1, %v1909_v23, %v2050_v2  ;;  %v2110_v23 = vand.u32 2147483648, %v2098_v52 }
 0x21c   :  { %v2056_v22 = vadd.f32 %v2052_v20, %v547_v41  ;;  %v2108_v41 = vand.u32 2147483647, %v2098_v52  ;;  %v2089_v20 = vor.u32 1.1754944e-38, %v2088_v40 }
 0x21d   :  { %v1923_v13 = vpop.f32.mrf.mxu2 }
 0x21e   :  { %v2116_v47 = vrot.slane %v2056_v22, 4  ;;  %v1936_v51 = vpop.f32.mrf.mxu3  ;;  %v6100_v36 = vpop.eup %6099  ;;  %vm2109_vm3 = vcmp.eq.f32.partialorder %v2108_v41, 8.507059e+37 }
 0x21f   :  { %v2078_v29 = vmul.f32 %v6100_v36, %v2076_v53  ;;  %v1947_v42 = vpop.f32.mrf.mxu0  ;;  %v1960_v34 = vpop.f32.mrf.mxu1  ;;  %vm2083_vm11 = vweird.f32 %v6100_v36 }
 0x220   :  { %v5834_v12 = vmul.f32 -1.442695, %v2116_v47  ;;  %v6102_v35 = vpop.eup %6101  ;;  %vm2084_vm14 = vmor %vm2082_vm12, %vm2083_vm11 }
 0x221   :  { %v2079_v60 = vsub.f32 1.0, %v2078_v29  ;;  %v2100_v28 = vmul.f32 %v6102_v35, %v2098_v52  ;;  %vm2105_vm13 = vweird.f32 %v6102_v35 }
 0x222   :  { %6103 = vpow2.f32 %v5834_v12  ;;  %vm2106_vm2 = vmor %vm2104_vm15, %vm2105_vm13 }
 0x223   :  { %6105 = vtanh.f32 %v2056_v22  ;;  %v2101_v21 = vsub.f32 1.0, %v2100_v28  ;;  %v2080_v59 = vmul.f32 %v6100_v36, %v2079_v60  ;;  %v2111_v28 = vor.u32 1.1754944e-38, %v2110_v23 }
 0x225   :  { %v2102_v2 = vmul.f32 %v6102_v35, %v2101_v21  ;;  %v2081_v46 = vadd.f32 %v6100_v36, %v2080_v59 }
 0x227   :  { %v2085_v13 = vsel %vm2084_vm14, %v6100_v36, %v2081_v46  ;;  %v2103_v29 = vadd.f32 %v6102_v35, %v2102_v2  ;;  %v1949_v53 = vpop.f32.mrf.mxu0  ;;  %v1962_v21 = vpop.f32.mrf.mxu1  ;;  %v1961_v36 = vadd.f32 %v1960_v34, %v1947_v42  ;;  %v9326_v46 = vld [vmem:[#allocation172_spill] sm:$0xff] }
 0x228   :  { %v6104_v47 = vpop.eup %6103  ;;  %v1973_v51 = vpop.f32.mrf.mxu2  ;;  %v2090_v60 = vsel %vm2087_vm0, %v2089_v20, %v2085_v13 }
 0x229   :  { %v1986_v12 = vpop.f32.mrf.mxu3  ;;  %v6106_v22 = vpop.eup %6105  ;;  %v2121_v6 = vadd.f32 1.0, %v6104_v47  ;;  %v2107_v58 = vsel %vm2106_vm2, %v6102_v35, %v2103_v29 }
 0x22a   :  { %v1987_v5 = vadd.f32 %v1986_v12, %v1973_v51  ;;  %v2138_v59 = vmul.f32 %v6106_v22, %v2090_v60  ;;  %v2112_v9 = vsel %vm2109_vm3, %v2111_v28, %v2107_v58 }
 0x22b   :  { %6107 = vrcp.f32 %v2121_v6  ;;  %v2137_v52 = vmul.f32 %v2112_v9, %v7266_v17  ;;  %v2133_v9 = vand.u32 2147483648, %v2121_v6  ;;  %v2131_v42 = vand.u32 2147483647, %v2121_v6 }
 0x22c   :  { %v2064_v40 = vrot.slane %v1987_v5, 4  ;;  %vm2127_vm5 = vweird.f32 %v2121_v6 }
 0x22d   :  { %v7423_v1 = vadd.f32 %v2138_v59, %v2137_v52  ;;  %v2134_v22 = vor.u32 1.1754944e-38, %v2133_v9  ;;  %vm2132_vm7 = vcmp.eq.f32.partialorder %v2131_v42, 8.507059e+37 }
 0x22e   :  { %v2066_v2 = vsel %vm122_vm1, %v1961_v36, %v2064_v40 }
 0x22f   :  { %v2070_v23 = vadd.f32 %v2066_v2, %v9326_v46 }
 0x230   :  { %v1975_v20 = vpop.f32.mrf.mxu2 }
 0x231   :  { %v1988_v47 = vpop.f32.mrf.mxu3  ;;  %v6108_v13 = vpop.eup %6107  ;;  %v5835_v51 = vmul.f32 -1.442695, %v2070_v23  ;;  %v2162_v12 = vrot.slane %v2070_v23, 4 }
 0x232   :  { %v2123_v35 = vmul.f32 %v6108_v13, %v2121_v6  ;;  %vm2128_vm4 = vweird.f32 %v6108_v13 }
 0x233   :  { %6109 = vpow2.f32 %v5835_v51  ;;  %v5836_v41 = vmul.f32 -1.442695, %v2162_v12  ;;  %vm2129_vm6 = vmor %vm2127_vm5, %vm2128_vm4 }
 0x234   :  { %v2124_v58 = vsub.f32 1.0, %v2123_v35  ;;  %6111 = vtanh.f32 %v7423_v1 }
 0x235   :  { %6113 = vpow2.f32 %v5836_v41 }
 0x236   :  { %v2125_v5 = vmul.f32 %v6108_v13, %v2124_v58 }
 0x238   :  { %v2126_v34 = vadd.f32 %v6108_v13, %v2125_v5 }
 0x239   :  { %v6110_v29 = vpop.eup %6109 }
 0x23a   :  { %v6112_v28 = vpop.eup %6111  ;;  %v2130_v60 = vsel %vm2129_vm6, %v6108_v13, %v2126_v34  ;;  %v2145_v53 = vadd.f32 1.0, %v6110_v29 }
 0x23b   :  { %v6114_v21 = vpop.eup %6113  ;;  %v2135_v59 = vsel %vm2132_vm7, %v2134_v22, %v2130_v60  ;;  %v9327_v60 = vld [vmem:[#allocation175_spill] sm:$0xff] }
 0x23c   :  { %v7428_v52 = vmul.f32 %v6112_v28, %v2135_v59  ;;  %6115 = vrcp.f32 %v2145_v53  ;;  %v2167_v36 = vadd.f32 1.0, %v6114_v21  ;;  %vm2151_vm13 = vweird.f32 %v2145_v53 }
 0x23e   :  { %2227 = vst [vmem:[#allocation6 + $0x4] sm:$0xf] %v7428_v52  ;;  %6117 = vrcp.f32 %v2167_v36  ;;  %v2179_v9 = vand.u32 2147483648, %v2167_v36  ;;  %v2177_v22 = vand.u32 2147483647, %v2167_v36  ;;  %vm2173_vm9 = vweird.f32 %v2167_v36 }
 0x23f   :  { %v1999_v40 = vpop.f32.mrf.mxu0  ;;  %v2012_v2 = vpop.f32.mrf.mxu1 }
 0x240   :  { %v2013_v5 = vadd.f32 %v2012_v2, %v1999_v40  ;;  %vm2178_vm12 = vcmp.eq.f32.partialorder %v2177_v22, 8.507059e+37 }
 0x242   :  { %v6116_v46 = vpop.eup %6115 }
 0x243   :  { %v2147_v6 = vmul.f32 %v6116_v46, %v2145_v53  ;;  %vm2152_vm11 = vweird.f32 %v6116_v46 }
 0x244   :  { %v6118_v23 = vpop.eup %6117  ;;  %vm2153_vm14 = vmor %vm2151_vm13, %vm2152_vm11 }
 0x245   :  { %v2148_v20 = vsub.f32 1.0, %v2147_v6  ;;  %v2169_v47 = vmul.f32 %v6118_v23, %v2167_v36  ;;  %vm2174_vm8 = vweird.f32 %v6118_v23  ;;  %v2207_v6 = vrot.slane %v7266_v17, 4 }
 0x246   :  { %vm2175_vm10 = vmor %vm2173_vm9, %vm2174_vm8 }
 0x247   :  { %v2025_v51 = vpop.f32.mrf.mxu2  ;;  %v2038_v13 = vpop.f32.mrf.mxu3  ;;  %v2170_v58 = vsub.f32 1.0, %v2169_v47  ;;  %v2149_v34 = vmul.f32 %v6116_v46, %v2148_v20  ;;  %v2157_v47 = vand.u32 2147483648, %v2145_v53 }
 0x248   :  { %v2039_v12 = vadd.f32 %v2038_v13, %v2025_v51  ;;  %v2001_v35 = vpop.f32.mrf.mxu0  ;;  %v2014_v41 = vpop.f32.mrf.mxu1  ;;  %v2180_v51 = vor.u32 1.1754944e-38, %v2179_v9 }
 0x249   :  { %v2171_v29 = vmul.f32 %v6118_v23, %v2170_v58  ;;  %v2150_v13 = vadd.f32 %v6116_v46, %v2149_v34 }
 0x24a   :  { %v2065_v42 = vrot.slane %v2039_v12, 4  ;;  %v2155_v12 = vand.u32 2147483647, %v2145_v53 }
 0x24b   :  { %v2172_v59 = vadd.f32 %v6118_v23, %v2171_v29 }
 0x24c   :  { %v2067_v28 = vsel %vm122_vm1, %v2013_v5, %v2065_v42  ;;  %v2154_v5 = vsel %vm2153_vm14, %v6116_v46, %v2150_v13  ;;  %v2158_v42 = vor.u32 1.1754944e-38, %v2157_v47  ;;  %vm2156_vm15 = vcmp.eq.f32.partialorder %v2155_v12, 8.507059e+37 }
 0x24d   :  { %v2071_v21 = vadd.f32 %v2067_v28, %v9327_v60  ;;  %v2176_v35 = vsel %vm2175_vm10, %v6118_v23, %v2172_v59 }
 0x24e   :  { %v2181_v41 = vsel %vm2178_vm12, %v2180_v51, %v2176_v35  ;;  %v2159_v9 = vsel %vm2156_vm15, %v2158_v42, %v2154_v5  ;;  %v9329_v42 = vld [vmem:[#allocation97_spill] sm:$0xff] }
 0x24f   :  { %6119 = vtanh.f32 %v2071_v21  ;;  %v2185_v40 = vrot.slane %v2071_v21, 4  ;;  %v2027_v2 = vpop.f32.mrf.mxu2  ;;  %v2040_v20 = vpop.f32.mrf.mxu3  ;;  %v2209_v58 = vmul.f32 %v2207_v6, %v2181_v41 }
 0x251   :  { %v5837_v36 = vmul.f32 -1.442695, %v2185_v40 }
 0x253   :  { %6121 = vpow2.f32 %v5837_v36 }
 0x255   :  { %v6120_v17 = vpop.eup %6119 }
 0x256   :  { %v2210_v34 = vmul.f32 %v6120_v17, %v2159_v9  ;;  %v9330_v17 = vld [vmem:[#allocation98_spill] sm:$0xff]  ;;  %v9331_v9 = vld [vmem:[#allocation99_spill] sm:$0xff] }
 0x258   :  { %v2211_v29 = vadd.f32 %v2210_v34, %v2209_v58  ;;  %v9332_v34 = vld [vmem:[#allocation100_spill] sm:$0xff] }
 0x259   :  { %v6122_v23 = vpop.eup %6121 }
 0x25a   :  { %v2190_v22 = vadd.f32 1.0, %v6122_v23  ;;  %v2222_v28 = vrot.slane %v2211_v29, 4  ;;  %v9334_v23 = vld [vmem:[#allocation102_spill] sm:$0xff] }
 0x25c   :  { %6123 = vrcp.f32 %v2190_v22  ;;  %v7436_v60 = vsel %vm122_vm1, %v7423_v1, %v2222_v28  ;;  %v2202_v6 = vand.u32 2147483648, %v2190_v22  ;;  %v2200_v51 = vand.u32 2147483647, %v2190_v22  ;;  %v9336_v28 = vld [vmem:[#allocation105_spill] sm:$0xff] }
 0x25d   :  { %6125 = vtanh.f32 %v2211_v29  ;;  %vm2196_vm2 = vweird.f32 %v2190_v22  ;;  %v9333_v29 = vld [vmem:[#allocation101_spill] sm:$0xff] }
 0x25e   :  { %v2203_v47 = vor.u32 1.1754944e-38, %v2202_v6  ;;  %vm2201_vm4 = vcmp.eq.f32.partialorder %v2200_v51, 8.507059e+37  ;;  %v9340_v6 = vld [vmem:[#allocation109_spill] sm:$0xff]  ;;  %v9342_v51 = vld [vmem:[#allocation111_spill] sm:$0xff] }
 0x262   :  { %v6124_v53 = vpop.eup %6123 }
 0x263   :  { %v2192_v21 = vmul.f32 %v6124_v53, %v2190_v22  ;;  %vm2197_vm0 = vweird.f32 %v6124_v53  ;;  %v6126_v40 = vpop.eup %6125  ;;  %v9335_v22 = vld [vmem:[#allocation103_spill] sm:$0xff] }
 0x264   :  { %vm2198_vm3 = vmor %vm2196_vm2, %vm2197_vm0 }
 0x265   :  { %v2193_v59 = vsub.f32 1.0, %v2192_v21  ;;  %v9338_v21 = vld [vmem:[#allocation107_spill] sm:$0xff] }
 0x267   :  { %v2194_v46 = vmul.f32 %v6124_v53, %v2193_v59  ;;  %v9339_v59 = vld [vmem:[#allocation108_spill] sm:$0xff] }
 0x269   :  { %v2195_v13 = vadd.f32 %v6124_v53, %v2194_v46  ;;  %v9341_v46 = vld [vmem:[#allocation110_spill] sm:$0xff] }
 0x26b   :  { %v2199_v35 = vsel %vm2198_vm3, %v6124_v53, %v2195_v13  ;;  %v9337_v53 = vld [vmem:[#allocation106_spill] sm:$0xff]  ;;  %v9343_v13 = vld [vmem:[#allocation112_spill] sm:$0xff] }
 0x26c   :  { %v2204_v2 = vsel %vm2201_vm4, %v2203_v47, %v2199_v35  ;;  %v9344_v47 = vld [vmem:[#allocation113_spill] sm:$0xff]  ;;  %v9345_v35 = vld [vmem:[#allocation114_spill] sm:$0xff] }
 0x26d   :  { %v2213_v20 = vmul.f32 %v6126_v40, %v2204_v2  ;;  %v9346_v40 = vld [vmem:[#allocation115_spill] sm:$0xff]  ;;  %v9347_v2 = vld [vmem:[#allocation116_spill] sm:$0xff] }
 0x26f   :  { %v2216_v12 = vrot.slane %v2213_v20, 4  ;;  %2229 = vst [vmem:[#allocation7 + $0x18] sm:$0xf] %v2213_v20  ;;  %v9348_v20 = vld [vmem:[#allocation117_spill] sm:$0xff] }
 0x271   :  { %v2217_v1 = vsel %vm122_vm1, %v7428_v52, %v2216_v12  ;;  %v9328_v52 = vld [vmem:[#allocation96_spill] sm:$0xff]  ;;  %v9349_v12 = vld [vmem:[#allocation118_spill] sm:$0xff] }
 0x272   :  { %2232 = vst [vmem:[#allocation1] ss:$2 sm:$0xff] %v2217_v1  ;;  %v9350_v1 = vld [vmem:[#allocation119_spill] sm:$0xff] }
 0x279   :  { %v2233_v41 = vld.sshfl [vmem:[#allocation1] sm:$0xff pattern:$0x75316420]  ;;  %v2234_v36 = vld.sshfl [vmem:[#allocation1 + $0x8] sm:$0xff pattern:$0x75316420] }
 0x27a   :  { %v7440_v58 = vpack.c.bf16 %v2233_v41, %v2233_v41  ;;  %v7442_v5 = vpack.c.bf16 %v2234_v36, %v2234_v36  ;;  %v9351_v41 = vld [vmem:[#allocation120_spill] sm:$0xff]  ;;  %v9352_v36 = vld [vmem:[#allocation121_spill] sm:$0xff] }
 0x27c   :  { %2247 = vmatmul.bf16.vlgmr.msra.gmra.mxu0 %v7440_v58  ;;  %2260 = vmatmul.bf16.vlgmr.msra.gmra.mxu1 %v7442_v5 }
 0x27d   :  { %2273 = vmatmul.bf16.vlgmr.msrb.gmra.mxu2 %v7440_v58  ;;  %2286 = vmatmul.bf16.vlgmr.msrb.gmra.mxu3 %v7442_v5 }
 0x27e   :  { %2343 = vmatpush.bf16.msra.mxu0 %v9229_v54  ;;  %2356 = vmatpush.bf16.msra.mxu1 %v9230_v11 }
 0x27f   :  { %2369 = vmatpush.bf16.msrb.mxu2 %v9231_v0  ;;  %2382 = vmatpush.bf16.msrb.mxu3 %v9232_v45 }
 0x282   :  { %2344 = vmatpush.bf16.msra.mxu0 %v9233_v24  ;;  %2357 = vmatpush.bf16.msra.mxu1 %v9234_v27 }
 0x283   :  { %2370 = vmatpush.bf16.msrb.mxu2 %v9235_v49  ;;  %2383 = vmatpush.bf16.msrb.mxu3 %v9236_v10 }
 0x286   :  { %2345 = vmatpush.bf16.msra.mxu0 %v9237_v43  ;;  %2358 = vmatpush.bf16.msra.mxu1 %v9238_v33 }
 0x287   :  { %2371 = vmatpush.bf16.msrb.mxu2 %v9239_v48  ;;  %2384 = vmatpush.bf16.msrb.mxu3 %v9240_v26 }
 0x28a   :  { %2346 = vmatpush.bf16.msra.mxu0 %v9241_v63  ;;  %2359 = vmatpush.bf16.msra.mxu1 %v9242_v38 }
 0x28b   :  { %2372 = vmatpush.bf16.msrb.mxu2 %v9243_v62  ;;  %2385 = vmatpush.bf16.msrb.mxu3 %v9244_v25 }
 0x28c   :  { %2299 = vmatmul.bf16.vlgmr.msrb.gmra.mxu0 %v7440_v58  ;;  %2312 = vmatmul.bf16.vlgmr.msrb.gmra.mxu1 %v7442_v5 }
 0x28d   :  { %2325 = vmatmul.bf16.vlgmr.msra.gmra.mxu2 %v7440_v58  ;;  %2338 = vmatmul.bf16.vlgmr.msra.gmra.mxu3 %v7442_v5 }
 0x28e   :  { %2347 = vmatpush.bf16.msra.mxu0 %v9245_v57  ;;  %2360 = vmatpush.bf16.msra.mxu1 %v9328_v52 }
 0x28f   :  { %2373 = vmatpush.bf16.msrb.mxu2 %v9329_v42  ;;  %2386 = vmatpush.bf16.msrb.mxu3 %v9330_v17 }
 0x292   :  { %2348 = vmatpush.bf16.msra.mxu0 %v9331_v9  ;;  %2361 = vmatpush.bf16.msra.mxu1 %v9332_v34 }
 0x293   :  { %2374 = vmatpush.bf16.msrb.mxu2 %v9333_v29  ;;  %2387 = vmatpush.bf16.msrb.mxu3 %v9334_v23 }
 0x296   :  { %2349 = vmatpush.bf16.msra.mxu0 %v9335_v22  ;;  %2362 = vmatpush.bf16.msra.mxu1 %v9254_v31 }
 0x297   :  { %2375 = vmatpush.bf16.msrb.mxu2 %v9336_v28  ;;  %2388 = vmatpush.bf16.msrb.mxu3 %v9337_v53 }
 0x29a   :  { %2350 = vmatpush.bf16.msra.mxu0 %v9338_v21  ;;  %2363 = vmatpush.bf16.msra.mxu1 %v9339_v59 }
 0x29b   :  { %2376 = vmatpush.bf16.msrb.mxu2 %v9340_v6  ;;  %2389 = vmatpush.bf16.msrb.mxu3 %v9341_v46 }
 0x29d   :  { %2351 = vmatmul.bf16.vlgmr.msra.gmra.mxu0 %v7440_v58  ;;  %2364 = vmatmul.bf16.vlgmr.msra.gmra.mxu1 %v7442_v5 }
 0x29e   :  { %2395 = vmatpush.bf16.msrb.mxu0 %v9342_v51  ;;  %2408 = vmatpush.bf16.msrb.mxu1 %v9343_v13 }
 0x29f   :  { %2421 = vmatpush.bf16.msra.mxu2 %v9344_v47  ;;  %2434 = vmatpush.bf16.msra.mxu3 %v9345_v35  ;;  %v9353_v35 = vld [vmem:[#allocation122_spill] sm:$0xff] }
 0x2a0   :  { %2377 = vmatmul.bf16.vlgmr.msrb.gmra.mxu2 %v7440_v58  ;;  %2390 = vmatmul.bf16.vlgmr.msrb.gmra.mxu3 %v7442_v5 }
 0x2a2   :  { %2396 = vmatpush.bf16.msrb.mxu0 %v9346_v40  ;;  %2409 = vmatpush.bf16.msrb.mxu1 %v9347_v2 }
 0x2a3   :  { %2422 = vmatpush.bf16.msra.mxu2 %v9348_v20  ;;  %2435 = vmatpush.bf16.msra.mxu3 %v9349_v12 }
 0x2a6   :  { %2397 = vmatpush.bf16.msrb.mxu0 %v9350_v1  ;;  %2410 = vmatpush.bf16.msrb.mxu1 %v9351_v41 }
 0x2a7   :  { %2423 = vmatpush.bf16.msra.mxu2 %v9352_v36  ;;  %2436 = vmatpush.bf16.msra.mxu3 %v9353_v35 }
 0x2aa   :  { %2398 = vmatpush.bf16.msrb.mxu0 %v9272_v44  ;;  %2411 = vmatpush.bf16.msrb.mxu1 %v9273_v7 }
 0x2ab   :  { %2424 = vmatpush.bf16.msra.mxu2 %v9274_v4  ;;  %2437 = vmatpush.bf16.msra.mxu3 %v9275_v30 }
 0x2ae   :  { %2399 = vmatpush.bf16.msrb.mxu0 %v9276_v39  ;;  %2412 = vmatpush.bf16.msrb.mxu1 %v9277_v14 }
 0x2af   :  { %2425 = vmatpush.bf16.msra.mxu2 %v9278_v15  ;;  %2438 = vmatpush.bf16.msra.mxu3 %v9279_v18  ;;  %v9354_v18 = vld [vmem:[#allocation150_spill] sm:$0xff] }
 0x2b2   :  { %2400 = vmatpush.bf16.msrb.mxu0 %v9280_v61  ;;  %2413 = vmatpush.bf16.msrb.mxu1 %v9281_v8  ;;  %v9355_v61 = vld [vmem:[#allocation151_spill] sm:$0xff] }
 0x2b3   :  { %2426 = vmatpush.bf16.msra.mxu2 %v9282_v37  ;;  %2439 = vmatpush.bf16.msra.mxu3 %v6988_v32  ;;  %v9356_v8 = vld [vmem:[#allocation15_spill] sm:$0xff]  ;;  %v9357_v37 = vld [vmem:[#allocation16_spill] sm:$0xff] }
 0x2b6   :  { %2401 = vmatpush.bf16.msrb.mxu0 %v7006_v3  ;;  %2414 = vmatpush.bf16.msrb.mxu1 %v7008_v55  ;;  %v9366_v55 = vld [vmem:[#allocation29_spill] sm:$0xff] }
 0x2b7   :  { %2427 = vmatpush.bf16.msra.mxu2 %v7015_v56  ;;  %2440 = vmatpush.bf16.msra.mxu3 %v7017_v19  ;;  %v9358_v19 = vld [vmem:[#allocation21_spill] sm:$0xff]  ;;  %v9365_v56 = vld [vmem:[#allocation20_spill] sm:$0xff] }
 0x2ba   :  { %2402 = vmatpush.bf16.msrb.mxu0 %v7021_v16  ;;  %2415 = vmatpush.bf16.msrb.mxu1 %v7023_v50  ;;  %v9359_v16 = vld [vmem:[#allocation22_spill] sm:$0xff]  ;;  %v9360_v50 = vld [vmem:[#allocation17_spill] sm:$0xff] }
 0x2bb   :  { %2428 = vmatpush.bf16.msra.mxu2 %v9354_v18  ;;  %2441 = vmatpush.bf16.msra.mxu3 %v9355_v61  ;;  %v9361_v18 = vld [vmem:[#allocation18_spill] sm:$0xff]  ;;  %v9362_v61 = vld [vmem:[#allocation25_spill] sm:$0xff] }
 0x2bd   :  { %2403 = vmatmul.bf16.vlgmr.msrb.gmra.mxu0 %v7440_v58  ;;  %2416 = vmatmul.bf16.vlgmr.msrb.gmra.mxu1 %v7442_v5 }
 0x2be   :  { %2644 = vmatpush.bf16.msra.mxu0 %v9356_v8  ;;  %2657 = vmatpush.bf16.msra.mxu1 %v9357_v37  ;;  %v9363_v8 = vld [vmem:[#allocation26_spill] sm:$0xff]  ;;  %v9364_v37 = vld [vmem:[#allocation19_spill] sm:$0xff] }
 0x2bf   :  { %2429 = vmatmul.bf16.vlgmr.msra.gmra.mxu2 %v7440_v58  ;;  %2442 = vmatmul.bf16.vlgmr.msra.gmra.mxu3 %v7442_v5  ;;  %v9367_v58 = vld [vmem:[#allocation30_spill] sm:$0xff]  ;;  %v9368_v5 = vld [vmem:[#allocation23_spill] sm:$0xff] }
 0x2c0   :  { %2670 = vmatpush.bf16.msrb.mxu2 %v9358_v19  ;;  %2683 = vmatpush.bf16.msrb.mxu3 %v9359_v16  ;;  %v9369_v19 = vld [vmem:[#allocation24_spill] sm:$0xff]  ;;  %v9370_v16 = vld [vmem:[#allocation33_spill] sm:$0xff] }
 0x2c2   :  { %2645 = vmatpush.bf16.msra.mxu0 %v9360_v50  ;;  %2658 = vmatpush.bf16.msra.mxu1 %v9361_v18  ;;  %v9371_v50 = vld [vmem:[#allocation34_spill] sm:$0xff]  ;;  %v9372_v18 = vld [vmem:[#allocation27_spill] sm:$0xff] }
 0x2c4   :  { %2671 = vmatpush.bf16.msrb.mxu2 %v9362_v61  ;;  %2684 = vmatpush.bf16.msrb.mxu3 %v9363_v8  ;;  %v9373_v61 = vld [vmem:[#allocation28_spill] sm:$0xff]  ;;  %v9374_v8 = vld [vmem:[#allocation37_spill] sm:$0xff] }
 0x2c6   :  { %2646 = vmatpush.bf16.msra.mxu0 %v9364_v37  ;;  %2659 = vmatpush.bf16.msra.mxu1 %v9365_v56  ;;  %v9375_v37 = vld [vmem:[#allocation38_spill] sm:$0xff]  ;;  %v9376_v56 = vld [vmem:[#allocation31_spill] sm:$0xff] }
 0x2c8   :  { %2672 = vmatpush.bf16.msrb.mxu2 %v9366_v55  ;;  %2685 = vmatpush.bf16.msrb.mxu3 %v9367_v58  ;;  %v9377_v55 = vld [vmem:[#allocation32_spill] sm:$0xff]  ;;  %v9378_v58 = vld [vmem:[#allocation43_spill] sm:$0xff] }
 0x2ca   :  { %2647 = vmatpush.bf16.msra.mxu0 %v9368_v5  ;;  %2660 = vmatpush.bf16.msra.mxu1 %v9369_v19  ;;  %v9379_v5 = vld [vmem:[#allocation44_spill] sm:$0xff]  ;;  %v9380_v19 = vld [vmem:[#allocation35_spill] sm:$0xff] }
 0x2cc   :  { %2673 = vmatpush.bf16.msrb.mxu2 %v9370_v16  ;;  %2686 = vmatpush.bf16.msrb.mxu3 %v9371_v50  ;;  %v9381_v16 = vld [vmem:[#allocation36_spill] sm:$0xff]  ;;  %v9382_v50 = vld [vmem:[#allocation47_spill] sm:$0xff] }
 0x2ce   :  { %2648 = vmatpush.bf16.msra.mxu0 %v9372_v18  ;;  %2661 = vmatpush.bf16.msra.mxu1 %v9373_v61  ;;  %v9383_v18 = vld [vmem:[#allocation48_spill] sm:$0xff]  ;;  %v9384_v61 = vld [vmem:[#allocation39_spill] sm:$0xff] }
 0x2d0   :  { %2674 = vmatpush.bf16.msrb.mxu2 %v9374_v8  ;;  %2687 = vmatpush.bf16.msrb.mxu3 %v9375_v37  ;;  %v9385_v8 = vld [vmem:[#allocation40_spill] sm:$0xff]  ;;  %v9386_v37 = vld [vmem:[#allocation41_spill] sm:$0xff] }
 0x2d2   :  { %2649 = vmatpush.bf16.msra.mxu0 %v9376_v56  ;;  %2662 = vmatpush.bf16.msra.mxu1 %v9377_v55  ;;  %v9387_v56 = vld [vmem:[#allocation42_spill] sm:$0xff]  ;;  %v9388_v55 = vld [vmem:[#allocation51_spill] sm:$0xff] }
 0x2d4   :  { %2675 = vmatpush.bf16.msrb.mxu2 %v9378_v58  ;;  %2688 = vmatpush.bf16.msrb.mxu3 %v9379_v5  ;;  %v9389_v58 = vld [vmem:[#allocation52_spill] sm:$0xff]  ;;  %v9390_v5 = vld [vmem:[#allocation53_spill] sm:$0xff] }
 0x2d6   :  { %2650 = vmatpush.bf16.msra.mxu0 %v9380_v19  ;;  %2663 = vmatpush.bf16.msra.mxu1 %v9381_v16  ;;  %v9391_v19 = vld [vmem:[#allocation54_spill] sm:$0xff]  ;;  %v9392_v16 = vld [vmem:[#allocation45_spill] sm:$0xff] }
 0x2d8   :  { %2676 = vmatpush.bf16.msrb.mxu2 %v9382_v50  ;;  %2689 = vmatpush.bf16.msrb.mxu3 %v9383_v18  ;;  %v9393_v50 = vld [vmem:[#allocation46_spill] sm:$0xff]  ;;  %v9394_v18 = vld [vmem:[#allocation57_spill] sm:$0xff] }
 0x2da   :  { %2651 = vmatpush.bf16.msra.mxu0 %v9384_v61  ;;  %2664 = vmatpush.bf16.msra.mxu1 %v9385_v8  ;;  %v9395_v61 = vld [vmem:[#allocation58_spill] sm:$0xff]  ;;  %v9396_v8 = vld [vmem:[#allocation49_spill] sm:$0xff] }
 0x2dc   :  { %2677 = vmatpush.bf16.msrb.mxu2 %v9388_v55  ;;  %2690 = vmatpush.bf16.msrb.mxu3 %v9389_v58  ;;  %v9399_v55 = vld [vmem:[#allocation62_spill] sm:$0xff]  ;;  %v9400_v58 = vld [vmem:[#allocation55_spill] sm:$0xff] }
 0x2de   :  { %2696 = vmatpush.bf16.msrb.mxu0 %v9386_v37  ;;  %2709 = vmatpush.bf16.msrb.mxu1 %v9387_v56  ;;  %v9397_v37 = vld [vmem:[#allocation50_spill] sm:$0xff]  ;;  %v9398_v56 = vld [vmem:[#allocation61_spill] sm:$0xff] }
 0x2e0   :  { %2722 = vmatpush.bf16.msra.mxu2 %v9390_v5  ;;  %2735 = vmatpush.bf16.msra.mxu3 %v9391_v19  ;;  %v9401_v5 = vld [vmem:[#allocation56_spill] sm:$0xff]  ;;  %v9402_v19 = vld [vmem:[#allocation65_spill] sm:$0xff] }
 0x2e2   :  { %2697 = vmatpush.bf16.msrb.mxu0 %v9392_v16  ;;  %2710 = vmatpush.bf16.msrb.mxu1 %v9393_v50  ;;  %v9403_v16 = vld [vmem:[#allocation66_spill] sm:$0xff]  ;;  %v9404_v50 = vld [vmem:[#allocation59_spill] sm:$0xff] }
 0x2e4   :  { %2723 = vmatpush.bf16.msra.mxu2 %v9394_v18  ;;  %2736 = vmatpush.bf16.msra.mxu3 %v9395_v61  ;;  %v9405_v18 = vld [vmem:[#allocation60_spill] sm:$0xff]  ;;  %v9406_v61 = vld [vmem:[#allocation69_spill] sm:$0xff] }
 0x2e6   :  { %2698 = vmatpush.bf16.msrb.mxu0 %v9396_v8  ;;  %2711 = vmatpush.bf16.msrb.mxu1 %v9397_v37  ;;  %v9407_v8 = vld [vmem:[#allocation70_spill] sm:$0xff]  ;;  %v9408_v37 = vld [vmem:[#allocation63_spill] sm:$0xff] }
 0x2e8   :  { %2724 = vmatpush.bf16.msra.mxu2 %v9398_v56  ;;  %2737 = vmatpush.bf16.msra.mxu3 %v9399_v55  ;;  %v9409_v56 = vld [vmem:[#allocation64_spill] sm:$0xff]  ;;  %v9410_v55 = vld [vmem:[#allocation73_spill] sm:$0xff] }
 0x2ea   :  { %2699 = vmatpush.bf16.msrb.mxu0 %v9400_v58  ;;  %2712 = vmatpush.bf16.msrb.mxu1 %v9401_v5  ;;  %v9411_v58 = vld [vmem:[#allocation74_spill] sm:$0xff]  ;;  %v9412_v5 = vld [vmem:[#allocation67_spill] sm:$0xff] }
 0x2ec   :  { %2725 = vmatpush.bf16.msra.mxu2 %v9402_v19  ;;  %2738 = vmatpush.bf16.msra.mxu3 %v9403_v16  ;;  %v9413_v19 = vld [vmem:[#allocation68_spill] sm:$0xff]  ;;  %v9414_v16 = vld [vmem:[#allocation75_spill] sm:$0xff] }
 0x2ee   :  { %2700 = vmatpush.bf16.msrb.mxu0 %v9404_v50  ;;  %2713 = vmatpush.bf16.msrb.mxu1 %v9405_v18  ;;  %v9415_v50 = vld [vmem:[#allocation76_spill] sm:$0xff]  ;;  %v9416_v18 = vld [vmem:[#allocation71_spill] sm:$0xff] }
 0x2f0   :  { %2726 = vmatpush.bf16.msra.mxu2 %v9406_v61  ;;  %2739 = vmatpush.bf16.msra.mxu3 %v9407_v8  ;;  %v9417_v61 = vld [vmem:[#allocation72_spill] sm:$0xff]  ;;  %v9418_v8 = vld [vmem:[#allocation77_spill] sm:$0xff] }
 0x2f2   :  { %2701 = vmatpush.bf16.msrb.mxu0 %v9408_v37  ;;  %2714 = vmatpush.bf16.msrb.mxu1 %v9409_v56  ;;  %v9419_v37 = vld [vmem:[#allocation78_spill] sm:$0xff] }
 0x2f4   :  { %2727 = vmatpush.bf16.msra.mxu2 %v9410_v55  ;;  %2740 = vmatpush.bf16.msra.mxu3 %v9411_v58 }
 0x2f6   :  { %2702 = vmatpush.bf16.msrb.mxu0 %v9412_v5  ;;  %2715 = vmatpush.bf16.msrb.mxu1 %v9413_v19 }
 0x2f8   :  { %2728 = vmatpush.bf16.msra.mxu2 %v9414_v16  ;;  %2741 = vmatpush.bf16.msra.mxu3 %v9415_v50  ;;  %v9420_v16 = vld [vmem:[#allocation134_spill] sm:$0xff]  ;;  %v9422_v50 = vld [vmem:[#allocation136_spill] sm:$0xff] }
 0x2f9   :  { %v2248_v56 = vpop.f32.mrf.mxu0  ;;  %v2261_v55 = vpop.f32.mrf.mxu1  ;;  %v9421_v39 = vrot.slane %v9420_v16, 4 }
 0x2fa   :  { %2703 = vmatpush.bf16.msrb.mxu0 %v9416_v18  ;;  %2716 = vmatpush.bf16.msrb.mxu1 %v9417_v61  ;;  %v2262_v19 = vadd.f32 %v2261_v55, %v2248_v56 }
 0x2fb   :  { %v552_v18 = vsel %vm122_vm1, %v9422_v50, %v9421_v39 }
 0x2fc   :  { %2729 = vmatpush.bf16.msra.mxu2 %v9418_v8  ;;  %2742 = vmatpush.bf16.msra.mxu3 %v9419_v37 }
 0x300   :  { %v2274_v3 = vpop.f32.mrf.mxu2  ;;  %v2287_v58 = vpop.f32.mrf.mxu3 }
 0x301   :  { %v2288_v32 = vadd.f32 %v2287_v58, %v2274_v3  ;;  %v2250_v5 = vpop.f32.mrf.mxu0  ;;  %v2263_v15 = vpop.f32.mrf.mxu1 }
 0x303   :  { %v2454_v14 = vrot.slane %v2288_v32, 4 }
 0x305   :  { %v2456_v61 = vsel %vm122_vm1, %v2262_v19, %v2454_v14 }
 0x306   :  { %v2460_v30 = vadd.f32 %v2456_v61, %v552_v18 }
 0x308   :  { %v5838_v8 = vmul.f32 -1.442695, %v2460_v30  ;;  %v2498_v4 = vrot.slane %v2460_v30, 4  ;;  %v2276_v37 = vpop.f32.mrf.mxu2  ;;  %v2289_v7 = vpop.f32.mrf.mxu3  ;;  %v9423_v30 = vld [vmem:[#allocation153_spill] sm:$0xff] }
 0x309   :  { %v2300_v44 = vpop.f32.mrf.mxu0  ;;  %v2313_v35 = vpop.f32.mrf.mxu1  ;;  %v9424_v14 = vrot.slane %v9423_v30, 4  ;;  %v9425_v37 = vld [vmem:[#allocation154_spill] sm:$0xff] }
 0x30a   :  { %6127 = vpow2.f32 %v5838_v8  ;;  %v5839_v3 = vmul.f32 -1.442695, %v2498_v4  ;;  %v2314_v18 = vadd.f32 %v2313_v35, %v2300_v44 }
 0x30b   :  { %v553_v61 = vsel %vm122_vm1, %v9425_v37, %v9424_v14 }
 0x30c   :  { %6129 = vpow2.f32 %v5839_v3 }
 0x310   :  { %v6128_v15 = vpop.eup %6127  ;;  %v2326_v56 = vpop.f32.mrf.mxu2 }
 0x311   :  { %v2339_v32 = vpop.f32.mrf.mxu3  ;;  %v2481_v55 = vadd.f32 1.0, %v6128_v15  ;;  %v2302_v58 = vpop.f32.mrf.mxu0 }
 0x312   :  { %v2340_v16 = vadd.f32 %v2339_v32, %v2326_v56  ;;  %v2315_v5 = vpop.f32.mrf.mxu1  ;;  %v6130_v50 = vpop.eup %6129 }
 0x313   :  { %6131 = vrcp.f32 %v2481_v55  ;;  %v2503_v19 = vadd.f32 1.0, %v6130_v50  ;;  %vm2487_vm6 = vweird.f32 %v2481_v55  ;;  %v2491_v37 = vand.u32 2147483647, %v2481_v55 }
 0x314   :  { %v2455_v39 = vrot.slane %v2340_v16, 4 }
 0x315   :  { %6133 = vrcp.f32 %v2503_v19  ;;  %v2515_v14 = vand.u32 2147483648, %v2503_v19  ;;  %vm2509_vm9 = vweird.f32 %v2503_v19  ;;  %vm2492_vm11 = vcmp.eq.f32.partialorder %v2491_v37, 8.507059e+37 }
 0x316   :  { %v2457_v8 = vsel %vm122_vm1, %v2314_v18, %v2455_v39  ;;  %v2493_v18 = vand.u32 2147483648, %v2481_v55 }
 0x317   :  { %v2461_v4 = vadd.f32 %v2457_v8, %v553_v61  ;;  %v2513_v8 = vand.u32 2147483647, %v2503_v19 }
 0x318   :  { %v2328_v3 = vpop.f32.mrf.mxu2 }
 0x319   :  { %v2521_v7 = vrot.slane %v2461_v4, 4  ;;  %v2341_v15 = vpop.f32.mrf.mxu3  ;;  %v6132_v56 = vpop.eup %6131  ;;  %vm2514_vm12 = vcmp.eq.f32.partialorder %v2513_v8, 8.507059e+37 }
 0x31a   :  { %v2483_v32 = vmul.f32 %v6132_v56, %v2481_v55  ;;  %v2352_v36 = vpop.f32.mrf.mxu0  ;;  %v2365_v50 = vpop.f32.mrf.mxu1  ;;  %vm2488_vm5 = vweird.f32 %v6132_v56  ;;  %v2494_v55 = vor.u32 1.1754944e-38, %v2493_v18 }
 0x31b   :  { %v5840_v58 = vmul.f32 -1.442695, %v2521_v7  ;;  %v6134_v5 = vpop.eup %6133  ;;  %vm7598_vm8 = vmor %vm2487_vm6, %vm2488_vm5  ;;  %v2366_v3 = vadd.f32 %v2365_v50, %v2352_v36 }
 0x31c   :  { %v2484_v44 = vsub.f32 1.0, %v2483_v32  ;;  %v2505_v35 = vmul.f32 %v6134_v5, %v2503_v19  ;;  %vm2510_vm7 = vweird.f32 %v6134_v5 }
 0x31d   :  { %6135 = vpow2.f32 %v5840_v58  ;;  %vm2511_vm10 = vmor %vm2509_vm9, %vm2510_vm7 }
 0x31e   :  { %v2506_v16 = vsub.f32 1.0, %v2505_v35  ;;  %v2485_v30 = vmul.f32 %v6132_v56, %v2484_v44  ;;  %6137 = vtanh.f32 %v2461_v4  ;;  %v2516_v35 = vor.u32 1.1754944e-38, %v2515_v14 }
 0x320   :  { %v2507_v39 = vmul.f32 %v6134_v5, %v2506_v16  ;;  %v2486_v61 = vadd.f32 %v6132_v56, %v2485_v30 }
 0x322   :  { %v2490_v15 = vsel %vm7598_vm8, %v6132_v56, %v2486_v61  ;;  %v2508_v32 = vadd.f32 %v6134_v5, %v2507_v39  ;;  %v2354_v30 = vpop.f32.mrf.mxu0  ;;  %v2367_v1 = vpop.f32.mrf.mxu1  ;;  %v9428_v61 = vld [vmem:[#allocation167_spill] sm:$0xff] }
 0x323   :  { %v6136_v7 = vpop.eup %6135  ;;  %v2378_v58 = vpop.f32.mrf.mxu2  ;;  %v2495_v20 = vsel %vm2492_vm11, %v2494_v55, %v2490_v15  ;;  %v573_v2 = vrot.slane %v9428_v61, 4 }
 0x324   :  { %v2391_v44 = vpop.f32.mrf.mxu3  ;;  %v2526_v16 = vadd.f32 1.0, %v6136_v7  ;;  %v2512_v12 = vsel %vm2511_vm10, %v6134_v5, %v2508_v32  ;;  %v6138_v39 = vpop.eup %6137 }
 0x325   :  { %v2392_v41 = vadd.f32 %v2391_v44, %v2378_v58  ;;  %v2517_v4 = vsel %vm2514_vm12, %v2516_v35, %v2512_v12  ;;  %v2543_v40 = vmul.f32 %v6138_v39, %v2495_v20 }
 0x326   :  { %6139 = vrcp.f32 %v2526_v16  ;;  %v2542_v19 = vmul.f32 %v2517_v4, %v7436_v60  ;;  %v2536_v20 = vand.u32 2147483647, %v2526_v16  ;;  %vm2532_vm14 = vweird.f32 %v2526_v16 }
 0x327   :  { %v2469_v56 = vrot.slane %v2392_v41, 4  ;;  %v2538_v41 = vand.u32 2147483648, %v2526_v16 }
 0x328   :  { %v7607_v7 = vadd.f32 %v2543_v40, %v2542_v19  ;;  %vm2537_vm0 = vcmp.eq.f32.partialorder %v2536_v20, 8.507059e+37 }
 0x329   :  { %v2471_v14 = vsel %vm122_vm1, %v2366_v3, %v2469_v56 }
 0x32a   :  { %v2475_v18 = vadd.f32 %v2471_v14, %v573_v2  ;;  %v2539_v2 = vor.u32 1.1754944e-38, %v2538_v41 }
 0x32b   :  { %v2380_v1 = vpop.f32.mrf.mxu2 }
 0x32c   :  { %v2393_v37 = vpop.f32.mrf.mxu3  ;;  %v6140_v5 = vpop.eup %6139  ;;  %v5841_v8 = vmul.f32 -1.442695, %v2475_v18  ;;  %v2567_v15 = vrot.slane %v2475_v18, 4 }
 0x32d   :  { %v2528_v12 = vmul.f32 %v6140_v5, %v2526_v16  ;;  %vm2533_vm13 = vweird.f32 %v6140_v5 }
 0x32e   :  { %6141 = vpow2.f32 %v5841_v8  ;;  %v5842_v32 = vmul.f32 -1.442695, %v2567_v15  ;;  %vm2534_vm15 = vmor %vm2532_vm14, %vm2533_vm13 }
 0x32f   :  { %v2529_v58 = vsub.f32 1.0, %v2528_v12  ;;  %6143 = vtanh.f32 %v7607_v7 }
 0x330   :  { %6145 = vpow2.f32 %v5842_v32 }
 0x331   :  { %v2530_v36 = vmul.f32 %v6140_v5, %v2529_v58 }
 0x333   :  { %v2531_v50 = vadd.f32 %v6140_v5, %v2530_v36 }
 0x334   :  { %v6142_v40 = vpop.eup %6141 }
 0x335   :  { %v6144_v44 = vpop.eup %6143  ;;  %v2535_v35 = vsel %vm2534_vm15, %v6140_v5, %v2531_v50  ;;  %v2550_v55 = vadd.f32 1.0, %v6142_v40  ;;  %v9430_v40 = vld [vmem:[#allocation174_spill] sm:$0xff] }
 0x336   :  { %v6146_v30 = vpop.eup %6145  ;;  %v2540_v4 = vsel %vm2537_vm0, %v2539_v2, %v2535_v35  ;;  %v575_v2 = vrot.slane %v9430_v40, 4 }
 0x337   :  { %v7610_v19 = vmul.f32 %v6144_v44, %v2540_v4  ;;  %6147 = vrcp.f32 %v2550_v55  ;;  %v2572_v3 = vadd.f32 1.0, %v6146_v30  ;;  %vm2556_vm7 = vweird.f32 %v2550_v55 }
 0x339   :  { %2632 = vst [vmem:[#allocation6 + $0x8] sm:$0xf] %v7610_v19  ;;  %6149 = vrcp.f32 %v2572_v3  ;;  %v2584_v41 = vand.u32 2147483648, %v2572_v3  ;;  %v2582_v35 = vand.u32 2147483647, %v2572_v3  ;;  %vm2578_vm3 = vweird.f32 %v2572_v3 }
 0x33a   :  { %v2404_v56 = vpop.f32.mrf.mxu0  ;;  %v2417_v39 = vpop.f32.mrf.mxu1 }
 0x33b   :  { %v2418_v36 = vadd.f32 %v2417_v39, %v2404_v56  ;;  %vm2583_vm6 = vcmp.eq.f32.partialorder %v2582_v35, 8.507059e+37 }
 0x33d   :  { %v6148_v61 = vpop.eup %6147 }
 0x33e   :  { %v2552_v16 = vmul.f32 %v6148_v61, %v2550_v55  ;;  %vm2557_vm5 = vweird.f32 %v6148_v61 }
 0x33f   :  { %v6150_v14 = vpop.eup %6149  ;;  %vm2558_vm8 = vmor %vm2556_vm7, %vm2557_vm5 }
 0x340   :  { %v7613_v18 = vld [vmem:[#allocation6 + $0x8] sm:$0xf]  ;;  %v2553_v1 = vsub.f32 1.0, %v2552_v16  ;;  %v2574_v37 = vmul.f32 %v6150_v14, %v2572_v3  ;;  %vm2579_vm2 = vweird.f32 %v6150_v14 }
 0x341   :  { %9429 = vst [vmem:[#allocation79_spill] sm:$0xff] %v7613_v18  ;;  %vm2580_vm4 = vmor %vm2578_vm3, %vm2579_vm2 }
 0x342   :  { %v2430_v5 = vpop.f32.mrf.mxu2  ;;  %v2443_v8 = vpop.f32.mrf.mxu3  ;;  %4705 = vst [vmem:[#allocation1 + $0x10] ss:$2 sm:$0xff] %v7613_v18  ;;  %v2575_v58 = vsub.f32 1.0, %v2574_v37  ;;  %v2554_v50 = vmul.f32 %v6148_v61, %v2553_v1  ;;  %v2612_v18 = vrot.slane %v7436_v60, 4  ;;  %v2562_v37 = vand.u32 2147483648, %v2550_v55 }
 0x343   :  { %v2444_v15 = vadd.f32 %v2443_v8, %v2430_v5  ;;  %v2406_v12 = vpop.f32.mrf.mxu0  ;;  %v2419_v32 = vpop.f32.mrf.mxu1  ;;  %v2585_v5 = vor.u32 1.1754944e-38, %v2584_v41 }
 0x344   :  { %v2576_v44 = vmul.f32 %v6150_v14, %v2575_v58  ;;  %v2555_v8 = vadd.f32 %v6148_v61, %v2554_v50  ;;  %v2560_v12 = vand.u32 2147483647, %v2550_v55 }
 0x345   :  { %v2470_v20 = vrot.slane %v2444_v15, 4 }
 0x346   :  { %v2577_v16 = vadd.f32 %v6150_v14, %v2576_v44  ;;  %vm2561_vm9 = vcmp.eq.f32.partialorder %v2560_v12, 8.507059e+37 }
 0x347   :  { %v2472_v30 = vsel %vm122_vm1, %v2418_v36, %v2470_v20  ;;  %v2559_v36 = vsel %vm2558_vm8, %v6148_v61, %v2555_v8  ;;  %v2563_v20 = vor.u32 1.1754944e-38, %v2562_v37 }
 0x348   :  { %v2476_v4 = vadd.f32 %v2472_v30, %v575_v2  ;;  %v2581_v56 = vsel %vm2580_vm4, %v6150_v14, %v2577_v16 }
 0x349   :  { %v2586_v32 = vsel %vm2583_vm6, %v2585_v5, %v2581_v56  ;;  %v2564_v41 = vsel %vm2561_vm9, %v2563_v20, %v2559_v36  ;;  %v9432_v36 = vld [vmem:[#allocation115_spill] sm:$0xff]  ;;  %v9433_v20 = vld [vmem:[#allocation116_spill] sm:$0xff] }
 0x34a   :  { %6151 = vtanh.f32 %v2476_v4  ;;  %v2590_v39 = vrot.slane %v2476_v4, 4  ;;  %v2432_v1 = vpop.f32.mrf.mxu2  ;;  %v2445_v15 = vpop.f32.mrf.mxu3  ;;  %v2614_v58 = vmul.f32 %v2612_v18, %v2586_v32 }
 0x34c   :  { %v5843_v3 = vmul.f32 -1.442695, %v2590_v39 }
 0x34e   :  { %6153 = vpow2.f32 %v5843_v3 }
 0x350   :  { %v6152_v60 = vpop.eup %6151 }
 0x351   :  { %v2615_v50 = vmul.f32 %v6152_v60, %v2564_v41  ;;  %v9434_v60 = vld [vmem:[#allocation117_spill] sm:$0xff]  ;;  %v9435_v41 = vld [vmem:[#allocation118_spill] sm:$0xff] }
 0x353   :  { %v2616_v40 = vadd.f32 %v2615_v50, %v2614_v58  ;;  %v9436_v50 = vld [vmem:[#allocation119_spill] sm:$0xff] }
 0x354   :  { %v6154_v14 = vpop.eup %6153 }
 0x355   :  { %v2595_v2 = vadd.f32 1.0, %v6154_v14  ;;  %v2627_v44 = vrot.slane %v2616_v40, 4  ;;  %v9438_v14 = vld [vmem:[#allocation121_spill] sm:$0xff] }
 0x357   :  { %6155 = vrcp.f32 %v2595_v2  ;;  %v7621_v35 = vsel %vm122_vm1, %v7607_v7, %v2627_v44  ;;  %v2607_v18 = vand.u32 2147483648, %v2595_v2  ;;  %v2605_v16 = vand.u32 2147483647, %v2595_v2  ;;  %v9440_v44 = vld [vmem:[#allocation123_spill] sm:$0xff] }
 0x358   :  { %6157 = vtanh.f32 %v2616_v40  ;;  %vm2601_vm11 = vweird.f32 %v2595_v2  ;;  %v9437_v40 = vld [vmem:[#allocation120_spill] sm:$0xff] }
 0x359   :  { %v2608_v8 = vor.u32 1.1754944e-38, %v2607_v18  ;;  %vm2606_vm13 = vcmp.eq.f32.partialorder %v2605_v16, 8.507059e+37  ;;  %v9444_v18 = vld [vmem:[#allocation130_spill] sm:$0xff]  ;;  %v9446_v16 = vld [vmem:[#allocation132_spill] sm:$0xff] }
 0x35d   :  { %v6156_v55 = vpop.eup %6155 }
 0x35e   :  { %v2597_v30 = vmul.f32 %v6156_v55, %v2595_v2  ;;  %vm2602_vm10 = vweird.f32 %v6156_v55  ;;  %v6158_v56 = vpop.eup %6157  ;;  %v9439_v2 = vld [vmem:[#allocation122_spill] sm:$0xff] }
 0x35f   :  { %vm2603_vm12 = vmor %vm2601_vm11, %vm2602_vm10 }
 0x360   :  { %v2598_v4 = vsub.f32 1.0, %v2597_v30  ;;  %v9442_v30 = vld [vmem:[#allocation125_spill] sm:$0xff] }
 0x362   :  { %v2599_v61 = vmul.f32 %v6156_v55, %v2598_v4  ;;  %v9443_v4 = vld [vmem:[#allocation126_spill] sm:$0xff] }
 0x364   :  { %v2600_v5 = vadd.f32 %v6156_v55, %v2599_v61  ;;  %v9445_v61 = vld [vmem:[#allocation131_spill] sm:$0xff] }
 0x366   :  { %v2604_v37 = vsel %vm2603_vm12, %v6156_v55, %v2600_v5  ;;  %v9441_v55 = vld [vmem:[#allocation124_spill] sm:$0xff]  ;;  %v9447_v5 = vld [vmem:[#allocation133_spill] sm:$0xff] }
 0x367   :  { %v2609_v39 = vsel %vm2606_vm13, %v2608_v8, %v2604_v37  ;;  %v9448_v8 = vld [vmem:[#allocation137_spill] sm:$0xff]  ;;  %v9449_v37 = vld [vmem:[#allocation138_spill] sm:$0xff] }
 0x368   :  { %v2618_v1 = vmul.f32 %v6158_v56, %v2609_v39  ;;  %v9450_v56 = vld [vmem:[#allocation140_spill] sm:$0xff]  ;;  %v9451_v39 = vld [vmem:[#allocation141_spill] sm:$0xff] }
 0x36a   :  { %v2621_v15 = vrot.slane %v2618_v1, 4  ;;  %2634 = vst [vmem:[#allocation7 + $0x14] sm:$0xf] %v2618_v1  ;;  %v9452_v1 = vld [vmem:[#allocation144_spill] sm:$0xff] }
 0x36c   :  { %v2622_v7 = vsel %vm122_vm1, %v7610_v19, %v2621_v15  ;;  %v9431_v19 = vld [vmem:[#allocation114_spill] sm:$0xff]  ;;  %v9453_v15 = vld [vmem:[#allocation145_spill] sm:$0xff] }
 0x36d   :  { %2637 = vst [vmem:[#allocation1] ss:$2 sm:$0xff] %v2622_v7  ;;  %v9454_v7 = vld [vmem:[#allocation146_spill] sm:$0xff] }
 0x374   :  { %v2638_v12 = vld.sshfl [vmem:[#allocation1] sm:$0xff pattern:$0x75316420]  ;;  %v2639_v32 = vld.sshfl [vmem:[#allocation1 + $0x8] sm:$0xff pattern:$0x75316420] }
 0x375   :  { %v7625_v3 = vpack.c.bf16 %v2638_v12, %v2638_v12  ;;  %v7627_v58 = vpack.c.bf16 %v2639_v32, %v2639_v32  ;;  %v9455_v12 = vld [vmem:[#allocation147_spill] sm:$0xff]  ;;  %v9456_v32 = vld [vmem:[#allocation148_spill] sm:$0xff] }
 0x377   :  { %2652 = vmatmul.bf16.vlgmr.msra.gmra.mxu0 %v7625_v3  ;;  %2665 = vmatmul.bf16.vlgmr.msra.gmra.mxu1 %v7627_v58 }
 0x378   :  { %2678 = vmatmul.bf16.vlgmr.msrb.gmra.mxu2 %v7625_v3  ;;  %2691 = vmatmul.bf16.vlgmr.msrb.gmra.mxu3 %v7627_v58 }
 0x379   :  { %2748 = vmatpush.bf16.msra.mxu0 %v9229_v54  ;;  %2761 = vmatpush.bf16.msra.mxu1 %v9230_v11 }
 0x37a   :  { %2774 = vmatpush.bf16.msrb.mxu2 %v9231_v0  ;;  %2787 = vmatpush.bf16.msrb.mxu3 %v9232_v45 }
 0x37d   :  { %2749 = vmatpush.bf16.msra.mxu0 %v9233_v24  ;;  %2762 = vmatpush.bf16.msra.mxu1 %v9234_v27 }
 0x37e   :  { %2775 = vmatpush.bf16.msrb.mxu2 %v9235_v49  ;;  %2788 = vmatpush.bf16.msrb.mxu3 %v9236_v10 }
 0x381   :  { %2750 = vmatpush.bf16.msra.mxu0 %v9237_v43  ;;  %2763 = vmatpush.bf16.msra.mxu1 %v9238_v33 }
 0x382   :  { %2776 = vmatpush.bf16.msrb.mxu2 %v9239_v48  ;;  %2789 = vmatpush.bf16.msrb.mxu3 %v9240_v26 }
 0x385   :  { %2751 = vmatpush.bf16.msra.mxu0 %v9241_v63  ;;  %2764 = vmatpush.bf16.msra.mxu1 %v9242_v38 }
 0x386   :  { %2777 = vmatpush.bf16.msrb.mxu2 %v9243_v62  ;;  %2790 = vmatpush.bf16.msrb.mxu3 %v9244_v25 }
 0x387   :  { %2704 = vmatmul.bf16.vlgmr.msrb.gmra.mxu0 %v7625_v3  ;;  %2717 = vmatmul.bf16.vlgmr.msrb.gmra.mxu1 %v7627_v58 }
 0x388   :  { %2730 = vmatmul.bf16.vlgmr.msra.gmra.mxu2 %v7625_v3  ;;  %2743 = vmatmul.bf16.vlgmr.msra.gmra.mxu3 %v7627_v58 }
 0x389   :  { %2752 = vmatpush.bf16.msra.mxu0 %v9245_v57  ;;  %2765 = vmatpush.bf16.msra.mxu1 %v9328_v52 }
 0x38a   :  { %2778 = vmatpush.bf16.msrb.mxu2 %v9329_v42  ;;  %2791 = vmatpush.bf16.msrb.mxu3 %v9330_v17 }
 0x38d   :  { %2753 = vmatpush.bf16.msra.mxu0 %v9331_v9  ;;  %2766 = vmatpush.bf16.msra.mxu1 %v9332_v34 }
 0x38e   :  { %2779 = vmatpush.bf16.msrb.mxu2 %v9333_v29  ;;  %2792 = vmatpush.bf16.msrb.mxu3 %v9334_v23 }
 0x391   :  { %2754 = vmatpush.bf16.msra.mxu0 %v9335_v22  ;;  %2767 = vmatpush.bf16.msra.mxu1 %v9254_v31 }
 0x392   :  { %2780 = vmatpush.bf16.msrb.mxu2 %v9336_v28  ;;  %2793 = vmatpush.bf16.msrb.mxu3 %v9337_v53 }
 0x395   :  { %2755 = vmatpush.bf16.msra.mxu0 %v9338_v21  ;;  %2768 = vmatpush.bf16.msra.mxu1 %v9339_v59 }
 0x396   :  { %2781 = vmatpush.bf16.msrb.mxu2 %v9340_v6  ;;  %2794 = vmatpush.bf16.msrb.mxu3 %v9341_v46 }
 0x398   :  { %2756 = vmatmul.bf16.vlgmr.msra.gmra.mxu0 %v7625_v3  ;;  %2769 = vmatmul.bf16.vlgmr.msra.gmra.mxu1 %v7627_v58 }
 0x399   :  { %2800 = vmatpush.bf16.msrb.mxu0 %v9342_v51  ;;  %2813 = vmatpush.bf16.msrb.mxu1 %v9343_v13 }
 0x39a   :  { %2826 = vmatpush.bf16.msra.mxu2 %v9344_v47  ;;  %2839 = vmatpush.bf16.msra.mxu3 %v9431_v19  ;;  %v3017_v19 = vrot.slane %v7621_v35, 4 }
 0x39b   :  { %2782 = vmatmul.bf16.vlgmr.msrb.gmra.mxu2 %v7625_v3  ;;  %2795 = vmatmul.bf16.vlgmr.msrb.gmra.mxu3 %v7627_v58 }
 0x39d   :  { %2801 = vmatpush.bf16.msrb.mxu0 %v9432_v36  ;;  %2814 = vmatpush.bf16.msrb.mxu1 %v9433_v20 }
 0x39e   :  { %2827 = vmatpush.bf16.msra.mxu2 %v9434_v60  ;;  %2840 = vmatpush.bf16.msra.mxu3 %v9435_v41 }
 0x3a1   :  { %2802 = vmatpush.bf16.msrb.mxu0 %v9436_v50  ;;  %2815 = vmatpush.bf16.msrb.mxu1 %v9437_v40 }
 0x3a2   :  { %2828 = vmatpush.bf16.msra.mxu2 %v9438_v14  ;;  %2841 = vmatpush.bf16.msra.mxu3 %v9439_v2 }
 0x3a5   :  { %2803 = vmatpush.bf16.msrb.mxu0 %v9440_v44  ;;  %2816 = vmatpush.bf16.msrb.mxu1 %v9441_v55 }
 0x3a6   :  { %2829 = vmatpush.bf16.msra.mxu2 %v9442_v30  ;;  %2842 = vmatpush.bf16.msra.mxu3 %v9443_v4 }
 0x3a9   :  { %2804 = vmatpush.bf16.msrb.mxu0 %v9444_v18  ;;  %2817 = vmatpush.bf16.msrb.mxu1 %v9445_v61 }
 0x3aa   :  { %2830 = vmatpush.bf16.msra.mxu2 %v9446_v16  ;;  %2843 = vmatpush.bf16.msra.mxu3 %v9447_v5  ;;  %v9457_v16 = vld [vmem:[#allocation149_spill] sm:$0xff]  ;;  %v9458_v5 = vld [vmem:[#allocation150_spill] sm:$0xff] }
 0x3ad   :  { %2805 = vmatpush.bf16.msrb.mxu0 %v9448_v8  ;;  %2818 = vmatpush.bf16.msrb.mxu1 %v9449_v37  ;;  %v9459_v8 = vld [vmem:[#allocation151_spill] sm:$0xff] }
 0x3ae   :  { %2831 = vmatpush.bf16.msra.mxu2 %v9450_v56  ;;  %2844 = vmatpush.bf16.msra.mxu3 %v9451_v39  ;;  %v9460_v37 = vld [vmem:[#allocation15_spill] sm:$0xff]  ;;  %v9461_v56 = vld [vmem:[#allocation16_spill] sm:$0xff] }
 0x3b1   :  { %2806 = vmatpush.bf16.msrb.mxu0 %v9452_v1  ;;  %2819 = vmatpush.bf16.msrb.mxu1 %v9453_v15  ;;  %v9470_v15 = vld [vmem:[#allocation29_spill] sm:$0xff] }
 0x3b2   :  { %2832 = vmatpush.bf16.msra.mxu2 %v9454_v7  ;;  %2845 = vmatpush.bf16.msra.mxu3 %v9455_v12  ;;  %v9462_v12 = vld [vmem:[#allocation21_spill] sm:$0xff]  ;;  %v9469_v7 = vld [vmem:[#allocation20_spill] sm:$0xff] }
 0x3b5   :  { %2807 = vmatpush.bf16.msrb.mxu0 %v9456_v32  ;;  %2820 = vmatpush.bf16.msrb.mxu1 %v9457_v16  ;;  %v9463_v32 = vld [vmem:[#allocation22_spill] sm:$0xff]  ;;  %v9464_v16 = vld [vmem:[#allocation17_spill] sm:$0xff] }
 0x3b6   :  { %2833 = vmatpush.bf16.msra.mxu2 %v9458_v5  ;;  %2846 = vmatpush.bf16.msra.mxu3 %v9459_v8  ;;  %v9465_v5 = vld [vmem:[#allocation18_spill] sm:$0xff]  ;;  %v9466_v8 = vld [vmem:[#allocation25_spill] sm:$0xff] }
 0x3b8   :  { %2808 = vmatmul.bf16.vlgmr.msrb.gmra.mxu0 %v7625_v3  ;;  %2821 = vmatmul.bf16.vlgmr.msrb.gmra.mxu1 %v7627_v58 }
 0x3b9   :  { %3049 = vmatpush.bf16.msra.mxu0 %v9460_v37  ;;  %3062 = vmatpush.bf16.msra.mxu1 %v9461_v56  ;;  %v9467_v37 = vld [vmem:[#allocation26_spill] sm:$0xff]  ;;  %v9468_v56 = vld [vmem:[#allocation19_spill] sm:$0xff] }
 0x3ba   :  { %2834 = vmatmul.bf16.vlgmr.msra.gmra.mxu2 %v7625_v3  ;;  %2847 = vmatmul.bf16.vlgmr.msra.gmra.mxu3 %v7627_v58  ;;  %v9471_v3 = vld [vmem:[#allocation30_spill] sm:$0xff]  ;;  %v9472_v58 = vld [vmem:[#allocation23_spill] sm:$0xff] }
 0x3bb   :  { %3075 = vmatpush.bf16.msrb.mxu2 %v9462_v12  ;;  %3088 = vmatpush.bf16.msrb.mxu3 %v9463_v32  ;;  %v9473_v12 = vld [vmem:[#allocation24_spill] sm:$0xff]  ;;  %v9474_v32 = vld [vmem:[#allocation33_spill] sm:$0xff] }
 0x3bd   :  { %3050 = vmatpush.bf16.msra.mxu0 %v9464_v16  ;;  %3063 = vmatpush.bf16.msra.mxu1 %v9465_v5  ;;  %v9475_v16 = vld [vmem:[#allocation34_spill] sm:$0xff]  ;;  %v9476_v5 = vld [vmem:[#allocation27_spill] sm:$0xff] }
 0x3bf   :  { %3076 = vmatpush.bf16.msrb.mxu2 %v9466_v8  ;;  %3089 = vmatpush.bf16.msrb.mxu3 %v9467_v37  ;;  %v9477_v8 = vld [vmem:[#allocation28_spill] sm:$0xff]  ;;  %v9478_v37 = vld [vmem:[#allocation37_spill] sm:$0xff] }
 0x3c1   :  { %3051 = vmatpush.bf16.msra.mxu0 %v9468_v56  ;;  %3064 = vmatpush.bf16.msra.mxu1 %v9469_v7  ;;  %v9479_v56 = vld [vmem:[#allocation38_spill] sm:$0xff]  ;;  %v9480_v7 = vld [vmem:[#allocation31_spill] sm:$0xff] }
 0x3c3   :  { %3077 = vmatpush.bf16.msrb.mxu2 %v9470_v15  ;;  %3090 = vmatpush.bf16.msrb.mxu3 %v9471_v3  ;;  %v9481_v15 = vld [vmem:[#allocation32_spill] sm:$0xff]  ;;  %v9482_v3 = vld [vmem:[#allocation43_spill] sm:$0xff] }
 0x3c5   :  { %3052 = vmatpush.bf16.msra.mxu0 %v9472_v58  ;;  %3065 = vmatpush.bf16.msra.mxu1 %v9473_v12  ;;  %v9483_v58 = vld [vmem:[#allocation44_spill] sm:$0xff]  ;;  %v9484_v12 = vld [vmem:[#allocation35_spill] sm:$0xff] }
 0x3c7   :  { %3078 = vmatpush.bf16.msrb.mxu2 %v9474_v32  ;;  %3091 = vmatpush.bf16.msrb.mxu3 %v9475_v16  ;;  %v9485_v32 = vld [vmem:[#allocation36_spill] sm:$0xff]  ;;  %v9486_v16 = vld [vmem:[#allocation47_spill] sm:$0xff] }
 0x3c9   :  { %3053 = vmatpush.bf16.msra.mxu0 %v9476_v5  ;;  %3066 = vmatpush.bf16.msra.mxu1 %v9477_v8  ;;  %v9487_v5 = vld [vmem:[#allocation48_spill] sm:$0xff]  ;;  %v9488_v8 = vld [vmem:[#allocation39_spill] sm:$0xff] }
 0x3cb   :  { %3079 = vmatpush.bf16.msrb.mxu2 %v9478_v37  ;;  %3092 = vmatpush.bf16.msrb.mxu3 %v9479_v56  ;;  %v9489_v37 = vld [vmem:[#allocation40_spill] sm:$0xff]  ;;  %v9490_v56 = vld [vmem:[#allocation41_spill] sm:$0xff] }
 0x3cd   :  { %3054 = vmatpush.bf16.msra.mxu0 %v9480_v7  ;;  %3067 = vmatpush.bf16.msra.mxu1 %v9481_v15  ;;  %v9491_v7 = vld [vmem:[#allocation42_spill] sm:$0xff]  ;;  %v9492_v15 = vld [vmem:[#allocation51_spill] sm:$0xff] }
 0x3cf   :  { %3080 = vmatpush.bf16.msrb.mxu2 %v9482_v3  ;;  %3093 = vmatpush.bf16.msrb.mxu3 %v9483_v58  ;;  %v9493_v3 = vld [vmem:[#allocation52_spill] sm:$0xff]  ;;  %v9494_v58 = vld [vmem:[#allocation53_spill] sm:$0xff] }
 0x3d1   :  { %3055 = vmatpush.bf16.msra.mxu0 %v9484_v12  ;;  %3068 = vmatpush.bf16.msra.mxu1 %v9485_v32  ;;  %v9495_v12 = vld [vmem:[#allocation54_spill] sm:$0xff]  ;;  %v9496_v32 = vld [vmem:[#allocation45_spill] sm:$0xff] }
 0x3d3   :  { %3081 = vmatpush.bf16.msrb.mxu2 %v9486_v16  ;;  %3094 = vmatpush.bf16.msrb.mxu3 %v9487_v5  ;;  %v9497_v16 = vld [vmem:[#allocation46_spill] sm:$0xff]  ;;  %v9498_v5 = vld [vmem:[#allocation57_spill] sm:$0xff] }
 0x3d5   :  { %3056 = vmatpush.bf16.msra.mxu0 %v9488_v8  ;;  %3069 = vmatpush.bf16.msra.mxu1 %v9489_v37  ;;  %v9499_v8 = vld [vmem:[#allocation58_spill] sm:$0xff]  ;;  %v9500_v37 = vld [vmem:[#allocation49_spill] sm:$0xff] }
 0x3d7   :  { %3082 = vmatpush.bf16.msrb.mxu2 %v9492_v15  ;;  %3095 = vmatpush.bf16.msrb.mxu3 %v9493_v3  ;;  %v9503_v15 = vld [vmem:[#allocation62_spill] sm:$0xff]  ;;  %v9504_v3 = vld [vmem:[#allocation55_spill] sm:$0xff] }
 0x3d9   :  { %3101 = vmatpush.bf16.msrb.mxu0 %v9490_v56  ;;  %3114 = vmatpush.bf16.msrb.mxu1 %v9491_v7  ;;  %v9501_v56 = vld [vmem:[#allocation50_spill] sm:$0xff]  ;;  %v9502_v7 = vld [vmem:[#allocation61_spill] sm:$0xff] }
 0x3db   :  { %3127 = vmatpush.bf16.msra.mxu2 %v9494_v58  ;;  %3140 = vmatpush.bf16.msra.mxu3 %v9495_v12  ;;  %v9505_v58 = vld [vmem:[#allocation56_spill] sm:$0xff]  ;;  %v9506_v12 = vld [vmem:[#allocation65_spill] sm:$0xff] }
 0x3dd   :  { %3102 = vmatpush.bf16.msrb.mxu0 %v9496_v32  ;;  %3115 = vmatpush.bf16.msrb.mxu1 %v9497_v16  ;;  %v9507_v32 = vld [vmem:[#allocation66_spill] sm:$0xff]  ;;  %v9508_v16 = vld [vmem:[#allocation59_spill] sm:$0xff] }
 0x3df   :  { %3128 = vmatpush.bf16.msra.mxu2 %v9498_v5  ;;  %3141 = vmatpush.bf16.msra.mxu3 %v9499_v8  ;;  %v9509_v5 = vld [vmem:[#allocation60_spill] sm:$0xff]  ;;  %v9510_v8 = vld [vmem:[#allocation69_spill] sm:$0xff] }
 0x3e1   :  { %3103 = vmatpush.bf16.msrb.mxu0 %v9500_v37  ;;  %3116 = vmatpush.bf16.msrb.mxu1 %v9501_v56  ;;  %v9511_v37 = vld [vmem:[#allocation70_spill] sm:$0xff]  ;;  %v9512_v56 = vld [vmem:[#allocation63_spill] sm:$0xff] }
 0x3e3   :  { %3129 = vmatpush.bf16.msra.mxu2 %v9502_v7  ;;  %3142 = vmatpush.bf16.msra.mxu3 %v9503_v15  ;;  %v9513_v7 = vld [vmem:[#allocation64_spill] sm:$0xff]  ;;  %v9514_v15 = vld [vmem:[#allocation73_spill] sm:$0xff] }
 0x3e5   :  { %3104 = vmatpush.bf16.msrb.mxu0 %v9504_v3  ;;  %3117 = vmatpush.bf16.msrb.mxu1 %v9505_v58  ;;  %v9515_v3 = vld [vmem:[#allocation74_spill] sm:$0xff]  ;;  %v9516_v58 = vld [vmem:[#allocation67_spill] sm:$0xff] }
 0x3e7   :  { %3130 = vmatpush.bf16.msra.mxu2 %v9506_v12  ;;  %3143 = vmatpush.bf16.msra.mxu3 %v9507_v32  ;;  %v9517_v12 = vld [vmem:[#allocation68_spill] sm:$0xff]  ;;  %v9518_v32 = vld [vmem:[#allocation75_spill] sm:$0xff] }
 0x3e9   :  { %3105 = vmatpush.bf16.msrb.mxu0 %v9508_v16  ;;  %3118 = vmatpush.bf16.msrb.mxu1 %v9509_v5  ;;  %v9519_v16 = vld [vmem:[#allocation76_spill] sm:$0xff]  ;;  %v9520_v5 = vld [vmem:[#allocation71_spill] sm:$0xff] }
 0x3eb   :  { %3131 = vmatpush.bf16.msra.mxu2 %v9510_v8  ;;  %3144 = vmatpush.bf16.msra.mxu3 %v9511_v37  ;;  %v9521_v8 = vld [vmem:[#allocation72_spill] sm:$0xff]  ;;  %v9522_v37 = vld [vmem:[#allocation77_spill] sm:$0xff] }
 0x3ed   :  { %3106 = vmatpush.bf16.msrb.mxu0 %v9512_v56  ;;  %3119 = vmatpush.bf16.msrb.mxu1 %v9513_v7  ;;  %v9523_v56 = vld [vmem:[#allocation78_spill] sm:$0xff] }
 0x3ef   :  { %3132 = vmatpush.bf16.msra.mxu2 %v9514_v15  ;;  %3145 = vmatpush.bf16.msra.mxu3 %v9515_v3 }
 0x3f1   :  { %3107 = vmatpush.bf16.msrb.mxu0 %v9516_v58  ;;  %3120 = vmatpush.bf16.msrb.mxu1 %v9517_v12 }
 0x3f3   :  { %3133 = vmatpush.bf16.msra.mxu2 %v9518_v32  ;;  %3146 = vmatpush.bf16.msra.mxu3 %v9519_v16  ;;  %v9524_v32 = vld [vmem:[#allocation142_spill] sm:$0xff] }
 0x3f4   :  { %v2653_v7 = vpop.f32.mrf.mxu0  ;;  %v2666_v15 = vpop.f32.mrf.mxu1  ;;  %v557_v4 = vrot.slane %v9524_v32, 4 }
 0x3f5   :  { %3108 = vmatpush.bf16.msrb.mxu0 %v9520_v5  ;;  %3121 = vmatpush.bf16.msrb.mxu1 %v9521_v8  ;;  %v2667_v12 = vadd.f32 %v2666_v15, %v2653_v7 }
 0x3f7   :  { %3134 = vmatpush.bf16.msra.mxu2 %v9522_v37  ;;  %3147 = vmatpush.bf16.msra.mxu3 %v9523_v56 }
 0x3fb   :  { %v2679_v1 = vpop.f32.mrf.mxu2  ;;  %v2692_v3 = vpop.f32.mrf.mxu3 }
 0x3fc   :  { %v2693_v39 = vadd.f32 %v2692_v3, %v2679_v1  ;;  %v2655_v58 = vpop.f32.mrf.mxu0  ;;  %v2668_v61 = vpop.f32.mrf.mxu1 }
 0x3fe   :  { %v2859_v18 = vrot.slane %v2693_v39, 4 }
 0x400   :  { %v2861_v16 = vsel %vm122_vm1, %v2667_v12, %v2859_v18 }
 0x401   :  { %v2865_v5 = vadd.f32 %v2861_v16, %v557_v4 }
 0x403   :  { %v5844_v30 = vmul.f32 -1.442695, %v2865_v5  ;;  %v2903_v8 = vrot.slane %v2865_v5, 4  ;;  %v2681_v55 = vpop.f32.mrf.mxu2  ;;  %v2694_v37 = vpop.f32.mrf.mxu3  ;;  %v9525_v5 = vld [vmem:[#allocation155_spill] sm:$0xff] }
 0x404   :  { %v2705_v44 = vpop.f32.mrf.mxu0  ;;  %v2718_v56 = vpop.f32.mrf.mxu1  ;;  %v559_v55 = vrot.slane %v9525_v5, 4 }
 0x405   :  { %6159 = vpow2.f32 %v5844_v30  ;;  %v5845_v2 = vmul.f32 -1.442695, %v2903_v8  ;;  %v2719_v4 = vadd.f32 %v2718_v56, %v2705_v44 }
 0x407   :  { %6161 = vpow2.f32 %v5845_v2 }
 0x40b   :  { %v6160_v14 = vpop.eup %6159  ;;  %v2731_v1 = vpop.f32.mrf.mxu2 }
 0x40c   :  { %v2744_v3 = vpop.f32.mrf.mxu3  ;;  %v2886_v61 = vadd.f32 1.0, %v6160_v14  ;;  %v2707_v39 = vpop.f32.mrf.mxu0 }
 0x40d   :  { %v2745_v15 = vadd.f32 %v2744_v3, %v2731_v1  ;;  %v2720_v7 = vpop.f32.mrf.mxu1  ;;  %v6162_v32 = vpop.eup %6161 }
 0x40e   :  { %6163 = vrcp.f32 %v2886_v61  ;;  %v2908_v18 = vadd.f32 1.0, %v6162_v32  ;;  %v2898_v44 = vand.u32 2147483648, %v2886_v61  ;;  %v2896_v32 = vand.u32 2147483647, %v2886_v61 }
 0x40f   :  { %v2860_v16 = vrot.slane %v2745_v15, 4  ;;  %vm2892_vm15 = vweird.f32 %v2886_v61 }
 0x410   :  { %6165 = vrcp.f32 %v2908_v18  ;;  %vm2914_vm3 = vweird.f32 %v2908_v18  ;;  %vm2897_vm4 = vcmp.eq.f32.partialorder %v2896_v32, 8.507059e+37 }
 0x411   :  { %v2862_v37 = vsel %vm122_vm1, %v2719_v4, %v2860_v16  ;;  %v2920_v4 = vand.u32 2147483648, %v2908_v18 }
 0x412   :  { %v2866_v30 = vadd.f32 %v2862_v37, %v559_v55  ;;  %v2918_v55 = vand.u32 2147483647, %v2908_v18  ;;  %v2899_v37 = vor.u32 1.1754944e-38, %v2898_v44 }
 0x413   :  { %v2733_v2 = vpop.f32.mrf.mxu2 }
 0x414   :  { %v2926_v8 = vrot.slane %v2866_v30, 4  ;;  %v2746_v12 = vpop.f32.mrf.mxu3  ;;  %v6164_v58 = vpop.eup %6163  ;;  %vm2919_vm6 = vcmp.eq.f32.partialorder %v2918_v55, 8.507059e+37 }
 0x415   :  { %v2888_v40 = vmul.f32 %v6164_v58, %v2886_v61  ;;  %v2757_v3 = vpop.f32.mrf.mxu0  ;;  %v2770_v39 = vpop.f32.mrf.mxu1  ;;  %vm2893_vm14 = vweird.f32 %v6164_v58 }
 0x416   :  { %v5846_v14 = vmul.f32 -1.442695, %v2926_v8  ;;  %v6166_v1 = vpop.eup %6165  ;;  %vm2894_vm2 = vmor %vm2892_vm15, %vm2893_vm14 }
 0x417   :  { %v2889_v7 = vsub.f32 1.0, %v2888_v40  ;;  %v2910_v50 = vmul.f32 %v6166_v1, %v2908_v18  ;;  %vm2915_vm0 = vweird.f32 %v6166_v1 }
 0x418   :  { %6167 = vpow2.f32 %v5846_v14  ;;  %vm2916_vm5 = vmor %vm2914_vm3, %vm2915_vm0 }
 0x419   :  { %6169 = vtanh.f32 %v2866_v30  ;;  %v2911_v56 = vsub.f32 1.0, %v2910_v50  ;;  %v2890_v15 = vmul.f32 %v6164_v58, %v2889_v7  ;;  %v2921_v50 = vor.u32 1.1754944e-38, %v2920_v4 }
 0x41b   :  { %v2912_v16 = vmul.f32 %v6166_v1, %v2911_v56  ;;  %v2891_v5 = vadd.f32 %v6164_v58, %v2890_v15 }
 0x41d   :  { %v2895_v2 = vsel %vm2894_vm2, %v6164_v58, %v2891_v5  ;;  %v2913_v40 = vadd.f32 %v6166_v1, %v2912_v16  ;;  %v2759_v61 = vpop.f32.mrf.mxu0  ;;  %v2772_v56 = vpop.f32.mrf.mxu1  ;;  %v2771_v58 = vadd.f32 %v2770_v39, %v2757_v3  ;;  %v9526_v5 = vld [vmem:[#allocation166_spill] sm:$0xff] }
 0x41e   :  { %v6168_v8 = vpop.eup %6167  ;;  %v2783_v12 = vpop.f32.mrf.mxu2  ;;  %v2900_v7 = vsel %vm2897_vm4, %v2899_v37, %v2895_v2 }
 0x41f   :  { %v2796_v14 = vpop.f32.mrf.mxu3  ;;  %v6170_v30 = vpop.eup %6169  ;;  %v2931_v41 = vadd.f32 1.0, %v6168_v8  ;;  %v2917_v20 = vsel %vm2916_vm5, %v6166_v1, %v2913_v40 }
 0x420   :  { %v2797_v60 = vadd.f32 %v2796_v14, %v2783_v12  ;;  %v2948_v15 = vmul.f32 %v6170_v30, %v2900_v7  ;;  %v2922_v36 = vsel %vm2919_vm6, %v2921_v50, %v2917_v20 }
 0x421   :  { %6171 = vrcp.f32 %v2931_v41  ;;  %v2947_v18 = vmul.f32 %v2922_v36, %v7621_v35  ;;  %v2943_v36 = vand.u32 2147483648, %v2931_v41  ;;  %v2941_v3 = vand.u32 2147483647, %v2931_v41 }
 0x422   :  { %v2874_v44 = vrot.slane %v2797_v60, 4  ;;  %vm2937_vm8 = vweird.f32 %v2931_v41 }
 0x423   :  { %v7778_v32 = vadd.f32 %v2948_v15, %v2947_v18  ;;  %v2944_v30 = vor.u32 1.1754944e-38, %v2943_v36  ;;  %vm2942_vm10 = vcmp.eq.f32.partialorder %v2941_v3, 8.507059e+37 }
 0x424   :  { %v2876_v16 = vsel %vm122_vm1, %v2771_v58, %v2874_v44 }
 0x425   :  { %v2880_v4 = vadd.f32 %v2876_v16, %v9526_v5 }
 0x426   :  { %v2785_v37 = vpop.f32.mrf.mxu2 }
 0x427   :  { %v2798_v8 = vpop.f32.mrf.mxu3  ;;  %v6172_v2 = vpop.eup %6171  ;;  %v5847_v12 = vmul.f32 -1.442695, %v2880_v4  ;;  %v2972_v14 = vrot.slane %v2880_v4, 4 }
 0x428   :  { %v2933_v1 = vmul.f32 %v6172_v2, %v2931_v41  ;;  %vm2938_vm7 = vweird.f32 %v6172_v2 }
 0x429   :  { %6173 = vpow2.f32 %v5847_v12  ;;  %v5848_v55 = vmul.f32 -1.442695, %v2972_v14  ;;  %vm2939_vm9 = vmor %vm2937_vm8, %vm2938_vm7 }
 0x42a   :  { %v2934_v20 = vsub.f32 1.0, %v2933_v1  ;;  %6175 = vtanh.f32 %v7778_v32 }
 0x42b   :  { %6177 = vpow2.f32 %v5848_v55 }
 0x42c   :  { %v2935_v60 = vmul.f32 %v6172_v2, %v2934_v20 }
 0x42e   :  { %v2936_v39 = vadd.f32 %v6172_v2, %v2935_v60 }
 0x42f   :  { %v6174_v40 = vpop.eup %6173 }
 0x430   :  { %v6176_v50 = vpop.eup %6175  ;;  %v2940_v7 = vsel %vm2939_vm9, %v6172_v2, %v2936_v39  ;;  %v2955_v61 = vadd.f32 1.0, %v6174_v40 }
 0x431   :  { %v6178_v56 = vpop.eup %6177  ;;  %v2945_v15 = vsel %vm2942_vm10, %v2944_v30, %v2940_v7 }
 0x432   :  { %v7783_v18 = vmul.f32 %v6176_v50, %v2945_v15  ;;  %6179 = vrcp.f32 %v2955_v61  ;;  %v2977_v58 = vadd.f32 1.0, %v6178_v56  ;;  %v9528_v56 = vld [vmem:[#allocation173_spill] sm:$0xff]  ;;  %vm2961_vm0 = vweird.f32 %v2955_v61 }
 0x434   :  { %3037 = vst [vmem:[#allocation6 + $0xc] sm:$0xf] %v7783_v18  ;;  %6181 = vrcp.f32 %v2977_v58  ;;  %v2989_v60 = vand.u32 2147483648, %v2977_v58  ;;  %v2987_v50 = vand.u32 2147483647, %v2977_v58  ;;  %vm2983_vm12 = vweird.f32 %v2977_v58 }
 0x435   :  { %v2809_v44 = vpop.f32.mrf.mxu0  ;;  %v2822_v16 = vpop.f32.mrf.mxu1 }
 0x436   :  { %v2823_v3 = vadd.f32 %v2822_v16, %v2809_v44  ;;  %vm2988_vm15 = vcmp.eq.f32.partialorder %v2987_v50, 8.507059e+37 }
 0x438   :  { %v6180_v5 = vpop.eup %6179 }
 0x439   :  { %v2957_v41 = vmul.f32 %v6180_v5, %v2955_v61  ;;  %vm2962_vm14 = vweird.f32 %v6180_v5 }
 0x43a   :  { %v6182_v4 = vpop.eup %6181  ;;  %vm2963_vm2 = vmor %vm2961_vm0, %vm2962_vm14 }
 0x43b   :  { %v7786_v37 = vld [vmem:[#allocation6 + $0xc] sm:$0xf]  ;;  %v2958_v8 = vsub.f32 1.0, %v2957_v41  ;;  %v2979_v2 = vmul.f32 %v6182_v4, %v2977_v58  ;;  %vm2984_vm11 = vweird.f32 %v6182_v4 }
 0x43c   :  { %9527 = vst [vmem:[#allocation80_spill] sm:$0xff] %v7786_v37  ;;  %vm2985_vm13 = vmor %vm2983_vm12, %vm2984_vm11 }
 0x43d   :  { %v2835_v12 = vpop.f32.mrf.mxu2  ;;  %v2848_v14 = vpop.f32.mrf.mxu3  ;;  %4707 = vst [vmem:[#allocation1 + $0x11] ss:$2 sm:$0xff] %v7786_v37  ;;  %v2980_v36 = vsub.f32 1.0, %v2979_v2  ;;  %v2959_v40 = vmul.f32 %v6180_v5, %v2958_v8  ;;  %v2967_v2 = vand.u32 2147483648, %v2955_v61  ;;  %v9554_v37 = vld [vmem:[#allocation148_spill] sm:$0xff] }
 0x43e   :  { %v2849_v1 = vadd.f32 %v2848_v14, %v2835_v12  ;;  %v2811_v55 = vpop.f32.mrf.mxu0  ;;  %v2824_v20 = vpop.f32.mrf.mxu1  ;;  %v2990_v12 = vor.u32 1.1754944e-38, %v2989_v60 }
 0x43f   :  { %v2981_v30 = vmul.f32 %v6182_v4, %v2980_v36  ;;  %v2960_v14 = vadd.f32 %v6180_v5, %v2959_v40 }
 0x440   :  { %v2875_v39 = vrot.slane %v2849_v1, 4  ;;  %v2965_v1 = vand.u32 2147483647, %v2955_v61 }
 0x441   :  { %v2982_v41 = vadd.f32 %v6182_v4, %v2981_v30 }
 0x442   :  { %v2877_v7 = vsel %vm122_vm1, %v2823_v3, %v2875_v39  ;;  %v2964_v3 = vsel %vm2963_vm2, %v6180_v5, %v2960_v14  ;;  %v2968_v39 = vor.u32 1.1754944e-38, %v2967_v2  ;;  %vm2966_vm3 = vcmp.eq.f32.partialorder %v2965_v1, 8.507059e+37 }
 0x443   :  { %v2881_v15 = vadd.f32 %v2877_v7, %v9528_v56  ;;  %v2986_v55 = vsel %vm2985_vm13, %v6182_v4, %v2982_v41 }
 0x444   :  { %v2991_v20 = vsel %vm2988_vm15, %v2990_v12, %v2986_v55  ;;  %v2969_v60 = vsel %vm2966_vm3, %v2968_v39, %v2964_v3  ;;  %v9530_v39 = vld [vmem:[#allocation115_spill] sm:$0xff] }
 0x445   :  { %6183 = vtanh.f32 %v2881_v15  ;;  %v2995_v44 = vrot.slane %v2881_v15, 4  ;;  %v2837_v16 = vpop.f32.mrf.mxu2  ;;  %v2850_v8 = vpop.f32.mrf.mxu3  ;;  %v3019_v36 = vmul.f32 %v3017_v19, %v2991_v20 }
 0x447   :  { %v5849_v58 = vmul.f32 -1.442695, %v2995_v44 }
 0x449   :  { %6185 = vpow2.f32 %v5849_v58 }
 0x44b   :  { %v6184_v35 = vpop.eup %6183 }
 0x44c   :  { %v3020_v40 = vmul.f32 %v6184_v35, %v2969_v60  ;;  %v9531_v35 = vld [vmem:[#allocation116_spill] sm:$0xff]  ;;  %v9532_v60 = vld [vmem:[#allocation117_spill] sm:$0xff] }
 0x44e   :  { %v3021_v30 = vadd.f32 %v3020_v40, %v3019_v36  ;;  %v9533_v40 = vld [vmem:[#allocation118_spill] sm:$0xff] }
 0x44f   :  { %v6186_v4 = vpop.eup %6185 }
 0x450   :  { %v3000_v50 = vadd.f32 1.0, %v6186_v4  ;;  %v3032_v7 = vrot.slane %v3021_v30, 4  ;;  %v9535_v4 = vld [vmem:[#allocation120_spill] sm:$0xff] }
 0x452   :  { %6187 = vrcp.f32 %v3000_v50  ;;  %v7794_v56 = vsel %vm122_vm1, %v7778_v32, %v3032_v7  ;;  %v3012_v19 = vand.u32 2147483648, %v3000_v50  ;;  %v3010_v12 = vand.u32 2147483647, %v3000_v50  ;;  %v9537_v7 = vld [vmem:[#allocation122_spill] sm:$0xff] }
 0x453   :  { %6189 = vtanh.f32 %v3021_v30  ;;  %vm3006_vm5 = vweird.f32 %v3000_v50  ;;  %v9534_v30 = vld [vmem:[#allocation119_spill] sm:$0xff] }
 0x454   :  { %v3013_v2 = vor.u32 1.1754944e-38, %v3012_v19  ;;  %vm3011_vm7 = vcmp.eq.f32.partialorder %v3010_v12, 8.507059e+37  ;;  %v9541_v19 = vld [vmem:[#allocation126_spill] sm:$0xff]  ;;  %v9543_v12 = vld [vmem:[#allocation131_spill] sm:$0xff] }
 0x458   :  { %v6188_v61 = vpop.eup %6187 }
 0x459   :  { %v3002_v15 = vmul.f32 %v6188_v61, %v3000_v50  ;;  %vm3007_vm4 = vweird.f32 %v6188_v61  ;;  %v6190_v44 = vpop.eup %6189  ;;  %v9536_v50 = vld [vmem:[#allocation121_spill] sm:$0xff] }
 0x45a   :  { %vm3008_vm6 = vmor %vm3006_vm5, %vm3007_vm4 }
 0x45b   :  { %v3003_v41 = vsub.f32 1.0, %v3002_v15  ;;  %v9539_v15 = vld [vmem:[#allocation124_spill] sm:$0xff] }
 0x45d   :  { %v3004_v5 = vmul.f32 %v6188_v61, %v3003_v41  ;;  %v9540_v41 = vld [vmem:[#allocation125_spill] sm:$0xff] }
 0x45f   :  { %v3005_v14 = vadd.f32 %v6188_v61, %v3004_v5  ;;  %v9542_v5 = vld [vmem:[#allocation130_spill] sm:$0xff] }
 0x461   :  { %v3009_v55 = vsel %vm3008_vm6, %v6188_v61, %v3005_v14  ;;  %v9538_v61 = vld [vmem:[#allocation123_spill] sm:$0xff]  ;;  %v9544_v14 = vld [vmem:[#allocation132_spill] sm:$0xff] }
 0x462   :  { %v3014_v16 = vsel %vm3011_vm7, %v3013_v2, %v3009_v55  ;;  %v9545_v2 = vld [vmem:[#allocation133_spill] sm:$0xff] }
 0x463   :  { %v3023_v8 = vmul.f32 %v6190_v44, %v3014_v16  ;;  %v9546_v55 = vld [vmem:[#allocation137_spill] sm:$0xff]  ;;  %v9547_v44 = vld [vmem:[#allocation138_spill] sm:$0xff]  ;;  %v9548_v16 = vld [vmem:[#allocation140_spill] sm:$0xff] }
 0x465   :  { %v3026_v1 = vrot.slane %v3023_v8, 4  ;;  %3039 = vst [vmem:[#allocation7 + $0x10] sm:$0xf] %v3023_v8  ;;  %v9549_v8 = vld [vmem:[#allocation141_spill] sm:$0xff] }
 0x467   :  { %v3027_v32 = vsel %vm122_vm1, %v7783_v18, %v3026_v1  ;;  %v9529_v18 = vld [vmem:[#allocation114_spill] sm:$0xff]  ;;  %v9550_v1 = vld [vmem:[#allocation144_spill] sm:$0xff] }
 0x468   :  { %3042 = vst [vmem:[#allocation1] ss:$2 sm:$0xff] %v3027_v32  ;;  %v9551_v32 = vld [vmem:[#allocation145_spill] sm:$0xff] }
 0x46f   :  { %v3043_v20 = vld.sshfl [vmem:[#allocation1] sm:$0xff pattern:$0x75316420]  ;;  %v3044_v58 = vld.sshfl [vmem:[#allocation1 + $0x8] sm:$0xff pattern:$0x75316420] }
 0x470   :  { %v7798_v36 = vpack.c.bf16 %v3043_v20, %v3043_v20  ;;  %v7800_v3 = vpack.c.bf16 %v3044_v58, %v3044_v58  ;;  %v9552_v20 = vld [vmem:[#allocation146_spill] sm:$0xff]  ;;  %v9553_v58 = vld [vmem:[#allocation147_spill] sm:$0xff] }
 0x472   :  { %3057 = vmatmul.bf16.vlgmr.msra.gmra.mxu0 %v7798_v36  ;;  %3070 = vmatmul.bf16.vlgmr.msra.gmra.mxu1 %v7800_v3 }
 0x473   :  { %3083 = vmatmul.bf16.vlgmr.msrb.gmra.mxu2 %v7798_v36  ;;  %3096 = vmatmul.bf16.vlgmr.msrb.gmra.mxu3 %v7800_v3 }
 0x474   :  { %3153 = vmatpush.bf16.msra.mxu0 %v9229_v54  ;;  %3166 = vmatpush.bf16.msra.mxu1 %v9230_v11 }
 0x475   :  { %3179 = vmatpush.bf16.msrb.mxu2 %v9231_v0  ;;  %3192 = vmatpush.bf16.msrb.mxu3 %v9232_v45 }
 0x478   :  { %3154 = vmatpush.bf16.msra.mxu0 %v9233_v24  ;;  %3167 = vmatpush.bf16.msra.mxu1 %v9234_v27 }
 0x479   :  { %3180 = vmatpush.bf16.msrb.mxu2 %v9235_v49  ;;  %3193 = vmatpush.bf16.msrb.mxu3 %v9236_v10 }
 0x47c   :  { %3155 = vmatpush.bf16.msra.mxu0 %v9237_v43  ;;  %3168 = vmatpush.bf16.msra.mxu1 %v9238_v33 }
 0x47d   :  { %3181 = vmatpush.bf16.msrb.mxu2 %v9239_v48  ;;  %3194 = vmatpush.bf16.msrb.mxu3 %v9240_v26 }
 0x480   :  { %3156 = vmatpush.bf16.msra.mxu0 %v9241_v63  ;;  %3169 = vmatpush.bf16.msra.mxu1 %v9242_v38 }
 0x481   :  { %3182 = vmatpush.bf16.msrb.mxu2 %v9243_v62  ;;  %3195 = vmatpush.bf16.msrb.mxu3 %v9244_v25 }
 0x482   :  { %3109 = vmatmul.bf16.vlgmr.msrb.gmra.mxu0 %v7798_v36  ;;  %3122 = vmatmul.bf16.vlgmr.msrb.gmra.mxu1 %v7800_v3 }
 0x483   :  { %3135 = vmatmul.bf16.vlgmr.msra.gmra.mxu2 %v7798_v36  ;;  %3148 = vmatmul.bf16.vlgmr.msra.gmra.mxu3 %v7800_v3 }
 0x484   :  { %3157 = vmatpush.bf16.msra.mxu0 %v9245_v57  ;;  %3170 = vmatpush.bf16.msra.mxu1 %v9328_v52 }
 0x485   :  { %3183 = vmatpush.bf16.msrb.mxu2 %v9329_v42  ;;  %3196 = vmatpush.bf16.msrb.mxu3 %v9330_v17 }
 0x488   :  { %3158 = vmatpush.bf16.msra.mxu0 %v9331_v9  ;;  %3171 = vmatpush.bf16.msra.mxu1 %v9332_v34 }
 0x489   :  { %3184 = vmatpush.bf16.msrb.mxu2 %v9333_v29  ;;  %3197 = vmatpush.bf16.msrb.mxu3 %v9334_v23 }
 0x48c   :  { %3159 = vmatpush.bf16.msra.mxu0 %v9335_v22  ;;  %3172 = vmatpush.bf16.msra.mxu1 %v9254_v31 }
 0x48d   :  { %3185 = vmatpush.bf16.msrb.mxu2 %v9336_v28  ;;  %3198 = vmatpush.bf16.msrb.mxu3 %v9337_v53 }
 0x490   :  { %3160 = vmatpush.bf16.msra.mxu0 %v9338_v21  ;;  %3173 = vmatpush.bf16.msra.mxu1 %v9339_v59 }
 0x491   :  { %3186 = vmatpush.bf16.msrb.mxu2 %v9340_v6  ;;  %3199 = vmatpush.bf16.msrb.mxu3 %v9341_v46 }
 0x493   :  { %3161 = vmatmul.bf16.vlgmr.msra.gmra.mxu0 %v7798_v36  ;;  %3174 = vmatmul.bf16.vlgmr.msra.gmra.mxu1 %v7800_v3 }
 0x494   :  { %3205 = vmatpush.bf16.msrb.mxu0 %v9342_v51  ;;  %3218 = vmatpush.bf16.msrb.mxu1 %v9343_v13 }
 0x495   :  { %3231 = vmatpush.bf16.msra.mxu2 %v9344_v47  ;;  %3244 = vmatpush.bf16.msra.mxu3 %v9529_v18 }
 0x496   :  { %3187 = vmatmul.bf16.vlgmr.msrb.gmra.mxu2 %v7798_v36  ;;  %3200 = vmatmul.bf16.vlgmr.msrb.gmra.mxu3 %v7800_v3 }
 0x498   :  { %3206 = vmatpush.bf16.msrb.mxu0 %v9530_v39  ;;  %3219 = vmatpush.bf16.msrb.mxu1 %v9531_v35  ;;  %v9624_v35 = vld [vmem:[#allocation161_spill] sm:$0xff] }
 0x499   :  { %3232 = vmatpush.bf16.msra.mxu2 %v9532_v60  ;;  %3245 = vmatpush.bf16.msra.mxu3 %v9533_v40 }
 0x49c   :  { %3207 = vmatpush.bf16.msrb.mxu0 %v9534_v30  ;;  %3220 = vmatpush.bf16.msrb.mxu1 %v9535_v4 }
 0x49d   :  { %3233 = vmatpush.bf16.msra.mxu2 %v9536_v50  ;;  %3246 = vmatpush.bf16.msra.mxu3 %v9537_v7 }
 0x4a0   :  { %3208 = vmatpush.bf16.msrb.mxu0 %v9538_v61  ;;  %3221 = vmatpush.bf16.msrb.mxu1 %v9539_v15 }
 0x4a1   :  { %3234 = vmatpush.bf16.msra.mxu2 %v9540_v41  ;;  %3247 = vmatpush.bf16.msra.mxu3 %v9541_v19 }
 0x4a4   :  { %3209 = vmatpush.bf16.msrb.mxu0 %v9542_v5  ;;  %3222 = vmatpush.bf16.msrb.mxu1 %v9543_v12 }
 0x4a5   :  { %3235 = vmatpush.bf16.msra.mxu2 %v9544_v14  ;;  %3248 = vmatpush.bf16.msra.mxu3 %v9545_v2  ;;  %v9555_v14 = vld [vmem:[#allocation149_spill] sm:$0xff]  ;;  %v9556_v2 = vld [vmem:[#allocation150_spill] sm:$0xff] }
 0x4a8   :  { %3210 = vmatpush.bf16.msrb.mxu0 %v9546_v55  ;;  %3223 = vmatpush.bf16.msrb.mxu1 %v9547_v44  ;;  %v9557_v55 = vld [vmem:[#allocation151_spill] sm:$0xff] }
 0x4a9   :  { %3236 = vmatpush.bf16.msra.mxu2 %v9548_v16  ;;  %3249 = vmatpush.bf16.msra.mxu3 %v9549_v8  ;;  %v9558_v44 = vld [vmem:[#allocation15_spill] sm:$0xff]  ;;  %v9559_v16 = vld [vmem:[#allocation16_spill] sm:$0xff] }
 0x4ac   :  { %3211 = vmatpush.bf16.msrb.mxu0 %v9550_v1  ;;  %3224 = vmatpush.bf16.msrb.mxu1 %v9551_v32  ;;  %v9568_v32 = vld [vmem:[#allocation29_spill] sm:$0xff] }
 0x4ad   :  { %3237 = vmatpush.bf16.msra.mxu2 %v9552_v20  ;;  %3250 = vmatpush.bf16.msra.mxu3 %v9553_v58  ;;  %v9560_v58 = vld [vmem:[#allocation21_spill] sm:$0xff]  ;;  %v9567_v20 = vld [vmem:[#allocation20_spill] sm:$0xff] }
 0x4b0   :  { %3212 = vmatpush.bf16.msrb.mxu0 %v9554_v37  ;;  %3225 = vmatpush.bf16.msrb.mxu1 %v9555_v14  ;;  %v9561_v37 = vld [vmem:[#allocation22_spill] sm:$0xff]  ;;  %v9562_v14 = vld [vmem:[#allocation17_spill] sm:$0xff] }
 0x4b1   :  { %3238 = vmatpush.bf16.msra.mxu2 %v9556_v2  ;;  %3251 = vmatpush.bf16.msra.mxu3 %v9557_v55  ;;  %v9563_v2 = vld [vmem:[#allocation18_spill] sm:$0xff]  ;;  %v9564_v55 = vld [vmem:[#allocation25_spill] sm:$0xff] }
 0x4b3   :  { %3213 = vmatmul.bf16.vlgmr.msrb.gmra.mxu0 %v7798_v36  ;;  %3226 = vmatmul.bf16.vlgmr.msrb.gmra.mxu1 %v7800_v3 }
 0x4b4   :  { %3454 = vmatpush.bf16.msra.mxu0 %v9558_v44  ;;  %3467 = vmatpush.bf16.msra.mxu1 %v9559_v16  ;;  %v9565_v44 = vld [vmem:[#allocation26_spill] sm:$0xff]  ;;  %v9566_v16 = vld [vmem:[#allocation19_spill] sm:$0xff] }
 0x4b5   :  { %3239 = vmatmul.bf16.vlgmr.msra.gmra.mxu2 %v7798_v36  ;;  %3252 = vmatmul.bf16.vlgmr.msra.gmra.mxu3 %v7800_v3  ;;  %v9569_v36 = vld [vmem:[#allocation30_spill] sm:$0xff]  ;;  %v9570_v3 = vld [vmem:[#allocation23_spill] sm:$0xff] }
 0x4b6   :  { %3480 = vmatpush.bf16.msrb.mxu2 %v9560_v58  ;;  %3493 = vmatpush.bf16.msrb.mxu3 %v9561_v37  ;;  %v9571_v58 = vld [vmem:[#allocation24_spill] sm:$0xff]  ;;  %v9572_v37 = vld [vmem:[#allocation33_spill] sm:$0xff] }
 0x4b8   :  { %3455 = vmatpush.bf16.msra.mxu0 %v9562_v14  ;;  %3468 = vmatpush.bf16.msra.mxu1 %v9563_v2  ;;  %v9573_v14 = vld [vmem:[#allocation34_spill] sm:$0xff]  ;;  %v9574_v2 = vld [vmem:[#allocation27_spill] sm:$0xff] }
 0x4ba   :  { %3481 = vmatpush.bf16.msrb.mxu2 %v9564_v55  ;;  %3494 = vmatpush.bf16.msrb.mxu3 %v9565_v44  ;;  %v9575_v55 = vld [vmem:[#allocation28_spill] sm:$0xff]  ;;  %v9576_v44 = vld [vmem:[#allocation37_spill] sm:$0xff] }
 0x4bc   :  { %3456 = vmatpush.bf16.msra.mxu0 %v9566_v16  ;;  %3469 = vmatpush.bf16.msra.mxu1 %v9567_v20  ;;  %v9577_v16 = vld [vmem:[#allocation38_spill] sm:$0xff]  ;;  %v9578_v20 = vld [vmem:[#allocation31_spill] sm:$0xff] }
 0x4be   :  { %3482 = vmatpush.bf16.msrb.mxu2 %v9568_v32  ;;  %3495 = vmatpush.bf16.msrb.mxu3 %v9569_v36  ;;  %v9579_v32 = vld [vmem:[#allocation32_spill] sm:$0xff]  ;;  %v9580_v36 = vld [vmem:[#allocation43_spill] sm:$0xff] }
 0x4c0   :  { %3457 = vmatpush.bf16.msra.mxu0 %v9570_v3  ;;  %3470 = vmatpush.bf16.msra.mxu1 %v9571_v58  ;;  %v9581_v3 = vld [vmem:[#allocation44_spill] sm:$0xff]  ;;  %v9582_v58 = vld [vmem:[#allocation35_spill] sm:$0xff] }
 0x4c2   :  { %3483 = vmatpush.bf16.msrb.mxu2 %v9572_v37  ;;  %3496 = vmatpush.bf16.msrb.mxu3 %v9573_v14  ;;  %v9583_v37 = vld [vmem:[#allocation36_spill] sm:$0xff]  ;;  %v9584_v14 = vld [vmem:[#allocation47_spill] sm:$0xff] }
 0x4c4   :  { %3458 = vmatpush.bf16.msra.mxu0 %v9574_v2  ;;  %3471 = vmatpush.bf16.msra.mxu1 %v9575_v55  ;;  %v9585_v2 = vld [vmem:[#allocation48_spill] sm:$0xff]  ;;  %v9586_v55 = vld [vmem:[#allocation39_spill] sm:$0xff] }
 0x4c6   :  { %3484 = vmatpush.bf16.msrb.mxu2 %v9576_v44  ;;  %3497 = vmatpush.bf16.msrb.mxu3 %v9577_v16  ;;  %v9587_v44 = vld [vmem:[#allocation40_spill] sm:$0xff]  ;;  %v9588_v16 = vld [vmem:[#allocation41_spill] sm:$0xff] }
 0x4c8   :  { %3459 = vmatpush.bf16.msra.mxu0 %v9578_v20  ;;  %3472 = vmatpush.bf16.msra.mxu1 %v9579_v32  ;;  %v9589_v20 = vld [vmem:[#allocation42_spill] sm:$0xff]  ;;  %v9590_v32 = vld [vmem:[#allocation51_spill] sm:$0xff] }
 0x4ca   :  { %3485 = vmatpush.bf16.msrb.mxu2 %v9580_v36  ;;  %3498 = vmatpush.bf16.msrb.mxu3 %v9581_v3  ;;  %v9591_v36 = vld [vmem:[#allocation52_spill] sm:$0xff]  ;;  %v9592_v3 = vld [vmem:[#allocation53_spill] sm:$0xff] }
 0x4cc   :  { %3460 = vmatpush.bf16.msra.mxu0 %v9582_v58  ;;  %3473 = vmatpush.bf16.msra.mxu1 %v9583_v37  ;;  %v9593_v58 = vld [vmem:[#allocation54_spill] sm:$0xff]  ;;  %v9594_v37 = vld [vmem:[#allocation45_spill] sm:$0xff] }
 0x4ce   :  { %3486 = vmatpush.bf16.msrb.mxu2 %v9584_v14  ;;  %3499 = vmatpush.bf16.msrb.mxu3 %v9585_v2  ;;  %v9595_v14 = vld [vmem:[#allocation46_spill] sm:$0xff]  ;;  %v9596_v2 = vld [vmem:[#allocation57_spill] sm:$0xff] }
 0x4d0   :  { %3461 = vmatpush.bf16.msra.mxu0 %v9586_v55  ;;  %3474 = vmatpush.bf16.msra.mxu1 %v9587_v44  ;;  %v9597_v55 = vld [vmem:[#allocation58_spill] sm:$0xff]  ;;  %v9598_v44 = vld [vmem:[#allocation49_spill] sm:$0xff] }
 0x4d2   :  { %3487 = vmatpush.bf16.msrb.mxu2 %v9590_v32  ;;  %3500 = vmatpush.bf16.msrb.mxu3 %v9591_v36  ;;  %v9601_v32 = vld [vmem:[#allocation62_spill] sm:$0xff]  ;;  %v9602_v36 = vld [vmem:[#allocation55_spill] sm:$0xff] }
 0x4d4   :  { %3506 = vmatpush.bf16.msrb.mxu0 %v9588_v16  ;;  %3519 = vmatpush.bf16.msrb.mxu1 %v9589_v20  ;;  %v9599_v16 = vld [vmem:[#allocation50_spill] sm:$0xff]  ;;  %v9600_v20 = vld [vmem:[#allocation61_spill] sm:$0xff] }
 0x4d6   :  { %3532 = vmatpush.bf16.msra.mxu2 %v9592_v3  ;;  %3545 = vmatpush.bf16.msra.mxu3 %v9593_v58  ;;  %v9603_v3 = vld [vmem:[#allocation56_spill] sm:$0xff]  ;;  %v9604_v58 = vld [vmem:[#allocation65_spill] sm:$0xff] }
 0x4d8   :  { %3507 = vmatpush.bf16.msrb.mxu0 %v9594_v37  ;;  %3520 = vmatpush.bf16.msrb.mxu1 %v9595_v14  ;;  %v9605_v37 = vld [vmem:[#allocation66_spill] sm:$0xff]  ;;  %v9606_v14 = vld [vmem:[#allocation59_spill] sm:$0xff] }
 0x4da   :  { %3533 = vmatpush.bf16.msra.mxu2 %v9596_v2  ;;  %3546 = vmatpush.bf16.msra.mxu3 %v9597_v55  ;;  %v9607_v2 = vld [vmem:[#allocation60_spill] sm:$0xff]  ;;  %v9608_v55 = vld [vmem:[#allocation69_spill] sm:$0xff] }
 0x4dc   :  { %3508 = vmatpush.bf16.msrb.mxu0 %v9598_v44  ;;  %3521 = vmatpush.bf16.msrb.mxu1 %v9599_v16  ;;  %v9609_v44 = vld [vmem:[#allocation70_spill] sm:$0xff]  ;;  %v9610_v16 = vld [vmem:[#allocation63_spill] sm:$0xff] }
 0x4de   :  { %3534 = vmatpush.bf16.msra.mxu2 %v9600_v20  ;;  %3547 = vmatpush.bf16.msra.mxu3 %v9601_v32  ;;  %v9611_v20 = vld [vmem:[#allocation64_spill] sm:$0xff]  ;;  %v9612_v32 = vld [vmem:[#allocation73_spill] sm:$0xff] }
 0x4e0   :  { %3509 = vmatpush.bf16.msrb.mxu0 %v9602_v36  ;;  %3522 = vmatpush.bf16.msrb.mxu1 %v9603_v3  ;;  %v9613_v36 = vld [vmem:[#allocation74_spill] sm:$0xff]  ;;  %v9614_v3 = vld [vmem:[#allocation67_spill] sm:$0xff] }
 0x4e2   :  { %3535 = vmatpush.bf16.msra.mxu2 %v9604_v58  ;;  %3548 = vmatpush.bf16.msra.mxu3 %v9605_v37  ;;  %v9615_v58 = vld [vmem:[#allocation68_spill] sm:$0xff]  ;;  %v9616_v37 = vld [vmem:[#allocation75_spill] sm:$0xff] }
 0x4e4   :  { %3510 = vmatpush.bf16.msrb.mxu0 %v9606_v14  ;;  %3523 = vmatpush.bf16.msrb.mxu1 %v9607_v2  ;;  %v9617_v14 = vld [vmem:[#allocation76_spill] sm:$0xff]  ;;  %v9618_v2 = vld [vmem:[#allocation71_spill] sm:$0xff] }
 0x4e6   :  { %3536 = vmatpush.bf16.msra.mxu2 %v9608_v55  ;;  %3549 = vmatpush.bf16.msra.mxu3 %v9609_v44  ;;  %v9619_v55 = vld [vmem:[#allocation72_spill] sm:$0xff]  ;;  %v9620_v44 = vld [vmem:[#allocation77_spill] sm:$0xff] }
 0x4e8   :  { %3511 = vmatpush.bf16.msrb.mxu0 %v9610_v16  ;;  %3524 = vmatpush.bf16.msrb.mxu1 %v9611_v20  ;;  %v9621_v16 = vld [vmem:[#allocation78_spill] sm:$0xff] }
 0x4ea   :  { %3537 = vmatpush.bf16.msra.mxu2 %v9612_v32  ;;  %3550 = vmatpush.bf16.msra.mxu3 %v9613_v36 }
 0x4ec   :  { %3512 = vmatpush.bf16.msrb.mxu0 %v9614_v3  ;;  %3525 = vmatpush.bf16.msrb.mxu1 %v9615_v58 }
 0x4ee   :  { %3538 = vmatpush.bf16.msra.mxu2 %v9616_v37  ;;  %3551 = vmatpush.bf16.msra.mxu3 %v9617_v14  ;;  %v9622_v14 = vld [vmem:[#allocation128_spill] sm:$0xff] }
 0x4ef   :  { %v3058_v20 = vpop.f32.mrf.mxu0  ;;  %v3071_v32 = vpop.f32.mrf.mxu1 }
 0x4f0   :  { %3513 = vmatpush.bf16.msrb.mxu0 %v9618_v2  ;;  %3526 = vmatpush.bf16.msrb.mxu1 %v9619_v55  ;;  %v3072_v58 = vadd.f32 %v3071_v32, %v3058_v20 }
 0x4f2   :  { %3539 = vmatpush.bf16.msra.mxu2 %v9620_v44  ;;  %3552 = vmatpush.bf16.msra.mxu3 %v9621_v16 }
 0x4f6   :  { %v3084_v1 = vpop.f32.mrf.mxu2  ;;  %v3097_v36 = vpop.f32.mrf.mxu3 }
 0x4f7   :  { %v3098_v8 = vadd.f32 %v3097_v36, %v3084_v1  ;;  %v3060_v3 = vpop.f32.mrf.mxu0  ;;  %v3073_v12 = vpop.f32.mrf.mxu1 }
 0x4f9   :  { %v3264_v5 = vrot.slane %v3098_v8, 4 }
 0x4fb   :  { %v3266_v37 = vsel %vm122_vm1, %v3072_v58, %v3264_v5 }
 0x4fc   :  { %v3270_v19 = vadd.f32 %v3266_v37, %v9622_v14 }
 0x4fe   :  { %v5850_v2 = vmul.f32 -1.442695, %v3270_v19  ;;  %v3308_v41 = vrot.slane %v3270_v19, 4  ;;  %v3086_v55 = vpop.f32.mrf.mxu2  ;;  %v3099_v15 = vpop.f32.mrf.mxu3  ;;  %v9623_v19 = vld [vmem:[#allocation158_spill] sm:$0xff] }
 0x4ff   :  { %v3110_v44 = vpop.f32.mrf.mxu0  ;;  %v3123_v61 = vpop.f32.mrf.mxu1 }
 0x500   :  { %6191 = vpow2.f32 %v5850_v2  ;;  %v5851_v16 = vmul.f32 -1.442695, %v3308_v41  ;;  %v3124_v37 = vadd.f32 %v3123_v61, %v3110_v44 }
 0x502   :  { %6193 = vpow2.f32 %v5851_v16 }
 0x506   :  { %v6192_v7 = vpop.eup %6191  ;;  %v3136_v50 = vpop.f32.mrf.mxu2 }
 0x507   :  { %v3149_v1 = vpop.f32.mrf.mxu3  ;;  %v3291_v36 = vadd.f32 1.0, %v6192_v7  ;;  %v3112_v32 = vpop.f32.mrf.mxu0 }
 0x508   :  { %v3150_v12 = vadd.f32 %v3149_v1, %v3136_v50  ;;  %v3125_v8 = vpop.f32.mrf.mxu1  ;;  %v6194_v20 = vpop.eup %6193 }
 0x509   :  { %6195 = vrcp.f32 %v3291_v36  ;;  %v3313_v5 = vadd.f32 1.0, %v6194_v20  ;;  %v3303_v20 = vand.u32 2147483648, %v3291_v36  ;;  %vm3297_vm9 = vweird.f32 %v3291_v36 }
 0x50a   :  { %v3265_v14 = vrot.slane %v3150_v12, 4  ;;  %v3301_v12 = vand.u32 2147483647, %v3291_v36 }
 0x50b   :  { %6197 = vrcp.f32 %v3313_v5  ;;  %vm3319_vm12 = vweird.f32 %v3313_v5 }
 0x50c   :  { %v3267_v15 = vsel %vm122_vm1, %v3124_v37, %v3265_v14  ;;  %v3325_v37 = vand.u32 2147483648, %v3313_v5  ;;  %vm3302_vm13 = vcmp.eq.f32.partialorder %v3301_v12, 8.507059e+37 }
 0x50d   :  { %v3271_v55 = vadd.f32 %v3267_v15, %v9623_v19  ;;  %v3323_v19 = vand.u32 2147483647, %v3313_v5 }
 0x50e   :  { %v3138_v41 = vpop.f32.mrf.mxu2 }
 0x50f   :  { %v3331_v2 = vrot.slane %v3271_v55, 4  ;;  %v3151_v16 = vpop.f32.mrf.mxu3  ;;  %v6196_v58 = vpop.eup %6195  ;;  %vm3324_vm15 = vcmp.eq.f32.partialorder %v3323_v19, 8.507059e+37 }
 0x510   :  { %v3293_v3 = vmul.f32 %v6196_v58, %v3291_v36  ;;  %v3162_v50 = vpop.f32.mrf.mxu0  ;;  %v3175_v1 = vpop.f32.mrf.mxu1  ;;  %vm3298_vm8 = vweird.f32 %v6196_v58 }
 0x511   :  { %v5852_v4 = vmul.f32 -1.442695, %v3331_v2  ;;  %v6198_v7 = vpop.eup %6197  ;;  %vm3299_vm11 = vmor %vm3297_vm9, %vm3298_vm8  ;;  %v3304_v2 = vor.u32 1.1754944e-38, %v3303_v20 }
 0x512   :  { %v3294_v32 = vsub.f32 1.0, %v3293_v3  ;;  %v3315_v8 = vmul.f32 %v6198_v7, %v3313_v5  ;;  %vm3320_vm10 = vweird.f32 %v6198_v7 }
 0x513   :  { %6199 = vpow2.f32 %v5852_v4  ;;  %vm3321_vm14 = vmor %vm3319_vm12, %vm3320_vm10 }
 0x514   :  { %6201 = vtanh.f32 %v3271_v55  ;;  %v3316_v61 = vsub.f32 1.0, %v3315_v8  ;;  %v3295_v44 = vmul.f32 %v6196_v58, %v3294_v32  ;;  %v3326_v32 = vor.u32 1.1754944e-38, %v3325_v37 }
 0x516   :  { %v3317_v14 = vmul.f32 %v6198_v7, %v3316_v61  ;;  %v3296_v15 = vadd.f32 %v6196_v58, %v3295_v44  ;;  %v9625_v44 = vld [vmem:[#allocation160_spill] sm:$0xff] }
 0x517   :  { %v9626_v39 = vrot.slane %v9625_v44, 4 }
 0x518   :  { %v3300_v16 = vsel %vm3299_vm11, %v6196_v58, %v3296_v15  ;;  %v3318_v3 = vadd.f32 %v6198_v7, %v3317_v14  ;;  %v3164_v36 = vpop.f32.mrf.mxu0  ;;  %v3177_v61 = vpop.f32.mrf.mxu1  ;;  %v3176_v14 = vadd.f32 %v3175_v1, %v3162_v50 }
 0x519   :  { %v6200_v41 = vpop.eup %6199  ;;  %v3188_v4 = vpop.f32.mrf.mxu2  ;;  %v3305_v8 = vsel %vm3302_vm13, %v3304_v2, %v3300_v16  ;;  %v560_v20 = vsel %vm122_vm1, %v9626_v39, %v9624_v35 }
 0x51a   :  { %v3201_v30 = vpop.f32.mrf.mxu3  ;;  %v6202_v55 = vpop.eup %6201  ;;  %v3336_v40 = vadd.f32 1.0, %v6200_v41  ;;  %v3322_v18 = vsel %vm3321_vm14, %v6198_v7, %v3318_v3  ;;  %v561_v37 = vrot.slane %v560_v20, 4 }
 0x51b   :  { %v3202_v60 = vadd.f32 %v3201_v30, %v3188_v4  ;;  %v3353_v5 = vmul.f32 %v6202_v55, %v3305_v8  ;;  %v3327_v58 = vsel %vm3324_vm15, %v3326_v32, %v3322_v18 }
 0x51c   :  { %6203 = vrcp.f32 %v3336_v40  ;;  %v3352_v12 = vmul.f32 %v3327_v58, %v7794_v56  ;;  %v3348_v19 = vand.u32 2147483648, %v3336_v40  ;;  %v3346_v50 = vand.u32 2147483647, %v3336_v40 }
 0x51d   :  { %v3279_v15 = vrot.slane %v3202_v60, 4  ;;  %vm3342_vm2 = vweird.f32 %v3336_v40 }
 0x51e   :  { %v7955_v2 = vadd.f32 %v3353_v5, %v3352_v12  ;;  %v3349_v55 = vor.u32 1.1754944e-38, %v3348_v19  ;;  %vm3347_vm4 = vcmp.eq.f32.partialorder %v3346_v50, 8.507059e+37 }
 0x51f   :  { %v3281_v30 = vsel %vm122_vm1, %v3176_v14, %v3279_v15 }
 0x520   :  { %v3285_v41 = vadd.f32 %v3281_v30, %v561_v37 }
 0x521   :  { %v3190_v16 = vpop.f32.mrf.mxu2 }
 0x522   :  { %v3203_v4 = vpop.f32.mrf.mxu3  ;;  %v6204_v36 = vpop.eup %6203  ;;  %v5853_v61 = vmul.f32 -1.442695, %v3285_v41  ;;  %v3377_v39 = vrot.slane %v3285_v41, 4 }
 0x523   :  { %v3338_v35 = vmul.f32 %v6204_v36, %v3336_v40  ;;  %vm3343_vm0 = vweird.f32 %v6204_v36 }
 0x524   :  { %6205 = vpow2.f32 %v5853_v61  ;;  %v5854_v7 = vmul.f32 -1.442695, %v3377_v39  ;;  %vm3344_vm3 = vmor %vm3342_vm2, %vm3343_vm0 }
 0x525   :  { %v3339_v18 = vsub.f32 1.0, %v3338_v35  ;;  %6207 = vtanh.f32 %v7955_v2 }
 0x526   :  { %6209 = vpow2.f32 %v5854_v7 }
 0x527   :  { %v3340_v60 = vmul.f32 %v6204_v36, %v3339_v18 }
 0x529   :  { %v3341_v1 = vadd.f32 %v6204_v36, %v3340_v60 }
 0x52a   :  { %v6206_v3 = vpop.eup %6205 }
 0x52b   :  { %v6208_v32 = vpop.eup %6207  ;;  %v3345_v8 = vsel %vm3344_vm3, %v6204_v36, %v3341_v1  ;;  %v3360_v44 = vadd.f32 1.0, %v6206_v3  ;;  %v9628_v1 = vld [vmem:[#allocation171_spill] sm:$0xff] }
 0x52c   :  { %v6210_v20 = vpop.eup %6209  ;;  %v3350_v5 = vsel %vm3347_vm4, %v3349_v55, %v3345_v8  ;;  %v563_v3 = vrot.slane %v9628_v1, 4 }
 0x52d   :  { %v7959_v58 = vmul.f32 %v6208_v32, %v3350_v5  ;;  %6211 = vrcp.f32 %v3360_v44  ;;  %v3382_v12 = vadd.f32 1.0, %v6210_v20  ;;  %vm3366_vm9 = vweird.f32 %v3360_v44 }
 0x52f   :  { %3442 = vst [vmem:[#allocation6 + $0x10] sm:$0xf] %v7959_v58  ;;  %6213 = vrcp.f32 %v3382_v12  ;;  %v3394_v8 = vand.u32 2147483648, %v3382_v12  ;;  %vm3388_vm6 = vweird.f32 %v3382_v12 }
 0x530   :  { %v3214_v14 = vpop.f32.mrf.mxu0  ;;  %v3227_v15 = vpop.f32.mrf.mxu1 }
 0x531   :  { %v3228_v19 = vadd.f32 %v3227_v15, %v3214_v14  ;;  %v3372_v14 = vand.u32 2147483648, %v3360_v44 }
 0x533   :  { %v6212_v37 = vpop.eup %6211 }
 0x534   :  { %v3362_v40 = vmul.f32 %v6212_v37, %v3360_v44  ;;  %vm3367_vm7 = vweird.f32 %v6212_v37 }
 0x535   :  { %v6214_v30 = vpop.eup %6213  ;;  %vm3368_vm10 = vmor %vm3366_vm9, %vm3367_vm7 }
 0x536   :  { %v7962_v41 = vld [vmem:[#allocation6 + $0x10] sm:$0xf]  ;;  %v3363_v16 = vsub.f32 1.0, %v3362_v40  ;;  %v3384_v4 = vmul.f32 %v6214_v30, %v3382_v12  ;;  %vm3389_vm5 = vweird.f32 %v6214_v30 }
 0x537   :  { %9627 = vst [vmem:[#allocation81_spill] sm:$0xff] %v7962_v41  ;;  %vm7967_vm8 = vmor %vm3388_vm6, %vm3389_vm5 }
 0x538   :  { %v3240_v36 = vpop.f32.mrf.mxu2  ;;  %v3253_v61 = vpop.f32.mrf.mxu3  ;;  %4709 = vst [vmem:[#allocation1 + $0x20] ss:$2 sm:$0xff] %v7962_v41  ;;  %v3385_v18 = vsub.f32 1.0, %v3384_v4  ;;  %v3364_v50 = vmul.f32 %v6212_v37, %v3363_v16  ;;  %v3392_v41 = vand.u32 2147483647, %v3382_v12  ;;  %v3373_v12 = vor.u32 1.1754944e-38, %v3372_v14 }
 0x539   :  { %v3254_v39 = vadd.f32 %v3253_v61, %v3240_v36  ;;  %v3216_v35 = vpop.f32.mrf.mxu0  ;;  %v3229_v7 = vpop.f32.mrf.mxu1  ;;  %v3370_v61 = vand.u32 2147483647, %v3360_v44 }
 0x53a   :  { %v3386_v55 = vmul.f32 %v6214_v30, %v3385_v18  ;;  %v3365_v40 = vadd.f32 %v6212_v37, %v3364_v50  ;;  %v3395_v35 = vor.u32 1.1754944e-38, %v3394_v8  ;;  %vm3393_vm11 = vcmp.eq.f32.partialorder %v3392_v41, 8.507059e+37 }
 0x53b   :  { %v3280_v60 = vrot.slane %v3254_v39, 4  ;;  %vm3371_vm12 = vcmp.eq.f32.partialorder %v3370_v61, 8.507059e+37 }
 0x53c   :  { %v3387_v5 = vadd.f32 %v6214_v30, %v3386_v55  ;;  %v3369_v18 = vsel %vm3368_vm10, %v6212_v37, %v3365_v40 }
 0x53d   :  { %v3282_v32 = vsel %vm122_vm1, %v3228_v19, %v3280_v60  ;;  %v3422_v60 = vrot.slane %v7794_v56, 4  ;;  %v3374_v1 = vsel %vm3371_vm12, %v3373_v12, %v3369_v18  ;;  %v7982_v18 = vld.sshfl [vmem:[#allocation1 + $0x10] sm:$0xff pattern:$0x75316420] }
 0x53e   :  { %v3286_v20 = vadd.f32 %v3282_v32, %v563_v3  ;;  %v3391_v39 = vsel %vm7967_vm8, %v6214_v30, %v3387_v5  ;;  %9632 = vst [vmem:[#allocation83_spill] sm:$0xff] %v7982_v18  ;;  %v9657_v18 = vld [vmem:[#allocation147_spill] sm:$0xff] }
 0x53f   :  { %v3396_v19 = vsel %vm3393_vm11, %v3395_v35, %v3391_v39 }
 0x540   :  { %6215 = vtanh.f32 %v3286_v20  ;;  %v3400_v15 = vrot.slane %v3286_v20, 4  ;;  %v3242_v16 = vpop.f32.mrf.mxu2  ;;  %v3255_v4 = vpop.f32.mrf.mxu3  ;;  %v3424_v3 = vmul.f32 %v3422_v60, %v3396_v19 }
 0x542   :  { %v5855_v7 = vmul.f32 -1.442695, %v3400_v15 }
 0x544   :  { %6217 = vpow2.f32 %v5855_v7 }
 0x546   :  { %v6216_v50 = vpop.eup %6215 }
 0x547   :  { %v3425_v55 = vmul.f32 %v6216_v50, %v3374_v1  ;;  %v9634_v1 = vld [vmem:[#allocation115_spill] sm:$0xff] }
 0x549   :  { %v3426_v32 = vadd.f32 %v3425_v55, %v3424_v3  ;;  %v9635_v3 = vld [vmem:[#allocation116_spill] sm:$0xff]  ;;  %v9636_v55 = vld [vmem:[#allocation117_spill] sm:$0xff] }
 0x54a   :  { %v6218_v44 = vpop.eup %6217 }
 0x54b   :  { %v3405_v20 = vadd.f32 1.0, %v6218_v44  ;;  %v3437_v36 = vrot.slane %v3426_v32, 4  ;;  %v9638_v44 = vld [vmem:[#allocation119_spill] sm:$0xff] }
 0x54d   :  { %6219 = vrcp.f32 %v3405_v20  ;;  %v7976_v30 = vsel %vm122_vm1, %v7955_v2, %v3437_v36  ;;  %v3417_v5 = vand.u32 2147483648, %v3405_v20  ;;  %v3415_v56 = vand.u32 2147483647, %v3405_v20  ;;  %v9640_v36 = vld [vmem:[#allocation121_spill] sm:$0xff] }
 0x54e   :  { %6221 = vtanh.f32 %v3426_v32  ;;  %vm3411_vm14 = vweird.f32 %v3405_v20  ;;  %v9637_v32 = vld [vmem:[#allocation118_spill] sm:$0xff] }
 0x54f   :  { %v3418_v15 = vor.u32 1.1754944e-38, %v3417_v5  ;;  %vm3416_vm0 = vcmp.eq.f32.partialorder %v3415_v56, 8.507059e+37  ;;  %v9644_v5 = vld [vmem:[#allocation125_spill] sm:$0xff]  ;;  %v9646_v56 = vld [vmem:[#allocation130_spill] sm:$0xff] }
 0x553   :  { %v6220_v37 = vpop.eup %6219 }
 0x554   :  { %v3407_v41 = vmul.f32 %v6220_v37, %v3405_v20  ;;  %vm3412_vm13 = vweird.f32 %v6220_v37  ;;  %v6222_v4 = vpop.eup %6221  ;;  %v9639_v20 = vld [vmem:[#allocation120_spill] sm:$0xff] }
 0x555   :  { %vm3413_vm15 = vmor %vm3411_vm14, %vm3412_vm13 }
 0x556   :  { %v3408_v8 = vsub.f32 1.0, %v3407_v41  ;;  %v9642_v41 = vld [vmem:[#allocation123_spill] sm:$0xff] }
 0x558   :  { %v3409_v40 = vmul.f32 %v6220_v37, %v3408_v8  ;;  %v9643_v8 = vld [vmem:[#allocation124_spill] sm:$0xff] }
 0x55a   :  { %v3410_v14 = vadd.f32 %v6220_v37, %v3409_v40  ;;  %v9645_v40 = vld [vmem:[#allocation126_spill] sm:$0xff] }
 0x55c   :  { %v3414_v16 = vsel %vm3413_vm15, %v6220_v37, %v3410_v14  ;;  %v9641_v37 = vld [vmem:[#allocation122_spill] sm:$0xff]  ;;  %v9647_v14 = vld [vmem:[#allocation131_spill] sm:$0xff] }
 0x55d   :  { %v3419_v61 = vsel %vm3416_vm0, %v3418_v15, %v3414_v16  ;;  %v9648_v15 = vld [vmem:[#allocation132_spill] sm:$0xff]  ;;  %v9649_v16 = vld [vmem:[#allocation133_spill] sm:$0xff] }
 0x55e   :  { %v3428_v39 = vmul.f32 %v6222_v4, %v3419_v61  ;;  %v9650_v4 = vld [vmem:[#allocation137_spill] sm:$0xff]  ;;  %v9651_v61 = vld [vmem:[#allocation138_spill] sm:$0xff] }
 0x560   :  { %v3431_v35 = vrot.slane %v3428_v39, 4  ;;  %3444 = vst [vmem:[#allocation7 + $0xc] sm:$0xf] %v3428_v39  ;;  %v9652_v39 = vld [vmem:[#allocation140_spill] sm:$0xff] }
 0x562   :  { %v3432_v2 = vsel %vm122_vm1, %v7959_v58, %v3431_v35  ;;  %v9633_v58 = vld [vmem:[#allocation114_spill] sm:$0xff]  ;;  %v9653_v35 = vld [vmem:[#allocation141_spill] sm:$0xff] }
 0x563   :  { %3447 = vst [vmem:[#allocation1] ss:$2 sm:$0xff] %v3432_v2  ;;  %v9654_v2 = vld [vmem:[#allocation144_spill] sm:$0xff] }
 0x567   :  { %v7980_v7 = vld [vmem:[#allocation7 + $0xc] sm:$0xf] }
 0x568   :  { %9631 = vst [vmem:[#allocation82_spill] sm:$0xff] %v7980_v7 }
 0x569   :  { %4787 = vst [vmem:[#allocation1 + $0x11] ss:$2 sm:$0xff] %v7980_v7 }
 0x56a   :  { %v3448_v12 = vld.sshfl [vmem:[#allocation1] sm:$0xff pattern:$0x75316420]  ;;  %v3449_v19 = vld.sshfl [vmem:[#allocation1 + $0x8] sm:$0xff pattern:$0x75316420] }
 0x56b   :  { %v7985_v60 = vpack.c.bf16 %v3448_v12, %v3448_v12  ;;  %v7987_v50 = vpack.c.bf16 %v3449_v19, %v3449_v19  ;;  %v9655_v12 = vld [vmem:[#allocation145_spill] sm:$0xff]  ;;  %v9656_v19 = vld [vmem:[#allocation146_spill] sm:$0xff] }
 0x56d   :  { %3462 = vmatmul.bf16.vlgmr.msra.gmra.mxu0 %v7985_v60  ;;  %3475 = vmatmul.bf16.vlgmr.msra.gmra.mxu1 %v7987_v50 }
 0x56e   :  { %3488 = vmatmul.bf16.vlgmr.msrb.gmra.mxu2 %v7985_v60  ;;  %3501 = vmatmul.bf16.vlgmr.msrb.gmra.mxu3 %v7987_v50 }
 0x56f   :  { %3558 = vmatpush.bf16.msra.mxu0 %v9229_v54  ;;  %3571 = vmatpush.bf16.msra.mxu1 %v9230_v11 }
 0x570   :  { %3584 = vmatpush.bf16.msrb.mxu2 %v9231_v0  ;;  %3597 = vmatpush.bf16.msrb.mxu3 %v9232_v45 }
 0x573   :  { %3559 = vmatpush.bf16.msra.mxu0 %v9233_v24  ;;  %3572 = vmatpush.bf16.msra.mxu1 %v9234_v27 }
 0x574   :  { %3585 = vmatpush.bf16.msrb.mxu2 %v9235_v49  ;;  %3598 = vmatpush.bf16.msrb.mxu3 %v9236_v10 }
 0x577   :  { %3560 = vmatpush.bf16.msra.mxu0 %v9237_v43  ;;  %3573 = vmatpush.bf16.msra.mxu1 %v9238_v33 }
 0x578   :  { %3586 = vmatpush.bf16.msrb.mxu2 %v9239_v48  ;;  %3599 = vmatpush.bf16.msrb.mxu3 %v9240_v26 }
 0x57b   :  { %3561 = vmatpush.bf16.msra.mxu0 %v9241_v63  ;;  %3574 = vmatpush.bf16.msra.mxu1 %v9242_v38 }
 0x57c   :  { %3587 = vmatpush.bf16.msrb.mxu2 %v9243_v62  ;;  %3600 = vmatpush.bf16.msrb.mxu3 %v9244_v25 }
 0x57d   :  { %3514 = vmatmul.bf16.vlgmr.msrb.gmra.mxu0 %v7985_v60  ;;  %3527 = vmatmul.bf16.vlgmr.msrb.gmra.mxu1 %v7987_v50 }
 0x57e   :  { %3540 = vmatmul.bf16.vlgmr.msra.gmra.mxu2 %v7985_v60  ;;  %3553 = vmatmul.bf16.vlgmr.msra.gmra.mxu3 %v7987_v50 }
 0x57f   :  { %3562 = vmatpush.bf16.msra.mxu0 %v9245_v57  ;;  %3575 = vmatpush.bf16.msra.mxu1 %v9328_v52 }
 0x580   :  { %3588 = vmatpush.bf16.msrb.mxu2 %v9329_v42  ;;  %3601 = vmatpush.bf16.msrb.mxu3 %v9330_v17 }
 0x583   :  { %3563 = vmatpush.bf16.msra.mxu0 %v9331_v9  ;;  %3576 = vmatpush.bf16.msra.mxu1 %v9332_v34 }
 0x584   :  { %3589 = vmatpush.bf16.msrb.mxu2 %v9333_v29  ;;  %3602 = vmatpush.bf16.msrb.mxu3 %v9334_v23 }
 0x587   :  { %3564 = vmatpush.bf16.msra.mxu0 %v9335_v22  ;;  %3577 = vmatpush.bf16.msra.mxu1 %v9254_v31 }
 0x588   :  { %3590 = vmatpush.bf16.msrb.mxu2 %v9336_v28  ;;  %3603 = vmatpush.bf16.msrb.mxu3 %v9337_v53 }
 0x58b   :  { %3565 = vmatpush.bf16.msra.mxu0 %v9338_v21  ;;  %3578 = vmatpush.bf16.msra.mxu1 %v9339_v59 }
 0x58c   :  { %3591 = vmatpush.bf16.msrb.mxu2 %v9340_v6  ;;  %3604 = vmatpush.bf16.msrb.mxu3 %v9341_v46 }
 0x58e   :  { %3566 = vmatmul.bf16.vlgmr.msra.gmra.mxu0 %v7985_v60  ;;  %3579 = vmatmul.bf16.vlgmr.msra.gmra.mxu1 %v7987_v50 }
 0x58f   :  { %3610 = vmatpush.bf16.msrb.mxu0 %v9342_v51  ;;  %3623 = vmatpush.bf16.msrb.mxu1 %v9343_v13  ;;  %v8152_v13 = vld [vmem:[#allocation7 + $0x10] sm:$0xf] }
 0x590   :  { %3636 = vmatpush.bf16.msra.mxu2 %v9344_v47  ;;  %3649 = vmatpush.bf16.msra.mxu3 %v9633_v58  ;;  %v3827_v47 = vrot.slane %v7976_v30, 4 }
 0x591   :  { %3592 = vmatmul.bf16.vlgmr.msrb.gmra.mxu2 %v7985_v60  ;;  %3605 = vmatmul.bf16.vlgmr.msrb.gmra.mxu3 %v7987_v50 }
 0x593   :  { %3611 = vmatpush.bf16.msrb.mxu0 %v9634_v1  ;;  %3624 = vmatpush.bf16.msrb.mxu1 %v9635_v3 }
 0x594   :  { %3637 = vmatpush.bf16.msra.mxu2 %v9636_v55  ;;  %3650 = vmatpush.bf16.msra.mxu3 %v9637_v32 }
 0x597   :  { %3612 = vmatpush.bf16.msrb.mxu0 %v9638_v44  ;;  %3625 = vmatpush.bf16.msrb.mxu1 %v9639_v20 }
 0x598   :  { %3638 = vmatpush.bf16.msra.mxu2 %v9640_v36  ;;  %3651 = vmatpush.bf16.msra.mxu3 %v9641_v37 }
 0x59b   :  { %3613 = vmatpush.bf16.msrb.mxu0 %v9642_v41  ;;  %3626 = vmatpush.bf16.msrb.mxu1 %v9643_v8 }
 0x59c   :  { %3639 = vmatpush.bf16.msra.mxu2 %v9644_v5  ;;  %3652 = vmatpush.bf16.msra.mxu3 %v9645_v40 }
 0x59f   :  { %3614 = vmatpush.bf16.msrb.mxu0 %v9646_v56  ;;  %3627 = vmatpush.bf16.msrb.mxu1 %v9647_v14  ;;  %v9658_v14 = vld [vmem:[#allocation148_spill] sm:$0xff] }
 0x5a0   :  { %3640 = vmatpush.bf16.msra.mxu2 %v9648_v15  ;;  %3653 = vmatpush.bf16.msra.mxu3 %v9649_v16  ;;  %v9659_v15 = vld [vmem:[#allocation149_spill] sm:$0xff]  ;;  %v9660_v16 = vld [vmem:[#allocation150_spill] sm:$0xff] }
 0x5a3   :  { %3615 = vmatpush.bf16.msrb.mxu0 %v9650_v4  ;;  %3628 = vmatpush.bf16.msrb.mxu1 %v9651_v61  ;;  %v9661_v4 = vld [vmem:[#allocation151_spill] sm:$0xff] }
 0x5a4   :  { %3641 = vmatpush.bf16.msra.mxu2 %v9652_v39  ;;  %3654 = vmatpush.bf16.msra.mxu3 %v9653_v35  ;;  %v9662_v61 = vld [vmem:[#allocation15_spill] sm:$0xff]  ;;  %v9663_v39 = vld [vmem:[#allocation16_spill] sm:$0xff] }
 0x5a7   :  { %3616 = vmatpush.bf16.msrb.mxu0 %v9654_v2  ;;  %3629 = vmatpush.bf16.msrb.mxu1 %v9655_v12  ;;  %v9672_v12 = vld [vmem:[#allocation29_spill] sm:$0xff] }
 0x5a8   :  { %3642 = vmatpush.bf16.msra.mxu2 %v9656_v19  ;;  %3655 = vmatpush.bf16.msra.mxu3 %v9657_v18  ;;  %v9664_v18 = vld [vmem:[#allocation21_spill] sm:$0xff]  ;;  %v9671_v19 = vld [vmem:[#allocation20_spill] sm:$0xff] }
 0x5ab   :  { %3617 = vmatpush.bf16.msrb.mxu0 %v9658_v14  ;;  %3630 = vmatpush.bf16.msrb.mxu1 %v9659_v15  ;;  %v9665_v14 = vld [vmem:[#allocation22_spill] sm:$0xff]  ;;  %v9666_v15 = vld [vmem:[#allocation17_spill] sm:$0xff] }
 0x5ac   :  { %3643 = vmatpush.bf16.msra.mxu2 %v9660_v16  ;;  %3656 = vmatpush.bf16.msra.mxu3 %v9661_v4  ;;  %v9667_v16 = vld [vmem:[#allocation18_spill] sm:$0xff]  ;;  %v9668_v4 = vld [vmem:[#allocation25_spill] sm:$0xff] }
 0x5ae   :  { %3618 = vmatmul.bf16.vlgmr.msrb.gmra.mxu0 %v7985_v60  ;;  %3631 = vmatmul.bf16.vlgmr.msrb.gmra.mxu1 %v7987_v50 }
 0x5af   :  { %3859 = vmatpush.bf16.msra.mxu0 %v9662_v61  ;;  %3872 = vmatpush.bf16.msra.mxu1 %v9663_v39  ;;  %v9669_v61 = vld [vmem:[#allocation26_spill] sm:$0xff]  ;;  %v9670_v39 = vld [vmem:[#allocation19_spill] sm:$0xff] }
 0x5b0   :  { %3644 = vmatmul.bf16.vlgmr.msra.gmra.mxu2 %v7985_v60  ;;  %3657 = vmatmul.bf16.vlgmr.msra.gmra.mxu3 %v7987_v50  ;;  %v9673_v60 = vld [vmem:[#allocation30_spill] sm:$0xff]  ;;  %v9674_v50 = vld [vmem:[#allocation23_spill] sm:$0xff] }
 0x5b1   :  { %3885 = vmatpush.bf16.msrb.mxu2 %v9664_v18  ;;  %3898 = vmatpush.bf16.msrb.mxu3 %v9665_v14  ;;  %v9675_v18 = vld [vmem:[#allocation24_spill] sm:$0xff]  ;;  %v9676_v14 = vld [vmem:[#allocation33_spill] sm:$0xff] }
 0x5b3   :  { %3860 = vmatpush.bf16.msra.mxu0 %v9666_v15  ;;  %3873 = vmatpush.bf16.msra.mxu1 %v9667_v16  ;;  %v9677_v15 = vld [vmem:[#allocation34_spill] sm:$0xff]  ;;  %v9678_v16 = vld [vmem:[#allocation27_spill] sm:$0xff] }
 0x5b5   :  { %3886 = vmatpush.bf16.msrb.mxu2 %v9668_v4  ;;  %3899 = vmatpush.bf16.msrb.mxu3 %v9669_v61  ;;  %v9679_v4 = vld [vmem:[#allocation28_spill] sm:$0xff]  ;;  %v9680_v61 = vld [vmem:[#allocation37_spill] sm:$0xff] }
 0x5b7   :  { %3861 = vmatpush.bf16.msra.mxu0 %v9670_v39  ;;  %3874 = vmatpush.bf16.msra.mxu1 %v9671_v19  ;;  %v9681_v39 = vld [vmem:[#allocation38_spill] sm:$0xff]  ;;  %v9682_v19 = vld [vmem:[#allocation31_spill] sm:$0xff] }
 0x5b9   :  { %3887 = vmatpush.bf16.msrb.mxu2 %v9672_v12  ;;  %3900 = vmatpush.bf16.msrb.mxu3 %v9673_v60  ;;  %v9683_v12 = vld [vmem:[#allocation32_spill] sm:$0xff]  ;;  %v9684_v60 = vld [vmem:[#allocation43_spill] sm:$0xff] }
 0x5bb   :  { %3862 = vmatpush.bf16.msra.mxu0 %v9674_v50  ;;  %3875 = vmatpush.bf16.msra.mxu1 %v9675_v18  ;;  %v9685_v50 = vld [vmem:[#allocation44_spill] sm:$0xff]  ;;  %v9686_v18 = vld [vmem:[#allocation35_spill] sm:$0xff] }
 0x5bd   :  { %3888 = vmatpush.bf16.msrb.mxu2 %v9676_v14  ;;  %3901 = vmatpush.bf16.msrb.mxu3 %v9677_v15  ;;  %v9687_v14 = vld [vmem:[#allocation36_spill] sm:$0xff]  ;;  %v9688_v15 = vld [vmem:[#allocation47_spill] sm:$0xff] }
 0x5bf   :  { %3863 = vmatpush.bf16.msra.mxu0 %v9678_v16  ;;  %3876 = vmatpush.bf16.msra.mxu1 %v9679_v4  ;;  %v9689_v16 = vld [vmem:[#allocation48_spill] sm:$0xff]  ;;  %v9690_v4 = vld [vmem:[#allocation39_spill] sm:$0xff] }
 0x5c1   :  { %3889 = vmatpush.bf16.msrb.mxu2 %v9680_v61  ;;  %3902 = vmatpush.bf16.msrb.mxu3 %v9681_v39  ;;  %v9691_v61 = vld [vmem:[#allocation40_spill] sm:$0xff]  ;;  %v9692_v39 = vld [vmem:[#allocation41_spill] sm:$0xff] }
 0x5c3   :  { %3864 = vmatpush.bf16.msra.mxu0 %v9682_v19  ;;  %3877 = vmatpush.bf16.msra.mxu1 %v9683_v12  ;;  %v9693_v19 = vld [vmem:[#allocation42_spill] sm:$0xff]  ;;  %v9694_v12 = vld [vmem:[#allocation51_spill] sm:$0xff] }
 0x5c5   :  { %3890 = vmatpush.bf16.msrb.mxu2 %v9684_v60  ;;  %3903 = vmatpush.bf16.msrb.mxu3 %v9685_v50  ;;  %v9695_v60 = vld [vmem:[#allocation52_spill] sm:$0xff]  ;;  %v9696_v50 = vld [vmem:[#allocation53_spill] sm:$0xff] }
 0x5c7   :  { %3865 = vmatpush.bf16.msra.mxu0 %v9686_v18  ;;  %3878 = vmatpush.bf16.msra.mxu1 %v9687_v14  ;;  %v9697_v18 = vld [vmem:[#allocation54_spill] sm:$0xff]  ;;  %v9698_v14 = vld [vmem:[#allocation45_spill] sm:$0xff] }
 0x5c9   :  { %3891 = vmatpush.bf16.msrb.mxu2 %v9688_v15  ;;  %3904 = vmatpush.bf16.msrb.mxu3 %v9689_v16  ;;  %v9699_v15 = vld [vmem:[#allocation46_spill] sm:$0xff]  ;;  %v9700_v16 = vld [vmem:[#allocation57_spill] sm:$0xff] }
 0x5cb   :  { %3866 = vmatpush.bf16.msra.mxu0 %v9690_v4  ;;  %3879 = vmatpush.bf16.msra.mxu1 %v9691_v61  ;;  %v9701_v4 = vld [vmem:[#allocation58_spill] sm:$0xff]  ;;  %v9702_v61 = vld [vmem:[#allocation49_spill] sm:$0xff] }
 0x5cd   :  { %3892 = vmatpush.bf16.msrb.mxu2 %v9694_v12  ;;  %3905 = vmatpush.bf16.msrb.mxu3 %v9695_v60  ;;  %v9705_v12 = vld [vmem:[#allocation62_spill] sm:$0xff]  ;;  %v9706_v60 = vld [vmem:[#allocation55_spill] sm:$0xff] }
 0x5cf   :  { %3911 = vmatpush.bf16.msrb.mxu0 %v9692_v39  ;;  %3924 = vmatpush.bf16.msrb.mxu1 %v9693_v19  ;;  %v9703_v39 = vld [vmem:[#allocation50_spill] sm:$0xff]  ;;  %v9704_v19 = vld [vmem:[#allocation61_spill] sm:$0xff] }
 0x5d1   :  { %3937 = vmatpush.bf16.msra.mxu2 %v9696_v50  ;;  %3950 = vmatpush.bf16.msra.mxu3 %v9697_v18  ;;  %v9707_v50 = vld [vmem:[#allocation56_spill] sm:$0xff]  ;;  %v9708_v18 = vld [vmem:[#allocation65_spill] sm:$0xff] }
 0x5d3   :  { %3912 = vmatpush.bf16.msrb.mxu0 %v9698_v14  ;;  %3925 = vmatpush.bf16.msrb.mxu1 %v9699_v15  ;;  %v9709_v14 = vld [vmem:[#allocation66_spill] sm:$0xff]  ;;  %v9710_v15 = vld [vmem:[#allocation59_spill] sm:$0xff] }
 0x5d5   :  { %3938 = vmatpush.bf16.msra.mxu2 %v9700_v16  ;;  %3951 = vmatpush.bf16.msra.mxu3 %v9701_v4  ;;  %v9711_v16 = vld [vmem:[#allocation60_spill] sm:$0xff]  ;;  %v9712_v4 = vld [vmem:[#allocation69_spill] sm:$0xff] }
 0x5d7   :  { %3913 = vmatpush.bf16.msrb.mxu0 %v9702_v61  ;;  %3926 = vmatpush.bf16.msrb.mxu1 %v9703_v39  ;;  %v9713_v61 = vld [vmem:[#allocation70_spill] sm:$0xff]  ;;  %v9714_v39 = vld [vmem:[#allocation63_spill] sm:$0xff] }
 0x5d9   :  { %3939 = vmatpush.bf16.msra.mxu2 %v9704_v19  ;;  %3952 = vmatpush.bf16.msra.mxu3 %v9705_v12  ;;  %v9715_v19 = vld [vmem:[#allocation64_spill] sm:$0xff]  ;;  %v9716_v12 = vld [vmem:[#allocation73_spill] sm:$0xff] }
 0x5db   :  { %3914 = vmatpush.bf16.msrb.mxu0 %v9706_v60  ;;  %3927 = vmatpush.bf16.msrb.mxu1 %v9707_v50  ;;  %v9717_v60 = vld [vmem:[#allocation74_spill] sm:$0xff]  ;;  %v9718_v50 = vld [vmem:[#allocation67_spill] sm:$0xff] }
 0x5dd   :  { %3940 = vmatpush.bf16.msra.mxu2 %v9708_v18  ;;  %3953 = vmatpush.bf16.msra.mxu3 %v9709_v14  ;;  %v9719_v18 = vld [vmem:[#allocation68_spill] sm:$0xff]  ;;  %v9720_v14 = vld [vmem:[#allocation75_spill] sm:$0xff] }
 0x5df   :  { %3915 = vmatpush.bf16.msrb.mxu0 %v9710_v15  ;;  %3928 = vmatpush.bf16.msrb.mxu1 %v9711_v16  ;;  %v9721_v15 = vld [vmem:[#allocation76_spill] sm:$0xff]  ;;  %v9722_v16 = vld [vmem:[#allocation71_spill] sm:$0xff] }
 0x5e1   :  { %3941 = vmatpush.bf16.msra.mxu2 %v9712_v4  ;;  %3954 = vmatpush.bf16.msra.mxu3 %v9713_v61  ;;  %v9723_v4 = vld [vmem:[#allocation72_spill] sm:$0xff]  ;;  %v9724_v61 = vld [vmem:[#allocation77_spill] sm:$0xff] }
 0x5e3   :  { %3916 = vmatpush.bf16.msrb.mxu0 %v9714_v39  ;;  %3929 = vmatpush.bf16.msrb.mxu1 %v9715_v19  ;;  %v9725_v39 = vld [vmem:[#allocation78_spill] sm:$0xff] }
 0x5e5   :  { %3942 = vmatpush.bf16.msra.mxu2 %v9716_v12  ;;  %3955 = vmatpush.bf16.msra.mxu3 %v9717_v60 }
 0x5e7   :  { %3917 = vmatpush.bf16.msrb.mxu0 %v9718_v50  ;;  %3930 = vmatpush.bf16.msrb.mxu1 %v9719_v18 }
 0x5e9   :  { %3943 = vmatpush.bf16.msra.mxu2 %v9720_v14  ;;  %3956 = vmatpush.bf16.msra.mxu3 %v9721_v15  ;;  %v9726_v14 = vld [vmem:[#allocation129_spill] sm:$0xff] }
 0x5ea   :  { %v3463_v19 = vpop.f32.mrf.mxu0  ;;  %v3476_v12 = vpop.f32.mrf.mxu1  ;;  %v569_v5 = vrot.slane %v9726_v14, 4 }
 0x5eb   :  { %3918 = vmatpush.bf16.msrb.mxu0 %v9722_v16  ;;  %3931 = vmatpush.bf16.msrb.mxu1 %v9723_v4  ;;  %v3477_v18 = vadd.f32 %v3476_v12, %v3463_v19 }
 0x5ed   :  { %3944 = vmatpush.bf16.msra.mxu2 %v9724_v61  ;;  %3957 = vmatpush.bf16.msra.mxu3 %v9725_v39 }
 0x5f1   :  { %v3489_v2 = vpop.f32.mrf.mxu2  ;;  %v3502_v60 = vpop.f32.mrf.mxu3 }
 0x5f2   :  { %v3503_v35 = vadd.f32 %v3502_v60, %v3489_v2  ;;  %v3465_v50 = vpop.f32.mrf.mxu0  ;;  %v3478_v56 = vpop.f32.mrf.mxu1 }
 0x5f4   :  { %v3669_v40 = vrot.slane %v3503_v35, 4 }
 0x5f6   :  { %v3671_v15 = vsel %vm122_vm1, %v3477_v18, %v3669_v40 }
 0x5f7   :  { %v3675_v16 = vadd.f32 %v3671_v15, %v569_v5  ;;  %v9727_v15 = vld [vmem:[#allocation159_spill] sm:$0xff] }
 0x5f9   :  { %v5856_v8 = vmul.f32 -1.442695, %v3675_v16  ;;  %v3713_v4 = vrot.slane %v3675_v16, 4  ;;  %v3491_v41 = vpop.f32.mrf.mxu2  ;;  %v3504_v61 = vpop.f32.mrf.mxu3 }
 0x5fa   :  { %v3515_v37 = vpop.f32.mrf.mxu0  ;;  %v3528_v39 = vpop.f32.mrf.mxu1  ;;  %v571_v41 = vrot.slane %v9727_v15, 4 }
 0x5fb   :  { %6223 = vpow2.f32 %v5856_v8  ;;  %v5857_v36 = vmul.f32 -1.442695, %v3713_v4  ;;  %v3529_v5 = vadd.f32 %v3528_v39, %v3515_v37 }
 0x5fd   :  { %6225 = vpow2.f32 %v5857_v36 }
 0x601   :  { %v6224_v20 = vpop.eup %6223  ;;  %v3541_v2 = vpop.f32.mrf.mxu2 }
 0x602   :  { %v3554_v60 = vpop.f32.mrf.mxu3  ;;  %v3696_v56 = vadd.f32 1.0, %v6224_v20  ;;  %v3517_v35 = vpop.f32.mrf.mxu0 }
 0x603   :  { %v3555_v12 = vadd.f32 %v3554_v60, %v3541_v2  ;;  %v3530_v19 = vpop.f32.mrf.mxu1  ;;  %v6226_v14 = vpop.eup %6225 }
 0x604   :  { %6227 = vrcp.f32 %v3696_v56  ;;  %v3718_v18 = vadd.f32 1.0, %v6226_v14  ;;  %v3708_v37 = vand.u32 2147483648, %v3696_v56  ;;  %v3706_v14 = vand.u32 2147483647, %v3696_v56 }
 0x605   :  { %v3670_v40 = vrot.slane %v3555_v12, 4  ;;  %vm3702_vm3 = vweird.f32 %v3696_v56 }
 0x606   :  { %6229 = vrcp.f32 %v3718_v18  ;;  %vm3724_vm6 = vweird.f32 %v3718_v18  ;;  %vm3707_vm7 = vcmp.eq.f32.partialorder %v3706_v14, 8.507059e+37 }
 0x607   :  { %v3672_v16 = vsel %vm122_vm1, %v3529_v5, %v3670_v40  ;;  %v3730_v5 = vand.u32 2147483648, %v3718_v18 }
 0x608   :  { %v3676_v8 = vadd.f32 %v3672_v16, %v571_v41  ;;  %v3728_v41 = vand.u32 2147483647, %v3718_v18  ;;  %v3709_v16 = vor.u32 1.1754944e-38, %v3708_v37 }
 0x609   :  { %v3543_v36 = vpop.f32.mrf.mxu2 }
 0x60a   :  { %v3736_v4 = vrot.slane %v3676_v8, 4  ;;  %v3556_v61 = vpop.f32.mrf.mxu3  ;;  %v6228_v50 = vpop.eup %6227  ;;  %vm3729_vm9 = vcmp.eq.f32.partialorder %v3728_v41, 8.507059e+37 }
 0x60b   :  { %v3698_v44 = vmul.f32 %v6228_v50, %v3696_v56  ;;  %v3567_v60 = vpop.f32.mrf.mxu0  ;;  %v3580_v35 = vpop.f32.mrf.mxu1  ;;  %vm3703_vm2 = vweird.f32 %v6228_v50 }
 0x60c   :  { %v5858_v20 = vmul.f32 -1.442695, %v3736_v4  ;;  %v6230_v2 = vpop.eup %6229  ;;  %vm3704_vm5 = vmor %vm3702_vm3, %vm3703_vm2 }
 0x60d   :  { %v3699_v19 = vsub.f32 1.0, %v3698_v44  ;;  %v3720_v32 = vmul.f32 %v6230_v2, %v3718_v18  ;;  %vm3725_vm4 = vweird.f32 %v6230_v2 }
 0x60e   :  { %6231 = vpow2.f32 %v5858_v20  ;;  %vm3726_vm8 = vmor %vm3724_vm6, %vm3725_vm4 }
 0x60f   :  { %6233 = vtanh.f32 %v3676_v8  ;;  %v3721_v39 = vsub.f32 1.0, %v3720_v32  ;;  %v3700_v12 = vmul.f32 %v6228_v50, %v3699_v19  ;;  %v3731_v32 = vor.u32 1.1754944e-38, %v3730_v5 }
 0x611   :  { %v3722_v40 = vmul.f32 %v6230_v2, %v3721_v39  ;;  %v3701_v15 = vadd.f32 %v6228_v50, %v3700_v12 }
 0x613   :  { %v3705_v36 = vsel %vm3704_vm5, %v6228_v50, %v3701_v15  ;;  %v3723_v44 = vadd.f32 %v6230_v2, %v3722_v40  ;;  %v3569_v56 = vpop.f32.mrf.mxu0  ;;  %v3582_v39 = vpop.f32.mrf.mxu1  ;;  %v3581_v50 = vadd.f32 %v3580_v35, %v3567_v60  ;;  %v9728_v15 = vld [vmem:[#allocation163_spill] sm:$0xff] }
 0x614   :  { %v6232_v4 = vpop.eup %6231  ;;  %v3593_v61 = vpop.f32.mrf.mxu2  ;;  %v3710_v19 = vsel %vm3707_vm7, %v3709_v16, %v3705_v36 }
 0x615   :  { %v3606_v20 = vpop.f32.mrf.mxu3  ;;  %v6234_v8 = vpop.eup %6233  ;;  %v3741_v55 = vadd.f32 1.0, %v6232_v4  ;;  %v3727_v1 = vsel %vm3726_vm8, %v6230_v2, %v3723_v44 }
 0x616   :  { %v3607_v3 = vadd.f32 %v3606_v20, %v3593_v61  ;;  %v3758_v12 = vmul.f32 %v6234_v8, %v3710_v19  ;;  %v3732_v58 = vsel %vm3729_vm9, %v3731_v32, %v3727_v1 }
 0x617   :  { %6235 = vrcp.f32 %v3741_v55  ;;  %v3757_v18 = vmul.f32 %v3732_v58, %v7976_v30  ;;  %v3753_v58 = vand.u32 2147483648, %v3741_v55  ;;  %v3751_v60 = vand.u32 2147483647, %v3741_v55  ;;  %v8162_v30 = vld [vmem:[#allocation7 + $0x14] sm:$0xf] }
 0x618   :  { %v3684_v37 = vrot.slane %v3607_v3, 4  ;;  %vm3747_vm11 = vweird.f32 %v3741_v55 }
 0x619   :  { %v8138_v14 = vadd.f32 %v3758_v12, %v3757_v18  ;;  %v3754_v8 = vor.u32 1.1754944e-38, %v3753_v58  ;;  %vm3752_vm13 = vcmp.eq.f32.partialorder %v3751_v60, 8.507059e+37 }
 0x61a   :  { %v3686_v40 = vsel %vm122_vm1, %v3581_v50, %v3684_v37 }
 0x61b   :  { %v3690_v5 = vadd.f32 %v3686_v40, %v9728_v15 }
 0x61c   :  { %v3595_v16 = vpop.f32.mrf.mxu2 }
 0x61d   :  { %v3608_v4 = vpop.f32.mrf.mxu3  ;;  %v6236_v36 = vpop.eup %6235  ;;  %v5859_v61 = vmul.f32 -1.442695, %v3690_v5  ;;  %v3782_v20 = vrot.slane %v3690_v5, 4 }
 0x61e   :  { %v3743_v2 = vmul.f32 %v6236_v36, %v3741_v55  ;;  %vm3748_vm10 = vweird.f32 %v6236_v36 }
 0x61f   :  { %6237 = vpow2.f32 %v5859_v61  ;;  %v5860_v41 = vmul.f32 -1.442695, %v3782_v20  ;;  %vm3749_vm12 = vmor %vm3747_vm11, %vm3748_vm10 }
 0x620   :  { %v3744_v1 = vsub.f32 1.0, %v3743_v2  ;;  %6239 = vtanh.f32 %v8138_v14 }
 0x621   :  { %6241 = vpow2.f32 %v5860_v41 }
 0x622   :  { %v3745_v3 = vmul.f32 %v6236_v36, %v3744_v1 }
 0x624   :  { %v3746_v35 = vadd.f32 %v6236_v36, %v3745_v3 }
 0x625   :  { %v6238_v44 = vpop.eup %6237 }
 0x626   :  { %v6240_v32 = vpop.eup %6239  ;;  %v3750_v19 = vsel %vm3749_vm12, %v6236_v36, %v3746_v35  ;;  %v3765_v56 = vadd.f32 1.0, %v6238_v44 }
 0x627   :  { %v6242_v39 = vpop.eup %6241  ;;  %v3755_v12 = vsel %vm3752_vm13, %v3754_v8, %v3750_v19 }
 0x628   :  { %v8143_v18 = vmul.f32 %v6240_v32, %v3755_v12  ;;  %6243 = vrcp.f32 %v3765_v56  ;;  %v3787_v50 = vadd.f32 1.0, %v6242_v39  ;;  %v9729_v39 = vld [vmem:[#allocation170_spill] sm:$0xff]  ;;  %vm3771_vm4 = vweird.f32 %v3765_v56 }
 0x62a   :  { %3847 = vst [vmem:[#allocation6 + $0x14] sm:$0xf] %v8143_v18  ;;  %6245 = vrcp.f32 %v3787_v50  ;;  %v3799_v3 = vand.u32 2147483648, %v3787_v50  ;;  %v3797_v32 = vand.u32 2147483647, %v3787_v50  ;;  %vm3793_vm15 = vweird.f32 %v3787_v50 }
 0x62b   :  { %v3619_v37 = vpop.f32.mrf.mxu0  ;;  %v3632_v40 = vpop.f32.mrf.mxu1 }
 0x62c   :  { %v3633_v60 = vadd.f32 %v3632_v40, %v3619_v37  ;;  %v3800_v37 = vor.u32 1.1754944e-38, %v3799_v3  ;;  %vm3798_vm3 = vcmp.eq.f32.partialorder %v3797_v32, 8.507059e+37 }
 0x62e   :  { %v6244_v15 = vpop.eup %6243 }
 0x62f   :  { %v3767_v55 = vmul.f32 %v6244_v15, %v3765_v56  ;;  %vm3772_vm2 = vweird.f32 %v6244_v15 }
 0x630   :  { %v6246_v5 = vpop.eup %6245  ;;  %vm3773_vm5 = vmor %vm3771_vm4, %vm3772_vm2 }
 0x631   :  { %v8146_v16 = vld [vmem:[#allocation6 + $0x14] sm:$0xf]  ;;  %v3768_v4 = vsub.f32 1.0, %v3767_v55  ;;  %v3789_v36 = vmul.f32 %v6246_v5, %v3787_v50  ;;  %vm3794_vm14 = vweird.f32 %v6246_v5 }
 0x632   :  { %4711 = vst [vmem:[#allocation1 + $0x21] ss:$2 sm:$0xff] %v8146_v16  ;;  %vm8154_vm0 = vmor %vm3793_vm15, %vm3794_vm14 }
 0x633   :  { %v3645_v61 = vpop.f32.mrf.mxu2  ;;  %v3658_v20 = vpop.f32.mrf.mxu3  ;;  %v3790_v58 = vsub.f32 1.0, %v3789_v36  ;;  %v3769_v44 = vmul.f32 %v6244_v15, %v3768_v4  ;;  %v3777_v4 = vand.u32 2147483648, %v3765_v56 }
 0x634   :  { %v3659_v2 = vadd.f32 %v3658_v20, %v3645_v61  ;;  %v3621_v41 = vpop.f32.mrf.mxu0  ;;  %v3634_v1 = vpop.f32.mrf.mxu1 }
 0x635   :  { %v3791_v8 = vmul.f32 %v6246_v5, %v3790_v58  ;;  %v3770_v40 = vadd.f32 %v6244_v15, %v3769_v44  ;;  %v3775_v1 = vand.u32 2147483647, %v3765_v56 }
 0x636   :  { %v3685_v35 = vrot.slane %v3659_v2, 4 }
 0x637   :  { %v3792_v55 = vadd.f32 %v6246_v5, %v3791_v8  ;;  %vm3776_vm6 = vcmp.eq.f32.partialorder %v3775_v1, 8.507059e+37 }
 0x638   :  { %v3687_v19 = vsel %vm122_vm1, %v3633_v60, %v3685_v35  ;;  %v3778_v35 = vor.u32 1.1754944e-38, %v3777_v4 }
 0x639   :  { %v3691_v12 = vadd.f32 %v3687_v19, %v9729_v39  ;;  %v3796_v36 = vsel %vm8154_vm0, %v6246_v5, %v3792_v55  ;;  %v8160_v41 = vld.sshfl [vmem:[#allocation1 + $0x20] sm:$0xff pattern:$0x75316420]  ;;  %v3774_v5 = vsel %vm3773_vm5, %v6244_v15, %v3770_v40 }
 0x63a   :  { %9732 = vst [vmem:[#allocation84_spill] sm:$0xff] %v8160_v41  ;;  %v3801_v58 = vsel %vm3798_vm3, %v3800_v37, %v3796_v36  ;;  %v3779_v8 = vsel %vm3776_vm6, %v3778_v35, %v3774_v5  ;;  %v9767_v41 = vld [vmem:[#allocation147_spill] sm:$0xff] }
 0x63b   :  { %6247 = vtanh.f32 %v3691_v12  ;;  %v3805_v50 = vrot.slane %v3691_v12, 4  ;;  %v3647_v20 = vpop.f32.mrf.mxu2  ;;  %v3660_v2 = vpop.f32.mrf.mxu3  ;;  %4789 = vst [vmem:[#allocation1 + $0x20] ss:$2 sm:$0xff] %v8152_v13  ;;  %v3829_v60 = vmul.f32 %v3827_v47, %v3801_v58 }
 0x63c   :  { %4791 = vst [vmem:[#allocation1 + $0x21] ss:$2 sm:$0xff] %v8162_v30 }
 0x63d   :  { %v5861_v3 = vmul.f32 -1.442695, %v3805_v50 }
 0x63f   :  { %6249 = vpow2.f32 %v5861_v3 }
 0x641   :  { %v6248_v44 = vpop.eup %6247 }
 0x642   :  { %v3830_v32 = vmul.f32 %v6248_v44, %v3779_v8 }
 0x643   :  { %v8166_v39 = vld.sshfl [vmem:[#allocation1 + $0x20] sm:$0xff pattern:$0x75316420] }
 0x644   :  { %v3831_v19 = vadd.f32 %v3830_v32, %v3829_v60  ;;  %9733 = vst [vmem:[#allocation85_spill] sm:$0xff] %v8166_v39  ;;  %v9764_v39 = vld [vmem:[#allocation144_spill] sm:$0xff] }
 0x645   :  { %v6250_v12 = vpop.eup %6249  ;;  %4865 = vst [vmem:[#allocation1 + $0x20] ss:$2 sm:$0xff] %v8146_v16 }
 0x646   :  { %v3810_v56 = vadd.f32 1.0, %v6250_v12  ;;  %v3842_v55 = vrot.slane %v3831_v19, 4  ;;  %v9737_v12 = vld [vmem:[#allocation81_spill] sm:$0xff] }
 0x648   :  { %6251 = vrcp.f32 %v3810_v56  ;;  %v8171_v47 = vsel %vm122_vm1, %v8138_v14, %v3842_v55  ;;  %v3822_v40 = vand.u32 2147483648, %v3810_v56  ;;  %v3820_v36 = vand.u32 2147483647, %v3810_v56 }
 0x649   :  { %6253 = vtanh.f32 %v3831_v19  ;;  %vm3816_vm8 = vweird.f32 %v3810_v56  ;;  %v9736_v19 = vld [vmem:[#allocation80_spill] sm:$0xff] }
 0x64a   :  { %v3823_v20 = vor.u32 1.1754944e-38, %v3822_v40  ;;  %vm3821_vm10 = vcmp.eq.f32.partialorder %v3820_v36, 8.507059e+37  ;;  %v9745_v40 = vld [vmem:[#allocation116_spill] sm:$0xff]  ;;  %v9747_v36 = vld [vmem:[#allocation118_spill] sm:$0xff] }
 0x64e   :  { %v6252_v15 = vpop.eup %6251 }
 0x64f   :  { %v3812_v61 = vmul.f32 %v6252_v15, %v3810_v56  ;;  %vm3817_vm7 = vweird.f32 %v6252_v15  ;;  %v6254_v1 = vpop.eup %6253 }
 0x650   :  { %vm3818_vm9 = vmor %vm3816_vm8, %vm3817_vm7 }
 0x651   :  { %v3813_v37 = vsub.f32 1.0, %v3812_v61  ;;  %v9742_v61 = vld [vmem:[#allocation113_spill] sm:$0xff] }
 0x653   :  { %v3814_v4 = vmul.f32 %v6252_v15, %v3813_v37  ;;  %v9743_v37 = vld [vmem:[#allocation114_spill] sm:$0xff] }
 0x655   :  { %v3815_v50 = vadd.f32 %v6252_v15, %v3814_v4  ;;  %v9746_v4 = vld [vmem:[#allocation117_spill] sm:$0xff] }
 0x657   :  { %v3819_v2 = vsel %vm3818_vm9, %v6252_v15, %v3815_v50  ;;  %v9748_v50 = vld [vmem:[#allocation119_spill] sm:$0xff] }
 0x658   :  { %v3824_v58 = vsel %vm3821_vm10, %v3823_v20, %v3819_v2  ;;  %v9749_v20 = vld [vmem:[#allocation120_spill] sm:$0xff]  ;;  %v9750_v2 = vld [vmem:[#allocation121_spill] sm:$0xff] }
 0x659   :  { %v3833_v3 = vmul.f32 %v6254_v1, %v3824_v58  ;;  %v9751_v1 = vld [vmem:[#allocation122_spill] sm:$0xff]  ;;  %v9752_v58 = vld [vmem:[#allocation123_spill] sm:$0xff] }
 0x65b   :  { %v3836_v60 = vrot.slane %v3833_v3, 4  ;;  %3849 = vst [vmem:[#allocation7 + $0x8] sm:$0xf] %v3833_v3  ;;  %v9753_v3 = vld [vmem:[#allocation124_spill] sm:$0xff] }
 0x65d   :  { %v3837_v14 = vsel %vm122_vm1, %v8143_v18, %v3836_v60  ;;  %v9754_v60 = vld [vmem:[#allocation125_spill] sm:$0xff] }
 0x65e   :  { %3852 = vst [vmem:[#allocation1] ss:$2 sm:$0xff] %v3837_v14  ;;  %v9755_v14 = vld [vmem:[#allocation126_spill] sm:$0xff] }
 0x662   :  { %v8175_v5 = vld [vmem:[#allocation7 + $0x8] sm:$0xf] }
 0x663   :  { %9734 = vst [vmem:[#allocation86_spill] sm:$0xff] %v8175_v5 }
 0x664   :  { %4785 = vst [vmem:[#allocation1 + $0x10] ss:$2 sm:$0xff] %v8175_v5  ;;  %v9765_v5 = vld [vmem:[#allocation145_spill] sm:$0xff] }
 0x665   :  { %v3853_v35 = vld.sshfl [vmem:[#allocation1] sm:$0xff pattern:$0x75316420]  ;;  %v3854_v44 = vld.sshfl [vmem:[#allocation1 + $0x8] sm:$0xff pattern:$0x75316420] }
 0x666   :  { %v8178_v8 = vpack.c.bf16 %v3853_v35, %v3853_v35  ;;  %v8180_v32 = vpack.c.bf16 %v3854_v44, %v3854_v44  ;;  %v9756_v35 = vld [vmem:[#allocation130_spill] sm:$0xff]  ;;  %v9757_v44 = vld [vmem:[#allocation131_spill] sm:$0xff] }
 0x668   :  { %3867 = vmatmul.bf16.vlgmr.msra.gmra.mxu0 %v8178_v8  ;;  %3880 = vmatmul.bf16.vlgmr.msra.gmra.mxu1 %v8180_v32 }
 0x669   :  { %3893 = vmatmul.bf16.vlgmr.msrb.gmra.mxu2 %v8178_v8  ;;  %3906 = vmatmul.bf16.vlgmr.msrb.gmra.mxu3 %v8180_v32 }
 0x66a   :  { %3963 = vmatpush.bf16.msra.mxu0 %v9229_v54  ;;  %3976 = vmatpush.bf16.msra.mxu1 %v9230_v11 }
 0x66b   :  { %v8188_v18 = vld.sshfl [vmem:[#allocation1 + $0x10] sm:$0xff pattern:$0x75316420]  ;;  %3989 = vmatpush.bf16.msrb.mxu2 %v9231_v0  ;;  %4002 = vmatpush.bf16.msrb.mxu3 %v9232_v45 }
 0x66c   :  { %9735 = vst [vmem:[#allocation87_spill] sm:$0xff] %v8188_v18  ;;  %v9766_v18 = vld [vmem:[#allocation146_spill] sm:$0xff] }
 0x66d   :  { %4861 = vst [vmem:[#allocation1 + $0x10] ss:$2 sm:$0xff] %v9736_v19  ;;  %v9762_v19 = vld [vmem:[#allocation140_spill] sm:$0xff] }
 0x66e   :  { %4863 = vst [vmem:[#allocation1 + $0x11] ss:$2 sm:$0xff] %v9737_v12  ;;  %3964 = vmatpush.bf16.msra.mxu0 %v9233_v24  ;;  %3977 = vmatpush.bf16.msra.mxu1 %v9234_v27 }
 0x66f   :  { %3990 = vmatpush.bf16.msrb.mxu2 %v9235_v49  ;;  %4003 = vmatpush.bf16.msrb.mxu3 %v9236_v10 }
 0x672   :  { %3965 = vmatpush.bf16.msra.mxu0 %v9237_v43  ;;  %3978 = vmatpush.bf16.msra.mxu1 %v9238_v33 }
 0x673   :  { %3991 = vmatpush.bf16.msrb.mxu2 %v9239_v48  ;;  %4004 = vmatpush.bf16.msrb.mxu3 %v9240_v26 }
 0x675   :  { %v8202_v56 = vld.sshfl [vmem:[#allocation1 + $0x10] sm:$0xff pattern:$0x75316420] }
 0x676   :  { %9738 = vst [vmem:[#allocation88_spill] sm:$0xff] %v8202_v56  ;;  %3966 = vmatpush.bf16.msra.mxu0 %v9241_v63  ;;  %3979 = vmatpush.bf16.msra.mxu1 %v9242_v38  ;;  %v9763_v56 = vld [vmem:[#allocation141_spill] sm:$0xff] }
 0x677   :  { %4937 = vst [vmem:[#allocation1 + $0x10] ss:$2 sm:$0xff] %v7980_v7  ;;  %3992 = vmatpush.bf16.msrb.mxu2 %v9243_v62  ;;  %4005 = vmatpush.bf16.msrb.mxu3 %v9244_v25  ;;  %v9760_v7 = vld [vmem:[#allocation137_spill] sm:$0xff] }
 0x678   :  { %4939 = vst [vmem:[#allocation1 + $0x11] ss:$2 sm:$0xff] %v8152_v13  ;;  %3919 = vmatmul.bf16.vlgmr.msrb.gmra.mxu0 %v8178_v8  ;;  %3932 = vmatmul.bf16.vlgmr.msrb.gmra.mxu1 %v8180_v32 }
 0x679   :  { %3945 = vmatmul.bf16.vlgmr.msra.gmra.mxu2 %v8178_v8  ;;  %3958 = vmatmul.bf16.vlgmr.msra.gmra.mxu3 %v8180_v32 }
 0x67a   :  { %3967 = vmatpush.bf16.msra.mxu0 %v9245_v57  ;;  %3980 = vmatpush.bf16.msra.mxu1 %v9328_v52 }
 0x67b   :  { %3993 = vmatpush.bf16.msrb.mxu2 %v9329_v42  ;;  %4006 = vmatpush.bf16.msrb.mxu3 %v9330_v17 }
 0x67e   :  { %3968 = vmatpush.bf16.msra.mxu0 %v9331_v9  ;;  %3981 = vmatpush.bf16.msra.mxu1 %v9332_v34 }
 0x67f   :  { %v8218_v55 = vld.sshfl [vmem:[#allocation1 + $0x10] sm:$0xff pattern:$0x75316420]  ;;  %3994 = vmatpush.bf16.msrb.mxu2 %v9333_v29  ;;  %4007 = vmatpush.bf16.msrb.mxu3 %v9334_v23 }
 0x680   :  { %9739 = vst [vmem:[#allocation89_spill] sm:$0xff] %v8218_v55  ;;  %v9761_v55 = vld [vmem:[#allocation138_spill] sm:$0xff] }
 0x681   :  { %5013 = vst [vmem:[#allocation1 + $0x10] ss:$2 sm:$0xff] %v9737_v12  ;;  %v9758_v12 = vld [vmem:[#allocation132_spill] sm:$0xff] }
 0x682   :  { %5015 = vst [vmem:[#allocation1 + $0x11] ss:$2 sm:$0xff] %v8146_v16  ;;  %3969 = vmatpush.bf16.msra.mxu0 %v9335_v22  ;;  %3982 = vmatpush.bf16.msra.mxu1 %v9254_v31  ;;  %v9741_v16 = vld [vmem:[#allocation112_spill] sm:$0xff] }
 0x683   :  { %3995 = vmatpush.bf16.msrb.mxu2 %v9336_v28  ;;  %4008 = vmatpush.bf16.msrb.mxu3 %v9337_v53 }
 0x686   :  { %3970 = vmatpush.bf16.msra.mxu0 %v9338_v21  ;;  %3983 = vmatpush.bf16.msra.mxu1 %v9339_v59 }
 0x687   :  { %3996 = vmatpush.bf16.msrb.mxu2 %v9340_v6  ;;  %4009 = vmatpush.bf16.msrb.mxu3 %v9341_v46 }
 0x689   :  { %v8230_v15 = vld.sshfl [vmem:[#allocation1 + $0x10] sm:$0xff pattern:$0x75316420]  ;;  %3971 = vmatmul.bf16.vlgmr.msra.gmra.mxu0 %v8178_v8  ;;  %3984 = vmatmul.bf16.vlgmr.msra.gmra.mxu1 %v8180_v32 }
 0x68a   :  { %9740 = vst [vmem:[#allocation90_spill] sm:$0xff] %v8230_v15  ;;  %4015 = vmatpush.bf16.msrb.mxu0 %v9342_v51  ;;  %4028 = vmatpush.bf16.msrb.mxu1 %v9741_v16  ;;  %v9759_v15 = vld [vmem:[#allocation133_spill] sm:$0xff] }
 0x68b   :  { %5089 = vst [vmem:[#allocation1 + $0x10] ss:$2 sm:$0xff] %v8152_v13  ;;  %4041 = vmatpush.bf16.msra.mxu2 %v9742_v61  ;;  %4054 = vmatpush.bf16.msra.mxu3 %v9743_v37  ;;  %v9744_v13 = vld [vmem:[#allocation115_spill] sm:$0xff] }
 0x68c   :  { %5091 = vst [vmem:[#allocation1 + $0x11] ss:$2 sm:$0xff] %v8162_v30  ;;  %3997 = vmatmul.bf16.vlgmr.msrb.gmra.mxu2 %v8178_v8  ;;  %4010 = vmatmul.bf16.vlgmr.msrb.gmra.mxu3 %v8180_v32 }
 0x68e   :  { %4016 = vmatpush.bf16.msrb.mxu0 %v9744_v13  ;;  %4029 = vmatpush.bf16.msrb.mxu1 %v9745_v40 }
 0x68f   :  { %4042 = vmatpush.bf16.msra.mxu2 %v9746_v4  ;;  %4055 = vmatpush.bf16.msra.mxu3 %v9747_v36 }
 0x692   :  { %4017 = vmatpush.bf16.msrb.mxu0 %v9748_v50  ;;  %4030 = vmatpush.bf16.msrb.mxu1 %v9749_v20 }
 0x693   :  { %4043 = vmatpush.bf16.msra.mxu2 %v9750_v2  ;;  %4056 = vmatpush.bf16.msra.mxu3 %v9751_v1 }
 0x696   :  { %4018 = vmatpush.bf16.msrb.mxu0 %v9752_v58  ;;  %4031 = vmatpush.bf16.msrb.mxu1 %v9753_v3 }
 0x697   :  { %4044 = vmatpush.bf16.msra.mxu2 %v9754_v60  ;;  %4057 = vmatpush.bf16.msra.mxu3 %v9755_v14 }
 0x69a   :  { %4019 = vmatpush.bf16.msrb.mxu0 %v9756_v35  ;;  %4032 = vmatpush.bf16.msrb.mxu1 %v9757_v44  ;;  %v9768_v44 = vld [vmem:[#allocation148_spill] sm:$0xff] }
 0x69b   :  { %4045 = vmatpush.bf16.msra.mxu2 %v9758_v12  ;;  %4058 = vmatpush.bf16.msra.mxu3 %v9759_v15  ;;  %v9769_v12 = vld [vmem:[#allocation149_spill] sm:$0xff]  ;;  %v9770_v15 = vld [vmem:[#allocation150_spill] sm:$0xff] }
 0x69e   :  { %4020 = vmatpush.bf16.msrb.mxu0 %v9760_v7  ;;  %4033 = vmatpush.bf16.msrb.mxu1 %v9761_v55  ;;  %v9771_v7 = vld [vmem:[#allocation151_spill] sm:$0xff] }
 0x69f   :  { %4046 = vmatpush.bf16.msra.mxu2 %v9762_v19  ;;  %4059 = vmatpush.bf16.msra.mxu3 %v9763_v56  ;;  %v9772_v55 = vld [vmem:[#allocation15_spill] sm:$0xff]  ;;  %v9773_v19 = vld [vmem:[#allocation16_spill] sm:$0xff] }
 0x6a2   :  { %4021 = vmatpush.bf16.msrb.mxu0 %v9764_v39  ;;  %4034 = vmatpush.bf16.msrb.mxu1 %v9765_v5  ;;  %v9782_v5 = vld [vmem:[#allocation29_spill] sm:$0xff] }
 0x6a3   :  { %4047 = vmatpush.bf16.msra.mxu2 %v9766_v18  ;;  %4060 = vmatpush.bf16.msra.mxu3 %v9767_v41  ;;  %v9774_v41 = vld [vmem:[#allocation21_spill] sm:$0xff]  ;;  %v9781_v18 = vld [vmem:[#allocation20_spill] sm:$0xff] }
 0x6a6   :  { %4022 = vmatpush.bf16.msrb.mxu0 %v9768_v44  ;;  %4035 = vmatpush.bf16.msrb.mxu1 %v9769_v12  ;;  %v9775_v44 = vld [vmem:[#allocation22_spill] sm:$0xff]  ;;  %v9776_v12 = vld [vmem:[#allocation17_spill] sm:$0xff] }
 0x6a7   :  { %4048 = vmatpush.bf16.msra.mxu2 %v9770_v15  ;;  %4061 = vmatpush.bf16.msra.mxu3 %v9771_v7  ;;  %v9777_v15 = vld [vmem:[#allocation18_spill] sm:$0xff]  ;;  %v9778_v7 = vld [vmem:[#allocation25_spill] sm:$0xff] }
 0x6a9   :  { %4023 = vmatmul.bf16.vlgmr.msrb.gmra.mxu0 %v8178_v8  ;;  %4036 = vmatmul.bf16.vlgmr.msrb.gmra.mxu1 %v8180_v32 }
 0x6aa   :  { %4264 = vmatpush.bf16.msra.mxu0 %v9772_v55  ;;  %4277 = vmatpush.bf16.msra.mxu1 %v9773_v19  ;;  %v9779_v55 = vld [vmem:[#allocation26_spill] sm:$0xff]  ;;  %v9780_v19 = vld [vmem:[#allocation19_spill] sm:$0xff] }
 0x6ab   :  { %4049 = vmatmul.bf16.vlgmr.msra.gmra.mxu2 %v8178_v8  ;;  %4062 = vmatmul.bf16.vlgmr.msra.gmra.mxu3 %v8180_v32  ;;  %v9783_v8 = vld [vmem:[#allocation30_spill] sm:$0xff]  ;;  %v9784_v32 = vld [vmem:[#allocation23_spill] sm:$0xff] }
 0x6ac   :  { %4290 = vmatpush.bf16.msrb.mxu2 %v9774_v41  ;;  %4303 = vmatpush.bf16.msrb.mxu3 %v9775_v44  ;;  %v9785_v41 = vld [vmem:[#allocation24_spill] sm:$0xff]  ;;  %v9786_v44 = vld [vmem:[#allocation33_spill] sm:$0xff] }
 0x6ae   :  { %4265 = vmatpush.bf16.msra.mxu0 %v9776_v12  ;;  %4278 = vmatpush.bf16.msra.mxu1 %v9777_v15  ;;  %v9787_v12 = vld [vmem:[#allocation34_spill] sm:$0xff]  ;;  %v9788_v15 = vld [vmem:[#allocation27_spill] sm:$0xff] }
 0x6b0   :  { %4291 = vmatpush.bf16.msrb.mxu2 %v9778_v7  ;;  %4304 = vmatpush.bf16.msrb.mxu3 %v9779_v55  ;;  %v9789_v7 = vld [vmem:[#allocation28_spill] sm:$0xff]  ;;  %v9790_v55 = vld [vmem:[#allocation37_spill] sm:$0xff] }
 0x6b2   :  { %4266 = vmatpush.bf16.msra.mxu0 %v9780_v19  ;;  %4279 = vmatpush.bf16.msra.mxu1 %v9781_v18  ;;  %v9791_v19 = vld [vmem:[#allocation38_spill] sm:$0xff]  ;;  %v9792_v18 = vld [vmem:[#allocation31_spill] sm:$0xff] }
 0x6b4   :  { %4292 = vmatpush.bf16.msrb.mxu2 %v9782_v5  ;;  %4305 = vmatpush.bf16.msrb.mxu3 %v9783_v8  ;;  %v9793_v5 = vld [vmem:[#allocation32_spill] sm:$0xff]  ;;  %v9794_v8 = vld [vmem:[#allocation43_spill] sm:$0xff] }
 0x6b6   :  { %4267 = vmatpush.bf16.msra.mxu0 %v9784_v32  ;;  %4280 = vmatpush.bf16.msra.mxu1 %v9785_v41  ;;  %v9795_v32 = vld [vmem:[#allocation44_spill] sm:$0xff]  ;;  %v9796_v41 = vld [vmem:[#allocation35_spill] sm:$0xff] }
 0x6b8   :  { %4293 = vmatpush.bf16.msrb.mxu2 %v9786_v44  ;;  %4306 = vmatpush.bf16.msrb.mxu3 %v9787_v12  ;;  %v9797_v44 = vld [vmem:[#allocation36_spill] sm:$0xff]  ;;  %v9798_v12 = vld [vmem:[#allocation47_spill] sm:$0xff] }
 0x6ba   :  { %4268 = vmatpush.bf16.msra.mxu0 %v9788_v15  ;;  %4281 = vmatpush.bf16.msra.mxu1 %v9789_v7  ;;  %v9799_v15 = vld [vmem:[#allocation48_spill] sm:$0xff]  ;;  %v9800_v7 = vld [vmem:[#allocation39_spill] sm:$0xff] }
 0x6bc   :  { %4294 = vmatpush.bf16.msrb.mxu2 %v9790_v55  ;;  %4307 = vmatpush.bf16.msrb.mxu3 %v9791_v19  ;;  %v9801_v55 = vld [vmem:[#allocation40_spill] sm:$0xff]  ;;  %v9802_v19 = vld [vmem:[#allocation41_spill] sm:$0xff] }
 0x6be   :  { %4269 = vmatpush.bf16.msra.mxu0 %v9792_v18  ;;  %4282 = vmatpush.bf16.msra.mxu1 %v9793_v5  ;;  %v9803_v18 = vld [vmem:[#allocation42_spill] sm:$0xff]  ;;  %v9804_v5 = vld [vmem:[#allocation51_spill] sm:$0xff] }
 0x6c0   :  { %4295 = vmatpush.bf16.msrb.mxu2 %v9794_v8  ;;  %4308 = vmatpush.bf16.msrb.mxu3 %v9795_v32  ;;  %v9805_v8 = vld [vmem:[#allocation52_spill] sm:$0xff]  ;;  %v9806_v32 = vld [vmem:[#allocation53_spill] sm:$0xff] }
 0x6c2   :  { %4270 = vmatpush.bf16.msra.mxu0 %v9796_v41  ;;  %4283 = vmatpush.bf16.msra.mxu1 %v9797_v44  ;;  %v9807_v41 = vld [vmem:[#allocation54_spill] sm:$0xff]  ;;  %v9808_v44 = vld [vmem:[#allocation45_spill] sm:$0xff] }
 0x6c4   :  { %4296 = vmatpush.bf16.msrb.mxu2 %v9798_v12  ;;  %4309 = vmatpush.bf16.msrb.mxu3 %v9799_v15  ;;  %v9809_v12 = vld [vmem:[#allocation46_spill] sm:$0xff]  ;;  %v9810_v15 = vld [vmem:[#allocation57_spill] sm:$0xff] }
 0x6c6   :  { %4271 = vmatpush.bf16.msra.mxu0 %v9800_v7  ;;  %4284 = vmatpush.bf16.msra.mxu1 %v9801_v55  ;;  %v9811_v7 = vld [vmem:[#allocation58_spill] sm:$0xff]  ;;  %v9812_v55 = vld [vmem:[#allocation49_spill] sm:$0xff] }
 0x6c8   :  { %4297 = vmatpush.bf16.msrb.mxu2 %v9804_v5  ;;  %4310 = vmatpush.bf16.msrb.mxu3 %v9805_v8  ;;  %v9815_v5 = vld [vmem:[#allocation62_spill] sm:$0xff]  ;;  %v9816_v8 = vld [vmem:[#allocation55_spill] sm:$0xff] }
 0x6ca   :  { %4316 = vmatpush.bf16.msrb.mxu0 %v9802_v19  ;;  %4329 = vmatpush.bf16.msrb.mxu1 %v9803_v18  ;;  %v9813_v19 = vld [vmem:[#allocation50_spill] sm:$0xff]  ;;  %v9814_v18 = vld [vmem:[#allocation61_spill] sm:$0xff] }
 0x6cc   :  { %4342 = vmatpush.bf16.msra.mxu2 %v9806_v32  ;;  %4355 = vmatpush.bf16.msra.mxu3 %v9807_v41  ;;  %v9817_v32 = vld [vmem:[#allocation56_spill] sm:$0xff]  ;;  %v9818_v41 = vld [vmem:[#allocation65_spill] sm:$0xff] }
 0x6ce   :  { %4317 = vmatpush.bf16.msrb.mxu0 %v9808_v44  ;;  %4330 = vmatpush.bf16.msrb.mxu1 %v9809_v12  ;;  %v9819_v44 = vld [vmem:[#allocation66_spill] sm:$0xff]  ;;  %v9820_v12 = vld [vmem:[#allocation59_spill] sm:$0xff] }
 0x6d0   :  { %4343 = vmatpush.bf16.msra.mxu2 %v9810_v15  ;;  %4356 = vmatpush.bf16.msra.mxu3 %v9811_v7  ;;  %v9821_v15 = vld [vmem:[#allocation60_spill] sm:$0xff]  ;;  %v9822_v7 = vld [vmem:[#allocation69_spill] sm:$0xff] }
 0x6d2   :  { %4318 = vmatpush.bf16.msrb.mxu0 %v9812_v55  ;;  %4331 = vmatpush.bf16.msrb.mxu1 %v9813_v19  ;;  %v9823_v55 = vld [vmem:[#allocation70_spill] sm:$0xff]  ;;  %v9824_v19 = vld [vmem:[#allocation63_spill] sm:$0xff] }
 0x6d4   :  { %4344 = vmatpush.bf16.msra.mxu2 %v9814_v18  ;;  %4357 = vmatpush.bf16.msra.mxu3 %v9815_v5  ;;  %v9825_v18 = vld [vmem:[#allocation64_spill] sm:$0xff]  ;;  %v9826_v5 = vld [vmem:[#allocation73_spill] sm:$0xff] }
 0x6d6   :  { %4319 = vmatpush.bf16.msrb.mxu0 %v9816_v8  ;;  %4332 = vmatpush.bf16.msrb.mxu1 %v9817_v32  ;;  %v9827_v8 = vld [vmem:[#allocation74_spill] sm:$0xff]  ;;  %v9828_v32 = vld [vmem:[#allocation67_spill] sm:$0xff] }
 0x6d8   :  { %4345 = vmatpush.bf16.msra.mxu2 %v9818_v41  ;;  %4358 = vmatpush.bf16.msra.mxu3 %v9819_v44  ;;  %v9829_v41 = vld [vmem:[#allocation68_spill] sm:$0xff]  ;;  %v9830_v44 = vld [vmem:[#allocation75_spill] sm:$0xff] }
 0x6da   :  { %4320 = vmatpush.bf16.msrb.mxu0 %v9820_v12  ;;  %4333 = vmatpush.bf16.msrb.mxu1 %v9821_v15  ;;  %v9831_v12 = vld [vmem:[#allocation76_spill] sm:$0xff]  ;;  %v9832_v15 = vld [vmem:[#allocation71_spill] sm:$0xff] }
 0x6dc   :  { %4346 = vmatpush.bf16.msra.mxu2 %v9822_v7  ;;  %4359 = vmatpush.bf16.msra.mxu3 %v9823_v55  ;;  %v9833_v7 = vld [vmem:[#allocation72_spill] sm:$0xff]  ;;  %v9834_v55 = vld [vmem:[#allocation77_spill] sm:$0xff] }
 0x6de   :  { %4321 = vmatpush.bf16.msrb.mxu0 %v9824_v19  ;;  %4334 = vmatpush.bf16.msrb.mxu1 %v9825_v18  ;;  %v9835_v19 = vld [vmem:[#allocation78_spill] sm:$0xff] }
 0x6e0   :  { %4347 = vmatpush.bf16.msra.mxu2 %v9826_v5  ;;  %4360 = vmatpush.bf16.msra.mxu3 %v9827_v8 }
 0x6e2   :  { %4322 = vmatpush.bf16.msrb.mxu0 %v9828_v32  ;;  %4335 = vmatpush.bf16.msrb.mxu1 %v9829_v41 }
 0x6e4   :  { %4348 = vmatpush.bf16.msra.mxu2 %v9830_v44  ;;  %4361 = vmatpush.bf16.msra.mxu3 %v9831_v12  ;;  %v9836_v44 = vld [vmem:[#allocation135_spill] sm:$0xff] }
 0x6e5   :  { %v3868_v18 = vpop.f32.mrf.mxu0  ;;  %v3881_v5 = vpop.f32.mrf.mxu1  ;;  %v9837_v60 = vrot.slane %v9836_v44, 4  ;;  %v9838_v12 = vld [vmem:[#allocation139_spill] sm:$0xff] }
 0x6e6   :  { %4323 = vmatpush.bf16.msrb.mxu0 %v9832_v15  ;;  %4336 = vmatpush.bf16.msrb.mxu1 %v9833_v7  ;;  %v3882_v41 = vadd.f32 %v3881_v5, %v3868_v18 }
 0x6e7   :  { %v576_v15 = vsel %vm122_vm1, %v9838_v12, %v9837_v60 }
 0x6e8   :  { %4349 = vmatpush.bf16.msra.mxu2 %v9834_v55  ;;  %4362 = vmatpush.bf16.msra.mxu3 %v9835_v19 }
 0x6ec   :  { %v3894_v39 = vpop.f32.mrf.mxu2  ;;  %v3907_v8 = vpop.f32.mrf.mxu3 }
 0x6ed   :  { %v3908_v56 = vadd.f32 %v3907_v8, %v3894_v39  ;;  %v3870_v32 = vpop.f32.mrf.mxu0  ;;  %v3883_v35 = vpop.f32.mrf.mxu1 }
 0x6ef   :  { %v4074_v14 = vrot.slane %v3908_v56, 4 }
 0x6f1   :  { %v4076_v7 = vsel %vm122_vm1, %v3882_v41, %v4074_v14 }
 0x6f2   :  { %v4080_v3 = vadd.f32 %v4076_v7, %v576_v15 }
 0x6f4   :  { %v5862_v55 = vmul.f32 -1.442695, %v4080_v3  ;;  %v4118_v58 = vrot.slane %v4080_v3, 4  ;;  %v3896_v19 = vpop.f32.mrf.mxu2  ;;  %v3909_v1 = vpop.f32.mrf.mxu3  ;;  %v9839_v3 = vld [vmem:[#allocation162_spill] sm:$0xff] }
 0x6f5   :  { %v3920_v2 = vpop.f32.mrf.mxu0  ;;  %v3933_v20 = vpop.f32.mrf.mxu1  ;;  %v9840_v15 = vrot.slane %v9839_v3, 4  ;;  %v9841_v1 = vld [vmem:[#allocation164_spill] sm:$0xff] }
 0x6f6   :  { %6255 = vpow2.f32 %v5862_v55  ;;  %v5863_v39 = vmul.f32 -1.442695, %v4118_v58  ;;  %v3934_v41 = vadd.f32 %v3933_v20, %v3920_v2 }
 0x6f7   :  { %v577_v7 = vsel %vm122_vm1, %v9841_v1, %v9840_v15 }
 0x6f8   :  { %6257 = vpow2.f32 %v5863_v39 }
 0x6fc   :  { %v6256_v35 = vpop.eup %6255  ;;  %v3946_v18 = vpop.f32.mrf.mxu2 }
 0x6fd   :  { %v3959_v56 = vpop.f32.mrf.mxu3  ;;  %v4101_v5 = vadd.f32 1.0, %v6256_v35  ;;  %v3922_v32 = vpop.f32.mrf.mxu0 }
 0x6fe   :  { %v3960_v8 = vadd.f32 %v3959_v56, %v3946_v18  ;;  %v3935_v44 = vpop.f32.mrf.mxu1  ;;  %v6258_v60 = vpop.eup %6257 }
 0x6ff   :  { %6259 = vrcp.f32 %v4101_v5  ;;  %v4123_v14 = vadd.f32 1.0, %v6258_v60  ;;  %vm4107_vm12 = vweird.f32 %v4101_v5  ;;  %v4111_v1 = vand.u32 2147483647, %v4101_v5 }
 0x700   :  { %v4075_v12 = vrot.slane %v3960_v8, 4 }
 0x701   :  { %6261 = vrcp.f32 %v4123_v14  ;;  %v4135_v15 = vand.u32 2147483648, %v4123_v14  ;;  %vm4129_vm15 = vweird.f32 %v4123_v14  ;;  %vm4112_vm2 = vcmp.eq.f32.partialorder %v4111_v1, 8.507059e+37 }
 0x702   :  { %v4077_v58 = vsel %vm122_vm1, %v3934_v41, %v4075_v12  ;;  %v4113_v41 = vand.u32 2147483648, %v4101_v5 }
 0x703   :  { %v4081_v55 = vadd.f32 %v4077_v58, %v577_v7  ;;  %v4133_v58 = vand.u32 2147483647, %v4123_v14 }
 0x704   :  { %v3948_v39 = vpop.f32.mrf.mxu2 }
 0x705   :  { %v4141_v19 = vrot.slane %v4081_v55, 4  ;;  %v3961_v35 = vpop.f32.mrf.mxu3  ;;  %v6260_v18 = vpop.eup %6259  ;;  %vm4134_vm3 = vcmp.eq.f32.partialorder %v4133_v58, 8.507059e+37 }
 0x706   :  { %v4103_v56 = vmul.f32 %v6260_v18, %v4101_v5  ;;  %v3972_v50 = vpop.f32.mrf.mxu0  ;;  %v3985_v60 = vpop.f32.mrf.mxu1  ;;  %vm4108_vm11 = vweird.f32 %v6260_v18  ;;  %v4114_v5 = vor.u32 1.1754944e-38, %v4113_v41 }
 0x707   :  { %v5864_v32 = vmul.f32 -1.442695, %v4141_v19  ;;  %v6262_v44 = vpop.eup %6261  ;;  %vm8352_vm14 = vmor %vm4107_vm12, %vm4108_vm11  ;;  %v3986_v39 = vadd.f32 %v3985_v60, %v3972_v50 }
 0x708   :  { %v4104_v20 = vsub.f32 1.0, %v4103_v56  ;;  %v4125_v2 = vmul.f32 %v6262_v44, %v4123_v14  ;;  %vm4130_vm13 = vweird.f32 %v6262_v44 }
 0x709   :  { %6263 = vpow2.f32 %v5864_v32  ;;  %vm4131_vm0 = vmor %vm4129_vm15, %vm4130_vm13 }
 0x70a   :  { %v4126_v8 = vsub.f32 1.0, %v4125_v2  ;;  %v4105_v3 = vmul.f32 %v6260_v18, %v4104_v20  ;;  %6265 = vtanh.f32 %v4081_v55  ;;  %v4136_v2 = vor.u32 1.1754944e-38, %v4135_v15 }
 0x70c   :  { %v4127_v12 = vmul.f32 %v6262_v44, %v4126_v8  ;;  %v4106_v7 = vadd.f32 %v6260_v18, %v4105_v3 }
 0x70e   :  { %v4110_v35 = vsel %vm8352_vm14, %v6260_v18, %v4106_v7  ;;  %v4128_v56 = vadd.f32 %v6262_v44, %v4127_v12  ;;  %v3974_v3 = vpop.f32.mrf.mxu0  ;;  %v3987_v4 = vpop.f32.mrf.mxu1  ;;  %v9844_v7 = vld [vmem:[#allocation157_spill] sm:$0xff] }
 0x70f   :  { %v6264_v19 = vpop.eup %6263  ;;  %v3998_v32 = vpop.f32.mrf.mxu2  ;;  %v4115_v13 = vsel %vm4112_vm2, %v4114_v5, %v4110_v35  ;;  %v549_v37 = vrot.slane %v9844_v7, 4 }
 0x710   :  { %v4011_v20 = vpop.f32.mrf.mxu3  ;;  %v4146_v8 = vadd.f32 1.0, %v6264_v19  ;;  %v4132_v40 = vsel %vm4131_vm0, %v6262_v44, %v4128_v56  ;;  %v6266_v12 = vpop.eup %6265 }
 0x711   :  { %v4012_v36 = vadd.f32 %v4011_v20, %v3998_v32  ;;  %v4137_v55 = vsel %vm4134_vm3, %v4136_v2, %v4132_v40  ;;  %v4163_v61 = vmul.f32 %v6266_v12, %v4115_v13 }
 0x712   :  { %6267 = vrcp.f32 %v4146_v8  ;;  %v4162_v14 = vmul.f32 %v4137_v55, %v8171_v47  ;;  %v4156_v13 = vand.u32 2147483647, %v4146_v8  ;;  %vm4152_vm5 = vweird.f32 %v4146_v8 }
 0x713   :  { %v4089_v18 = vrot.slane %v4012_v36, 4  ;;  %v4158_v36 = vand.u32 2147483648, %v4146_v8 }
 0x714   :  { %v8361_v19 = vadd.f32 %v4163_v61, %v4162_v14  ;;  %vm4157_vm7 = vcmp.eq.f32.partialorder %v4156_v13, 8.507059e+37 }
 0x715   :  { %v4091_v15 = vsel %vm122_vm1, %v3986_v39, %v4089_v18 }
 0x716   :  { %v4095_v41 = vadd.f32 %v4091_v15, %v549_v37  ;;  %v4159_v37 = vor.u32 1.1754944e-38, %v4158_v36 }
 0x717   :  { %v4000_v4 = vpop.f32.mrf.mxu2 }
 0x718   :  { %v4013_v1 = vpop.f32.mrf.mxu3  ;;  %v6268_v44 = vpop.eup %6267  ;;  %v5865_v58 = vmul.f32 -1.442695, %v4095_v41  ;;  %v4187_v35 = vrot.slane %v4095_v41, 4 }
 0x719   :  { %v4148_v40 = vmul.f32 %v6268_v44, %v4146_v8  ;;  %vm4153_vm4 = vweird.f32 %v6268_v44 }
 0x71a   :  { %6269 = vpow2.f32 %v5865_v58  ;;  %v5866_v56 = vmul.f32 -1.442695, %v4187_v35  ;;  %vm4154_vm6 = vmor %vm4152_vm5, %vm4153_vm4 }
 0x71b   :  { %v4149_v32 = vsub.f32 1.0, %v4148_v40  ;;  %6271 = vtanh.f32 %v8361_v19 }
 0x71c   :  { %6273 = vpow2.f32 %v5866_v56 }
 0x71d   :  { %v4150_v50 = vmul.f32 %v6268_v44, %v4149_v32 }
 0x71f   :  { %v4151_v60 = vadd.f32 %v6268_v44, %v4150_v50 }
 0x720   :  { %v6270_v61 = vpop.eup %6269 }
 0x721   :  { %v6272_v20 = vpop.eup %6271  ;;  %v4155_v2 = vsel %vm4154_vm6, %v6268_v44, %v4151_v60  ;;  %v4170_v5 = vadd.f32 1.0, %v6270_v61  ;;  %v9845_v61 = vld [vmem:[#allocation169_spill] sm:$0xff] }
 0x722   :  { %v6274_v3 = vpop.eup %6273  ;;  %v4160_v55 = vsel %vm4157_vm7, %v4159_v37, %v4155_v2  ;;  %v551_v37 = vrot.slane %v9845_v61, 4 }
 0x723   :  { %v8364_v14 = vmul.f32 %v6272_v20, %v4160_v55  ;;  %6275 = vrcp.f32 %v4170_v5  ;;  %v4192_v39 = vadd.f32 1.0, %v6274_v3  ;;  %vm4176_vm13 = vweird.f32 %v4170_v5 }
 0x725   :  { %4252 = vst [vmem:[#allocation6 + $0x18] sm:$0xf] %v8364_v14  ;;  %6277 = vrcp.f32 %v4192_v39  ;;  %v4204_v36 = vand.u32 2147483648, %v4192_v39  ;;  %v4202_v2 = vand.u32 2147483647, %v4192_v39  ;;  %vm4198_vm9 = vweird.f32 %v4192_v39 }
 0x726   :  { %v4024_v18 = vpop.f32.mrf.mxu0  ;;  %v4037_v12 = vpop.f32.mrf.mxu1 }
 0x727   :  { %v4038_v50 = vadd.f32 %v4037_v12, %v4024_v18  ;;  %v4182_v12 = vand.u32 2147483648, %v4170_v5  ;;  %vm4203_vm12 = vcmp.eq.f32.partialorder %v4202_v2, 8.507059e+37 }
 0x729   :  { %v6276_v7 = vpop.eup %6275 }
 0x72a   :  { %v4172_v8 = vmul.f32 %v6276_v7, %v4170_v5  ;;  %vm4177_vm11 = vweird.f32 %v6276_v7 }
 0x72b   :  { %v6278_v15 = vpop.eup %6277  ;;  %vm4178_vm14 = vmor %vm4176_vm13, %vm4177_vm11 }
 0x72c   :  { %v4664_v41 = vld [vmem:[#allocation6 + $0x18] sm:$0xf]  ;;  %v4173_v4 = vsub.f32 1.0, %v4172_v8  ;;  %v4194_v1 = vmul.f32 %v6278_v15, %v4192_v39  ;;  %vm4199_vm8 = vweird.f32 %v6278_v15 }
 0x72d   :  { %4867 = vst [vmem:[#allocation1 + $0x21] ss:$2 sm:$0xff] %v4664_v41  ;;  %vm8370_vm10 = vmor %vm4198_vm9, %vm4199_vm8 }
 0x72e   :  { %v4050_v44 = vpop.f32.mrf.mxu2  ;;  %v4063_v58 = vpop.f32.mrf.mxu3  ;;  %v4195_v32 = vsub.f32 1.0, %v4194_v1  ;;  %v4174_v60 = vmul.f32 %v6276_v7, %v4173_v4  ;;  %v4205_v1 = vor.u32 1.1754944e-38, %v4204_v36 }
 0x72f   :  { %v4064_v35 = vadd.f32 %v4063_v58, %v4050_v44  ;;  %v4026_v40 = vpop.f32.mrf.mxu0  ;;  %v4039_v56 = vpop.f32.mrf.mxu1  ;;  %v4232_v44 = vrot.slane %v8171_v47, 4  ;;  %v4180_v47 = vand.u32 2147483647, %v4170_v5 }
 0x730   :  { %v4196_v20 = vmul.f32 %v6278_v15, %v4195_v32  ;;  %v4175_v18 = vadd.f32 %v6276_v7, %v4174_v60  ;;  %v8378_v32 = vld [vmem:[#allocation7 + $0x18] sm:$0xf]  ;;  %v4183_v60 = vor.u32 1.1754944e-38, %v4182_v12 }
 0x731   :  { %v4090_v13 = vrot.slane %v4064_v35, 4  ;;  %vm4181_vm15 = vcmp.eq.f32.partialorder %v4180_v47, 8.507059e+37 }
 0x732   :  { %v4197_v8 = vadd.f32 %v6278_v15, %v4196_v20 }
 0x733   :  { %v4092_v3 = vsel %vm122_vm1, %v4038_v50, %v4090_v13 }
 0x734   :  { %v4096_v55 = vadd.f32 %v4092_v3, %v551_v37  ;;  %v4201_v4 = vsel %vm8370_vm10, %v6278_v15, %v4197_v8  ;;  %v8376_v56 = vld.sshfl [vmem:[#allocation1 + $0x20] sm:$0xff pattern:$0x75316420]  ;;  %v4179_v15 = vsel %vm4178_vm14, %v6276_v7, %v4175_v18 }
 0x735   :  { %v4206_v50 = vsel %vm4203_vm12, %v4205_v1, %v4201_v4  ;;  %4941 = vst [vmem:[#allocation1 + $0x20] ss:$2 sm:$0xff] %v8162_v30  ;;  %v4184_v37 = vsel %vm4181_vm15, %v4183_v60, %v4179_v15  ;;  %v8390_v60 = vld [vmem:[#allocation6 + $0x4] sm:$0xf] }
 0x736   :  { %6279 = vtanh.f32 %v4096_v55  ;;  %v4210_v35 = vrot.slane %v4096_v55, 4  ;;  %v4052_v40 = vpop.f32.mrf.mxu2  ;;  %v4065_v39 = vpop.f32.mrf.mxu3  ;;  %v4234_v13 = vmul.f32 %v4232_v44, %v4206_v50  ;;  %4943 = vst [vmem:[#allocation1 + $0x21] ss:$2 sm:$0xff] %v8378_v32 }
 0x738   :  { %v5867_v36 = vmul.f32 -1.442695, %v4210_v35 }
 0x73a   :  { %6281 = vpow2.f32 %v5867_v36  ;;  %v4658_v36 = vld [vmem:[#allocation6] sm:$0xf] }
 0x73c   :  { %v6280_v61 = vpop.eup %6279 }
 0x73d   :  { %v4235_v20 = vmul.f32 %v6280_v61, %v4184_v37  ;;  %v8382_v3 = vld.sshfl [vmem:[#allocation1 + $0x20] sm:$0xff pattern:$0x75316420] }
 0x73e   :  { %5017 = vst [vmem:[#allocation1 + $0x20] ss:$2 sm:$0xff] %v4664_v41 }
 0x73f   :  { %v4236_v2 = vadd.f32 %v4235_v20, %v4234_v13 }
 0x740   :  { %v6282_v55 = vpop.eup %6281 }
 0x741   :  { %v4215_v5 = vadd.f32 1.0, %v6282_v55  ;;  %v4247_v8 = vrot.slane %v4236_v2, 4  ;;  %v4689_v55 = vld [vmem:[%s8720_s4 + $0x50] sm:$0xff] }
 0x743   :  { %6283 = vrcp.f32 %v4215_v5  ;;  %v8386_v30 = vsel %vm122_vm1, %v8361_v19, %v4247_v8  ;;  %v4227_v1 = vand.u32 2147483648, %v4215_v5  ;;  %v4225_v12 = vand.u32 2147483647, %v4215_v5  ;;  %v4687_v8 = vld [vmem:[%s8720_s4 + $0x40] sm:$0xff] }
 0x744   :  { %6285 = vtanh.f32 %v4236_v2  ;;  %vm4221_vm2 = vweird.f32 %v4215_v5  ;;  %v4690_v2 = vld [vmem:[%s8720_s4 + $0x58] sm:$0xff] }
 0x745   :  { %v4228_v35 = vor.u32 1.1754944e-38, %v4227_v1  ;;  %vm4226_vm4 = vcmp.eq.f32.partialorder %v4225_v12, 8.507059e+37  ;;  %v4683_v1 = vld [vmem:[%s8720_s4 + $0x20] sm:$0xff]  ;;  %v4681_v12 = vld [vmem:[%s8720_s4 + $0x10] sm:$0xff] }
 0x749   :  { %v6284_v44 = vpop.eup %6283 }
 0x74a   :  { %v4217_v7 = vmul.f32 %v6284_v44, %v4215_v5  ;;  %vm4222_vm0 = vweird.f32 %v6284_v44  ;;  %v6286_v40 = vpop.eup %6285  ;;  %v4688_v5 = vld [vmem:[%s8720_s4 + $0x48] sm:$0xff] }
 0x74b   :  { %vm4223_vm3 = vmor %vm4221_vm2, %vm4222_vm0 }
 0x74c   :  { %v4218_v58 = vsub.f32 1.0, %v4217_v7  ;;  %v4685_v7 = vld [vmem:[%s8720_s4 + $0x30] sm:$0xff] }
 0x74e   :  { %v4219_v18 = vmul.f32 %v6284_v44, %v4218_v58  ;;  %v4684_v58 = vld [vmem:[%s8720_s4 + $0x28] sm:$0xff] }
 0x750   :  { %v4220_v4 = vadd.f32 %v6284_v44, %v4219_v18  ;;  %v4682_v18 = vld [vmem:[%s8720_s4 + $0x18] sm:$0xff] }
 0x752   :  { %v4224_v41 = vsel %vm4223_vm3, %v6284_v44, %v4220_v4  ;;  %v4686_v44 = vld [vmem:[%s8720_s4 + $0x38] sm:$0xff]  ;;  %v4680_v4 = vld [vmem:[%s8720_s4 + $0x8] sm:$0xff] }
 0x753   :  { %v4229_v39 = vsel %vm4226_vm4, %v4228_v35, %v4224_v41  ;;  %v4679_v35 = vld [vmem:[%s8720_s4] sm:$0xff]  ;;  %v9878_v41 = vld [vmem:[#allocation83_spill] sm:$0xff] }
 0x754   :  { %v4238_v47 = vmul.f32 %v6286_v40, %v4229_v39  ;;  %v9879_v40 = vld [vmem:[#allocation84_spill] sm:$0xff] }
 0x756   :  { %v4241_v50 = vrot.slane %v4238_v47, 4  ;;  %4254 = vst [vmem:[#allocation7 + $0x4] sm:$0xf] %v4238_v47 }
 0x758   :  { %v4242_v19 = vsel %vm122_vm1, %v8364_v14, %v4241_v50 }
 0x759   :  { %4257 = vst [vmem:[#allocation1] ss:$2 sm:$0xff] %v4242_v19 }
 0x75d   :  { %v8405_v14 = vld [vmem:[#allocation7 + $0x4] sm:$0xf] }
 0x760   :  { %v4258_v13 = vld.sshfl [vmem:[#allocation1] sm:$0xff pattern:$0x75316420]  ;;  %v4259_v15 = vld.sshfl [vmem:[#allocation1 + $0x8] sm:$0xff pattern:$0x75316420] }
 0x761   :  { %v8392_v61 = vpack.c.bf16 %v4258_v13, %v4258_v13  ;;  %v8394_v37 = vpack.c.bf16 %v4259_v15, %v4259_v15  ;;  %4701 = vst [vmem:[#allocation1] ss:$2 sm:$0xff] %v4658_v36 }
 0x762   :  { %4703 = vst [vmem:[#allocation1 + $0x1] ss:$2 sm:$0xff] %v8390_v60 }
 0x763   :  { %4272 = vmatmul.bf16.vlgmr.msra.gmra.mxu0 %v8392_v61  ;;  %4285 = vmatmul.bf16.vlgmr.msra.gmra.mxu1 %v8394_v37 }
 0x764   :  { %4298 = vmatmul.bf16.vlgmr.msrb.gmra.mxu2 %v8392_v61  ;;  %4311 = vmatmul.bf16.vlgmr.msrb.gmra.mxu3 %v8394_v37 }
 0x765   :  { %4368 = vmatpush.bf16.msra.mxu0 %v9229_v54  ;;  %4381 = vmatpush.bf16.msra.mxu1 %v9230_v11  ;;  %v9848_v54 = vld [vmem:[#allocation113_spill] sm:$0xff]  ;;  %v9849_v11 = vld [vmem:[#allocation114_spill] sm:$0xff] }
 0x766   :  { %4394 = vmatpush.bf16.msrb.mxu2 %v9231_v0  ;;  %4407 = vmatpush.bf16.msrb.mxu3 %v9232_v45  ;;  %v9850_v0 = vld [vmem:[#allocation115_spill] sm:$0xff]  ;;  %v9851_v45 = vld [vmem:[#allocation116_spill] sm:$0xff] }
 0x769   :  { %4369 = vmatpush.bf16.msra.mxu0 %v9233_v24  ;;  %4382 = vmatpush.bf16.msra.mxu1 %v9234_v27  ;;  %v8409_v20 = vld.sshfl [vmem:[#allocation1] sm:$0xff pattern:$0x75316420]  ;;  %v9852_v24 = vld [vmem:[#allocation117_spill] sm:$0xff] }
 0x76a   :  { %4395 = vmatpush.bf16.msrb.mxu2 %v9235_v49  ;;  %4408 = vmatpush.bf16.msrb.mxu3 %v9236_v10  ;;  %4783 = vst [vmem:[#allocation1 + $0x1] ss:$2 sm:$0xff] %v8405_v14  ;;  %v9853_v27 = vld [vmem:[#allocation118_spill] sm:$0xff]  ;;  %v9854_v49 = vld [vmem:[#allocation119_spill] sm:$0xff]  ;;  %v9855_v10 = vld [vmem:[#allocation120_spill] sm:$0xff] }
 0x76d   :  { %4370 = vmatpush.bf16.msra.mxu0 %v9237_v43  ;;  %4383 = vmatpush.bf16.msra.mxu1 %v9238_v33  ;;  %v9856_v43 = vld [vmem:[#allocation121_spill] sm:$0xff]  ;;  %v9857_v33 = vld [vmem:[#allocation122_spill] sm:$0xff] }
 0x76e   :  { %4396 = vmatpush.bf16.msrb.mxu2 %v9239_v48  ;;  %4409 = vmatpush.bf16.msrb.mxu3 %v9240_v26  ;;  %v9858_v48 = vld [vmem:[#allocation123_spill] sm:$0xff]  ;;  %v9859_v26 = vld [vmem:[#allocation124_spill] sm:$0xff] }
 0x771   :  { %4371 = vmatpush.bf16.msra.mxu0 %v9241_v63  ;;  %4384 = vmatpush.bf16.msra.mxu1 %v9242_v38  ;;  %v9860_v63 = vld [vmem:[#allocation125_spill] sm:$0xff]  ;;  %v9861_v38 = vld [vmem:[#allocation126_spill] sm:$0xff] }
 0x772   :  { %4397 = vmatpush.bf16.msrb.mxu2 %v9243_v62  ;;  %4410 = vmatpush.bf16.msrb.mxu3 %v9244_v25  ;;  %v9862_v62 = vld [vmem:[#allocation130_spill] sm:$0xff]  ;;  %v9863_v25 = vld [vmem:[#allocation131_spill] sm:$0xff] }
 0x773   :  { %4324 = vmatmul.bf16.vlgmr.msrb.gmra.mxu0 %v8392_v61  ;;  %4337 = vmatmul.bf16.vlgmr.msrb.gmra.mxu1 %v8394_v37 }
 0x774   :  { %4350 = vmatmul.bf16.vlgmr.msra.gmra.mxu2 %v8392_v61  ;;  %4363 = vmatmul.bf16.vlgmr.msra.gmra.mxu3 %v8394_v37 }
 0x775   :  { %4372 = vmatpush.bf16.msra.mxu0 %v9245_v57  ;;  %4385 = vmatpush.bf16.msra.mxu1 %v9328_v52  ;;  %v9864_v57 = vld [vmem:[#allocation132_spill] sm:$0xff]  ;;  %v9866_v52 = vld [vmem:[#allocation137_spill] sm:$0xff] }
 0x776   :  { %4398 = vmatpush.bf16.msrb.mxu2 %v9329_v42  ;;  %4411 = vmatpush.bf16.msrb.mxu3 %v9330_v17  ;;  %v9867_v42 = vld [vmem:[#allocation138_spill] sm:$0xff]  ;;  %v9868_v17 = vld [vmem:[#allocation140_spill] sm:$0xff] }
 0x779   :  { %4373 = vmatpush.bf16.msra.mxu0 %v9331_v9  ;;  %4386 = vmatpush.bf16.msra.mxu1 %v9332_v34  ;;  %v9869_v9 = vld [vmem:[#allocation141_spill] sm:$0xff]  ;;  %v9870_v34 = vld [vmem:[#allocation144_spill] sm:$0xff] }
 0x77a   :  { %4399 = vmatpush.bf16.msrb.mxu2 %v9333_v29  ;;  %4412 = vmatpush.bf16.msrb.mxu3 %v9334_v23  ;;  %v9871_v29 = vld [vmem:[#allocation145_spill] sm:$0xff]  ;;  %v9872_v23 = vld [vmem:[#allocation146_spill] sm:$0xff] }
 0x77d   :  { %4374 = vmatpush.bf16.msra.mxu0 %v9335_v22  ;;  %4387 = vmatpush.bf16.msra.mxu1 %v9254_v31  ;;  %v9865_v31 = vld [vmem:[#allocation133_spill] sm:$0xff]  ;;  %v9873_v22 = vld [vmem:[#allocation147_spill] sm:$0xff] }
 0x77e   :  { %4400 = vmatpush.bf16.msrb.mxu2 %v9336_v28  ;;  %4413 = vmatpush.bf16.msrb.mxu3 %v9337_v53  ;;  %v4694_v28 = vld [vmem:[%s8720_s4 + $0x78] sm:$0xff]  ;;  %v9874_v53 = vld [vmem:[#allocation148_spill] sm:$0xff] }
 0x781   :  { %4375 = vmatpush.bf16.msra.mxu0 %v9338_v21  ;;  %4388 = vmatpush.bf16.msra.mxu1 %v9339_v59  ;;  %v9875_v21 = vld [vmem:[#allocation149_spill] sm:$0xff]  ;;  %v9876_v59 = vld [vmem:[#allocation150_spill] sm:$0xff] }
 0x782   :  { %4401 = vmatpush.bf16.msrb.mxu2 %v9340_v6  ;;  %4414 = vmatpush.bf16.msrb.mxu3 %v9341_v46  ;;  %v9877_v6 = vld [vmem:[#allocation151_spill] sm:$0xff]  ;;  %v4693_v46 = vld [vmem:[%s8720_s4 + $0x70] sm:$0xff] }
 0x784   :  { %4376 = vmatmul.bf16.vlgmr.msra.gmra.mxu0 %v8392_v61  ;;  %4389 = vmatmul.bf16.vlgmr.msra.gmra.mxu1 %v8394_v37 }
 0x785   :  { %4420 = vmatpush.bf16.msrb.mxu0 %v9342_v51  ;;  %4433 = vmatpush.bf16.msrb.mxu1 %v9741_v16  ;;  %v4692_v51 = vld [vmem:[%s8720_s4 + $0x68] sm:$0xff]  ;;  %v4691_v16 = vld [vmem:[%s8720_s4 + $0x60] sm:$0xff] }
 0x786   :  { %4446 = vmatpush.bf16.msra.mxu2 %v9848_v54  ;;  %4459 = vmatpush.bf16.msra.mxu3 %v9849_v11  ;;  %v9880_v54 = vld [vmem:[#allocation143_spill] sm:$0xff] }
 0x787   :  { %4402 = vmatmul.bf16.vlgmr.msrb.gmra.mxu2 %v8392_v61  ;;  %4415 = vmatmul.bf16.vlgmr.msrb.gmra.mxu3 %v8394_v37  ;;  %v581_v11 = vrot.slane %v9880_v54, 4 }
 0x789   :  { %4421 = vmatpush.bf16.msrb.mxu0 %v9850_v0  ;;  %4434 = vmatpush.bf16.msrb.mxu1 %v9851_v45 }
 0x78a   :  { %4447 = vmatpush.bf16.msra.mxu2 %v9852_v24  ;;  %4460 = vmatpush.bf16.msra.mxu3 %v9853_v27 }
 0x78d   :  { %4422 = vmatpush.bf16.msrb.mxu0 %v9854_v49  ;;  %4435 = vmatpush.bf16.msrb.mxu1 %v9855_v10 }
 0x78e   :  { %4448 = vmatpush.bf16.msra.mxu2 %v9856_v43  ;;  %4461 = vmatpush.bf16.msra.mxu3 %v9857_v33 }
 0x791   :  { %4423 = vmatpush.bf16.msrb.mxu0 %v9858_v48  ;;  %4436 = vmatpush.bf16.msrb.mxu1 %v9859_v26 }
 0x792   :  { %4449 = vmatpush.bf16.msra.mxu2 %v9860_v63  ;;  %4462 = vmatpush.bf16.msra.mxu3 %v9861_v38 }
 0x795   :  { %4424 = vmatpush.bf16.msrb.mxu0 %v9862_v62  ;;  %4437 = vmatpush.bf16.msrb.mxu1 %v9863_v25 }
 0x796   :  { %4450 = vmatpush.bf16.msra.mxu2 %v9864_v57  ;;  %4463 = vmatpush.bf16.msra.mxu3 %v9865_v31 }
 0x799   :  { %4425 = vmatpush.bf16.msrb.mxu0 %v9866_v52  ;;  %4438 = vmatpush.bf16.msrb.mxu1 %v9867_v42 }
 0x79a   :  { %4451 = vmatpush.bf16.msra.mxu2 %v9868_v17  ;;  %4464 = vmatpush.bf16.msra.mxu3 %v9869_v9  ;;  %v9881_v9 = vld [vmem:[#allocation165_spill] sm:$0xff] }
 0x79d   :  { %4426 = vmatpush.bf16.msrb.mxu0 %v9870_v34  ;;  %4439 = vmatpush.bf16.msrb.mxu1 %v9871_v29  ;;  %v583_v34 = vrot.slane %v9881_v9, 4 }
 0x79e   :  { %4452 = vmatpush.bf16.msra.mxu2 %v9872_v23  ;;  %4465 = vmatpush.bf16.msra.mxu3 %v9873_v22 }
 0x7a1   :  { %4427 = vmatpush.bf16.msrb.mxu0 %v9874_v53  ;;  %4440 = vmatpush.bf16.msrb.mxu1 %v9875_v21 }
 0x7a2   :  { %4453 = vmatpush.bf16.msra.mxu2 %v9876_v59  ;;  %4466 = vmatpush.bf16.msra.mxu3 %v9877_v6 }
 0x7a4   :  { %4428 = vmatmul.bf16.vlgmr.msrb.gmra.mxu0 %v8392_v61  ;;  %4441 = vmatmul.bf16.vlgmr.msrb.gmra.mxu1 %v8394_v37 }
 0x7a5   :  { %4718 = vmatpush.msra.mxu0 %v4694_v28  ;;  %4454 = vmatmul.bf16.vlgmr.msra.gmra.mxu2 %v8392_v61 }
 0x7a6   :  { %4467 = vmatmul.bf16.vlgmr.msra.gmra.mxu3 %v8394_v37 }
 0x7a7   :  { %4719 = vmatpush.msra.mxu0 %v4693_v46 }
 0x7a9   :  { %4720 = vmatpush.msra.mxu0 %v4692_v51 }
 0x7ab   :  { %4721 = vmatpush.msra.mxu0 %v4691_v16 }
 0x7ad   :  { %4722 = vmatpush.msra.mxu0 %v4690_v2 }
 0x7af   :  { %4723 = vmatpush.msra.mxu0 %v4689_v55 }
 0x7b1   :  { %4724 = vmatpush.msra.mxu0 %v4688_v5 }
 0x7b3   :  { %4725 = vmatpush.msra.mxu0 %v4687_v8 }
 0x7b5   :  { %4726 = vmatpush.msra.mxu0 %v4686_v44 }
 0x7b7   :  { %4727 = vmatpush.msra.mxu0 %v4685_v7 }
 0x7b9   :  { %4728 = vmatpush.msra.mxu0 %v4684_v58 }
 0x7bb   :  { %4729 = vmatpush.msra.mxu0 %v4683_v1 }
 0x7bd   :  { %4730 = vmatpush.msra.mxu0 %v4682_v18 }
 0x7bf   :  { %4731 = vmatpush.msra.mxu0 %v4681_v12 }
 0x7c1   :  { %4732 = vmatpush.msra.mxu0 %v4680_v4 }
 0x7c3   :  { %4733 = vmatpush.msra.mxu0 %v4679_v35 }
 0x7c4   :  { %4734 = vmatmul.f32.vlgmr.msra.gmra.mxu0 %v8409_v20 }
 0x7cc   :  { %4737 = vmatmul.f32.gmra.mxu0 %v9878_v41 }
 0x7d4   :  { %4740 = vmatmul.f32.gmra.mxu0 %v9879_v40 }
 0x7e0   :  { %v4273_v39 = vpop.f32.mrf.mxu0  ;;  %v4286_v47 = vpop.f32.mrf.mxu1 }
 0x7e1   :  { %v4287_v61 = vadd.f32 %v4286_v47, %v4273_v39 }
 0x7e7   :  { %v4299_v50 = vpop.f32.mrf.mxu2  ;;  %v4312_v19 = vpop.f32.mrf.mxu3 }
 0x7e8   :  { %v4313_v36 = vadd.f32 %v4312_v19, %v4299_v50  ;;  %v4275_v13 = vpop.f32.mrf.mxu0  ;;  %v4288_v15 = vpop.f32.mrf.mxu1 }
 0x7ea   :  { %v4479_v37 = vrot.slane %v4313_v36, 4 }
 0x7ec   :  { %v4481_v0 = vsel %vm122_vm1, %v4287_v61, %v4479_v37 }
 0x7ed   :  { %v4485_v45 = vadd.f32 %v4481_v0, %v581_v11 }
 0x7ef   :  { %v5868_v24 = vmul.f32 -1.442695, %v4485_v45  ;;  %v4522_v20 = vrot.slane %v4485_v45, 4  ;;  %v4301_v27 = vpop.f32.mrf.mxu2  ;;  %v4314_v49 = vpop.f32.mrf.mxu3 }
 0x7f0   :  { %v4325_v10 = vpop.f32.mrf.mxu0  ;;  %v4338_v43 = vpop.f32.mrf.mxu1 }
 0x7f1   :  { %6287 = vpow2.f32 %v5868_v24  ;;  %v5869_v33 = vmul.f32 -1.442695, %v4522_v20  ;;  %v4339_v42 = vadd.f32 %v4338_v43, %v4325_v10  ;;  %v9882_v10 = vld [vmem:[#allocation156_spill] sm:$0xff] }
 0x7f3   :  { %6289 = vpow2.f32 %v5869_v33 }
 0x7f7   :  { %v6288_v48 = vpop.eup %6287  ;;  %v4351_v26 = vpop.f32.mrf.mxu2 }
 0x7f8   :  { %v4364_v63 = vpop.f32.mrf.mxu3  ;;  %v4505_v38 = vadd.f32 1.0, %v6288_v48  ;;  %v4327_v25 = vpop.f32.mrf.mxu0 }
 0x7f9   :  { %v4365_v62 = vadd.f32 %v4364_v63, %v4351_v26  ;;  %v4340_v57 = vpop.f32.mrf.mxu1  ;;  %v6290_v31 = vpop.eup %6289 }
 0x7fa   :  { %6291 = vrcp.f32 %v4505_v38  ;;  %v4527_v52 = vadd.f32 1.0, %v6290_v31  ;;  %v4517_v5 = vand.u32 2147483648, %v4505_v38  ;;  %v4515_v7 = vand.u32 2147483647, %v4505_v38 }
 0x7fb   :  { %v4480_v17 = vrot.slane %v4365_v62, 4  ;;  %vm4511_vm6 = vweird.f32 %v4505_v38 }
 0x7fc   :  { %6293 = vrcp.f32 %v4527_v52  ;;  %v4539_v58 = vand.u32 2147483648, %v4527_v52  ;;  %v4537_v12 = vand.u32 2147483647, %v4527_v52  ;;  %v4518_v4 = vor.u32 1.1754944e-38, %v4517_v5 }
 0x7fd   :  { %v4482_v29 = vsel %vm122_vm1, %v4339_v42, %v4480_v17  ;;  %vm4533_vm9 = vweird.f32 %v4527_v52  ;;  %vm4516_vm10 = vcmp.eq.f32.partialorder %v4515_v7, 8.507059e+37 }
 0x7fe   :  { %v4486_v23 = vadd.f32 %v4482_v29, %v583_v34  ;;  %v4540_v19 = vor.u32 1.1754944e-38, %v4539_v58  ;;  %vm4538_vm12 = vcmp.eq.f32.partialorder %v4537_v12, 8.507059e+37 }
 0x7ff   :  { %v4353_v28 = vpop.f32.mrf.mxu2 }
 0x800   :  { %v4545_v22 = vrot.slane %v4486_v23, 4  ;;  %v4366_v53 = vpop.f32.mrf.mxu3  ;;  %v6292_v21 = vpop.eup %6291 }
 0x801   :  { %v4507_v59 = vmul.f32 %v6292_v21, %v4505_v38  ;;  %v4377_v51 = vpop.f32.mrf.mxu0  ;;  %v4390_v16 = vpop.f32.mrf.mxu1  ;;  %vm4512_vm5 = vweird.f32 %v6292_v21 }
 0x802   :  { %v5870_v6 = vmul.f32 -1.442695, %v4545_v22  ;;  %v6294_v46 = vpop.eup %6293  ;;  %vm4513_vm8 = vmor %vm4511_vm6, %vm4512_vm5  ;;  %v4391_v24 = vadd.f32 %v4390_v16, %v4377_v51  ;;  %v4774_v51 = vld [vmem:[#allocation12 + $0x78] sm:$0xff]  ;;  %v4773_v16 = vld [vmem:[#allocation12 + $0x70] sm:$0xff] }
 0x803   :  { %v4508_v2 = vsub.f32 1.0, %v4507_v59  ;;  %v4529_v55 = vmul.f32 %v6294_v46, %v4527_v52  ;;  %vm4534_vm7 = vweird.f32 %v6294_v46  ;;  %4798 = vmatpush.msra.mxu1 %v4774_v51  ;;  %v4929_v51 = vld [vmem:[#allocation12 + $0xe8] sm:$0xff] }
 0x804   :  { %6295 = vpow2.f32 %v5870_v6  ;;  %vm4535_vm11 = vmor %vm4533_vm9, %vm4534_vm7 }
 0x805   :  { %6297 = vtanh.f32 %v4486_v23  ;;  %v4530_v8 = vsub.f32 1.0, %v4529_v55  ;;  %v4509_v44 = vmul.f32 %v6292_v21, %v4508_v2  ;;  %4799 = vmatpush.msra.mxu1 %v4773_v16  ;;  %v4772_v55 = vld [vmem:[#allocation12 + $0x68] sm:$0xff] }
 0x807   :  { %v4531_v1 = vmul.f32 %v6294_v46, %v4530_v8  ;;  %v4510_v18 = vadd.f32 %v6292_v21, %v4509_v44  ;;  %4800 = vmatpush.msra.mxu1 %v4772_v55  ;;  %v4771_v44 = vld [vmem:[#allocation12 + $0x60] sm:$0xff] }
 0x809   :  { %v4514_v41 = vsel %vm4513_vm8, %v6292_v21, %v4510_v18  ;;  %v4532_v40 = vadd.f32 %v6294_v46, %v4531_v1  ;;  %v4379_v61 = vpop.f32.mrf.mxu0  ;;  %v4392_v37 = vpop.f32.mrf.mxu1  ;;  %4801 = vmatpush.msra.mxu1 %v4771_v44  ;;  %v4928_v44 = vld [vmem:[#allocation12 + $0xe0] sm:$0xff] }
 0x80a   :  { %v6296_v35 = vpop.eup %6295  ;;  %v4403_v39 = vpop.f32.mrf.mxu2  ;;  %v4519_v36 = vsel %vm4516_vm10, %v4518_v4, %v4514_v41  ;;  %v5888_v61 = vld [vmem:[%s8720_s4 + $0xf0] sm:$0xff] }
 0x80b   :  { %v4416_v47 = vpop.f32.mrf.mxu3  ;;  %v6298_v50 = vpop.eup %6297  ;;  %v4550_v13 = vadd.f32 1.0, %v6296_v35  ;;  %v4536_v54 = vsel %vm4535_vm11, %v6294_v46, %v4532_v40  ;;  %v4770_v40 = vld [vmem:[#allocation12 + $0x58] sm:$0xff] }
 0x80c   :  { %v4417_v15 = vadd.f32 %v4416_v47, %v4403_v39  ;;  %v4567_v11 = vmul.f32 %v6298_v50, %v4519_v36  ;;  %v4541_v0 = vsel %vm4538_vm12, %v4540_v19, %v4536_v54  ;;  %v5889_v39 = vld [vmem:[%s8720_s4 + $0xf8] sm:$0xff]  ;;  %4802 = vmatpush.msra.mxu1 %v4770_v40 }
 0x80d   :  { %6299 = vrcp.f32 %v4550_v13  ;;  %v4566_v45 = vmul.f32 %v4541_v0, %v8386_v30  ;;  %v4562_v31 = vand.u32 2147483648, %v4550_v13  ;;  %v4560_v42 = vand.u32 2147483647, %v4550_v13  ;;  %4874 = vmatpush.msrb.mxu2 %v5889_v39  ;;  %v4926_v40 = vld [vmem:[#allocation12 + $0xd0] sm:$0xff]  ;;  %v5904_v39 = vld [vmem:[%s8720_s4 + $0x170] sm:$0xff] }
 0x80e   :  { %v4493_v20 = vrot.slane %v4417_v15, 4  ;;  %vm4556_vm14 = vweird.f32 %v4550_v13  ;;  %v4769_v15 = vld [vmem:[#allocation12 + $0x50] sm:$0xff]  ;;  %v4636_v0 = vrot.slane %v8386_v30, 4 }
 0x80f   :  { %v4568_v27 = vadd.f32 %v4567_v11, %v4566_v45  ;;  %v4563_v34 = vor.u32 1.1754944e-38, %v4562_v31  ;;  %vm4561_vm0 = vcmp.eq.f32.partialorder %v4560_v42, 8.507059e+37  ;;  %4803 = vmatpush.msra.mxu1 %v4769_v15  ;;  %4875 = vmatpush.msrb.mxu2 %v5888_v61  ;;  %v4768_v45 = vld [vmem:[#allocation12 + $0x48] sm:$0xff]  ;;  %v4759_v15 = vld [vmem:[#allocation12] sm:$0xff]  ;;  %v5878_v61 = vld [vmem:[%s8720_s4 + $0xa0] sm:$0xff] }
 0x810   :  { %v4495_v49 = vsel %vm122_vm1, %v4391_v24, %v4493_v20  ;;  %v5887_v24 = vld [vmem:[%s8720_s4 + $0xe8] sm:$0xff]  ;;  %v9883_v20 = vld [vmem:[#allocation168_spill] sm:$0xff] }
 0x811   :  { %v4499_v43 = vadd.f32 %v4495_v49, %v9882_v10  ;;  %4804 = vmatpush.msra.mxu1 %v4768_v45  ;;  %4876 = vmatpush.msrb.mxu2 %v5887_v24  ;;  %v5901_v45 = vld [vmem:[%s8720_s4 + $0x158] sm:$0xff]  ;;  %v5083_v24 = vld [vmem:[#allocation12 + $0x178] sm:$0xff] }
 0x812   :  { %v4405_v33 = vpop.f32.mrf.mxu2 }
 0x813   :  { %v4418_v48 = vpop.f32.mrf.mxu3  ;;  %v6300_v26 = vpop.eup %6299  ;;  %v5871_v63 = vmul.f32 -1.442695, %v4499_v43  ;;  %v4591_v38 = vrot.slane %v4499_v43, 4  ;;  %v4673_v43 = vld [vmem:[#allocation7 + $0x1c] sm:$0xf]  ;;  %v5875_v33 = vld [vmem:[%s8720_s4 + $0x88] sm:$0xff] }
 0x814   :  { %v4552_v62 = vmul.f32 %v6300_v26, %v4550_v13  ;;  %vm4557_vm13 = vweird.f32 %v6300_v26 }
 0x815   :  { %6301 = vpow2.f32 %v5871_v63  ;;  %v5872_v25 = vmul.f32 -1.442695, %v4591_v38  ;;  %vm4558_vm15 = vmor %vm4556_vm14, %vm4557_vm13  ;;  %v4767_v63 = vld [vmem:[#allocation12 + $0x40] sm:$0xff]  ;;  %v5886_v38 = vld [vmem:[%s8720_s4 + $0xe0] sm:$0xff]  ;;  %vm5186_vm14 = vcmask 1043458  }
 0x816   :  { %v4553_v57 = vsub.f32 1.0, %v4552_v62  ;;  %6303 = vtanh.f32 %v4568_v27  ;;  %4805 = vmatpush.msra.mxu1 %v4767_v63  ;;  %4877 = vmatpush.msrb.mxu2 %v5886_v38  ;;  %v5081_v63 = vld [vmem:[#allocation12 + $0x168] sm:$0xff]  ;;  %v5874_v38 = vld [vmem:[%s8720_s4 + $0x80] sm:$0xff] }
 0x817   :  { %6305 = vpow2.f32 %v5872_v25 }
 0x818   :  { %v4554_v52 = vmul.f32 %v6300_v26, %v4553_v57 }
 0x81a   :  { %v4555_v17 = vadd.f32 %v6300_v26, %v4554_v52 }
 0x81b   :  { %v6302_v9 = vpop.eup %6301 }
 0x81c   :  { %v6304_v29 = vpop.eup %6303  ;;  %v4559_v23 = vsel %vm4558_vm15, %v6300_v26, %v4555_v17  ;;  %v8540_v22 = vadd.f32 1.0, %v6302_v9  ;;  %v4766_v17 = vld [vmem:[#allocation12 + $0x38] sm:$0xff]  ;;  %v5885_v9 = vld [vmem:[%s8720_s4 + $0xd8] sm:$0xff]  ;;  %vm5165_vm15 = vcmask 1041408  }
 0x81d   :  { %v6306_v28 = vpop.eup %6305  ;;  %v4564_v53 = vsel %vm4561_vm0, %v4563_v34, %v4559_v23  ;;  %v4931_v34 = vld [vmem:[#allocation12 + $0xf8] sm:$0xff]  ;;  %4806 = vmatpush.msra.mxu1 %v4766_v17  ;;  %4878 = vmatpush.msrb.mxu2 %v5885_v9 }
 0x81e   :  { %v4570_v21 = vmul.f32 %v6304_v29, %v4564_v53  ;;  %6307 = vrcp.f32 %v8540_v22  ;;  %v4596_v59 = vadd.f32 1.0, %v6306_v28  ;;  %v4584_v49 = vand.u32 2147483647, %v8540_v22  ;;  %4950 = vmatpush.msrb.mxu3 %v4931_v34  ;;  %v4765_v53 = vld [vmem:[#allocation12 + $0x30] sm:$0xff] }
 0x81f   :  { %v4586_v26 = vand.u32 2147483648, %v8540_v22  ;;  %vm4580_vm7 = vweird.f32 %v8540_v22  ;;  %4807 = vmatpush.msra.mxu1 %v4765_v53 }
 0x820   :  { %4656 = vst [vmem:[#allocation6 + $0x1c] sm:$0xf] %v4570_v21  ;;  %6309 = vrcp.f32 %v4596_v59  ;;  %v4608_v50 = vand.u32 2147483648, %v4596_v59  ;;  %v4606_v54 = vand.u32 2147483647, %v4596_v59  ;;  %vm4602_vm3 = vweird.f32 %v4596_v59  ;;  %v4930_v21 = vld [vmem:[#allocation12 + $0xf0] sm:$0xff] }
 0x821   :  { %v4429_v6 = vpop.f32.mrf.mxu0  ;;  %v4442_v46 = vpop.f32.mrf.mxu1  ;;  %vm4585_vm9 = vcmp.eq.f32.partialorder %v4584_v49, 8.507059e+37  ;;  %4951 = vmatpush.msrb.mxu3 %v4930_v21  ;;  %v5896_v21 = vld [vmem:[%s8720_s4 + $0x130] sm:$0xff] }
 0x822   :  { %v4443_v19 = vadd.f32 %v4442_v46, %v4429_v6  ;;  %v4609_v30 = vor.u32 1.1754944e-38, %v4608_v50  ;;  %vm4607_vm6 = vcmp.eq.f32.partialorder %v4606_v54, 8.507059e+37  ;;  %v4764_v6 = vld [vmem:[#allocation12 + $0x28] sm:$0xff]  ;;  %v5883_v46 = vld [vmem:[%s8720_s4 + $0xc8] sm:$0xff]  ;;  %v5902_v54 = vld [vmem:[%s8720_s4 + $0x160] sm:$0xff] }
 0x823   :  { %4808 = vmatpush.msra.mxu1 %v4764_v6  ;;  %4952 = vmatpush.msrb.mxu3 %v4929_v51  ;;  %v4760_v50 = vld [vmem:[#allocation12 + $0x8] sm:$0xff]  ;;  %v5895_v51 = vld [vmem:[%s8720_s4 + $0x128] sm:$0xff] }
 0x824   :  { %v8543_v2 = vpop.eup %6307 }
 0x825   :  { %v4576_v5 = vmul.f32 %v8543_v2, %v8540_v22  ;;  %vm4581_vm5 = vweird.f32 %v8543_v2  ;;  %4953 = vmatpush.msrb.mxu3 %v4928_v44  ;;  %v5894_v44 = vld [vmem:[%s8720_s4 + $0x120] sm:$0xff] }
 0x826   :  { %v6310_v8 = vpop.eup %6309  ;;  %vm8583_vm8 = vmor %vm4580_vm7, %vm4581_vm5 }
 0x827   :  { %v4665_v7 = vld [vmem:[#allocation6 + $0x1c] sm:$0xf]  ;;  %v4577_v58 = vsub.f32 1.0, %v4576_v5  ;;  %v4598_v1 = vmul.f32 %v6310_v8, %v4596_v59  ;;  %vm4603_vm2 = vweird.f32 %v6310_v8  ;;  %v4587_v59 = vor.u32 1.1754944e-38, %v4586_v26  ;;  %v4763_v5 = vld [vmem:[#allocation12 + $0x20] sm:$0xff] }
 0x828   :  { %v4455_v18 = vpop.f32.mrf.mxu2  ;;  %5019 = vst [vmem:[#allocation1 + $0x21] ss:$2 sm:$0xff] %v4665_v7  ;;  %vm8562_vm4 = vmor %vm4602_vm3, %vm4603_vm2  ;;  %4809 = vmatpush.msra.mxu1 %v4763_v5  ;;  %v4762_v7 = vld [vmem:[#allocation12 + $0x18] sm:$0xff]  ;;  %v5899_v26 = vld [vmem:[%s8720_s4 + $0x148] sm:$0xff] }
 0x829   :  { %v4468_v12 = vpop.f32.mrf.mxu3  ;;  %v4431_v35 = vpop.f32.mrf.mxu0  ;;  %v4599_v47 = vsub.f32 1.0, %v4598_v1  ;;  %v4578_v13 = vmul.f32 %v8543_v2, %v4577_v58  ;;  %v5881_v58 = vld [vmem:[%s8720_s4 + $0xb8] sm:$0xff]  ;;  %v4927_v1 = vld [vmem:[#allocation12 + $0xd8] sm:$0xff] }
 0x82a   :  { %v4469_v4 = vadd.f32 %v4468_v12, %v4455_v18  ;;  %v4444_v41 = vpop.f32.mrf.mxu1  ;;  %v5905_v12 = vld [vmem:[%s8720_s4 + $0x178] sm:$0xff]  ;;  %v5880_v35 = vld [vmem:[%s8720_s4 + $0xb0] sm:$0xff]  ;;  %4810 = vmatpush.msra.mxu1 %v4762_v7  ;;  %4954 = vmatpush.msrb.mxu3 %v4927_v1  ;;  %v5076_v7 = vld [vmem:[#allocation12 + $0x140] sm:$0xff] }
 0x82b   :  { %v4600_v37 = vmul.f32 %v6310_v8, %v4599_v47  ;;  %v4579_v48 = vadd.f32 %v8543_v2, %v4578_v13  ;;  %5026 = vmatpush.msrb.mxu0 %v5905_v12  ;;  %v5903_v13 = vld [vmem:[%s8720_s4 + $0x168] sm:$0xff]  ;;  %v5075_v1 = vld [vmem:[#allocation12 + $0x138] sm:$0xff]  ;;  %v5074_v12 = vld [vmem:[#allocation12 + $0x130] sm:$0xff] }
 0x82c   :  { %v4494_v36 = vrot.slane %v4469_v4, 4  ;;  %v4761_v4 = vld [vmem:[#allocation12 + $0x10] sm:$0xff]  ;;  %4955 = vmatpush.msrb.mxu3 %v4926_v40  ;;  %v5890_v40 = vld [vmem:[%s8720_s4 + $0x100] sm:$0xff] }
 0x82d   :  { %v4601_v10 = vadd.f32 %v6310_v8, %v4600_v37  ;;  %v4583_v22 = vsel %vm8583_vm8, %v8543_v2, %v4579_v48  ;;  %4811 = vmatpush.msra.mxu1 %v4761_v4  ;;  %5027 = vmatpush.msrb.mxu0 %v5904_v39  ;;  %v4924_v37 = vld [vmem:[#allocation12 + $0xc0] sm:$0xff]  ;;  %v4921_v48 = vld [vmem:[#allocation12 + $0xa8] sm:$0xff]  ;;  %vm5222_vm8 = vcmask 1024  }
 0x82e   :  { %v4496_v11 = vsel %vm122_vm1, %v4443_v19, %v4494_v36  ;;  %v4588_v2 = vsel %vm4585_vm9, %v4587_v59, %v4583_v22  ;;  %v5879_v19 = vld [vmem:[%s8720_s4 + $0xa8] sm:$0xff]  ;;  %v4925_v36 = vld [vmem:[#allocation12 + $0xc8] sm:$0xff]  ;;  %v5079_v22 = vld [vmem:[#allocation12 + $0x158] sm:$0xff] }
 0x82f   :  { %v4500_v27 = vadd.f32 %v4496_v11, %v9883_v20  ;;  %v4605_v62 = vsel %vm8562_vm4, %v6310_v8, %v4601_v10  ;;  %v8574_v52 = vld.sshfl [vmem:[#allocation1 + $0x20] sm:$0xff pattern:$0x75316420]  ;;  %4812 = vmatpush.msra.mxu1 %v4760_v50  ;;  %4956 = vmatpush.msrb.mxu3 %v4925_v36  ;;  %v5877_v11 = vld [vmem:[%s8720_s4 + $0x98] sm:$0xff]  ;;  %v5876_v20 = vld [vmem:[%s8720_s4 + $0x90] sm:$0xff] }
 0x830   :  { %v4457_v57 = vpop.f32.mrf.mxu2  ;;  %v4610_v42 = vsel %vm4607_vm6, %v4609_v30, %v4605_v62  ;;  %5093 = vst [vmem:[#allocation1 + $0x20] ss:$2 sm:$0xff] %v8378_v32  ;;  %v5884_v32 = vld [vmem:[%s8720_s4 + $0xd0] sm:$0xff]  ;;  %v5882_v8 = vld [vmem:[%s8720_s4 + $0xc0] sm:$0xff]  ;;  %5028 = vmatpush.msrb.mxu0 %v5903_v13  ;;  %v5078_v59 = vld [vmem:[#allocation12 + $0x150] sm:$0xff] }
 0x831   :  { %6311 = vtanh.f32 %v4500_v27  ;;  %v4614_v25 = vrot.slane %v4500_v27, 4  ;;  %v4470_v31 = vpop.f32.mrf.mxu3  ;;  %v4638_v28 = vmul.f32 %v4636_v0, %v4610_v42  ;;  %5095 = vst [vmem:[#allocation1 + $0x21] ss:$2 sm:$0xff] %v4673_v43  ;;  %4879 = vmatpush.msrb.mxu2 %v5884_v32  ;;  %4813 = vmatpush.msra.mxu1 %v4759_v15  ;;  %v4923_v0 = vld [vmem:[#allocation12 + $0xb8] sm:$0xff]  ;;  %v4922_v27 = vld [vmem:[#allocation12 + $0xb0] sm:$0xff]  ;;  %v5900_v10 = vld [vmem:[%s8720_s4 + $0x150] sm:$0xff] }
 0x832   :  { %4957 = vmatpush.msrb.mxu3 %v4924_v37  ;;  %5029 = vmatpush.msrb.mxu0 %v5902_v54  ;;  %v5082_v43 = vld [vmem:[#allocation12 + $0x170] sm:$0xff]  ;;  %v5898_v57 = vld [vmem:[%s8720_s4 + $0x140] sm:$0xff]  ;;  %v5080_v42 = vld [vmem:[#allocation12 + $0x160] sm:$0xff] }
 0x833   :  { %v5873_v23 = vmul.f32 -1.442695, %v4614_v25  ;;  %4880 = vmatpush.msrb.mxu2 %v5883_v46  ;;  %5102 = vmatpush.msrb.mxu1 %v5083_v24  ;;  %v4920_v25 = vld [vmem:[#allocation12 + $0xa0] sm:$0xff]  ;;  %v4918_v32 = vld [vmem:[#allocation12 + $0x90] sm:$0xff]  ;;  %v4917_v46 = vld [vmem:[#allocation12 + $0x88] sm:$0xff] }
 0x834   :  { %4958 = vmatpush.msrb.mxu3 %v4923_v0  ;;  %5030 = vmatpush.msrb.mxu0 %v5901_v45  ;;  %v5891_v4 = vld [vmem:[%s8720_s4 + $0x108] sm:$0xff]  ;;  %v5070_v50 = vld [vmem:[#allocation12 + $0x110] sm:$0xff]  ;;  %v9892_v54 = vld [vmem:[#allocation86_spill] sm:$0xff] }
 0x835   :  { %6313 = vpow2.f32 %v5873_v23  ;;  %4881 = vmatpush.msrb.mxu2 %v5882_v8  ;;  %5103 = vmatpush.msrb.mxu1 %v5082_v43  ;;  %v4919_v23 = vld [vmem:[#allocation12 + $0x98] sm:$0xff]  ;;  %v4916_v8 = vld [vmem:[#allocation12 + $0x80] sm:$0xff]  ;;  %v9894_v0 = vld [vmem:[#allocation88_spill] sm:$0xff] }
 0x836   :  { %4959 = vmatpush.msrb.mxu3 %v4922_v27  ;;  %5031 = vmatpush.msrb.mxu0 %v5900_v10  ;;  %v5072_v39 = vld [vmem:[#allocation12 + $0x120] sm:$0xff]  ;;  %v9896_v24 = vld [vmem:[#allocation89_spill] sm:$0xff]  ;;  %v9898_v27 = vld [vmem:[#allocation90_spill] sm:$0xff] }
 0x837   :  { %v6312_v16 = vpop.eup %6311  ;;  %4882 = vmatpush.msrb.mxu2 %v5881_v58  ;;  %5104 = vmatpush.msrb.mxu1 %v5081_v63  ;;  %v5893_v58 = vld [vmem:[%s8720_s4 + $0x118] sm:$0xff]  ;;  %v5068_v13 = vld [vmem:[#allocation12 + $0x100] sm:$0xff]  ;;  %v5097_v10 = vld.sshfl [vmem:[#allocation1 + $0x10] sm:$0xff pattern:$0x75316420] }
 0x838   :  { %v4639_v55 = vmul.f32 %v6312_v16, %v4588_v2  ;;  %4960 = vmatpush.msrb.mxu3 %v4921_v48  ;;  %5032 = vmatpush.msrb.mxu0 %v5899_v26  ;;  %v9890_v15 = vld [vmem:[#allocation79_spill] sm:$0xff]  ;;  %v5098_v43 = vld.sshfl [vmem:[#allocation1 + $0x20] sm:$0xff pattern:$0x75316420] }
 0x839   :  { %4883 = vmatpush.msrb.mxu2 %v5880_v35  ;;  %5105 = vmatpush.msrb.mxu1 %v5080_v42  ;;  %v5073_v35 = vld [vmem:[#allocation12 + $0x128] sm:$0xff] }
 0x83a   :  { %v4640_v18 = vadd.f32 %v4639_v55, %v4638_v28  ;;  %4961 = vmatpush.msrb.mxu3 %v4920_v25  ;;  %5033 = vmatpush.msrb.mxu0 %v5898_v57  ;;  %v5897_v28 = vld [vmem:[%s8720_s4 + $0x138] sm:$0xff]  ;;  %v5077_v55 = vld [vmem:[#allocation12 + $0x148] sm:$0xff]  ;;  %v6062_v57 = vld [vmem:[%s8722_s6] ss:$0 sm:$0xff] }
 0x83b   :  { %v6314_v41 = vpop.eup %6313  ;;  %4884 = vmatpush.msrb.mxu2 %v5879_v19  ;;  %5106 = vmatpush.msrb.mxu1 %v5079_v22  ;;  %v5069_v19 = vld [vmem:[#allocation12 + $0x108] sm:$0xff] }
 0x83c   :  { %v8611_v47 = vadd.f32 1.0, %v6314_v41  ;;  %4962 = vmatpush.msrb.mxu3 %v4919_v23  ;;  %5034 = vmatpush.msrb.mxu0 %v5897_v28 }
 0x83d   :  { %4885 = vmatpush.msrb.mxu2 %v5878_v61  ;;  %5107 = vmatpush.msrb.mxu1 %v5078_v59  ;;  %v9891_v61 = vld [vmem:[#allocation87_spill] sm:$0xff] }
 0x83e   :  { %6315 = vrcp.f32 %v8611_v47  ;;  %v4631_v31 = vand.u32 2147483648, %v8611_v47  ;;  %vm4625_vm11 = vweird.f32 %v8611_v47  ;;  %v4629_v9 = vand.u32 2147483647, %v8611_v47  ;;  %4963 = vmatpush.msrb.mxu3 %v4918_v32  ;;  %5035 = vmatpush.msrb.mxu0 %v5896_v21 }
 0x83f   :  { %4886 = vmatpush.msrb.mxu2 %v5877_v11  ;;  %6317 = vtanh.f32 %v4640_v18  ;;  %5108 = vmatpush.msrb.mxu1 %v5077_v55  ;;  %v5892_v18 = vld [vmem:[%s8720_s4 + $0x110] sm:$0xff]  ;;  %v9893_v11 = vld [vmem:[#allocation85_spill] sm:$0xff] }
 0x840   :  { %v4632_v53 = vor.u32 1.1754944e-38, %v4631_v31  ;;  %vm4630_vm13 = vcmp.eq.f32.partialorder %v4629_v9, 8.507059e+37  ;;  %4964 = vmatpush.msrb.mxu3 %v4917_v46  ;;  %5036 = vmatpush.msrb.mxu0 %v5895_v51 }
 0x841   :  { %4887 = vmatpush.msrb.mxu2 %v5876_v20  ;;  %5109 = vmatpush.msrb.mxu1 %v5076_v7 }
 0x842   :  { %4965 = vmatpush.msrb.mxu3 %v4916_v8  ;;  %5037 = vmatpush.msrb.mxu0 %v5894_v44 }
 0x843   :  { %4888 = vmatpush.msrb.mxu2 %v5875_v33  ;;  %5110 = vmatpush.msrb.mxu1 %v5075_v1 }
 0x844   :  { %v6316_v49 = vpop.eup %6315  ;;  %5038 = vmatpush.msrb.mxu0 %v5893_v58 }
 0x845   :  { %v4621_v30 = vmul.f32 %v6316_v49, %v8611_v47  ;;  %vm4626_vm10 = vweird.f32 %v6316_v49  ;;  %4889 = vmatpush.msrb.mxu2 %v5874_v38  ;;  %v6318_v16 = vpop.eup %6317  ;;  %5111 = vmatpush.msrb.mxu1 %v5074_v12  ;;  %v5071_v47 = vld [vmem:[#allocation12 + $0x118] sm:$0xff] }
 0x846   :  { %vm8655_vm12 = vmor %vm4625_vm11, %vm4626_vm10  ;;  %5039 = vmatpush.msrb.mxu0 %v5892_v18 }
 0x847   :  { %v4622_v62 = vsub.f32 1.0, %v4621_v30  ;;  %5112 = vmatpush.msrb.mxu1 %v5073_v35 }
 0x848   :  { %5040 = vmatpush.msrb.mxu0 %v5891_v4 }
 0x849   :  { %v4623_v17 = vmul.f32 %v6316_v49, %v4622_v62  ;;  %5113 = vmatpush.msrb.mxu1 %v5072_v39 }
 0x84a   :  { %5041 = vmatpush.msrb.mxu0 %v5890_v40 }
 0x84b   :  { %v4624_v29 = vadd.f32 %v6316_v49, %v4623_v17  ;;  %5114 = vmatpush.msrb.mxu1 %v5071_v47 }
 0x84d   :  { %v4628_v6 = vsel %vm8655_vm12, %v6316_v49, %v4624_v29  ;;  %5115 = vmatpush.msrb.mxu1 %v5070_v50 }
 0x84e   :  { %v4633_v2 = vsel %vm4630_vm13, %v4632_v53, %v4628_v6 }
 0x84f   :  { %v4642_v5 = vmul.f32 %v6318_v16, %v4633_v2  ;;  %5116 = vmatpush.msrb.mxu1 %v5069_v19 }
 0x851   :  { %4657 = vst [vmem:[#allocation7] sm:$0xf] %v4642_v5  ;;  %5117 = vmatpush.msrb.mxu1 %v5068_v13 }
 0x858   :  { %v4666_v41 = vld [vmem:[#allocation7] sm:$0xf] }
 0x859   :  { %4781 = vst [vmem:[#allocation1] ss:$2 sm:$0xff] %v4666_v41 }
 0x860   :  { %v4792_v36 = vld.sshfl [vmem:[#allocation1] sm:$0xff pattern:$0x75316420] }
 0x861   :  { %4814 = vmatmul.f32.vlgmr.msra.gmra.mxu1 %v4792_v36  ;;  %4857 = vst [vmem:[#allocation1] ss:$2 sm:$0xff] %v8390_v60  ;;  %v9895_v60 = vld [vmem:[#allocation80_spill] sm:$0xff] }
 0x862   :  { %4859 = vst [vmem:[#allocation1 + $0x1] ss:$2 sm:$0xff] %v9890_v15 }
 0x869   :  { %4817 = vmatmul.f32.gmra.mxu1 %v9891_v61  ;;  %v4868_v37 = vld.sshfl [vmem:[#allocation1] sm:$0xff pattern:$0x75316420] }
 0x86a   :  { %4890 = vmatmul.f32.vlgmr.msrb.gmra.mxu2 %v4868_v37  ;;  %4933 = vst [vmem:[#allocation1] ss:$2 sm:$0xff] %v8405_v14  ;;  %v9897_v14 = vld [vmem:[#allocation82_spill] sm:$0xff] }
 0x86b   :  { %4935 = vst [vmem:[#allocation1 + $0x1] ss:$2 sm:$0xff] %v9892_v54 }
 0x871   :  { %4820 = vmatmul.f32.gmra.mxu1 %v9893_v11 }
 0x872   :  { %4893 = vmatmul.f32.gmra.mxu2 %v9894_v0  ;;  %v4944_v45 = vld.sshfl [vmem:[#allocation1] sm:$0xff pattern:$0x75316420] }
 0x873   :  { %4966 = vmatmul.f32.vlgmr.msrb.gmra.mxu3 %v4944_v45  ;;  %5009 = vst [vmem:[#allocation1] ss:$2 sm:$0xff] %v9890_v15 }
 0x874   :  { %5011 = vst [vmem:[#allocation1 + $0x1] ss:$2 sm:$0xff] %v9895_v60 }
 0x87a   :  { %4896 = vmatmul.f32.gmra.mxu2 %v8376_v56  ;;  %v4735_v56 = vpop.f32.mrf.mxu0 }
 0x87b   :  { %4969 = vmatmul.f32.gmra.mxu3 %v9896_v24  ;;  %v5020_v20 = vld.sshfl [vmem:[#allocation1] sm:$0xff pattern:$0x75316420]  ;;  %v4753_v9 = vadd.f32 %v6062_v57, %v4735_v56 }
 0x87c   :  { %5042 = vmatmul.f32.vlgmr.msrb.gmra.mxu0 %v5020_v20  ;;  %5085 = vst [vmem:[#allocation1] ss:$2 sm:$0xff] %v9892_v54 }
 0x87d   :  { %5087 = vst [vmem:[#allocation1 + $0x1] ss:$2 sm:$0xff] %v9897_v14 }
 0x882   :  { %v4738_v30 = vpop.f32.mrf.mxu0 }
 0x883   :  { %4972 = vmatmul.f32.gmra.mxu3 %v8382_v3  ;;  %v4748_v42 = vrot.slane %v4738_v30, 4  ;;  %v4755_v51 = vadd.f32 %v6062_v57, %v4738_v30 }
 0x884   :  { %5045 = vmatmul.f32.gmra.mxu0 %v9898_v27  ;;  %v5096_v49 = vld.sshfl [vmem:[#allocation1] sm:$0xff pattern:$0x75316420] }
 0x885   :  { %5118 = vmatmul.f32.vlgmr.msrb.gmra.mxu1 %v5096_v49  ;;  %v4756_v53 = vadd.f32 %v6062_v57, %v4748_v42 }
 0x88a   :  { %v4741_v26 = vpop.f32.mrf.mxu0 }
 0x88b   :  { %v4749_v32 = vrot.slane %v4741_v26, 4  ;;  %v4757_v8 = vadd.f32 %v6062_v57, %v4741_v26 }
 0x88c   :  { %5048 = vmatmul.f32.gmra.mxu0 %v8574_v52  ;;  %v4747_v52 = vrot.slane %v4735_v56, 4 }
 0x88d   :  { %5121 = vmatmul.f32.gmra.mxu1 %v5097_v10  ;;  %v4758_v58 = vadd.f32 %v6062_v57, %v4749_v32 }
 0x88e   :  { %v4754_v28 = vadd.f32 %v6062_v57, %v4747_v52 }
 0x895   :  { %5124 = vmatmul.f32.gmra.mxu1 %v5098_v43 }
 0x8de   :  { %v4815_v33 = vpop.f32.mrf.mxu1 }
 0x8df   :  { %v4827_v17 = vrot.slane %v4815_v33, 4  ;;  %v4833_v21 = vadd.f32 %v4815_v33, %v4753_v9 }
 0x8e1   :  { %v4834_v6 = vadd.f32 %v4827_v17, %v4754_v28 }
 0x8e6   :  { %v4818_v48 = vpop.f32.mrf.mxu1 }
 0x8e7   :  { %v4828_v34 = vrot.slane %v4818_v48, 4  ;;  %v4835_v1 = vadd.f32 %v4818_v48, %v4755_v51 }
 0x8e9   :  { %v4836_v16 = vadd.f32 %v4828_v34, %v4756_v53 }
 0x8ed   :  { %v4891_v63 = vpop.f32.mrf.mxu2 }
 0x8ee   :  { %v4821_v25 = vpop.f32.mrf.mxu1  ;;  %v4903_v22 = vrot.slane %v4891_v63, 4  ;;  %v4909_v2 = vadd.f32 %v4891_v63, %v4833_v21 }
 0x8ef   :  { %v4829_v7 = vrot.slane %v4821_v25, 4  ;;  %v4837_v35 = vadd.f32 %v4821_v25, %v4757_v8 }
 0x8f0   :  { %v4910_v44 = vadd.f32 %v4903_v22, %v4834_v6 }
 0x8f1   :  { %v4838_v13 = vadd.f32 %v4829_v7, %v4758_v58 }
 0x8f5   :  { %v4894_v3 = vpop.f32.mrf.mxu2 }
 0x8f6   :  { %v4967_v38 = vpop.f32.mrf.mxu3  ;;  %v4904_v59 = vrot.slane %v4894_v3, 4  ;;  %v4911_v47 = vadd.f32 %v4894_v3, %v4835_v1 }
 0x8f7   :  { %v4979_v46 = vrot.slane %v4967_v38, 4  ;;  %v4985_v12 = vadd.f32 %v4967_v38, %v4909_v2 }
 0x8f8   :  { %v4912_v18 = vadd.f32 %v4904_v59, %v4836_v16 }
 0x8f9   :  { %v5043_v62 = vpop.f32.mrf.mxu0  ;;  %v4986_v41 = vadd.f32 %v4979_v46, %v4910_v44 }
 0x8fa   :  { %v5055_v40 = vrot.slane %v5043_v62, 4  ;;  %v5061_v54 = vadd.f32 %v5043_v62, %v4985_v12 }
 0x8fc   :  { %v5062_v60 = vadd.f32 %v5055_v40, %v4986_v41 }
 0x8fd   :  { %v4897_v55 = vpop.f32.mrf.mxu2 }
 0x8fe   :  { %v4970_v31 = vpop.f32.mrf.mxu3  ;;  %v4905_v39 = vrot.slane %v4897_v55, 4  ;;  %v4913_v15 = vadd.f32 %v4897_v55, %v4837_v35 }
 0x8ff   :  { %v4980_v5 = vrot.slane %v4970_v31, 4  ;;  %v4987_v11 = vadd.f32 %v4970_v31, %v4911_v47 }
 0x900   :  { %v4914_v24 = vadd.f32 %v4905_v39, %v4838_v13 }
 0x901   :  { %v5046_v29 = vpop.f32.mrf.mxu0  ;;  %v4988_v50 = vadd.f32 %v4980_v5, %v4912_v18 }
 0x902   :  { %v5119_v23 = vpop.f32.mrf.mxu1  ;;  %v5056_v19 = vrot.slane %v5046_v29, 4  ;;  %v5063_v56 = vadd.f32 %v5046_v29, %v4987_v11 }
 0x903   :  { %v5131_v61 = vrot.slane %v5119_v23, 4  ;;  %v5137_v27 = vadd.f32 %v5119_v23, %v5061_v54 }
 0x904   :  { %v5064_v14 = vadd.f32 %v5056_v19, %v4988_v50 }
 0x905   :  { %v5138_v49 = vadd.f32 %v5131_v61, %v5062_v60  ;;  %6319 = vtanh.f32 %v5137_v27 }
 0x906   :  { %v4973_v4 = vpop.f32.mrf.mxu3 }
 0x907   :  { %v4981_v37 = vrot.slane %v4973_v4, 4  ;;  %v4989_v20 = vadd.f32 %v4973_v4, %v4913_v15  ;;  %6321 = vtanh.f32 %v5138_v49 }
 0x909   :  { %v5049_v0 = vpop.f32.mrf.mxu0  ;;  %v4990_v10 = vadd.f32 %v4981_v37, %v4914_v24 }
 0x90a   :  { %v5122_v36 = vpop.f32.mrf.mxu1  ;;  %v5057_v43 = vrot.slane %v5049_v0, 4  ;;  %v5065_v30 = vadd.f32 %v5049_v0, %v4989_v20 }
 0x90b   :  { %v5132_v45 = vrot.slane %v5122_v36, 4  ;;  %v5139_v48 = vadd.f32 %v5122_v36, %v5063_v56  ;;  %v6320_v3 = vpop.eup %6319 }
 0x90c   :  { %v5066_v63 = vadd.f32 %v5057_v43, %v4990_v10  ;;  %v5149_v34 = vsel %vm122_vm1, %v6320_v3, -inf }
 0x90d   :  { %v5140_v33 = vadd.f32 %v5132_v45, %v5064_v14  ;;  %v6322_v57 = vpop.eup %6321 }
 0x90e   :  { %v5150_v29 = vsel %vm122_vm1, %v6322_v57, -inf }
 0x90f   :  { %6323 = vtanh.f32 %v5140_v33 }
 0x912   :  { %v5125_v26 = vpop.f32.mrf.mxu1 }
 0x913   :  { %v5133_v38 = vrot.slane %v5125_v26, 4  ;;  %v5141_v62 = vadd.f32 %v5125_v26, %v5065_v30 }
 0x915   :  { %v5142_v25 = vadd.f32 %v5133_v38, %v5066_v63  ;;  %6325 = vtanh.f32 %v5141_v62  ;;  %v6324_v31 = vpop.eup %6323 }
 0x916   :  { %6327 = vtanh.f32 %v5139_v48  ;;  %v5152_v23 = vsel %vm122_vm1, %v6324_v31, -inf }
 0x917   :  { %6329 = vtanh.f32 %v5142_v25 }
 0x91b   :  { %v6326_v52 = vpop.eup %6325 }
 0x91c   :  { %v6328_v42 = vpop.eup %6327  ;;  %v5153_v17 = vsel %vm122_vm1, %v6326_v52, -inf }
 0x91d   :  { %v6330_v9 = vpop.eup %6329  ;;  %v5154_v22 = vmax.f32 %v5149_v34, %v5153_v17  ;;  %v5151_v32 = vsel %vm122_vm1, %v6328_v42, -inf }
 0x91e   :  { %v5155_v28 = vsel %vm122_vm1, %v6330_v9, -inf  ;;  %v5158_v21 = vmax.f32 %v5151_v32, %v5152_v23 }
 0x91f   :  { %v5156_v53 = vmax.f32 %v5150_v29, %v5155_v28 }
 0x921   :  { %v5157_v59 = vmax.f32 %v5154_v22, %v5156_v53 }
 0x923   :  { %v5159_v6 = vmax.f32 %v5157_v59, %v5158_v21 }
 0x925   :  { %v5169_v46 = vmul.f32 %v5159_v6, %v5159_v6  ;;  %5160 = vst [vmem:[%s8724_s8] sm:$0xf] %v5159_v6  ;;  %v5162_v51 = vrot.slane %v5159_v6, 2 }
 0x927   :  { %v5187_v16 = vsel %vm5186_vm14, %v5169_v46, 0.0  ;;  %v5164_v2 = vmul.f32 %v5162_v51, %v5159_v6  ;;  %v5170_v5 = vsel %vm5165_vm15, %v5169_v46, 0.0 }
 0x928   :  { %5188 = vadd.xlane.f32.xlu0 %v5187_v16 }
 0x929   :  { %v5166_v55 = vsel %vm5165_vm15, %v5164_v2, 0.0 }
 0x92a   :  { %5167 = vadd.xlane.f32.xlu1 %v5166_v55 }
 0x930   :  { %5171 = vadd.xlane.f32.xlu0 %v5170_v5 }
 0x99b   :  { %v5189_v8 = vpop.xlane.xlu0 %5188 }
 0x99c   :  { %6331 = vrsqrt.f32 %v5189_v8  ;;  %vm5197_vm1 = vcmp.eq.f32.partialorder %v5189_v8, inf  ;;  %v5200_v19 = vand.u32 2147483648, %v5189_v8  ;;  %vm5199_vm0 = vcmp.eq.f32.partialorder %v5189_v8, 0.0 }
 0x99d   :  { %v5168_v48 = vpop.xlane.xlu1 %5167 }
 0x9a2   :  { %v6332_v44 = vpop.eup %6331 }
 0x9a3   :  { %v5191_v7 = vmul.f32 %v6332_v44, %v5189_v8  ;;  %v5172_v58 = vpop.xlane.xlu0 %5171 }
 0x9a4   :  { %6333 = vrsqrt.f32 %v5172_v58  ;;  %vm5180_vm2 = vcmp.eq.f32.partialorder %v5172_v58, inf  ;;  %v5183_v54 = vand.u32 2147483648, %v5172_v58  ;;  %vm5182_vm3 = vcmp.eq.f32.partialorder %v5172_v58, 0.0 }
 0x9a5   :  { %v5192_v1 = vmul.f32 %v6332_v44, %v5191_v7 }
 0x9a7   :  { %v5193_v18 = vmul.f32 0.5, %v5192_v1 }
 0x9a9   :  { %v5194_v12 = vsub.f32 1.5, %v5193_v18 }
 0x9aa   :  { %v6334_v4 = vpop.eup %6333 }
 0x9ab   :  { %v5195_v35 = vmul.f32 %v6332_v44, %v5194_v12  ;;  %v5174_v41 = vmul.f32 %v6334_v4, %v5172_v58 }
 0x9ad   :  { %v5196_v40 = vmul.f32 %v5195_v35, %v5189_v8  ;;  %v5175_v39 = vmul.f32 %v6334_v4, %v5174_v41 }
 0x9af   :  { %v5198_v47 = vsel %vm5197_vm1, %v5189_v8, %v5196_v40  ;;  %v5176_v50 = vmul.f32 0.5, %v5175_v39 }
 0x9b0   :  { %v5201_v13 = vsel %vm5199_vm0, %v5200_v19, %v5198_v47 }
 0x9b1   :  { %v5177_v36 = vsub.f32 1.5, %v5176_v50  ;;  %v5202_v61 = vmax.f32 %v5201_v13, 1e-08 }
 0x9b3   :  { %v5178_v15 = vmul.f32 %v6334_v4, %v5177_v36  ;;  %v5204_v45 = vrot.slane %v5202_v61, 2 }
 0x9b5   :  { %v5179_v37 = vmul.f32 %v5178_v15, %v5172_v58 }
 0x9b7   :  { %v5181_v11 = vsel %vm5180_vm2, %v5172_v58, %v5179_v37 }
 0x9b8   :  { %v5184_v0 = vsel %vm5182_vm3, %v5183_v54, %v5181_v11 }
 0x9b9   :  { %v5185_v60 = vmax.f32 %v5184_v0, 1e-08 }
 0x9bb   :  { %v5206_v24 = vmul.f32 %v5204_v45, %v5185_v60 }
 0x9bd   :  { %6335 = vrcp.f32 %v5206_v24  ;;  %v5218_v49 = vand.u32 2147483648, %v5206_v24  ;;  %v5216_v43 = vand.u32 2147483647, %v5206_v24  ;;  %vm5212_vm5 = vweird.f32 %v5206_v24 }
 0x9bf   :  { %v5219_v33 = vor.u32 1.1754944e-38, %v5218_v49  ;;  %vm5217_vm7 = vcmp.eq.f32.partialorder %v5216_v43, 8.507059e+37 }
 0x9c3   :  { %v6336_v20 = vpop.eup %6335 }
 0x9c4   :  { %v5208_v14 = vmul.f32 %v6336_v20, %v5206_v24  ;;  %vm5213_vm4 = vweird.f32 %v6336_v20 }
 0x9c5   :  { %vm5214_vm6 = vmor %vm5212_vm5, %vm5213_vm4 }
 0x9c6   :  { %v5209_v27 = vsub.f32 1.0, %v5208_v14 }
 0x9c8   :  { %v5210_v10 = vmul.f32 %v6336_v20, %v5209_v27 }
 0x9ca   :  { %v5211_v56 = vadd.f32 %v6336_v20, %v5210_v10 }
 0x9cc   :  { %v5215_v30 = vsel %vm5214_vm6, %v6336_v20, %v5211_v56 }
 0x9cd   :  { %v5220_v26 = vsel %vm5217_vm7, %v5219_v33, %v5215_v30 }
 0x9ce   :  { %v5221_v63 = vmul.f32 %v5220_v26, %v5168_v48 }
 0x9d0   :  { %5223 = vst.msk [vmem:[%s8723_s7] sm:$0x3] %vm5222_vm8, %v5221_v63 }
 0x9d1   :  { %5232 = vsyncpa [#allocation9], 1 }
 0x9d2   :  { %5233 = vsyncpa [#allocation11], 1 }

</bundles_post_ra>
